<compile_context>
chip_gen: v5e
topology: v5e:2x2
jax: 0.10.0
libtpu: 0.0.40
codegen_flags: <defaults>
</compile_context>

<pallas_src>
import jax
import jax.numpy as jnp
from jax.experimental import pallas as pl
from jax.experimental.pallas import tpu as pltpu

TANDEM_LENGTH = 7
INPUT_SIZE = 4
HIDDEN = 128
NUM_OUT = TANDEM_LENGTH + 1  # 8


def _lstm_kernel(x_ref, wih0_ref, whh0_ref, b0_ref, w1_ref, b1_ref,
                 wout_ref, bout_ref, out_ref):
    B, T, I = x_ref.shape
    H = whh0_ref.shape[0]

    # ---- Hoisted layer-0 input projection (no sequential dependence) ----
    x2d = x_ref[...].astype(jnp.float32).reshape(B * T, I)        # (B*T, I)
    xproj = (jnp.dot(x2d, wih0_ref[...],
                     preferred_element_type=jnp.float32)
             + b0_ref[...])                                       # (B*T, 4H)
    xproj = xproj.reshape(B, T, 4 * H)

    # Weights loaded once (bf16 MXU operands), biases in f32.
    whh0 = whh0_ref[...]          # (H, 4H)  bf16
    w1 = w1_ref[...]              # (2H, 4H) bf16
    b1 = b1_ref[...]              # (1, 4H)  f32

    def apply_gates(gates, c):
        # All elementwise gate math stays f32 (v5e has no bf16 VPU/EUP).
        i_g = jax.nn.sigmoid(gates[:, 0 * H:1 * H])
        f_g = jax.nn.sigmoid(gates[:, 1 * H:2 * H])
        g_g = jnp.tanh(gates[:, 2 * H:3 * H])
        o_g = jax.nn.sigmoid(gates[:, 3 * H:4 * H])
        c_new = f_g * c + i_g * g_g
        h_new = o_g * jnp.tanh(c_new)
        return h_new, c_new

    zeros = jnp.zeros((B, H), jnp.float32)
    h1, c1, h2, c2 = zeros, zeros, zeros, zeros

    # Fully unrolled time loop; state lives in vregs (no VMEM round-trips).
    for t in range(T):
        # Layer 0: only the recurrent matmul is on the critical path.
        g0 = xproj[:, t, :] + jnp.dot(h1.astype(jnp.bfloat16), whh0,
                                      preferred_element_type=jnp.float32)
        h1, c1 = apply_gates(g0, c1)

        # Layer 1: fused [h1 | h2] @ [W_ih1; W_hh1]  (one MXU push per step).
        hcat = jnp.concatenate([h1, h2], axis=1).astype(jnp.bfloat16)  # (B,2H)
        g1 = jnp.dot(hcat, w1, preferred_element_type=jnp.float32) + b1
        h2, c2 = apply_gates(g1, c2)

    # Final linear head on the last hidden state.
    out_ref[...] = (jnp.dot(h2.astype(jnp.bfloat16), wout_ref[...],
                            preferred_element_type=jnp.float32)
                    + bout_ref[...]).astype(out_ref.dtype)


@jax.jit
def repeat_rnn_forward(x, params):
    """x: (B, T, INPUT_SIZE) float32 (batch_first, same as PyTorch)."""
    (wih0, whh0, b0, wih1, whh1, b1, wout, bout) = params
    B, T, I = x.shape
    H = HIDDEN
    O = NUM_OUT

    # Kernel-side weight prep: stack layer-1 weights, cast MXU operands to bf16.
    w1 = jnp.concatenate([wih1, whh1], axis=0).astype(jnp.bfloat16)  # (2H, 4H)
    whh0_b = whh0.astype(jnp.bfloat16)
    wout_b = wout.astype(jnp.bfloat16)

    full2d = lambda a: pl.BlockSpec(a.shape, lambda i: (0, 0))

    out = pl.pallas_call(
        _lstm_kernel,
        out_shape=jax.ShapeDtypeStruct((B, O), jnp.float32),
        grid=(1,),                                   # single invocation; time
        in_specs=[                                   # loop is fully in-kernel
            pl.BlockSpec((B, T, I), lambda i: (0, 0, 0)),   # x, fully resident
            full2d(wih0), full2d(whh0_b), full2d(b0),
            full2d(w1), full2d(b1),
            full2d(wout_b), full2d(bout),
        ],
        out_specs=pl.BlockSpec((B, O), lambda i: (0, 0)),
        compiler_params=pltpu.CompilerParams(
            dimension_semantics=("arbitrary",)),
    )(x, wih0, whh0_b, b0, w1, b1, wout_b, bout)
    return out


def init_params(key):
    """PyTorch-style uniform(-1/sqrt(H), 1/sqrt(H)) init, stored transposed
    (row-major matmul layout) in f32. The wrapper handles bf16 casts/stacking."""
    H, I, O = HIDDEN, INPUT_SIZE, NUM_OUT
    k = 1.0 / jnp.sqrt(jnp.float32(H))
    keys = jax.random.split(key, 10)
    u = lambda kk, shape: jax.random.uniform(kk, shape, jnp.float32, -k, k)

    wih0 = u(keys[0], (I, 4 * H))
    whh0 = u(keys[1], (H, 4 * H))
    b0 = u(keys[2], (1, 4 * H)) + u(keys[3], (1, 4 * H))   # b_ih_l0 + b_hh_l0
    wih1 = u(keys[4], (H, 4 * H))
    whh1 = u(keys[5], (H, 4 * H))
    b1 = u(keys[6], (1, 4 * H)) + u(keys[7], (1, 4 * H))   # b_ih_l1 + b_hh_l1
    wout = u(keys[8], (H, O))
    bout = u(keys[9], (1, O))
    return (wih0, whh0, b0, wih1, whh1, b1, wout, bout)


def repeat_rnn_ref(x, params):
    """Pure-JAX f32 reference (same math as the PyTorch module)."""
    (wih0, whh0, b0, wih1, whh1, b1, wout, bout) = params
    B, T, I = x.shape
    H = HIDDEN

    def cell(x_t, h, c, wih, whh, b):
        g = x_t @ wih + h @ whh + b
        i = jax.nn.sigmoid(g[:, 0 * H:1 * H])
        f = jax.nn.sigmoid(g[:, 1 * H:2 * H])
        gg = jnp.tanh(g[:, 2 * H:3 * H])
        o = jax.nn.sigmoid(g[:, 3 * H:4 * H])
        c = f * c + i * gg
        h = o * jnp.tanh(c)
        return h, c

    h1 = c1 = h2 = c2 = jnp.zeros((B, H), jnp.float32)
    for t in range(T):
        h1, c1 = cell(x[:, t, :], h1, c1, wih0, whh0, b0)
        h2, c2 = cell(h1, h2, c2, wih1, whh1, b1)
    return h2 @ wout + bout


if __name__ == "__main__":
    key = jax.random.PRNGKey(0)
    k_param, k_x = jax.random.split(key)

    # Small shapes consistent with the module (input_size=4). Note: cost is
    # ~flat in batch up to the MXU M-dim, so larger B is near-free throughput.
    B, T = 2, 8
    x = jax.random.normal(k_x, (B, T, INPUT_SIZE), jnp.float32)
    params = init_params(k_param)

    out = jax.block_until_ready(repeat_rnn_forward(x, params))

    ref = repeat_rnn_ref(x, params)
    assert out.shape == (B, NUM_OUT)
    # Tolerance accounts for bf16 MXU operands (f32 accumulation).
    assert jnp.allclose(out, ref, rtol=2e-2, atol=2e-2), (out, ref)

    print("KERNEL_OK")
</pallas_src>

<mosaic_0001>
module attributes {stable_mosaic.version = 11 : i64} {
  func.func @_lstm_kernel(%arg0: i32, %arg1: memref<2x8x4xf32, #tpu.memory_space<vmem>>, %arg2: memref<4x512xf32, #tpu.memory_space<vmem>>, %arg3: memref<128x512xbf16, #tpu.memory_space<vmem>>, %arg4: memref<1x512xf32, #tpu.memory_space<vmem>>, %arg5: memref<256x512xbf16, #tpu.memory_space<vmem>>, %arg6: memref<1x512xf32, #tpu.memory_space<vmem>>, %arg7: memref<128x8xbf16, #tpu.memory_space<vmem>>, %arg8: memref<1x8xf32, #tpu.memory_space<vmem>>, %arg9: memref<2x8xf32, #tpu.memory_space<vmem>>) attributes {dimension_semantics = [#tpu.dimension_semantics<arbitrary>], iteration_bounds = array<i64: 1>, scalar_prefetch = 0 : i64, scratch_operands = 0 : i64, tpu.core_type = #tpu.core_type<tc>, window_params = [{pipeline_mode = #tpu.pipeline_mode<synchronous>, transform_indices = @transform_0, window_bounds = array<i64: 2, 8, 4>}, {pipeline_mode = #tpu.pipeline_mode<synchronous>, transform_indices = @transform_1, window_bounds = array<i64: 4, 512>}, {pipeline_mode = #tpu.pipeline_mode<synchronous>, transform_indices = @transform_2, window_bounds = array<i64: 128, 512>}, {pipeline_mode = #tpu.pipeline_mode<synchronous>, transform_indices = @transform_3, window_bounds = array<i64: 1, 512>}, {pipeline_mode = #tpu.pipeline_mode<synchronous>, transform_indices = @transform_4, window_bounds = array<i64: 256, 512>}, {pipeline_mode = #tpu.pipeline_mode<synchronous>, transform_indices = @transform_5, window_bounds = array<i64: 1, 512>}, {pipeline_mode = #tpu.pipeline_mode<synchronous>, transform_indices = @transform_6, window_bounds = array<i64: 128, 8>}, {pipeline_mode = #tpu.pipeline_mode<synchronous>, transform_indices = @transform_7, window_bounds = array<i64: 1, 8>}, {pipeline_mode = #tpu.pipeline_mode<synchronous>, transform_indices = @transform_8, window_bounds = array<i64: 2, 8>}]} {
    %c0 = arith.constant 0 : index
    %c0_0 = arith.constant 0 : index
    %c0_1 = arith.constant 0 : index
    %0 = vector.load %arg1[%c0, %c0_0, %c0_1] : memref<2x8x4xf32, #tpu.memory_space<vmem>>, vector<2x8x4xf32>
    %1 = vector.shape_cast %0 : vector<2x8x4xf32> to vector<16x4xf32>
    %c0_2 = arith.constant 0 : index
    %c0_3 = arith.constant 0 : index
    %2 = vector.load %arg2[%c0_2, %c0_3] : memref<4x512xf32, #tpu.memory_space<vmem>>, vector<4x512xf32>
    %cst = arith.constant dense<0.000000e+00> : vector<16x512xf32>
    %3 = tpu.matmul %1, %2, %cst {dimension_numbers = #tpu.dot_dimension_numbers<[1], [0], [0], [1], [0, 0, 1, 1], [], []>} : vector<16x4xf32>, vector<4x512xf32>, vector<16x512xf32> -> vector<16x512xf32>
    %c0_4 = arith.constant 0 : index
    %c0_5 = arith.constant 0 : index
    %4 = vector.load %arg4[%c0_4, %c0_5] : memref<1x512xf32, #tpu.memory_space<vmem>>, vector<1x512xf32>
    %5 = vector.broadcast %4 : vector<1x512xf32> to vector<16x512xf32>
    %6 = arith.addf %3, %5 : vector<16x512xf32>
    %7 = vector.shape_cast %6 : vector<16x512xf32> to vector<2x8x512xf32>
    %c0_6 = arith.constant 0 : index
    %c0_7 = arith.constant 0 : index
    %8 = vector.load %arg3[%c0_6, %c0_7] : memref<128x512xbf16, #tpu.memory_space<vmem>>, vector<128x512xbf16>
    %c0_8 = arith.constant 0 : index
    %c0_9 = arith.constant 0 : index
    %9 = vector.load %arg5[%c0_8, %c0_9] : memref<256x512xbf16, #tpu.memory_space<vmem>>, vector<256x512xbf16>
    %c0_10 = arith.constant 0 : index
    %c0_11 = arith.constant 0 : index
    %10 = vector.load %arg6[%c0_10, %c0_11] : memref<1x512xf32, #tpu.memory_space<vmem>>, vector<1x512xf32>
    %cst_12 = arith.constant 0.000000e+00 : f32
    %11 = vector.broadcast %cst_12 : f32 to vector<2x128xf32>
    %12 = vector.extract_strided_slice %7 {offsets = [0, 0, 0], sizes = [2, 1, 512], strides = [1, 1, 1]} : vector<2x8x512xf32> to vector<2x1x512xf32>
    %13 = vector.shape_cast %12 : vector<2x1x512xf32> to vector<2x512xf32>
    %14 = arith.truncf %11 : vector<2x128xf32> to vector<2x128xbf16>
    %cst_13 = arith.constant dense<0.000000e+00> : vector<2x512xf32>
    %15 = tpu.matmul %14, %8, %cst_13 {dimension_numbers = #tpu.dot_dimension_numbers<[1], [0], [0], [1], [0, 0, 1, 1], [], []>} : vector<2x128xbf16>, vector<128x512xbf16>, vector<2x512xf32> -> vector<2x512xf32>
    %16 = arith.addf %13, %15 : vector<2x512xf32>
    %17 = vector.extract_strided_slice %16 {offsets = [0, 0], sizes = [2, 128], strides = [1, 1]} : vector<2x512xf32> to vector<2x128xf32>
    %18 = arith.negf %17 : vector<2x128xf32>
    %19 = math.exp %18 : vector<2x128xf32>
    %cst_14 = arith.constant 1.000000e+00 : f32
    %20 = vector.broadcast %cst_14 : f32 to vector<2x128xf32>
    %21 = arith.addf %20, %19 : vector<2x128xf32>
    %22 = arith.divf %20, %21 : vector<2x128xf32>
    %23 = vector.extract_strided_slice %16 {offsets = [0, 128], sizes = [2, 128], strides = [1, 1]} : vector<2x512xf32> to vector<2x128xf32>
    %24 = arith.negf %23 : vector<2x128xf32>
    %25 = math.exp %24 : vector<2x128xf32>
    %cst_15 = arith.constant 1.000000e+00 : f32
    %26 = vector.broadcast %cst_15 : f32 to vector<2x128xf32>
    %27 = arith.addf %26, %25 : vector<2x128xf32>
    %28 = arith.divf %26, %27 : vector<2x128xf32>
    %29 = vector.extract_strided_slice %16 {offsets = [0, 256], sizes = [2, 128], strides = [1, 1]} : vector<2x512xf32> to vector<2x128xf32>
    %30 = math.tanh %29 : vector<2x128xf32>
    %31 = vector.extract_strided_slice %16 {offsets = [0, 384], sizes = [2, 128], strides = [1, 1]} : vector<2x512xf32> to vector<2x128xf32>
    %32 = arith.negf %31 : vector<2x128xf32>
    %33 = math.exp %32 : vector<2x128xf32>
    %cst_16 = arith.constant 1.000000e+00 : f32
    %34 = vector.broadcast %cst_16 : f32 to vector<2x128xf32>
    %35 = arith.addf %34, %33 : vector<2x128xf32>
    %36 = arith.divf %34, %35 : vector<2x128xf32>
    %37 = arith.mulf %28, %11 : vector<2x128xf32>
    %38 = arith.mulf %22, %30 : vector<2x128xf32>
    %39 = arith.addf %37, %38 : vector<2x128xf32>
    %40 = math.tanh %39 : vector<2x128xf32>
    %41 = arith.mulf %36, %40 : vector<2x128xf32>
    %42 = tpu.concatenate %41, %11 in 1 : vector<2x128xf32>, vector<2x128xf32> -> vector<2x256xf32>
    %43 = arith.truncf %42 : vector<2x256xf32> to vector<2x256xbf16>
    %cst_17 = arith.constant dense<0.000000e+00> : vector<2x512xf32>
    %44 = tpu.matmul %43, %9, %cst_17 {dimension_numbers = #tpu.dot_dimension_numbers<[1], [0], [0], [1], [0, 0, 1, 1], [], []>} : vector<2x256xbf16>, vector<256x512xbf16>, vector<2x512xf32> -> vector<2x512xf32>
    %45 = vector.broadcast %10 : vector<1x512xf32> to vector<2x512xf32>
    %46 = arith.addf %44, %45 : vector<2x512xf32>
    %47 = vector.extract_strided_slice %46 {offsets = [0, 0], sizes = [2, 128], strides = [1, 1]} : vector<2x512xf32> to vector<2x128xf32>
    %48 = arith.negf %47 : vector<2x128xf32>
    %49 = math.exp %48 : vector<2x128xf32>
    %cst_18 = arith.constant 1.000000e+00 : f32
    %50 = vector.broadcast %cst_18 : f32 to vector<2x128xf32>
    %51 = arith.addf %50, %49 : vector<2x128xf32>
    %52 = arith.divf %50, %51 : vector<2x128xf32>
    %53 = vector.extract_strided_slice %46 {offsets = [0, 128], sizes = [2, 128], strides = [1, 1]} : vector<2x512xf32> to vector<2x128xf32>
    %54 = arith.negf %53 : vector<2x128xf32>
    %55 = math.exp %54 : vector<2x128xf32>
    %cst_19 = arith.constant 1.000000e+00 : f32
    %56 = vector.broadcast %cst_19 : f32 to vector<2x128xf32>
    %57 = arith.addf %56, %55 : vector<2x128xf32>
    %58 = arith.divf %56, %57 : vector<2x128xf32>
    %59 = vector.extract_strided_slice %46 {offsets = [0, 256], sizes = [2, 128], strides = [1, 1]} : vector<2x512xf32> to vector<2x128xf32>
    %60 = math.tanh %59 : vector<2x128xf32>
    %61 = vector.extract_strided_slice %46 {offsets = [0, 384], sizes = [2, 128], strides = [1, 1]} : vector<2x512xf32> to vector<2x128xf32>
    %62 = arith.negf %61 : vector<2x128xf32>
    %63 = math.exp %62 : vector<2x128xf32>
    %cst_20 = arith.constant 1.000000e+00 : f32
    %64 = vector.broadcast %cst_20 : f32 to vector<2x128xf32>
    %65 = arith.addf %64, %63 : vector<2x128xf32>
    %66 = arith.divf %64, %65 : vector<2x128xf32>
    %67 = arith.mulf %58, %11 : vector<2x128xf32>
    %68 = arith.mulf %52, %60 : vector<2x128xf32>
    %69 = arith.addf %67, %68 : vector<2x128xf32>
    %70 = math.tanh %69 : vector<2x128xf32>
    %71 = arith.mulf %66, %70 : vector<2x128xf32>
    %72 = vector.extract_strided_slice %7 {offsets = [0, 1, 0], sizes = [2, 1, 512], strides = [1, 1, 1]} : vector<2x8x512xf32> to vector<2x1x512xf32>
    %73 = vector.shape_cast %72 : vector<2x1x512xf32> to vector<2x512xf32>
    %74 = arith.truncf %41 : vector<2x128xf32> to vector<2x128xbf16>
    %cst_21 = arith.constant dense<0.000000e+00> : vector<2x512xf32>
    %75 = tpu.matmul %74, %8, %cst_21 {dimension_numbers = #tpu.dot_dimension_numbers<[1], [0], [0], [1], [0, 0, 1, 1], [], []>} : vector<2x128xbf16>, vector<128x512xbf16>, vector<2x512xf32> -> vector<2x512xf32>
    %76 = arith.addf %73, %75 : vector<2x512xf32>
    %77 = vector.extract_strided_slice %76 {offsets = [0, 0], sizes = [2, 128], strides = [1, 1]} : vector<2x512xf32> to vector<2x128xf32>
    %78 = arith.negf %77 : vector<2x128xf32>
    %79 = math.exp %78 : vector<2x128xf32>
    %cst_22 = arith.constant 1.000000e+00 : f32
    %80 = vector.broadcast %cst_22 : f32 to vector<2x128xf32>
    %81 = arith.addf %80, %79 : vector<2x128xf32>
    %82 = arith.divf %80, %81 : vector<2x128xf32>
    %83 = vector.extract_strided_slice %76 {offsets = [0, 128], sizes = [2, 128], strides = [1, 1]} : vector<2x512xf32> to vector<2x128xf32>
    %84 = arith.negf %83 : vector<2x128xf32>
    %85 = math.exp %84 : vector<2x128xf32>
    %cst_23 = arith.constant 1.000000e+00 : f32
    %86 = vector.broadcast %cst_23 : f32 to vector<2x128xf32>
    %87 = arith.addf %86, %85 : vector<2x128xf32>
    %88 = arith.divf %86, %87 : vector<2x128xf32>
    %89 = vector.extract_strided_slice %76 {offsets = [0, 256], sizes = [2, 128], strides = [1, 1]} : vector<2x512xf32> to vector<2x128xf32>
    %90 = math.tanh %89 : vector<2x128xf32>
    %91 = vector.extract_strided_slice %76 {offsets = [0, 384], sizes = [2, 128], strides = [1, 1]} : vector<2x512xf32> to vector<2x128xf32>
    %92 = arith.negf %91 : vector<2x128xf32>
    %93 = math.exp %92 : vector<2x128xf32>
    %cst_24 = arith.constant 1.000000e+00 : f32
    %94 = vector.broadcast %cst_24 : f32 to vector<2x128xf32>
    %95 = arith.addf %94, %93 : vector<2x128xf32>
    %96 = arith.divf %94, %95 : vector<2x128xf32>
    %97 = arith.mulf %88, %39 : vector<2x128xf32>
    %98 = arith.mulf %82, %90 : vector<2x128xf32>
    %99 = arith.addf %97, %98 : vector<2x128xf32>
    %100 = math.tanh %99 : vector<2x128xf32>
    %101 = arith.mulf %96, %100 : vector<2x128xf32>
    %102 = tpu.concatenate %101, %71 in 1 : vector<2x128xf32>, vector<2x128xf32> -> vector<2x256xf32>
    %103 = arith.truncf %102 : vector<2x256xf32> to vector<2x256xbf16>
    %cst_25 = arith.constant dense<0.000000e+00> : vector<2x512xf32>
    %104 = tpu.matmul %103, %9, %cst_25 {dimension_numbers = #tpu.dot_dimension_numbers<[1], [0], [0], [1], [0, 0, 1, 1], [], []>} : vector<2x256xbf16>, vector<256x512xbf16>, vector<2x512xf32> -> vector<2x512xf32>
    %105 = vector.broadcast %10 : vector<1x512xf32> to vector<2x512xf32>
    %106 = arith.addf %104, %105 : vector<2x512xf32>
    %107 = vector.extract_strided_slice %106 {offsets = [0, 0], sizes = [2, 128], strides = [1, 1]} : vector<2x512xf32> to vector<2x128xf32>
    %108 = arith.negf %107 : vector<2x128xf32>
    %109 = math.exp %108 : vector<2x128xf32>
    %cst_26 = arith.constant 1.000000e+00 : f32
    %110 = vector.broadcast %cst_26 : f32 to vector<2x128xf32>
    %111 = arith.addf %110, %109 : vector<2x128xf32>
    %112 = arith.divf %110, %111 : vector<2x128xf32>
    %113 = vector.extract_strided_slice %106 {offsets = [0, 128], sizes = [2, 128], strides = [1, 1]} : vector<2x512xf32> to vector<2x128xf32>
    %114 = arith.negf %113 : vector<2x128xf32>
    %115 = math.exp %114 : vector<2x128xf32>
    %cst_27 = arith.constant 1.000000e+00 : f32
    %116 = vector.broadcast %cst_27 : f32 to vector<2x128xf32>
    %117 = arith.addf %116, %115 : vector<2x128xf32>
    %118 = arith.divf %116, %117 : vector<2x128xf32>
    %119 = vector.extract_strided_slice %106 {offsets = [0, 256], sizes = [2, 128], strides = [1, 1]} : vector<2x512xf32> to vector<2x128xf32>
    %120 = math.tanh %119 : vector<2x128xf32>
    %121 = vector.extract_strided_slice %106 {offsets = [0, 384], sizes = [2, 128], strides = [1, 1]} : vector<2x512xf32> to vector<2x128xf32>
    %122 = arith.negf %121 : vector<2x128xf32>
    %123 = math.exp %122 : vector<2x128xf32>
    %cst_28 = arith.constant 1.000000e+00 : f32
    %124 = vector.broadcast %cst_28 : f32 to vector<2x128xf32>
    %125 = arith.addf %124, %123 : vector<2x128xf32>
    %126 = arith.divf %124, %125 : vector<2x128xf32>
    %127 = arith.mulf %118, %69 : vector<2x128xf32>
    %128 = arith.mulf %112, %120 : vector<2x128xf32>
    %129 = arith.addf %127, %128 : vector<2x128xf32>
    %130 = math.tanh %129 : vector<2x128xf32>
    %131 = arith.mulf %126, %130 : vector<2x128xf32>
    %132 = vector.extract_strided_slice %7 {offsets = [0, 2, 0], sizes = [2, 1, 512], strides = [1, 1, 1]} : vector<2x8x512xf32> to vector<2x1x512xf32>
    %133 = vector.shape_cast %132 : vector<2x1x512xf32> to vector<2x512xf32>
    %134 = arith.truncf %101 : vector<2x128xf32> to vector<2x128xbf16>
    %cst_29 = arith.constant dense<0.000000e+00> : vector<2x512xf32>
    %135 = tpu.matmul %134, %8, %cst_29 {dimension_numbers = #tpu.dot_dimension_numbers<[1], [0], [0], [1], [0, 0, 1, 1], [], []>} : vector<2x128xbf16>, vector<128x512xbf16>, vector<2x512xf32> -> vector<2x512xf32>
    %136 = arith.addf %133, %135 : vector<2x512xf32>
    %137 = vector.extract_strided_slice %136 {offsets = [0, 0], sizes = [2, 128], strides = [1, 1]} : vector<2x512xf32> to vector<2x128xf32>
    %138 = arith.negf %137 : vector<2x128xf32>
    %139 = math.exp %138 : vector<2x128xf32>
    %cst_30 = arith.constant 1.000000e+00 : f32
    %140 = vector.broadcast %cst_30 : f32 to vector<2x128xf32>
    %141 = arith.addf %140, %139 : vector<2x128xf32>
    %142 = arith.divf %140, %141 : vector<2x128xf32>
    %143 = vector.extract_strided_slice %136 {offsets = [0, 128], sizes = [2, 128], strides = [1, 1]} : vector<2x512xf32> to vector<2x128xf32>
    %144 = arith.negf %143 : vector<2x128xf32>
    %145 = math.exp %144 : vector<2x128xf32>
    %cst_31 = arith.constant 1.000000e+00 : f32
    %146 = vector.broadcast %cst_31 : f32 to vector<2x128xf32>
    %147 = arith.addf %146, %145 : vector<2x128xf32>
    %148 = arith.divf %146, %147 : vector<2x128xf32>
    %149 = vector.extract_strided_slice %136 {offsets = [0, 256], sizes = [2, 128], strides = [1, 1]} : vector<2x512xf32> to vector<2x128xf32>
    %150 = math.tanh %149 : vector<2x128xf32>
    %151 = vector.extract_strided_slice %136 {offsets = [0, 384], sizes = [2, 128], strides = [1, 1]} : vector<2x512xf32> to vector<2x128xf32>
    %152 = arith.negf %151 : vector<2x128xf32>
    %153 = math.exp %152 : vector<2x128xf32>
    %cst_32 = arith.constant 1.000000e+00 : f32
    %154 = vector.broadcast %cst_32 : f32 to vector<2x128xf32>
    %155 = arith.addf %154, %153 : vector<2x128xf32>
    %156 = arith.divf %154, %155 : vector<2x128xf32>
    %157 = arith.mulf %148, %99 : vector<2x128xf32>
    %158 = arith.mulf %142, %150 : vector<2x128xf32>
    %159 = arith.addf %157, %158 : vector<2x128xf32>
    %160 = math.tanh %159 : vector<2x128xf32>
    %161 = arith.mulf %156, %160 : vector<2x128xf32>
    %162 = tpu.concatenate %161, %131 in 1 : vector<2x128xf32>, vector<2x128xf32> -> vector<2x256xf32>
    %163 = arith.truncf %162 : vector<2x256xf32> to vector<2x256xbf16>
    %cst_33 = arith.constant dense<0.000000e+00> : vector<2x512xf32>
    %164 = tpu.matmul %163, %9, %cst_33 {dimension_numbers = #tpu.dot_dimension_numbers<[1], [0], [0], [1], [0, 0, 1, 1], [], []>} : vector<2x256xbf16>, vector<256x512xbf16>, vector<2x512xf32> -> vector<2x512xf32>
    %165 = vector.broadcast %10 : vector<1x512xf32> to vector<2x512xf32>
    %166 = arith.addf %164, %165 : vector<2x512xf32>
    %167 = vector.extract_strided_slice %166 {offsets = [0, 0], sizes = [2, 128], strides = [1, 1]} : vector<2x512xf32> to vector<2x128xf32>
    %168 = arith.negf %167 : vector<2x128xf32>
    %169 = math.exp %168 : vector<2x128xf32>
    %cst_34 = arith.constant 1.000000e+00 : f32
    %170 = vector.broadcast %cst_34 : f32 to vector<2x128xf32>
    %171 = arith.addf %170, %169 : vector<2x128xf32>
    %172 = arith.divf %170, %171 : vector<2x128xf32>
    %173 = vector.extract_strided_slice %166 {offsets = [0, 128], sizes = [2, 128], strides = [1, 1]} : vector<2x512xf32> to vector<2x128xf32>
    %174 = arith.negf %173 : vector<2x128xf32>
    %175 = math.exp %174 : vector<2x128xf32>
    %cst_35 = arith.constant 1.000000e+00 : f32
    %176 = vector.broadcast %cst_35 : f32 to vector<2x128xf32>
    %177 = arith.addf %176, %175 : vector<2x128xf32>
    %178 = arith.divf %176, %177 : vector<2x128xf32>
    %179 = vector.extract_strided_slice %166 {offsets = [0, 256], sizes = [2, 128], strides = [1, 1]} : vector<2x512xf32> to vector<2x128xf32>
    %180 = math.tanh %179 : vector<2x128xf32>
    %181 = vector.extract_strided_slice %166 {offsets = [0, 384], sizes = [2, 128], strides = [1, 1]} : vector<2x512xf32> to vector<2x128xf32>
    %182 = arith.negf %181 : vector<2x128xf32>
    %183 = math.exp %182 : vector<2x128xf32>
    %cst_36 = arith.constant 1.000000e+00 : f32
    %184 = vector.broadcast %cst_36 : f32 to vector<2x128xf32>
    %185 = arith.addf %184, %183 : vector<2x128xf32>
    %186 = arith.divf %184, %185 : vector<2x128xf32>
    %187 = arith.mulf %178, %129 : vector<2x128xf32>
    %188 = arith.mulf %172, %180 : vector<2x128xf32>
    %189 = arith.addf %187, %188 : vector<2x128xf32>
    %190 = math.tanh %189 : vector<2x128xf32>
    %191 = arith.mulf %186, %190 : vector<2x128xf32>
    %192 = vector.extract_strided_slice %7 {offsets = [0, 3, 0], sizes = [2, 1, 512], strides = [1, 1, 1]} : vector<2x8x512xf32> to vector<2x1x512xf32>
    %193 = vector.shape_cast %192 : vector<2x1x512xf32> to vector<2x512xf32>
    %194 = arith.truncf %161 : vector<2x128xf32> to vector<2x128xbf16>
    %cst_37 = arith.constant dense<0.000000e+00> : vector<2x512xf32>
    %195 = tpu.matmul %194, %8, %cst_37 {dimension_numbers = #tpu.dot_dimension_numbers<[1], [0], [0], [1], [0, 0, 1, 1], [], []>} : vector<2x128xbf16>, vector<128x512xbf16>, vector<2x512xf32> -> vector<2x512xf32>
    %196 = arith.addf %193, %195 : vector<2x512xf32>
    %197 = vector.extract_strided_slice %196 {offsets = [0, 0], sizes = [2, 128], strides = [1, 1]} : vector<2x512xf32> to vector<2x128xf32>
    %198 = arith.negf %197 : vector<2x128xf32>
    %199 = math.exp %198 : vector<2x128xf32>
    %cst_38 = arith.constant 1.000000e+00 : f32
    %200 = vector.broadcast %cst_38 : f32 to vector<2x128xf32>
    %201 = arith.addf %200, %199 : vector<2x128xf32>
    %202 = arith.divf %200, %201 : vector<2x128xf32>
    %203 = vector.extract_strided_slice %196 {offsets = [0, 128], sizes = [2, 128], strides = [1, 1]} : vector<2x512xf32> to vector<2x128xf32>
    %204 = arith.negf %203 : vector<2x128xf32>
    %205 = math.exp %204 : vector<2x128xf32>
    %cst_39 = arith.constant 1.000000e+00 : f32
    %206 = vector.broadcast %cst_39 : f32 to vector<2x128xf32>
    %207 = arith.addf %206, %205 : vector<2x128xf32>
    %208 = arith.divf %206, %207 : vector<2x128xf32>
    %209 = vector.extract_strided_slice %196 {offsets = [0, 256], sizes = [2, 128], strides = [1, 1]} : vector<2x512xf32> to vector<2x128xf32>
    %210 = math.tanh %209 : vector<2x128xf32>
    %211 = vector.extract_strided_slice %196 {offsets = [0, 384], sizes = [2, 128], strides = [1, 1]} : vector<2x512xf32> to vector<2x128xf32>
    %212 = arith.negf %211 : vector<2x128xf32>
    %213 = math.exp %212 : vector<2x128xf32>
    %cst_40 = arith.constant 1.000000e+00 : f32
    %214 = vector.broadcast %cst_40 : f32 to vector<2x128xf32>
    %215 = arith.addf %214, %213 : vector<2x128xf32>
    %216 = arith.divf %214, %215 : vector<2x128xf32>
    %217 = arith.mulf %208, %159 : vector<2x128xf32>
    %218 = arith.mulf %202, %210 : vector<2x128xf32>
    %219 = arith.addf %217, %218 : vector<2x128xf32>
    %220 = math.tanh %219 : vector<2x128xf32>
    %221 = arith.mulf %216, %220 : vector<2x128xf32>
    %222 = tpu.concatenate %221, %191 in 1 : vector<2x128xf32>, vector<2x128xf32> -> vector<2x256xf32>
    %223 = arith.truncf %222 : vector<2x256xf32> to vector<2x256xbf16>
    %cst_41 = arith.constant dense<0.000000e+00> : vector<2x512xf32>
    %224 = tpu.matmul %223, %9, %cst_41 {dimension_numbers = #tpu.dot_dimension_numbers<[1], [0], [0], [1], [0, 0, 1, 1], [], []>} : vector<2x256xbf16>, vector<256x512xbf16>, vector<2x512xf32> -> vector<2x512xf32>
    %225 = vector.broadcast %10 : vector<1x512xf32> to vector<2x512xf32>
    %226 = arith.addf %224, %225 : vector<2x512xf32>
    %227 = vector.extract_strided_slice %226 {offsets = [0, 0], sizes = [2, 128], strides = [1, 1]} : vector<2x512xf32> to vector<2x128xf32>
    %228 = arith.negf %227 : vector<2x128xf32>
    %229 = math.exp %228 : vector<2x128xf32>
    %cst_42 = arith.constant 1.000000e+00 : f32
    %230 = vector.broadcast %cst_42 : f32 to vector<2x128xf32>
    %231 = arith.addf %230, %229 : vector<2x128xf32>
    %232 = arith.divf %230, %231 : vector<2x128xf32>
    %233 = vector.extract_strided_slice %226 {offsets = [0, 128], sizes = [2, 128], strides = [1, 1]} : vector<2x512xf32> to vector<2x128xf32>
    %234 = arith.negf %233 : vector<2x128xf32>
    %235 = math.exp %234 : vector<2x128xf32>
    %cst_43 = arith.constant 1.000000e+00 : f32
    %236 = vector.broadcast %cst_43 : f32 to vector<2x128xf32>
    %237 = arith.addf %236, %235 : vector<2x128xf32>
    %238 = arith.divf %236, %237 : vector<2x128xf32>
    %239 = vector.extract_strided_slice %226 {offsets = [0, 256], sizes = [2, 128], strides = [1, 1]} : vector<2x512xf32> to vector<2x128xf32>
    %240 = math.tanh %239 : vector<2x128xf32>
    %241 = vector.extract_strided_slice %226 {offsets = [0, 384], sizes = [2, 128], strides = [1, 1]} : vector<2x512xf32> to vector<2x128xf32>
    %242 = arith.negf %241 : vector<2x128xf32>
    %243 = math.exp %242 : vector<2x128xf32>
    %cst_44 = arith.constant 1.000000e+00 : f32
    %244 = vector.broadcast %cst_44 : f32 to vector<2x128xf32>
    %245 = arith.addf %244, %243 : vector<2x128xf32>
    %246 = arith.divf %244, %245 : vector<2x128xf32>
    %247 = arith.mulf %238, %189 : vector<2x128xf32>
    %248 = arith.mulf %232, %240 : vector<2x128xf32>
    %249 = arith.addf %247, %248 : vector<2x128xf32>
    %250 = math.tanh %249 : vector<2x128xf32>
    %251 = arith.mulf %246, %250 : vector<2x128xf32>
    %252 = vector.extract_strided_slice %7 {offsets = [0, 4, 0], sizes = [2, 1, 512], strides = [1, 1, 1]} : vector<2x8x512xf32> to vector<2x1x512xf32>
    %253 = vector.shape_cast %252 : vector<2x1x512xf32> to vector<2x512xf32>
    %254 = arith.truncf %221 : vector<2x128xf32> to vector<2x128xbf16>
    %cst_45 = arith.constant dense<0.000000e+00> : vector<2x512xf32>
    %255 = tpu.matmul %254, %8, %cst_45 {dimension_numbers = #tpu.dot_dimension_numbers<[1], [0], [0], [1], [0, 0, 1, 1], [], []>} : vector<2x128xbf16>, vector<128x512xbf16>, vector<2x512xf32> -> vector<2x512xf32>
    %256 = arith.addf %253, %255 : vector<2x512xf32>
    %257 = vector.extract_strided_slice %256 {offsets = [0, 0], sizes = [2, 128], strides = [1, 1]} : vector<2x512xf32> to vector<2x128xf32>
    %258 = arith.negf %257 : vector<2x128xf32>
    %259 = math.exp %258 : vector<2x128xf32>
    %cst_46 = arith.constant 1.000000e+00 : f32
    %260 = vector.broadcast %cst_46 : f32 to vector<2x128xf32>
    %261 = arith.addf %260, %259 : vector<2x128xf32>
    %262 = arith.divf %260, %261 : vector<2x128xf32>
    %263 = vector.extract_strided_slice %256 {offsets = [0, 128], sizes = [2, 128], strides = [1, 1]} : vector<2x512xf32> to vector<2x128xf32>
    %264 = arith.negf %263 : vector<2x128xf32>
    %265 = math.exp %264 : vector<2x128xf32>
    %cst_47 = arith.constant 1.000000e+00 : f32
    %266 = vector.broadcast %cst_47 : f32 to vector<2x128xf32>
    %267 = arith.addf %266, %265 : vector<2x128xf32>
    %268 = arith.divf %266, %267 : vector<2x128xf32>
    %269 = vector.extract_strided_slice %256 {offsets = [0, 256], sizes = [2, 128], strides = [1, 1]} : vector<2x512xf32> to vector<2x128xf32>
    %270 = math.tanh %269 : vector<2x128xf32>
    %271 = vector.extract_strided_slice %256 {offsets = [0, 384], sizes = [2, 128], strides = [1, 1]} : vector<2x512xf32> to vector<2x128xf32>
    %272 = arith.negf %271 : vector<2x128xf32>
    %273 = math.exp %272 : vector<2x128xf32>
    %cst_48 = arith.constant 1.000000e+00 : f32
    %274 = vector.broadcast %cst_48 : f32 to vector<2x128xf32>
    %275 = arith.addf %274, %273 : vector<2x128xf32>
    %276 = arith.divf %274, %275 : vector<2x128xf32>
    %277 = arith.mulf %268, %219 : vector<2x128xf32>
    %278 = arith.mulf %262, %270 : vector<2x128xf32>
    %279 = arith.addf %277, %278 : vector<2x128xf32>
    %280 = math.tanh %279 : vector<2x128xf32>
    %281 = arith.mulf %276, %280 : vector<2x128xf32>
    %282 = tpu.concatenate %281, %251 in 1 : vector<2x128xf32>, vector<2x128xf32> -> vector<2x256xf32>
    %283 = arith.truncf %282 : vector<2x256xf32> to vector<2x256xbf16>
    %cst_49 = arith.constant dense<0.000000e+00> : vector<2x512xf32>
    %284 = tpu.matmul %283, %9, %cst_49 {dimension_numbers = #tpu.dot_dimension_numbers<[1], [0], [0], [1], [0, 0, 1, 1], [], []>} : vector<2x256xbf16>, vector<256x512xbf16>, vector<2x512xf32> -> vector<2x512xf32>
    %285 = vector.broadcast %10 : vector<1x512xf32> to vector<2x512xf32>
    %286 = arith.addf %284, %285 : vector<2x512xf32>
    %287 = vector.extract_strided_slice %286 {offsets = [0, 0], sizes = [2, 128], strides = [1, 1]} : vector<2x512xf32> to vector<2x128xf32>
    %288 = arith.negf %287 : vector<2x128xf32>
    %289 = math.exp %288 : vector<2x128xf32>
    %cst_50 = arith.constant 1.000000e+00 : f32
    %290 = vector.broadcast %cst_50 : f32 to vector<2x128xf32>
    %291 = arith.addf %290, %289 : vector<2x128xf32>
    %292 = arith.divf %290, %291 : vector<2x128xf32>
    %293 = vector.extract_strided_slice %286 {offsets = [0, 128], sizes = [2, 128], strides = [1, 1]} : vector<2x512xf32> to vector<2x128xf32>
    %294 = arith.negf %293 : vector<2x128xf32>
    %295 = math.exp %294 : vector<2x128xf32>
    %cst_51 = arith.constant 1.000000e+00 : f32
    %296 = vector.broadcast %cst_51 : f32 to vector<2x128xf32>
    %297 = arith.addf %296, %295 : vector<2x128xf32>
    %298 = arith.divf %296, %297 : vector<2x128xf32>
    %299 = vector.extract_strided_slice %286 {offsets = [0, 256], sizes = [2, 128], strides = [1, 1]} : vector<2x512xf32> to vector<2x128xf32>
    %300 = math.tanh %299 : vector<2x128xf32>
    %301 = vector.extract_strided_slice %286 {offsets = [0, 384], sizes = [2, 128], strides = [1, 1]} : vector<2x512xf32> to vector<2x128xf32>
    %302 = arith.negf %301 : vector<2x128xf32>
    %303 = math.exp %302 : vector<2x128xf32>
    %cst_52 = arith.constant 1.000000e+00 : f32
    %304 = vector.broadcast %cst_52 : f32 to vector<2x128xf32>
    %305 = arith.addf %304, %303 : vector<2x128xf32>
    %306 = arith.divf %304, %305 : vector<2x128xf32>
    %307 = arith.mulf %298, %249 : vector<2x128xf32>
    %308 = arith.mulf %292, %300 : vector<2x128xf32>
    %309 = arith.addf %307, %308 : vector<2x128xf32>
    %310 = math.tanh %309 : vector<2x128xf32>
    %311 = arith.mulf %306, %310 : vector<2x128xf32>
    %312 = vector.extract_strided_slice %7 {offsets = [0, 5, 0], sizes = [2, 1, 512], strides = [1, 1, 1]} : vector<2x8x512xf32> to vector<2x1x512xf32>
    %313 = vector.shape_cast %312 : vector<2x1x512xf32> to vector<2x512xf32>
    %314 = arith.truncf %281 : vector<2x128xf32> to vector<2x128xbf16>
    %cst_53 = arith.constant dense<0.000000e+00> : vector<2x512xf32>
    %315 = tpu.matmul %314, %8, %cst_53 {dimension_numbers = #tpu.dot_dimension_numbers<[1], [0], [0], [1], [0, 0, 1, 1], [], []>} : vector<2x128xbf16>, vector<128x512xbf16>, vector<2x512xf32> -> vector<2x512xf32>
    %316 = arith.addf %313, %315 : vector<2x512xf32>
    %317 = vector.extract_strided_slice %316 {offsets = [0, 0], sizes = [2, 128], strides = [1, 1]} : vector<2x512xf32> to vector<2x128xf32>
    %318 = arith.negf %317 : vector<2x128xf32>
    %319 = math.exp %318 : vector<2x128xf32>
    %cst_54 = arith.constant 1.000000e+00 : f32
    %320 = vector.broadcast %cst_54 : f32 to vector<2x128xf32>
    %321 = arith.addf %320, %319 : vector<2x128xf32>
    %322 = arith.divf %320, %321 : vector<2x128xf32>
    %323 = vector.extract_strided_slice %316 {offsets = [0, 128], sizes = [2, 128], strides = [1, 1]} : vector<2x512xf32> to vector<2x128xf32>
    %324 = arith.negf %323 : vector<2x128xf32>
    %325 = math.exp %324 : vector<2x128xf32>
    %cst_55 = arith.constant 1.000000e+00 : f32
    %326 = vector.broadcast %cst_55 : f32 to vector<2x128xf32>
    %327 = arith.addf %326, %325 : vector<2x128xf32>
    %328 = arith.divf %326, %327 : vector<2x128xf32>
    %329 = vector.extract_strided_slice %316 {offsets = [0, 256], sizes = [2, 128], strides = [1, 1]} : vector<2x512xf32> to vector<2x128xf32>
    %330 = math.tanh %329 : vector<2x128xf32>
    %331 = vector.extract_strided_slice %316 {offsets = [0, 384], sizes = [2, 128], strides = [1, 1]} : vector<2x512xf32> to vector<2x128xf32>
    %332 = arith.negf %331 : vector<2x128xf32>
    %333 = math.exp %332 : vector<2x128xf32>
    %cst_56 = arith.constant 1.000000e+00 : f32
    %334 = vector.broadcast %cst_56 : f32 to vector<2x128xf32>
    %335 = arith.addf %334, %333 : vector<2x128xf32>
    %336 = arith.divf %334, %335 : vector<2x128xf32>
    %337 = arith.mulf %328, %279 : vector<2x128xf32>
    %338 = arith.mulf %322, %330 : vector<2x128xf32>
    %339 = arith.addf %337, %338 : vector<2x128xf32>
    %340 = math.tanh %339 : vector<2x128xf32>
    %341 = arith.mulf %336, %340 : vector<2x128xf32>
    %342 = tpu.concatenate %341, %311 in 1 : vector<2x128xf32>, vector<2x128xf32> -> vector<2x256xf32>
    %343 = arith.truncf %342 : vector<2x256xf32> to vector<2x256xbf16>
    %cst_57 = arith.constant dense<0.000000e+00> : vector<2x512xf32>
    %344 = tpu.matmul %343, %9, %cst_57 {dimension_numbers = #tpu.dot_dimension_numbers<[1], [0], [0], [1], [0, 0, 1, 1], [], []>} : vector<2x256xbf16>, vector<256x512xbf16>, vector<2x512xf32> -> vector<2x512xf32>
    %345 = vector.broadcast %10 : vector<1x512xf32> to vector<2x512xf32>
    %346 = arith.addf %344, %345 : vector<2x512xf32>
    %347 = vector.extract_strided_slice %346 {offsets = [0, 0], sizes = [2, 128], strides = [1, 1]} : vector<2x512xf32> to vector<2x128xf32>
    %348 = arith.negf %347 : vector<2x128xf32>
    %349 = math.exp %348 : vector<2x128xf32>
    %cst_58 = arith.constant 1.000000e+00 : f32
    %350 = vector.broadcast %cst_58 : f32 to vector<2x128xf32>
    %351 = arith.addf %350, %349 : vector<2x128xf32>
    %352 = arith.divf %350, %351 : vector<2x128xf32>
    %353 = vector.extract_strided_slice %346 {offsets = [0, 128], sizes = [2, 128], strides = [1, 1]} : vector<2x512xf32> to vector<2x128xf32>
    %354 = arith.negf %353 : vector<2x128xf32>
    %355 = math.exp %354 : vector<2x128xf32>
    %cst_59 = arith.constant 1.000000e+00 : f32
    %356 = vector.broadcast %cst_59 : f32 to vector<2x128xf32>
    %357 = arith.addf %356, %355 : vector<2x128xf32>
    %358 = arith.divf %356, %357 : vector<2x128xf32>
    %359 = vector.extract_strided_slice %346 {offsets = [0, 256], sizes = [2, 128], strides = [1, 1]} : vector<2x512xf32> to vector<2x128xf32>
    %360 = math.tanh %359 : vector<2x128xf32>
    %361 = vector.extract_strided_slice %346 {offsets = [0, 384], sizes = [2, 128], strides = [1, 1]} : vector<2x512xf32> to vector<2x128xf32>
    %362 = arith.negf %361 : vector<2x128xf32>
    %363 = math.exp %362 : vector<2x128xf32>
    %cst_60 = arith.constant 1.000000e+00 : f32
    %364 = vector.broadcast %cst_60 : f32 to vector<2x128xf32>
    %365 = arith.addf %364, %363 : vector<2x128xf32>
    %366 = arith.divf %364, %365 : vector<2x128xf32>
    %367 = arith.mulf %358, %309 : vector<2x128xf32>
    %368 = arith.mulf %352, %360 : vector<2x128xf32>
    %369 = arith.addf %367, %368 : vector<2x128xf32>
    %370 = math.tanh %369 : vector<2x128xf32>
    %371 = arith.mulf %366, %370 : vector<2x128xf32>
    %372 = vector.extract_strided_slice %7 {offsets = [0, 6, 0], sizes = [2, 1, 512], strides = [1, 1, 1]} : vector<2x8x512xf32> to vector<2x1x512xf32>
    %373 = vector.shape_cast %372 : vector<2x1x512xf32> to vector<2x512xf32>
    %374 = arith.truncf %341 : vector<2x128xf32> to vector<2x128xbf16>
    %cst_61 = arith.constant dense<0.000000e+00> : vector<2x512xf32>
    %375 = tpu.matmul %374, %8, %cst_61 {dimension_numbers = #tpu.dot_dimension_numbers<[1], [0], [0], [1], [0, 0, 1, 1], [], []>} : vector<2x128xbf16>, vector<128x512xbf16>, vector<2x512xf32> -> vector<2x512xf32>
    %376 = arith.addf %373, %375 : vector<2x512xf32>
    %377 = vector.extract_strided_slice %376 {offsets = [0, 0], sizes = [2, 128], strides = [1, 1]} : vector<2x512xf32> to vector<2x128xf32>
    %378 = arith.negf %377 : vector<2x128xf32>
    %379 = math.exp %378 : vector<2x128xf32>
    %cst_62 = arith.constant 1.000000e+00 : f32
    %380 = vector.broadcast %cst_62 : f32 to vector<2x128xf32>
    %381 = arith.addf %380, %379 : vector<2x128xf32>
    %382 = arith.divf %380, %381 : vector<2x128xf32>
    %383 = vector.extract_strided_slice %376 {offsets = [0, 128], sizes = [2, 128], strides = [1, 1]} : vector<2x512xf32> to vector<2x128xf32>
    %384 = arith.negf %383 : vector<2x128xf32>
    %385 = math.exp %384 : vector<2x128xf32>
    %cst_63 = arith.constant 1.000000e+00 : f32
    %386 = vector.broadcast %cst_63 : f32 to vector<2x128xf32>
    %387 = arith.addf %386, %385 : vector<2x128xf32>
    %388 = arith.divf %386, %387 : vector<2x128xf32>
    %389 = vector.extract_strided_slice %376 {offsets = [0, 256], sizes = [2, 128], strides = [1, 1]} : vector<2x512xf32> to vector<2x128xf32>
    %390 = math.tanh %389 : vector<2x128xf32>
    %391 = vector.extract_strided_slice %376 {offsets = [0, 384], sizes = [2, 128], strides = [1, 1]} : vector<2x512xf32> to vector<2x128xf32>
    %392 = arith.negf %391 : vector<2x128xf32>
    %393 = math.exp %392 : vector<2x128xf32>
    %cst_64 = arith.constant 1.000000e+00 : f32
    %394 = vector.broadcast %cst_64 : f32 to vector<2x128xf32>
    %395 = arith.addf %394, %393 : vector<2x128xf32>
    %396 = arith.divf %394, %395 : vector<2x128xf32>
    %397 = arith.mulf %388, %339 : vector<2x128xf32>
    %398 = arith.mulf %382, %390 : vector<2x128xf32>
    %399 = arith.addf %397, %398 : vector<2x128xf32>
    %400 = math.tanh %399 : vector<2x128xf32>
    %401 = arith.mulf %396, %400 : vector<2x128xf32>
    %402 = tpu.concatenate %401, %371 in 1 : vector<2x128xf32>, vector<2x128xf32> -> vector<2x256xf32>
    %403 = arith.truncf %402 : vector<2x256xf32> to vector<2x256xbf16>
    %cst_65 = arith.constant dense<0.000000e+00> : vector<2x512xf32>
    %404 = tpu.matmul %403, %9, %cst_65 {dimension_numbers = #tpu.dot_dimension_numbers<[1], [0], [0], [1], [0, 0, 1, 1], [], []>} : vector<2x256xbf16>, vector<256x512xbf16>, vector<2x512xf32> -> vector<2x512xf32>
    %405 = vector.broadcast %10 : vector<1x512xf32> to vector<2x512xf32>
    %406 = arith.addf %404, %405 : vector<2x512xf32>
    %407 = vector.extract_strided_slice %406 {offsets = [0, 0], sizes = [2, 128], strides = [1, 1]} : vector<2x512xf32> to vector<2x128xf32>
    %408 = arith.negf %407 : vector<2x128xf32>
    %409 = math.exp %408 : vector<2x128xf32>
    %cst_66 = arith.constant 1.000000e+00 : f32
    %410 = vector.broadcast %cst_66 : f32 to vector<2x128xf32>
    %411 = arith.addf %410, %409 : vector<2x128xf32>
    %412 = arith.divf %410, %411 : vector<2x128xf32>
    %413 = vector.extract_strided_slice %406 {offsets = [0, 128], sizes = [2, 128], strides = [1, 1]} : vector<2x512xf32> to vector<2x128xf32>
    %414 = arith.negf %413 : vector<2x128xf32>
    %415 = math.exp %414 : vector<2x128xf32>
    %cst_67 = arith.constant 1.000000e+00 : f32
    %416 = vector.broadcast %cst_67 : f32 to vector<2x128xf32>
    %417 = arith.addf %416, %415 : vector<2x128xf32>
    %418 = arith.divf %416, %417 : vector<2x128xf32>
    %419 = vector.extract_strided_slice %406 {offsets = [0, 256], sizes = [2, 128], strides = [1, 1]} : vector<2x512xf32> to vector<2x128xf32>
    %420 = math.tanh %419 : vector<2x128xf32>
    %421 = vector.extract_strided_slice %406 {offsets = [0, 384], sizes = [2, 128], strides = [1, 1]} : vector<2x512xf32> to vector<2x128xf32>
    %422 = arith.negf %421 : vector<2x128xf32>
    %423 = math.exp %422 : vector<2x128xf32>
    %cst_68 = arith.constant 1.000000e+00 : f32
    %424 = vector.broadcast %cst_68 : f32 to vector<2x128xf32>
    %425 = arith.addf %424, %423 : vector<2x128xf32>
    %426 = arith.divf %424, %425 : vector<2x128xf32>
    %427 = arith.mulf %418, %369 : vector<2x128xf32>
    %428 = arith.mulf %412, %420 : vector<2x128xf32>
    %429 = arith.addf %427, %428 : vector<2x128xf32>
    %430 = math.tanh %429 : vector<2x128xf32>
    %431 = arith.mulf %426, %430 : vector<2x128xf32>
    %432 = vector.extract_strided_slice %7 {offsets = [0, 7, 0], sizes = [2, 1, 512], strides = [1, 1, 1]} : vector<2x8x512xf32> to vector<2x1x512xf32>
    %433 = vector.shape_cast %432 : vector<2x1x512xf32> to vector<2x512xf32>
    %434 = arith.truncf %401 : vector<2x128xf32> to vector<2x128xbf16>
    %cst_69 = arith.constant dense<0.000000e+00> : vector<2x512xf32>
    %435 = tpu.matmul %434, %8, %cst_69 {dimension_numbers = #tpu.dot_dimension_numbers<[1], [0], [0], [1], [0, 0, 1, 1], [], []>} : vector<2x128xbf16>, vector<128x512xbf16>, vector<2x512xf32> -> vector<2x512xf32>
    %436 = arith.addf %433, %435 : vector<2x512xf32>
    %437 = vector.extract_strided_slice %436 {offsets = [0, 0], sizes = [2, 128], strides = [1, 1]} : vector<2x512xf32> to vector<2x128xf32>
    %438 = arith.negf %437 : vector<2x128xf32>
    %439 = math.exp %438 : vector<2x128xf32>
    %cst_70 = arith.constant 1.000000e+00 : f32
    %440 = vector.broadcast %cst_70 : f32 to vector<2x128xf32>
    %441 = arith.addf %440, %439 : vector<2x128xf32>
    %442 = arith.divf %440, %441 : vector<2x128xf32>
    %443 = vector.extract_strided_slice %436 {offsets = [0, 128], sizes = [2, 128], strides = [1, 1]} : vector<2x512xf32> to vector<2x128xf32>
    %444 = arith.negf %443 : vector<2x128xf32>
    %445 = math.exp %444 : vector<2x128xf32>
    %cst_71 = arith.constant 1.000000e+00 : f32
    %446 = vector.broadcast %cst_71 : f32 to vector<2x128xf32>
    %447 = arith.addf %446, %445 : vector<2x128xf32>
    %448 = arith.divf %446, %447 : vector<2x128xf32>
    %449 = vector.extract_strided_slice %436 {offsets = [0, 256], sizes = [2, 128], strides = [1, 1]} : vector<2x512xf32> to vector<2x128xf32>
    %450 = math.tanh %449 : vector<2x128xf32>
    %451 = vector.extract_strided_slice %436 {offsets = [0, 384], sizes = [2, 128], strides = [1, 1]} : vector<2x512xf32> to vector<2x128xf32>
    %452 = arith.negf %451 : vector<2x128xf32>
    %453 = math.exp %452 : vector<2x128xf32>
    %cst_72 = arith.constant 1.000000e+00 : f32
    %454 = vector.broadcast %cst_72 : f32 to vector<2x128xf32>
    %455 = arith.addf %454, %453 : vector<2x128xf32>
    %456 = arith.divf %454, %455 : vector<2x128xf32>
    %457 = arith.mulf %448, %399 : vector<2x128xf32>
    %458 = arith.mulf %442, %450 : vector<2x128xf32>
    %459 = arith.addf %457, %458 : vector<2x128xf32>
    %460 = math.tanh %459 : vector<2x128xf32>
    %461 = arith.mulf %456, %460 : vector<2x128xf32>
    %462 = tpu.concatenate %461, %431 in 1 : vector<2x128xf32>, vector<2x128xf32> -> vector<2x256xf32>
    %463 = arith.truncf %462 : vector<2x256xf32> to vector<2x256xbf16>
    %cst_73 = arith.constant dense<0.000000e+00> : vector<2x512xf32>
    %464 = tpu.matmul %463, %9, %cst_73 {dimension_numbers = #tpu.dot_dimension_numbers<[1], [0], [0], [1], [0, 0, 1, 1], [], []>} : vector<2x256xbf16>, vector<256x512xbf16>, vector<2x512xf32> -> vector<2x512xf32>
    %465 = vector.broadcast %10 : vector<1x512xf32> to vector<2x512xf32>
    %466 = arith.addf %464, %465 : vector<2x512xf32>
    %467 = vector.extract_strided_slice %466 {offsets = [0, 0], sizes = [2, 128], strides = [1, 1]} : vector<2x512xf32> to vector<2x128xf32>
    %468 = arith.negf %467 : vector<2x128xf32>
    %469 = math.exp %468 : vector<2x128xf32>
    %cst_74 = arith.constant 1.000000e+00 : f32
    %470 = vector.broadcast %cst_74 : f32 to vector<2x128xf32>
    %471 = arith.addf %470, %469 : vector<2x128xf32>
    %472 = arith.divf %470, %471 : vector<2x128xf32>
    %473 = vector.extract_strided_slice %466 {offsets = [0, 128], sizes = [2, 128], strides = [1, 1]} : vector<2x512xf32> to vector<2x128xf32>
    %474 = arith.negf %473 : vector<2x128xf32>
    %475 = math.exp %474 : vector<2x128xf32>
    %cst_75 = arith.constant 1.000000e+00 : f32
    %476 = vector.broadcast %cst_75 : f32 to vector<2x128xf32>
    %477 = arith.addf %476, %475 : vector<2x128xf32>
    %478 = arith.divf %476, %477 : vector<2x128xf32>
    %479 = vector.extract_strided_slice %466 {offsets = [0, 256], sizes = [2, 128], strides = [1, 1]} : vector<2x512xf32> to vector<2x128xf32>
    %480 = math.tanh %479 : vector<2x128xf32>
    %481 = vector.extract_strided_slice %466 {offsets = [0, 384], sizes = [2, 128], strides = [1, 1]} : vector<2x512xf32> to vector<2x128xf32>
    %482 = arith.negf %481 : vector<2x128xf32>
    %483 = math.exp %482 : vector<2x128xf32>
    %cst_76 = arith.constant 1.000000e+00 : f32
    %484 = vector.broadcast %cst_76 : f32 to vector<2x128xf32>
    %485 = arith.addf %484, %483 : vector<2x128xf32>
    %486 = arith.divf %484, %485 : vector<2x128xf32>
    %487 = arith.mulf %478, %429 : vector<2x128xf32>
    %488 = arith.mulf %472, %480 : vector<2x128xf32>
    %489 = arith.addf %487, %488 : vector<2x128xf32>
    %490 = math.tanh %489 : vector<2x128xf32>
    %491 = arith.mulf %486, %490 : vector<2x128xf32>
    %492 = arith.truncf %491 : vector<2x128xf32> to vector<2x128xbf16>
    %c0_77 = arith.constant 0 : index
    %c0_78 = arith.constant 0 : index
    %493 = vector.load %arg7[%c0_77, %c0_78] : memref<128x8xbf16, #tpu.memory_space<vmem>>, vector<128x8xbf16>
    %cst_79 = arith.constant dense<0.000000e+00> : vector<2x8xf32>
    %494 = tpu.matmul %492, %493, %cst_79 {dimension_numbers = #tpu.dot_dimension_numbers<[1], [0], [0], [1], [0, 0, 1, 1], [], []>} : vector<2x128xbf16>, vector<128x8xbf16>, vector<2x8xf32> -> vector<2x8xf32>
    %c0_80 = arith.constant 0 : index
    %c0_81 = arith.constant 0 : index
    %495 = vector.load %arg8[%c0_80, %c0_81] : memref<1x8xf32, #tpu.memory_space<vmem>>, vector<1x8xf32>
    %496 = vector.broadcast %495 : vector<1x8xf32> to vector<2x8xf32>
    %497 = arith.addf %494, %496 : vector<2x8xf32>
    %c0_82 = arith.constant 0 : index
    %c0_83 = arith.constant 0 : index
    %498 = vector.load %arg9[%c0_82, %c0_83] : memref<2x8xf32, #tpu.memory_space<vmem>>, vector<2x8xf32>
    tpu.vector_store %arg9[%c0_82, %c0_83], %497 {strides = array<i32>} : memref<2x8xf32, #tpu.memory_space<vmem>>, vector<2x8xf32>,
    return
  }
  func.func @transform_0(%arg0: i32) -> (i32, i32, i32) {
    %c0_i32 = arith.constant 0 : i32
    %c0_i32_0 = arith.constant 0 : i32
    %c0_i32_1 = arith.constant 0 : i32
    %c0_i32_2 = arith.constant 0 : i32
    return %c0_i32, %c0_i32_0, %c0_i32_1 : i32, i32, i32
  }
  func.func @transform_1(%arg0: i32) -> (i32, i32) {
    %c0_i32 = arith.constant 0 : i32
    %c0_i32_0 = arith.constant 0 : i32
    %c0_i32_1 = arith.constant 0 : i32
    return %c0_i32, %c0_i32_0 : i32, i32
  }
  func.func @transform_2(%arg0: i32) -> (i32, i32) {
    %c0_i32 = arith.constant 0 : i32
    %c0_i32_0 = arith.constant 0 : i32
    %c0_i32_1 = arith.constant 0 : i32
    return %c0_i32, %c0_i32_0 : i32, i32
  }
  func.func @transform_3(%arg0: i32) -> (i32, i32) {
    %c0_i32 = arith.constant 0 : i32
    %c0_i32_0 = arith.constant 0 : i32
    %c0_i32_1 = arith.constant 0 : i32
    return %c0_i32, %c0_i32_0 : i32, i32
  }
  func.func @transform_4(%arg0: i32) -> (i32, i32) {
    %c0_i32 = arith.constant 0 : i32
    %c0_i32_0 = arith.constant 0 : i32
    %c0_i32_1 = arith.constant 0 : i32
    return %c0_i32, %c0_i32_0 : i32, i32
  }
  func.func @transform_5(%arg0: i32) -> (i32, i32) {
    %c0_i32 = arith.constant 0 : i32
    %c0_i32_0 = arith.constant 0 : i32
    %c0_i32_1 = arith.constant 0 : i32
    return %c0_i32, %c0_i32_0 : i32, i32
  }
  func.func @transform_6(%arg0: i32) -> (i32, i32) {
    %c0_i32 = arith.constant 0 : i32
    %c0_i32_0 = arith.constant 0 : i32
    %c0_i32_1 = arith.constant 0 : i32
    return %c0_i32, %c0_i32_0 : i32, i32
  }
  func.func @transform_7(%arg0: i32) -> (i32, i32) {
    %c0_i32 = arith.constant 0 : i32
    %c0_i32_0 = arith.constant 0 : i32
    %c0_i32_1 = arith.constant 0 : i32
    return %c0_i32, %c0_i32_0 : i32, i32
  }
  func.func @transform_8(%arg0: i32) -> (i32, i32) {
    %c0_i32 = arith.constant 0 : i32
    %c0_i32_0 = arith.constant 0 : i32
    %c0_i32_1 = arith.constant 0 : i32
    return %c0_i32, %c0_i32_0 : i32, i32
  }
}

</mosaic_0001>

<bundles_post_ra>
// kernel: repeat_rnn_forward.1
= control target key start
LH: loop header
LB: loop body
LE: loop exit
PB: predicated region body
PF: predicated region fallthrough
CT: control target
= control target key end

     0   :  { %vm61_vm0 = vcmask 1043456   ;;  %vm54_vm1 = vcmask 31744   ;;  %s8157_s0 = inlined_call_operand.vmem [shape: f32[2,8,4], index: 0, kind: input, shape index: {}]   ;;  %s8158_s1 = inlined_call_operand.vmem [shape: f32[4,512], index: 1, kind: input, shape index: {}]   ;;  %s8159_s2 = inlined_call_operand.vmem [shape: bf16[128,512], index: 2, kind: input, shape index: {}]   ;;  %s8160_s3 = inlined_call_operand.vmem [shape: f32[1,512], index: 3, kind: input, shape index: {}]   ;;  %s8161_s4 = inlined_call_operand.vmem [shape: bf16[256,512], index: 4, kind: input, shape index: {}]   ;;  %s8162_s5 = inlined_call_operand.vmem [shape: f32[1,512], index: 5, kind: input, shape index: {}]   ;;  %s8163_s6 = inlined_call_operand.vmem [shape: bf16[128,8], index: 6, kind: input, shape index: {}]   ;;  %s8164_s7 = inlined_call_operand.vmem [shape: f32[1,8], index: 7, kind: input, shape index: {}]   ;;  %s8165_s8 = inlined_call_operand.hbm [shape: f32[2,8], index: 8, kind: output, shape index: {}]  }
   0x1   :  { %v4239_v0 = vld [vmem:[%s8159_s2 + $0xe0] sm:$0xf]  ;;  %v4643_v1 = vld [vmem:[%s8159_s2 + $0xec] sm:$0xf0]  ;;  %v34_v6 = vld [vmem:[%s8158_s1 + $0x8] sm:$0xff] }
   0x2   :  { %v4223_v2 = vld [vmem:[%s8159_s2 + $0xc0] sm:$0xf]  ;;  %v5188_v3 = vor.u32 %v4643_v1, %v4239_v0  ;;  %v4639_v4 = vld [vmem:[%s8159_s2 + $0xcc] sm:$0xf0]  ;;  %49 = vst [vmem:[#allocation1 + $0x10] ss:$2 sm:$0xff] %v34_v6 }
   0x3   :  { %v33_v5 = vld [vmem:[%s8158_s1] sm:$0xff]  ;;  %v5200_v7 = vor.u32 %v4639_v4, %v4223_v2  ;;  %v4642_v8 = vld [vmem:[%s8159_s2 + $0xec] sm:$0xf]  ;;  %v4249_v9 = vld [vmem:[%s8159_s2 + $0xf8] sm:$0xf0] }
   0x4   :  { %47 = vst [vmem:[#allocation1] ss:$2 sm:$0xff] %v33_v5  ;;  %419 = vmatpush.bf16.msra.mxu0 %v5188_v3  ;;  %v4207_v10 = vld [vmem:[%s8159_s2 + $0xa0] sm:$0xf]  ;;  %v4635_v12 = vld [vmem:[%s8159_s2 + $0xac] sm:$0xf0]  ;;  %v5235_v18 = vor.u32 %v4642_v8, %v4249_v9 }
   0x5   :  { %v5214_v11 = vld [vmem:[%s8157_s0] sm:$0xff]  ;;  %v4241_v14 = vld [vmem:[%s8159_s2 + $0xf0] sm:$0xf0]  ;;  %v4247_v15 = vld [vmem:[%s8159_s2 + $0xe8] sm:$0xf]  ;;  %v5246_v24 = vor.u32 %v4635_v12, %v4207_v10 }
   0x6   :  { %v4641_v13 = vld [vmem:[%s8159_s2 + $0xe4] sm:$0xf]  ;;  %v4644_v16 = vld [vmem:[%s8159_s2 + $0xf4] sm:$0xf0]  ;;  %v4638_v17 = vld [vmem:[%s8159_s2 + $0xcc] sm:$0xf] }
   0x7   :  { %8389 = vst [vmem:[#allocation5_spill] sm:$0xff] %v5235_v18  ;;  %v4233_v19 = vld [vmem:[%s8159_s2 + $0xd8] sm:$0xf0]  ;;  %v4191_v20 = vld [vmem:[%s8159_s2 + $0x80] sm:$0xf]  ;;  %v5252_v28 = vor.u32 %v4641_v13, %v4241_v14  ;;  %v5254_v29 = vor.u32 %v4644_v16, %v4247_v15  ;;  %v5314_v45 = vld [vmem:[%s8157_s0 + $0x8] sm:$0xff] }
   0x8   :  { %420 = vmatpush.bf16.msra.mxu0 %v5200_v7  ;;  %v4631_v21 = vld [vmem:[%s8159_s2 + $0x8c] sm:$0xf0]  ;;  %v4637_v25 = vld [vmem:[%s8159_s2 + $0xc4] sm:$0xf]  ;;  %v4225_v30 = vld [vmem:[%s8159_s2 + $0xd0] sm:$0xf0]  ;;  %v5270_v33 = vor.u32 %v4638_v17, %v4233_v19 }
   0x9   :  { %v53_v26 = vld.sshfl [vmem:[#allocation1 + $0x18] sm:$0xff pattern:$0x75316420]  ;;  %v52_v27 = vld.sshfl [vmem:[#allocation1 + $0x10] sm:$0xff pattern:$0x75316420]  ;;  %v5274_v34 = vor.u32 %v4631_v21, %v4191_v20  ;;  %v5284_v37 = vor.u32 %v4637_v25, %v4225_v30 }
   0xa   :  { %8390 = vst [vmem:[#allocation6_spill] sm:$0xff] %v5252_v28  ;;  %4122 = vmatpush.msk.msra.mxu3 %vm61_vm0, %v53_v26  ;;  %v4231_v31 = vld [vmem:[%s8159_s2 + $0xc8] sm:$0xf]  ;;  %v4640_v32 = vld [vmem:[%s8159_s2 + $0xd4] sm:$0xf0]  ;;  %4119 = vmatpush.msk.msra.mxu2 %vm61_vm0, %v52_v27 }
   0xb   :  { %v50_v22 = vld.sshfl [vmem:[#allocation1] sm:$0xff pattern:$0x75316420]  ;;  %v51_v23 = vld.sshfl [vmem:[#allocation1 + $0x8] sm:$0xff pattern:$0x75316420]  ;;  %v5286_v38 = vor.u32 %v4640_v32, %v4231_v31  ;;  %4123 = vmatmul.msk.f32.vlgmr.msra.gmra.mxu3 %vm54_vm1, %v5214_v11  ;;  %4120 = vmatmul.msk.f32.vlgmr.msra.gmra.mxu2 %vm54_vm1, %v5214_v11 }
   0xc   :  { %4113 = vmatpush.msk.msra.mxu1 %vm61_vm0, %v50_v22  ;;  %458 = vmatpush.bf16.msrb.mxu3 %v5235_v18  ;;  %8391 = vst [vmem:[#allocation7_spill] sm:$0xff] %v5270_v33  ;;  %v4634_v35 = vld [vmem:[%s8159_s2 + $0xac] sm:$0xf]  ;;  %v4217_v36 = vld [vmem:[%s8159_s2 + $0xb8] sm:$0xf0] }
   0xd   :  { %4114 = vmatmul.msk.f32.vlgmr.msra.gmra.mxu1 %vm54_vm1, %v5214_v11  ;;  %421 = vmatpush.bf16.msra.mxu0 %v5246_v24  ;;  %8392 = vst [vmem:[#allocation8_spill] sm:$0xff] %v5274_v34  ;;  %v4175_v39 = vld [vmem:[%s8159_s2 + $0x60] sm:$0xf]  ;;  %v4627_v40 = vld [vmem:[%s8159_s2 + $0x6c] sm:$0xf0]  ;;  %v5316_v46 = vor.u32 %v4634_v35, %v4217_v36 }
   0xe   :  { %4116 = vmatpush.msk.msrb.mxu1 %vm61_vm0, %v51_v23  ;;  %445 = vmatpush.bf16.msrb.mxu2 %v5254_v29  ;;  %8393 = vst [vmem:[#allocation9_spill] sm:$0xff] %v5284_v37  ;;  %v4633_v41 = vld [vmem:[%s8159_s2 + $0xa4] sm:$0xf]  ;;  %v4209_v42 = vld [vmem:[%s8159_s2 + $0xb0] sm:$0xf0]  ;;  %v5319_v47 = vor.u32 %v4627_v40, %v4175_v39 }
   0xf   :  { %v4215_v43 = vld [vmem:[%s8159_s2 + $0xa8] sm:$0xf]  ;;  %v4636_v44 = vld [vmem:[%s8159_s2 + $0xb4] sm:$0xf0]  ;;  %8394 = vst [vmem:[#allocation10_spill] sm:$0xff] %v5316_v46  ;;  %v5329_v50 = vor.u32 %v4633_v41, %v4209_v42 }
  0x10   :  { %432 = vmatpush.bf16.msra.mxu1 %v5252_v28  ;;  %459 = vmatpush.bf16.msrb.mxu3 %v5270_v33  ;;  %8395 = vst [vmem:[#allocation11_spill] sm:$0xff] %v5319_v47  ;;  %v4630_v48 = vld [vmem:[%s8159_s2 + $0x8c] sm:$0xf]  ;;  %v4201_v49 = vld [vmem:[%s8159_s2 + $0x98] sm:$0xf0]  ;;  %v5331_v51 = vor.u32 %v4636_v44, %v4215_v43 }
  0x11   :  { %422 = vmatpush.bf16.msra.mxu0 %v5274_v34  ;;  %8396 = vst [vmem:[#allocation12_spill] sm:$0xff] %v5329_v50  ;;  %v4159_v52 = vld [vmem:[%s8159_s2 + $0x40] sm:$0xf]  ;;  %v4623_v53 = vld [vmem:[%s8159_s2 + $0x4c] sm:$0xf0]  ;;  %v5354_v58 = vor.u32 %v4630_v48, %v4201_v49 }
  0x12   :  { %446 = vmatpush.bf16.msrb.mxu2 %v5286_v38  ;;  %v4629_v54 = vld [vmem:[%s8159_s2 + $0x84] sm:$0xf]  ;;  %v4193_v55 = vld [vmem:[%s8159_s2 + $0x90] sm:$0xf0]  ;;  %v4199_v56 = vld [vmem:[%s8159_s2 + $0x88] sm:$0xf]  ;;  %v5357_v59 = vor.u32 %v4623_v53, %v4159_v52 }
  0x13   :  { %v4632_v57 = vld [vmem:[%s8159_s2 + $0x94] sm:$0xf0]  ;;  %8397 = vst [vmem:[#allocation13_spill] sm:$0xff] %v5354_v58  ;;  %v4626_v60 = vld [vmem:[%s8159_s2 + $0x6c] sm:$0xf]  ;;  %v5367_v62 = vor.u32 %v4629_v54, %v4193_v55  ;;  %4124 = vmatmul.msk.f32.gmra.mxu3 %vm54_vm1, %v5314_v45  ;;  %4121 = vmatmul.msk.f32.gmra.mxu2 %vm54_vm1, %v5314_v45 }
  0x14   :  { %433 = vmatpush.bf16.msra.mxu1 %v5284_v37  ;;  %460 = vmatpush.bf16.msrb.mxu3 %v5316_v46  ;;  %8398 = vst [vmem:[#allocation14_spill] sm:$0xff] %v5357_v59  ;;  %v4185_v61 = vld [vmem:[%s8159_s2 + $0x78] sm:$0xf0]  ;;  %v5369_v63 = vor.u32 %v4632_v57, %v4199_v56  ;;  %v4143_v0 = vld [vmem:[%s8159_s2 + $0x20] sm:$0xf] }
  0x15   :  { %4115 = vmatmul.msk.f32.gmra.mxu1 %vm54_vm1, %v5314_v45  ;;  %423 = vmatpush.bf16.msra.mxu0 %v5319_v47  ;;  %8399 = vst [vmem:[#allocation15_spill] sm:$0xff] %v5367_v62  ;;  %v4619_v1 = vld [vmem:[%s8159_s2 + $0x2c] sm:$0xf0]  ;;  %v4625_v2 = vld [vmem:[%s8159_s2 + $0x64] sm:$0xf]  ;;  %v5394_v8 = vor.u32 %v4626_v60, %v4185_v61 }
  0x16   :  { %447 = vmatpush.bf16.msrb.mxu2 %v5331_v51  ;;  %8400 = vst [vmem:[#allocation16_spill] sm:$0xff] %v5369_v63  ;;  %v4177_v4 = vld [vmem:[%s8159_s2 + $0x70] sm:$0xf0]  ;;  %v4183_v5 = vld [vmem:[%s8159_s2 + $0x68] sm:$0xf]  ;;  %v5400_v10 = vor.u32 %v4619_v1, %v4143_v0 }
  0x17   :  { %v4628_v6 = vld [vmem:[%s8159_s2 + $0x74] sm:$0xf0]  ;;  %8401 = vst [vmem:[#allocation17_spill] sm:$0xff] %v5394_v8  ;;  %v4622_v9 = vld [vmem:[%s8159_s2 + $0x4c] sm:$0xf]  ;;  %v5413_v15 = vor.u32 %v4625_v2, %v4177_v4 }
  0x18   :  { %434 = vmatpush.bf16.msra.mxu1 %v5329_v50  ;;  %461 = vmatpush.bf16.msrb.mxu3 %v5354_v58  ;;  %8402 = vst [vmem:[#allocation18_spill] sm:$0xff] %v5400_v10  ;;  %v4169_v12 = vld [vmem:[%s8159_s2 + $0x58] sm:$0xf0]  ;;  %v4127_v13 = vld [vmem:[%s8159_s2] sm:$0xf]  ;;  %v5415_v16 = vor.u32 %v4628_v6, %v4183_v5 }
  0x19   :  { %424 = vmatpush.bf16.msra.mxu0 %v5357_v59  ;;  %v4615_v14 = vld [vmem:[%s8159_s2 + $0xc] sm:$0xf0]  ;;  %8403 = vst [vmem:[#allocation19_spill] sm:$0xff] %v5413_v15  ;;  %v4621_v17 = vld [vmem:[%s8159_s2 + $0x44] sm:$0xf] }
  0x1a   :  { %448 = vmatpush.bf16.msrb.mxu2 %v5369_v63  ;;  %8404 = vst [vmem:[#allocation20_spill] sm:$0xff] %v5415_v16  ;;  %v4161_v19 = vld [vmem:[%s8159_s2 + $0x50] sm:$0xf0]  ;;  %v4167_v20 = vld [vmem:[%s8159_s2 + $0x48] sm:$0xf] }
  0x1b   :  { %v4624_v21 = vld [vmem:[%s8159_s2 + $0x54] sm:$0xf0] }
  0x1c   :  { %435 = vmatpush.bf16.msra.mxu1 %v5367_v62 }
  0x1d   :  { %4117 = vmatmul.msk.f32.vlgmr.msrb.gmra.mxu1 %vm54_vm1, %v5214_v11 }
  0x1e   :  { %13 = vsyncpa [#allocation3], 0  ;;  %462 = vmatpush.bf16.msrb.mxu3 %v5394_v8  ;;  %v5432_v22 = vor.u32 %v4622_v9, %v4169_v12  ;;  %425 = vmatpush.bf16.msra.mxu0 %v5400_v10  ;;  %v5435_v23 = vor.u32 %v4615_v14, %v4127_v13  ;;  %v4618_v25 = vld [vmem:[%s8159_s2 + $0x2c] sm:$0xf]  ;;  %v4153_v11 = vld [vmem:[%s8159_s2 + $0x38] sm:$0xf0]  ;;  %v5445_v26 = vor.u32 %v4621_v17, %v4161_v19 }
  0x1f   :  { %449 = vmatpush.bf16.msrb.mxu2 %v5415_v16  ;;  %v5447_v27 = vor.u32 %v4624_v21, %v4167_v20  ;;  %v4617_v30 = vld [vmem:[%s8159_s2 + $0x24] sm:$0xf]  ;;  %v4145_v31 = vld [vmem:[%s8159_s2 + $0x30] sm:$0xf0]  ;;  %v4151_v32 = vld [vmem:[%s8159_s2 + $0x28] sm:$0xf]  ;;  %v5462_v36 = vor.u32 %v4618_v25, %v4153_v11 }
  0x20   :  { %8405 = vst [vmem:[#allocation21_spill] sm:$0xff] %v5432_v22  ;;  %436 = vmatpush.bf16.msra.mxu1 %v5413_v15  ;;  %v4620_v35 = vld [vmem:[%s8159_s2 + $0x34] sm:$0xf0]  ;;  %v4614_v39 = vld [vmem:[%s8159_s2 + $0xc] sm:$0xf]  ;;  %v5473_v41 = vor.u32 %v4617_v30, %v4145_v31  ;;  %v5131_v54 = vmov 0  }
  0x21   :  { %8406 = vst [vmem:[#allocation22_spill] sm:$0xff] %v5435_v23  ;;  %v4137_v40 = vld [vmem:[%s8159_s2 + $0x18] sm:$0xf0]  ;;  %v5475_v42 = vor.u32 %v4620_v35, %v4151_v32  ;;  %v4613_v43 = vld [vmem:[%s8159_s2 + $0x4] sm:$0xf]  ;;  %s5133_s18 = smov [#allocation2]  }
  0x22   :  { %8407 = vst [vmem:[#allocation23_spill] sm:$0xff] %v5445_v26  ;;  %463 = vmatpush.bf16.msrb.mxu3 %v5432_v22  ;;  %426 = vmatpush.bf16.msra.mxu0 %v5435_v23  ;;  %v4705_v44 = vld [vmem:[%s8161_s4 + $0x1e4] sm:$0xf]  ;;  %v4503_v48 = vld [vmem:[%s8161_s4 + $0x1f0] sm:$0xf0]  ;;  %v5498_v55 = vor.u32 %v4614_v39, %v4137_v40  ;;  %s4102_s19 = sshll.u32 %s5133_s18, 4  ;;  %s4103_s19 = int_to_ptr.vmem [resolvable:$true] %s4102_s19 }
  0x23   :  { %8408 = vst [vmem:[#allocation24_spill] sm:$0xff] %v5447_v27  ;;  %450 = vmatpush.bf16.msrb.mxu2 %v5447_v27  ;;  %v4129_v49 = vld [vmem:[%s8159_s2 + $0x10] sm:$0xf0]  ;;  %v4135_v52 = vld [vmem:[%s8159_s2 + $0x8] sm:$0xf]  ;;  %v5506_v57 = vor.u32 %v4705_v44, %v4503_v48  ;;  %s4104_s22 = sshll.u32 %s8165_s8, 4  ;;  %s4105_s22 = int_to_ptr.hbm [resolvable:$true] %s4104_s22 }
  0x24   :  { %8409 = vst [vmem:[#allocation25_spill] sm:$0xff] %v5462_v36  ;;  %437 = vmatpush.bf16.msra.mxu1 %v5445_v26  ;;  %v4616_v53 = vld [vmem:[%s8159_s2 + $0x14] sm:$0xf0]  ;;  %v4707_v56 = vld [vmem:[%s8161_s4 + $0x1ec] sm:$0xf0]  ;;  %v5510_v60 = vor.u32 %v4613_v43, %v4129_v49 }
  0x25   :  { %8410 = vst [vmem:[#allocation26_spill] sm:$0xff] %v5473_v41  ;;  %4118 = vmatmul.msk.f32.gmra.mxu1 %vm54_vm1, %v5314_v45  ;;  %427 = vmatmul.bf16.vlgmr.msra.gmra.mxu0 %v5131_v54  ;;  %v4501_v45 = vld [vmem:[%s8161_s4 + $0x1e0] sm:$0xf]  ;;  %v5512_v61 = vor.u32 %v4616_v53, %v4135_v52  ;;  %v4703_v2 = vld [vmem:[%s8161_s4 + $0x1cc] sm:$0xf0] }
  0x26   :  { %8411 = vst [vmem:[#allocation27_spill] sm:$0xff] %v5475_v42  ;;  %464 = vmatpush.bf16.msrb.mxu3 %v5462_v36  ;;  %v5514_v0 = vor.u32 %v4707_v56, %v4501_v45  ;;  %v4485_v1 = vld [vmem:[%s8161_s4 + $0x1c0] sm:$0xf]  ;;  %v4701_v4 = vld [vmem:[%s8161_s4 + $0x1c4] sm:$0xf] }
  0x27   :  { %451 = vmatpush.bf16.msrb.mxu2 %v5475_v42  ;;  %8412 = vst [vmem:[#allocation28_spill] sm:$0xff] %v5512_v61  ;;  %v5530_v5 = vor.u32 %v4703_v2, %v4485_v1  ;;  %v4487_v6 = vld [vmem:[%s8161_s4 + $0x1d0] sm:$0xf0]  ;;  %v4469_v9 = vld [vmem:[%s8161_s4 + $0x1a0] sm:$0xf] }
  0x28   :  { %438 = vmatpush.bf16.msra.mxu1 %v5473_v41  ;;  %8413 = vst [vmem:[#allocation29_spill] sm:$0xff] %v5514_v0  ;;  %v4699_v12 = vld [vmem:[%s8161_s4 + $0x1ac] sm:$0xf0]  ;;  %v5541_v13 = vor.u32 %v4701_v4, %v4487_v6  ;;  %v4697_v14 = vld [vmem:[%s8161_s4 + $0x1a4] sm:$0xf] }
  0x29   :  { %8414 = vst [vmem:[#allocation30_spill] sm:$0xff] %v5530_v5  ;;  %v4471_v17 = vld [vmem:[%s8161_s4 + $0x1b0] sm:$0xf0]  ;;  %v5550_v19 = vor.u32 %v4699_v12, %v4469_v9  ;;  %v4453_v21 = vld [vmem:[%s8161_s4 + $0x180] sm:$0xf] }
  0x2a   :  { %465 = vmatpush.bf16.msrb.mxu3 %v5498_v55  ;;  %8415 = vst [vmem:[#allocation31_spill] sm:$0xff] %v5541_v13  ;;  %v5553_v20 = vor.u32 %v4697_v14, %v4471_v17  ;;  %v4695_v25 = vld [vmem:[%s8161_s4 + $0x18c] sm:$0xf0]  ;;  %v4693_v11 = vld [vmem:[%s8161_s4 + $0x184] sm:$0xf] }
  0x2b   :  { %452 = vmatpush.bf16.msrb.mxu2 %v5512_v61  ;;  %8416 = vst [vmem:[#allocation32_spill] sm:$0xff] %v5550_v19  ;;  %v5566_v30 = vor.u32 %v4695_v25, %v4453_v21  ;;  %v4455_v31 = vld [vmem:[%s8161_s4 + $0x190] sm:$0xf0]  ;;  %v4437_v32 = vld [vmem:[%s8161_s4 + $0x160] sm:$0xf] }
  0x2c   :  { %439 = vmatpush.bf16.msra.mxu1 %v5510_v60  ;;  %8417 = vst [vmem:[#allocation33_spill] sm:$0xff] %v5553_v20  ;;  %v4691_v35 = vld [vmem:[%s8161_s4 + $0x16c] sm:$0xf0]  ;;  %v5577_v39 = vor.u32 %v4693_v11, %v4455_v31  ;;  %v4689_v40 = vld [vmem:[%s8161_s4 + $0x164] sm:$0xf] }
  0x2d   :  { %466 = vmatmul.bf16.vlgmr.msrb.gmra.mxu3 %v5131_v54  ;;  %8418 = vst [vmem:[#allocation34_spill] sm:$0xff] %v5566_v30  ;;  %v4439_v43 = vld [vmem:[%s8161_s4 + $0x170] sm:$0xf0]  ;;  %v5586_v44 = vor.u32 %v4691_v35, %v4437_v32  ;;  %v4421_v49 = vld [vmem:[%s8161_s4 + $0x140] sm:$0xf] }
  0x2e   :  { %997 = vmatpush.bf16.msra.mxu3 %v5506_v57  ;;  %453 = vmatmul.bf16.vlgmr.msrb.gmra.mxu2 %v5131_v54  ;;  %8419 = vst [vmem:[#allocation35_spill] sm:$0xff] %v5577_v39  ;;  %v5589_v48 = vor.u32 %v4689_v40, %v4439_v43  ;;  %v4687_v52 = vld [vmem:[%s8161_s4 + $0x14c] sm:$0xf0]  ;;  %v4685_v53 = vld [vmem:[%s8161_s4 + $0x144] sm:$0xf] }
  0x2f   :  { %440 = vmatmul.bf16.vlgmr.msra.gmra.mxu1 %v5131_v54  ;;  %8420 = vst [vmem:[#allocation36_spill] sm:$0xff] %v5586_v44  ;;  %v5602_v54 = vor.u32 %v4687_v52, %v4421_v49  ;;  %v4423_v45 = vld [vmem:[%s8161_s4 + $0x150] sm:$0xf0]  ;;  %v4405_v56 = vld [vmem:[%s8161_s4 + $0x120] sm:$0xf] }
  0x30   :  { %971 = vmatpush.bf16.msrb.mxu1 %v5514_v0  ;;  %8421 = vst [vmem:[#allocation37_spill] sm:$0xff] %v5589_v48  ;;  %v5610_v1 = vor.u32 %v4685_v53, %v4423_v45  ;;  %v4683_v2 = vld [vmem:[%s8161_s4 + $0x12c] sm:$0xf0]  ;;  %v4681_v4 = vld [vmem:[%s8161_s4 + $0x124] sm:$0xf] }
  0x31   :  { %8422 = vst [vmem:[#allocation38_spill] sm:$0xff] %v5602_v54  ;;  %v4407_v6 = vld [vmem:[%s8161_s4 + $0x130] sm:$0xf0]  ;;  %v5622_v9 = vor.u32 %v4683_v2, %v4405_v56  ;;  %v4373_v14 = vld [vmem:[%s8161_s4 + $0xe0] sm:$0xf] }
  0x32   :  { %998 = vmatpush.bf16.msra.mxu3 %v5541_v13  ;;  %8423 = vst [vmem:[#allocation39_spill] sm:$0xff] %v5610_v1  ;;  %v5625_v12 = vor.u32 %v4681_v4, %v4407_v6  ;;  %v4675_v17 = vld [vmem:[%s8161_s4 + $0xec] sm:$0xf0]  ;;  %v4389_v21 = vld [vmem:[%s8161_s4 + $0x100] sm:$0xf] }
  0x33   :  { %8424 = vst [vmem:[#allocation40_spill] sm:$0xff] %v5622_v9  ;;  %v5638_v25 = vor.u32 %v4675_v17, %v4373_v14  ;;  %v4679_v11 = vld [vmem:[%s8161_s4 + $0x10c] sm:$0xf0]  ;;  %v4673_v31 = vld [vmem:[%s8161_s4 + $0xe4] sm:$0xf] }
  0x34   :  { %972 = vmatpush.bf16.msrb.mxu1 %v5530_v5  ;;  %8425 = vst [vmem:[#allocation41_spill] sm:$0xff] %v5625_v12  ;;  %v4375_v32 = vld [vmem:[%s8161_s4 + $0xf0] sm:$0xf0]  ;;  %v5649_v35 = vor.u32 %v4679_v11, %v4389_v21  ;;  %v4677_v43 = vld [vmem:[%s8161_s4 + $0x104] sm:$0xf] }
  0x35   :  { %8426 = vst [vmem:[#allocation42_spill] sm:$0xff] %v5638_v25  ;;  %v5651_v40 = vor.u32 %v4673_v31, %v4375_v32  ;;  %v4391_v49 = vld [vmem:[%s8161_s4 + $0x110] sm:$0xf0]  ;;  %v4509_v52 = vld [vmem:[%s8161_s4 + $0x1e8] sm:$0xf]  ;;  %958 = vmatpush.bf16.msrb.mxu0 %v5638_v25 }
  0x36   :  { %999 = vmatpush.bf16.msra.mxu3 %v5553_v20  ;;  %8427 = vst [vmem:[#allocation43_spill] sm:$0xff] %v5649_v35  ;;  %v5663_v53 = vor.u32 %v4677_v43, %v4391_v49  ;;  %v4708_v45 = vld [vmem:[%s8161_s4 + $0x1f4] sm:$0xf0]  ;;  %v4706_v56 = vld [vmem:[%s8161_s4 + $0x1ec] sm:$0xf] }
  0x37   :  { %8428 = vst [vmem:[#allocation44_spill] sm:$0xff] %v5651_v40  ;;  %v4511_v2 = vld [vmem:[%s8161_s4 + $0x1f8] sm:$0xf0]  ;;  %984 = vmatpush.bf16.msra.mxu2 %v5651_v40  ;;  %v5676_v4 = vor.u32 %v4708_v45, %v4509_v52  ;;  %v4357_v14 = vld [vmem:[%s8161_s4 + $0xc0] sm:$0xf] }
  0x38   :  { %973 = vmatpush.bf16.msrb.mxu1 %v5550_v19  ;;  %8429 = vst [vmem:[#allocation45_spill] sm:$0xff] %v5663_v53  ;;  %v5678_v6 = vor.u32 %v4706_v56, %v4511_v2  ;;  %v4671_v17 = vld [vmem:[%s8161_s4 + $0xcc] sm:$0xf0]  ;;  %v4669_v21 = vld [vmem:[%s8161_s4 + $0xc4] sm:$0xf] }
  0x39   :  { %8430 = vst [vmem:[#allocation46_spill] sm:$0xff] %v5676_v4  ;;  %v5690_v11 = vor.u32 %v4671_v17, %v4357_v14  ;;  %v4359_v31 = vld [vmem:[%s8161_s4 + $0xd0] sm:$0xf0]  ;;  %v4493_v32 = vld [vmem:[%s8161_s4 + $0x1c8] sm:$0xf] }
  0x3a   :  { %1000 = vmatpush.bf16.msra.mxu3 %v5577_v39  ;;  %8431 = vst [vmem:[#allocation47_spill] sm:$0xff] %v5678_v6  ;;  %v4704_v43 = vld [vmem:[%s8161_s4 + $0x1d4] sm:$0xf0]  ;;  %v5703_v49 = vor.u32 %v4669_v21, %v4359_v31  ;;  %v4702_v45 = vld [vmem:[%s8161_s4 + $0x1cc] sm:$0xf] }
  0x3b   :  { %8432 = vst [vmem:[#allocation48_spill] sm:$0xff] %v5690_v11  ;;  %v5705_v52 = vor.u32 %v4704_v43, %v4493_v32  ;;  %v4495_v56 = vld [vmem:[%s8161_s4 + $0x1d8] sm:$0xf0]  ;;  %959 = vmatpush.bf16.msrb.mxu0 %v5690_v11  ;;  %v4341_v17 = vld [vmem:[%s8161_s4 + $0xa0] sm:$0xf] }
  0x3c   :  { %974 = vmatpush.bf16.msrb.mxu1 %v5566_v30  ;;  %8433 = vst [vmem:[#allocation49_spill] sm:$0xff] %v5703_v49  ;;  %v5716_v14 = vor.u32 %v4702_v45, %v4495_v56  ;;  %985 = vmatpush.bf16.msra.mxu2 %v5703_v49  ;;  %v4667_v21 = vld [vmem:[%s8161_s4 + $0xac] sm:$0xf0]  ;;  %v4665_v31 = vld [vmem:[%s8161_s4 + $0xa4] sm:$0xf] }
  0x3d   :  { %8434 = vst [vmem:[#allocation50_spill] sm:$0xff] %v5705_v52  ;;  %v5730_v32 = vor.u32 %v4667_v21, %v4341_v17  ;;  %v4343_v43 = vld [vmem:[%s8161_s4 + $0xb0] sm:$0xf0]  ;;  %v4477_v45 = vld [vmem:[%s8161_s4 + $0x1a8] sm:$0xf] }
  0x3e   :  { %1001 = vmatpush.bf16.msra.mxu3 %v5589_v48  ;;  %8435 = vst [vmem:[#allocation51_spill] sm:$0xff] %v5716_v14  ;;  %v4700_v56 = vld [vmem:[%s8161_s4 + $0x1b4] sm:$0xf0]  ;;  %v5741_v49 = vor.u32 %v4665_v31, %v4343_v43  ;;  %v4698_v17 = vld [vmem:[%s8161_s4 + $0x1ac] sm:$0xf] }
  0x3f   :  { %8436 = vst [vmem:[#allocation52_spill] sm:$0xff] %v5730_v32  ;;  %v5743_v11 = vor.u32 %v4700_v56, %v4477_v45  ;;  %v4479_v21 = vld [vmem:[%s8161_s4 + $0x1b8] sm:$0xf0]  ;;  %960 = vmatpush.bf16.msrb.mxu0 %v5730_v32  ;;  %v4325_v31 = vld [vmem:[%s8161_s4 + $0x80] sm:$0xf] }
  0x40   :  { %975 = vmatpush.bf16.msrb.mxu1 %v5586_v44  ;;  %8437 = vst [vmem:[#allocation53_spill] sm:$0xff] %v5741_v49  ;;  %v5752_v40 = vor.u32 %v4698_v17, %v4479_v21  ;;  %986 = vmatpush.bf16.msra.mxu2 %v5741_v49  ;;  %v4663_v43 = vld [vmem:[%s8161_s4 + $0x8c] sm:$0xf0]  ;;  %v4661_v45 = vld [vmem:[%s8161_s4 + $0x84] sm:$0xf] }
  0x41   :  { %8438 = vst [vmem:[#allocation54_spill] sm:$0xff] %v5743_v11  ;;  %v5766_v56 = vor.u32 %v4663_v43, %v4325_v31  ;;  %v4327_v17 = vld [vmem:[%s8161_s4 + $0x90] sm:$0xf0]  ;;  %v4461_v32 = vld [vmem:[%s8161_s4 + $0x188] sm:$0xf] }
  0x42   :  { %1002 = vmatpush.bf16.msra.mxu3 %v5610_v1  ;;  %8439 = vst [vmem:[#allocation55_spill] sm:$0xff] %v5752_v40  ;;  %v5773_v49 = vor.u32 %v4661_v45, %v4327_v17  ;;  %v4696_v31 = vld [vmem:[%s8161_s4 + $0x194] sm:$0xf0]  ;;  %v4694_v43 = vld [vmem:[%s8161_s4 + $0x18c] sm:$0xf] }
  0x43   :  { %8440 = vst [vmem:[#allocation56_spill] sm:$0xff] %v5766_v56  ;;  %961 = vmatpush.bf16.msrb.mxu0 %v5766_v56  ;;  %v5786_v25 = vor.u32 %v4696_v31, %v4461_v32  ;;  %v4463_v45 = vld [vmem:[%s8161_s4 + $0x198] sm:$0xf0]  ;;  %v4659_v56 = vld [vmem:[%s8161_s4 + $0x6c] sm:$0xf0] }
  0x44   :  { %976 = vmatpush.bf16.msrb.mxu1 %v5602_v54  ;;  %8441 = vst [vmem:[#allocation57_spill] sm:$0xff] %v5773_v49  ;;  %987 = vmatpush.bf16.msra.mxu2 %v5773_v49  ;;  %v5791_v17 = vor.u32 %v4694_v43, %v4463_v45  ;;  %v4309_v49 = vld [vmem:[%s8161_s4 + $0x60] sm:$0xf]  ;;  %v4657_v32 = vld [vmem:[%s8161_s4 + $0x64] sm:$0xf] }
  0x45   :  { %8442 = vst [vmem:[#allocation58_spill] sm:$0xff] %v5786_v25  ;;  %v5804_v31 = vor.u32 %v4659_v56, %v4309_v49  ;;  %v4311_v43 = vld [vmem:[%s8161_s4 + $0x70] sm:$0xf0]  ;;  %v4445_v45 = vld [vmem:[%s8161_s4 + $0x168] sm:$0xf] }
  0x46   :  { %1003 = vmatpush.bf16.msra.mxu3 %v5625_v12  ;;  %8443 = vst [vmem:[#allocation59_spill] sm:$0xff] %v5791_v17  ;;  %v4692_v61 = vld [vmem:[%s8161_s4 + $0x174] sm:$0xf0]  ;;  %v5817_v42 = vor.u32 %v4657_v32, %v4311_v43  ;;  %v4690_v49 = vld [vmem:[%s8161_s4 + $0x16c] sm:$0xf] }
  0x47   :  { %8444 = vst [vmem:[#allocation60_spill] sm:$0xff] %v5804_v31  ;;  %v5819_v10 = vor.u32 %v4692_v61, %v4445_v45  ;;  %v4447_v56 = vld [vmem:[%s8161_s4 + $0x178] sm:$0xf0]  ;;  %v5830_v27 = vld [vmem:[%s8160_s3] sm:$0xf]  ;;  %962 = vmatpush.bf16.msrb.mxu0 %v5804_v31 }
  0x48   :  { %977 = vmatpush.bf16.msrb.mxu1 %v5622_v9  ;;  %8445 = vst [vmem:[#allocation61_spill] sm:$0xff] %v5817_v42  ;;  %v5833_v59 = vor.u32 %v4690_v49, %v4447_v56  ;;  %988 = vmatpush.bf16.msra.mxu2 %v5817_v42  ;;  %v4293_v61 = vld [vmem:[%s8161_s4 + $0x40] sm:$0xf]  ;;  %v4655_v43 = vld [vmem:[%s8161_s4 + $0x4c] sm:$0xf0] }
  0x49   :  { %8446 = vst [vmem:[#allocation62_spill] sm:$0xff] %v5819_v10  ;;  %v4653_v45 = vld [vmem:[%s8161_s4 + $0x44] sm:$0xf]  ;;  %v5849_v49 = vor.u32 %v4655_v43, %v4293_v61  ;;  %v4295_v56 = vld [vmem:[%s8161_s4 + $0x50] sm:$0xf0] }
  0x4a   :  { %1004 = vmatpush.bf16.msra.mxu3 %v5663_v53  ;;  %8447 = vst [vmem:[#allocation63_spill] sm:$0xff] %v5833_v59  ;;  %v4429_v42 = vld [vmem:[%s8161_s4 + $0x148] sm:$0xf]  ;;  %v4688_v31 = vld [vmem:[%s8161_s4 + $0x154] sm:$0xf0] }
  0x4b   :  { %8448 = vst [vmem:[#allocation64_spill] sm:$0xff] %v5849_v49  ;;  %v5865_v61 = vor.u32 %v4688_v31, %v4429_v42  ;;  %v4686_v43 = vld [vmem:[%s8161_s4 + $0x14c] sm:$0xf]  ;;  %963 = vmatpush.bf16.msrb.mxu0 %v5849_v49  ;;  %v4277_v42 = vld [vmem:[%s8161_s4 + $0x20] sm:$0xf] }
  0x4c   :  { %978 = vmatpush.bf16.msrb.mxu1 %v5649_v35  ;;  %v4651_v31 = vld [vmem:[%s8161_s4 + $0x2c] sm:$0xf0] }
  0x4d   :  { %8450 = vst [vmem:[#allocation66_spill] sm:$0xff] %v5865_v61 }
  0x4e   :  { %1049 = vmatpush.bf16.msrb.mxu3 %v5678_v6 }
  0x50   :  { %1023 = vmatpush.bf16.msra.mxu1 %v5676_v4 }
  0x52   :  { %1050 = vmatpush.bf16.msrb.mxu3 %v5716_v14 }
  0x54   :  { %1024 = vmatpush.bf16.msra.mxu1 %v5705_v52 }
  0x56   :  { %1051 = vmatpush.bf16.msrb.mxu3 %v5752_v40 }
  0x58   :  { %1025 = vmatpush.bf16.msra.mxu1 %v5743_v11 }
  0x5a   :  { %1052 = vmatpush.bf16.msrb.mxu3 %v5791_v17 }
  0x5c   :  { %1026 = vmatpush.bf16.msra.mxu1 %v5786_v25  ;;  %v5863_v25 = vor.u32 %v4653_v45, %v4295_v56  ;;  %v4649_v45 = vld [vmem:[%s8161_s4 + $0x24] sm:$0xf]  ;;  %v4279_v56 = vld [vmem:[%s8161_s4 + $0x30] sm:$0xf0] }
  0x5d   :  { %v5902_v47 = vor.u32 %v4649_v45, %v4279_v56  ;;  %v4261_v56 = vld [vmem:[%s8161_s4] sm:$0xf] }
  0x5e   :  { %1053 = vmatpush.bf16.msrb.mxu3 %v5833_v59  ;;  %8449 = vst [vmem:[#allocation65_spill] sm:$0xff] %v5863_v25  ;;  %v4431_v59 = vld [vmem:[%s8161_s4 + $0x158] sm:$0xf0]  ;;  %989 = vmatpush.bf16.msra.mxu2 %v5863_v25  ;;  %v4684_v25 = vld [vmem:[%s8161_s4 + $0x134] sm:$0xf0] }
  0x5f   :  { %v5874_v16 = vor.u32 %v4686_v43, %v4431_v59  ;;  %v5888_v59 = vor.u32 %v4651_v31, %v4277_v42  ;;  %v4413_v43 = vld [vmem:[%s8161_s4 + $0x128] sm:$0xf]  ;;  %8454 = vst [vmem:[#allocation70_spill] sm:$0xff] %v5902_v47  ;;  %v4682_v31 = vld [vmem:[%s8161_s4 + $0x12c] sm:$0xf] }
  0x60   :  { %1027 = vmatpush.bf16.msra.mxu1 %v5819_v10  ;;  %v37_v10 = vperm.slane %v5830_v27, 0  ;;  %v5904_v42 = vor.u32 %v4684_v25, %v4413_v43  ;;  %v4647_v43 = vld [vmem:[%s8161_s4 + $0xc] sm:$0xf0] }
  0x61   :  { %8451 = vst [vmem:[#allocation67_spill] sm:$0xff] %v5874_v16  ;;  %964 = vmatpush.bf16.msrb.mxu0 %v5888_v59 }
  0x62   :  { %1054 = vmatpush.bf16.msrb.mxu3 %v5874_v16  ;;  %8452 = vst [vmem:[#allocation68_spill] sm:$0xff] %v5888_v59  ;;  %v4415_v16 = vld [vmem:[%s8161_s4 + $0x138] sm:$0xf0]  ;;  %990 = vmatpush.bf16.msra.mxu2 %v5902_v47 }
  0x63   :  { %8455 = vst [vmem:[#allocation71_spill] sm:$0xff] %v5904_v42  ;;  %v5913_v11 = vor.u32 %v4682_v31, %v4415_v16  ;;  %v5928_v16 = vor.u32 %v4647_v43, %v4261_v56  ;;  %v4676_v56 = vld [vmem:[%s8161_s4 + $0xf4] sm:$0xf0]  ;;  %v4397_v43 = vld [vmem:[%s8161_s4 + $0x108] sm:$0xf] }
  0x64   :  { %1028 = vmatpush.bf16.msra.mxu1 %v5865_v61 }
  0x65   :  { %8456 = vst [vmem:[#allocation72_spill] sm:$0xff] %v5913_v11  ;;  %965 = vmatpush.bf16.msrb.mxu0 %v5928_v16 }
  0x66   :  { %1055 = vmatpush.bf16.msrb.mxu3 %v5913_v11  ;;  %8458 = vst [vmem:[#allocation74_spill] sm:$0xff] %v5928_v16  ;;  %v38_v11 = vperm.slane %v5830_v27, 1 }
  0x68   :  { %1029 = vmatpush.bf16.msra.mxu1 %v5904_v42 }
  0x8a   :  { %v5713_v2 = vpop.f32.mrf.mxu1 }
  0x8b   :  { %v5900_v49 = vadd.f32 %v5713_v2, %v37_v10 }
  0x8d   :  { %8453 = vst [vmem:[#allocation69_spill] sm:$0xff] %v5900_v49 }
  0x8e   :  { %v5835_v32 = vpop.f32.mrf.mxu3  ;;  %v5861_v17 = vpop.f32.mrf.mxu2 }
  0x92   :  { %v5771_v21 = vpop.f32.mrf.mxu1 }
  0x93   :  { %v5916_v2 = vadd.f32 %v5771_v21, %v37_v10  ;;  %v4645_v10 = vld [vmem:[%s8161_s4 + $0x4] sm:$0xf]  ;;  %v4381_v21 = vld [vmem:[%s8161_s4 + $0xe8] sm:$0xf] }
  0x94   :  { %v5950_v42 = vor.u32 %v4676_v56, %v4381_v21  ;;  %v4383_v21 = vld [vmem:[%s8161_s4 + $0xf8] sm:$0xf0]  ;;  %v4678_v56 = vld [vmem:[%s8161_s4 + $0x10c] sm:$0xf] }
  0x95   :  { %8457 = vst [vmem:[#allocation73_spill] sm:$0xff] %v5916_v2 }
  0x96   :  { %v159_v47 = vpop.f32.mrf.mxu3  ;;  %8460 = vst [vmem:[#allocation76_spill] sm:$0xff] %v5950_v42  ;;  %1010 = vmatpush.bf16.msra.mxu0 %v5950_v42 }
  0x9a   :  { %v5815_v23 = vpop.f32.mrf.mxu1 }
  0xa2   :  { %v113_v61 = vpop.f32.mrf.mxu1  ;;  %v428_v40 = vpop.f32.mrf.mxu0 }
  0xa3   :  { %v475_v45 = vrot.slane %v428_v40, 1  ;;  %v487_v25 = vadd.f32 %v428_v40, %v5900_v49  ;;  %v4263_v40 = vld [vmem:[%s8161_s4 + $0x10] sm:$0xf0] }
  0xa4   :  { %v5940_v59 = vor.u32 %v4645_v10, %v4263_v40  ;;  %v5958_v40 = vpop.f32.mrf.mxu2 }
  0xa5   :  { %v491_v31 = vadd.f32 %v475_v45, %v5916_v2  ;;  %v4253_v49 = vmul.f32 -1.442695, %v487_v25  ;;  %v4680_v45 = vld [vmem:[%s8161_s4 + $0x114] sm:$0xf0]  ;;  %v4674_v25 = vld [vmem:[%s8161_s4 + $0xec] sm:$0xf] }
  0xa6   :  { %8459 = vst [vmem:[#allocation75_spill] sm:$0xff] %v5940_v59  ;;  %991 = vmatpush.bf16.msra.mxu2 %v5940_v59  ;;  %v8236_v2 = vmov 0.0|0.0   ;;  %v5962_v16 = vor.u32 %v4680_v45, %v4397_v43  ;;  %v4365_v43 = vld [vmem:[%s8161_s4 + $0xc8] sm:$0xf]  ;;  %v4672_v45 = vld [vmem:[%s8161_s4 + $0xd4] sm:$0xf0]  ;;  %v5995_v59 = vadd.f32 %v5815_v23, %v38_v11 }
  0xa7   :  { %4721 = vpow2.f32 %v4253_v49  ;;  %v4254_v10 = vmul.f32 -1.442695, %v491_v31  ;;  %979 = vmatmul.bf16.vlgmr.msrb.gmra.mxu1 %v8236_v2  ;;  %1005 = vmatmul.bf16.vlgmr.msra.gmra.mxu3 %v8236_v2  ;;  %v5972_v49 = vor.u32 %v4674_v25, %v4383_v21  ;;  %v4399_v31 = vld [vmem:[%s8161_s4 + $0x118] sm:$0xf0]  ;;  %v5986_v42 = vor.u32 %v4672_v45, %v4365_v43  ;;  %v4670_v25 = vld [vmem:[%s8161_s4 + $0xcc] sm:$0xf] }
  0xa8   :  { %8461 = vst [vmem:[#allocation77_spill] sm:$0xff] %v5962_v16  ;;  %1030 = vmatpush.bf16.msra.mxu1 %v5962_v16  ;;  %v5984_v2 = vor.u32 %v4678_v56, %v4399_v31  ;;  %v4367_v21 = vld [vmem:[%s8161_s4 + $0xd8] sm:$0xf0]  ;;  %v40_v56 = vperm.slane %v5830_v27, 3  ;;  %v6003_v43 = vadd.f32 %v113_v61, %v38_v11  ;;  %v4668_v23 = vld [vmem:[%s8161_s4 + $0xb4] sm:$0xf0] }
  0xa9   :  { %8462 = vst [vmem:[#allocation78_spill] sm:$0xff] %v5972_v49  ;;  %4723 = vpow2.f32 %v4254_v10  ;;  %v5999_v10 = vor.u32 %v4670_v25, %v4367_v21  ;;  %1011 = vmatpush.bf16.msra.mxu0 %v5986_v42  ;;  %v4666_v11 = vld [vmem:[%s8161_s4 + $0xac] sm:$0xf]  ;;  %v4351_v61 = vld [vmem:[%s8161_s4 + $0xb8] sm:$0xf0] }
  0xaa   :  { %8463 = vst [vmem:[#allocation79_spill] sm:$0xff] %v5984_v2  ;;  %v430_v63 = vpop.f32.mrf.mxu0  ;;  %1036 = vmatpush.bf16.msrb.mxu2 %v5972_v49  ;;  %1056 = vmatpush.bf16.msrb.mxu3 %v5984_v2 }
  0xab   :  { %8464 = vst [vmem:[#allocation80_spill] sm:$0xff] %v5986_v42  ;;  %v4349_v63 = vld [vmem:[%s8161_s4 + $0xa8] sm:$0xf]  ;;  %v6032_v42 = vadd.f32 %v159_v47, %v40_v56 }
  0xac   :  { %8465 = vst [vmem:[#allocation81_spill] sm:$0xff] %v5995_v59  ;;  %1148 = vmatpush.bf16.msrb.mxu1 %v5252_v28  ;;  %v441_v31 = vpop.f32.mrf.mxu1  ;;  %v6014_v21 = vor.u32 %v4668_v23, %v4349_v63  ;;  %v6030_v23 = vadd.f32 %v5835_v32, %v40_v56  ;;  %v4662_v56 = vld [vmem:[%s8161_s4 + $0x8c] sm:$0xf] }
  0xad   :  { %8466 = vst [vmem:[#allocation82_spill] sm:$0xff] %v5999_v10  ;;  %v476_v45 = vrot.slane %v441_v31, 1  ;;  %v488_v16 = vadd.f32 %v441_v31, %v5995_v59  ;;  %v4722_v25 = vpop.eup %4721  ;;  %v6027_v59 = vor.u32 %v4666_v11, %v4351_v61  ;;  %v4335_v61 = vld [vmem:[%s8161_s4 + $0x98] sm:$0xf0] }
  0xae   :  { %8467 = vst [vmem:[#allocation83_spill] sm:$0xff] %v6003_v43  ;;  %1174 = vmatpush.bf16.msra.mxu3 %v5235_v18  ;;  %v6022_v31 = vadd.f32 1.0, %v4722_v25  ;;  %1037 = vmatpush.bf16.msrb.mxu2 %v5999_v10 }
  0xaf   :  { %8468 = vst [vmem:[#allocation84_spill] sm:$0xff] %v6014_v21  ;;  %v492_v18 = vadd.f32 %v476_v45, %v6003_v43  ;;  %v4255_v28 = vmul.f32 -1.442695, %v488_v16  ;;  %v4724_v63 = vpop.eup %4723  ;;  %1012 = vmatpush.bf16.msra.mxu0 %v6014_v21 }
  0xb0   :  { %1149 = vmatpush.bf16.msrb.mxu1 %v5284_v37  ;;  %8469 = vst [vmem:[#allocation85_spill] sm:$0xff] %v6027_v59  ;;  %v467_v49 = vpop.f32.mrf.mxu3  ;;  %v6034_v2 = vadd.f32 1.0, %v4724_v63  ;;  %4725 = vrcp.f32 %v6022_v31  ;;  %vm508_vm2 = vweird.f32 %v6022_v31 }
  0xb1   :  { %8470 = vst [vmem:[#allocation86_spill] sm:$0xff] %v6030_v23  ;;  %v4256_v25 = vmul.f32 -1.442695, %v492_v18  ;;  %v478_v45 = vrot.slane %v467_v49, 1  ;;  %4727 = vpow2.f32 %v4255_v28  ;;  %v490_v16 = vadd.f32 %v467_v49, %v6030_v23  ;;  %v6040_v11 = vpop.f32.mrf.mxu2  ;;  %v4333_v18 = vld [vmem:[%s8161_s4 + $0x88] sm:$0xf] }
  0xb2   :  { %8471 = vst [vmem:[#allocation87_spill] sm:$0xff] %v6032_v42  ;;  %1175 = vmatpush.bf16.msra.mxu3 %v5270_v33  ;;  %4729 = vrcp.f32 %v6034_v2  ;;  %1038 = vmatpush.bf16.msrb.mxu2 %v6027_v59  ;;  %v4664_v28 = vld [vmem:[%s8161_s4 + $0x94] sm:$0xf0]  ;;  %v6076_v33 = vor.u32 %v4662_v56, %v4335_v61  ;;  %v4301_v61 = vld [vmem:[%s8161_s4 + $0x48] sm:$0xf]  ;;  %v529_v59 = vand.u32 2147483648, %v6034_v2  ;;  %vm523_vm6 = vweird.f32 %v6034_v2 }
  0xb3   :  { %v494_v47 = vadd.f32 %v478_v45, %v6032_v42  ;;  %4731 = vpow2.f32 %v4256_v25  ;;  %v4257_v32 = vmul.f32 -1.442695, %v490_v16  ;;  %v4317_v45 = vld [vmem:[%s8161_s4 + $0x68] sm:$0xf]  ;;  %v4660_v25 = vld [vmem:[%s8161_s4 + $0x74] sm:$0xf0] }
  0xb4   :  { %1150 = vmatpush.bf16.msrb.mxu1 %v5329_v50  ;;  %v443_v49 = vpop.f32.mrf.mxu1  ;;  %v39_v16 = vperm.slane %v5830_v27, 2  ;;  %v4658_v50 = vld [vmem:[%s8161_s4 + $0x6c] sm:$0xf]  ;;  %8473 = vst [vmem:[#allocation89_spill] sm:$0xff] %v6076_v33  ;;  %v527_v43 = vand.u32 2147483647, %v6034_v2 }
  0xb5   :  { %v4258_v63 = vmul.f32 -1.442695, %v494_v47  ;;  %4733 = vpow2.f32 %v4257_v32  ;;  %v6066_v49 = vor.u32 %v4664_v28, %v4333_v18  ;;  %v4319_v47 = vld [vmem:[%s8161_s4 + $0x78] sm:$0xf0]  ;;  %v6082_v28 = vor.u32 %v4660_v25, %v4317_v45 }
  0xb6   :  { %1176 = vmatpush.bf16.msra.mxu3 %v5316_v46  ;;  %v6074_v46 = vpop.eup %4725  ;;  %v8475_v32 = vmov 0.0|0.0   ;;  %1039 = vmatpush.bf16.msrb.mxu2 %v6076_v33  ;;  %v6091_v56 = vor.u32 %v4658_v50, %v4319_v47  ;;  %v6100_v25 = vadd.f32 %v5861_v17, %v39_v16  ;;  %v4654_v47 = vld [vmem:[%s8161_s4 + $0x4c] sm:$0xf]  ;;  %vm6173_vm5 = vcmp.eq.f32.partialorder %v527_v43, 8.507059e+37  ;;  %v4648_v43 = vld [vmem:[%s8161_s4 + $0x14] sm:$0xf0] }
  0xb7   :  { %8472 = vst [vmem:[#allocation88_spill] sm:$0xff] %v6066_v49  ;;  %4735 = vpow2.f32 %v4258_v63  ;;  %v4728_v37 = vpop.eup %4727  ;;  %v504_v27 = vmul.f32 %v6074_v46, %v6022_v31  ;;  %1013 = vmatpush.bf16.msra.mxu0 %v6066_v49  ;;  %1031 = vmatmul.bf16.vlgmr.msra.gmra.mxu1 %v8475_v32  ;;  %v4656_v63 = vld [vmem:[%s8161_s4 + $0x54] sm:$0xf0]  ;;  %vm509_vm4 = vweird.f32 %v6074_v46 }
  0xb8   :  { %1151 = vmatpush.bf16.msrb.mxu1 %v5367_v62  ;;  %v469_v18 = vpop.f32.mrf.mxu3  ;;  %8474 = vst [vmem:[#allocation90_spill] sm:$0xff] %v6082_v28  ;;  %v6085_v23 = vpop.eup %4729  ;;  %v6087_v42 = vadd.f32 1.0, %v4728_v37  ;;  %1057 = vmatmul.bf16.vlgmr.msrb.gmra.mxu3 %v8475_v32  ;;  %v4303_v62 = vld [vmem:[%s8161_s4 + $0x58] sm:$0xf0]  ;;  %v6123_v33 = vor.u32 %v4656_v63, %v4301_v61  ;;  %v4652_v61 = vld [vmem:[%s8161_s4 + $0x34] sm:$0xf0]  ;;  %vm6202_vm9 = vmor %vm508_vm2, %vm509_vm4 }
  0xb9   :  { %8476 = vst [vmem:[#allocation91_spill] sm:$0xff] %v6091_v56  ;;  %v4732_v45 = vpop.eup %4731  ;;  %v505_v37 = vsub.f32 1.0, %v504_v27  ;;  %v519_v18 = vmul.f32 %v6085_v23, %v6034_v2  ;;  %v456_v50 = vpop.f32.mrf.mxu2  ;;  %v477_v27 = vrot.slane %v6040_v11, 1  ;;  %vm524_vm7 = vweird.f32 %v6085_v23 }
  0xba   :  { %1177 = vmatpush.bf16.msra.mxu3 %v5354_v58  ;;  %8477 = vst [vmem:[#allocation92_spill] sm:$0xff] %v6100_v25  ;;  %v6105_v58 = vadd.f32 %v5958_v40, %v39_v16  ;;  %v6114_v17 = vadd.f32 1.0, %v4732_v45  ;;  %4737 = vrcp.f32 %v6087_v42  ;;  %v512_v40 = vand.u32 2147483647, %v6022_v31  ;;  %1040 = vmatpush.bf16.msrb.mxu2 %v6091_v56  ;;  %vm6222_vm11 = vmor %vm523_vm6, %vm524_vm7 }
  0xbb   :  { %v4734_v16 = vpop.eup %4733  ;;  %v520_v32 = vsub.f32 1.0, %v519_v18  ;;  %v514_v50 = vand.u32 2147483648, %v6022_v31  ;;  %1014 = vmatpush.bf16.msra.mxu0 %v6082_v28  ;;  %8479 = vst [vmem:[#allocation94_spill] sm:$0xff] %v6123_v33  ;;  %v506_v49 = vmul.f32 %v6074_v46, %v505_v37  ;;  %v6130_v18 = vor.u32 %v4654_v47, %v4303_v62  ;;  %v4650_v37 = vld [vmem:[%s8161_s4 + $0x2c] sm:$0xf] }
  0xbc   :  { %8478 = vst [vmem:[#allocation93_spill] sm:$0xff] %v6105_v58  ;;  %1152 = vmatpush.bf16.msrb.mxu1 %v5413_v15  ;;  %4739 = vrcp.f32 %v6114_v17  ;;  %v4285_v15 = vld [vmem:[%s8161_s4 + $0x28] sm:$0xf]  ;;  %v6138_v63 = vadd.f32 1.0, %v4734_v16  ;;  %v4287_v62 = vld [vmem:[%s8161_s4 + $0x38] sm:$0xf0]  ;;  %v489_v47 = vadd.f32 %v6040_v11, %v6100_v25  ;;  %v493_v16 = vadd.f32 %v477_v27, %v6105_v58 }
  0xbd   :  { %v4736_v45 = vpop.eup %4735  ;;  %8480 = vst [vmem:[#allocation95_spill] sm:$0xff] %v6130_v18  ;;  %vm6155_vm3 = vcmp.eq.f32.partialorder %v512_v40, 8.507059e+37  ;;  %v6160_v56 = vor.u32 %v4652_v61, %v4285_v15  ;;  %v507_v11 = vadd.f32 %v6074_v46, %v506_v49  ;;  %v6169_v27 = vor.u32 %v4650_v37, %v4287_v62  ;;  %v4269_v49 = vld [vmem:[%s8161_s4 + $0x8] sm:$0xf] }
  0xbe   :  { %1178 = vmatpush.bf16.msra.mxu3 %v5394_v8  ;;  %v6140_v28 = vadd.f32 1.0, %v4736_v45  ;;  %v521_v8 = vmul.f32 %v6085_v23, %v520_v32  ;;  %4741 = vrcp.f32 %v6138_v63  ;;  %1041 = vmatpush.bf16.msrb.mxu2 %v6130_v18  ;;  %v515_v32 = vor.u32 1.1754944e-38, %v514_v50  ;;  %v4271_v50 = vld [vmem:[%s8161_s4 + $0x18] sm:$0xf0] }
  0xbf   :  { %1015 = vmatpush.bf16.msra.mxu0 %v6123_v33  ;;  %8483 = vst [vmem:[#allocation96_spill] sm:$0xff] %v6160_v56  ;;  %v530_v61 = vor.u32 1.1754944e-38, %v529_v59  ;;  %v4646_v59 = vld [vmem:[%s8161_s4 + $0xc] sm:$0xf]  ;;  %vm546_vm8 = vweird.f32 %v6087_v42  ;;  %v565_v2 = vand.u32 2147483647, %v6114_v17  ;;  %vm561_vm13 = vweird.f32 %v6114_v17 }
  0xc0   :  { %1153 = vmatpush.bf16.msrb.mxu1 %v5445_v26  ;;  %v6162_v21 = vpop.eup %4737  ;;  %4743 = vrcp.f32 %v6140_v28  ;;  %8484 = vst [vmem:[#allocation97_spill] sm:$0xff] %v6169_v27  ;;  %v522_v25 = vadd.f32 %v6085_v23, %v521_v8  ;;  %vm601_vm6 = vweird.f32 %v6140_v28 }
  0xc1   :  { %v542_v40 = vmul.f32 %v6162_v21, %v6087_v42  ;;  %4745 = vtanh.f32 %v489_v47  ;;  %v552_v47 = vand.u32 2147483648, %v6087_v42  ;;  %vm547_vm10 = vweird.f32 %v6162_v21 }
  0xc2   :  { %1179 = vmatpush.bf16.msra.mxu3 %v5432_v22  ;;  %v6180_v26 = vpop.eup %4739  ;;  %4747 = vtanh.f32 %v493_v16  ;;  %1042 = vmatpush.bf16.msrb.mxu2 %v6169_v27  ;;  %vm548_vm14 = vmor %vm546_vm8, %vm547_vm10  ;;  %vm566_vm1 = vcmp.eq.f32.partialorder %v565_v2, 8.507059e+37  ;;  %v607_v2 = vand.u32 2147483648, %v6140_v28  ;;  %vm624_vm10 = vcmask 1041409  }
  0xc3   :  { %v543_v8 = vsub.f32 1.0, %v542_v40  ;;  %v557_v37 = vmul.f32 %v6180_v26, %v6114_v17  ;;  %1016 = vmatpush.bf16.msra.mxu0 %v6160_v56  ;;  %v511_v40 = vsel %vm6202_vm9, %v6074_v46, %v507_v11  ;;  %v6226_v46 = vor.u32 %v4648_v43, %v4269_v49 }
  0xc4   :  { %1154 = vmatpush.bf16.msrb.mxu1 %v5473_v41  ;;  %v550_v41 = vand.u32 2147483647, %v6087_v42  ;;  %v6215_v31 = vpop.eup %4741  ;;  %v6228_v11 = vor.u32 %v4646_v59, %v4271_v50  ;;  %vm562_vm12 = vweird.f32 %v6180_v26  ;;  %v553_v62 = vor.u32 1.1754944e-38, %v552_v47 }
  0xc5   :  { %v544_v16 = vmul.f32 %v6162_v21, %v543_v8  ;;  %v558_v22 = vsub.f32 1.0, %v557_v37  ;;  %8491 = vst [vmem:[#allocation98_spill] sm:$0xff] %v6226_v46  ;;  %v582_v8 = vmul.f32 %v6215_v31, %v6138_v63  ;;  %v526_v37 = vsel %vm6222_vm11, %v6085_v23, %v522_v25  ;;  %vm563_vm0 = vmor %vm561_vm13, %vm562_vm12 }
  0xc6   :  { %1180 = vmatpush.bf16.msra.mxu3 %v5462_v36  ;;  %8492 = vst [vmem:[#allocation99_spill] sm:$0xff] %v6228_v11  ;;  %v6230_v58 = vpop.eup %4743  ;;  %v567_v36 = vand.u32 2147483648, %v6114_v17  ;;  %v516_v25 = vsel %vm6155_vm3, %v515_v32, %v511_v40  ;;  %1043 = vmatpush.bf16.msrb.mxu2 %v6228_v11  ;;  %vm551_vm15 = vcmp.eq.f32.partialorder %v550_v41, 8.507059e+37  ;;  %v531_v42 = vsel %vm6173_vm5, %v530_v61, %v526_v37 }
  0xc7   :  { %v559_v49 = vmul.f32 %v6180_v26, %v558_v22  ;;  %v597_v43 = vmul.f32 %v6230_v58, %v6140_v28  ;;  %v545_v59 = vadd.f32 %v6162_v21, %v544_v16  ;;  %1017 = vmatpush.bf16.msra.mxu0 %v6226_v46  ;;  %v4746_v50 = vpop.eup %4745  ;;  %v583_v23 = vsub.f32 1.0, %v582_v8 }
  0xc8   :  { %1155 = vmatpush.bf16.msrb.mxu1 %v5510_v60  ;;  %v4748_v22 = vpop.eup %4747  ;;  %v568_v45 = vor.u32 1.1754944e-38, %v567_v36  ;;  %vm587_vm2 = vweird.f32 %v6215_v31  ;;  %vm586_vm3 = vweird.f32 %v6138_v63  ;;  %v590_v61 = vand.u32 2147483647, %v6138_v63 }
  0xc9   :  { %v598_v16 = vsub.f32 1.0, %v597_v43  ;;  %v560_v47 = vadd.f32 %v6180_v26, %v559_v49  ;;  %v584_v32 = vmul.f32 %v6215_v31, %v583_v23  ;;  %vm602_vm4 = vweird.f32 %v6230_v58  ;;  %vm588_vm5 = vmor %vm586_vm3, %vm587_vm2 }
  0xca   :  { %1181 = vmatpush.bf16.msra.mxu3 %v5498_v55  ;;  %vm603_vm7 = vmor %vm601_vm6, %vm602_vm4  ;;  %vm591_vm8 = vcmp.eq.f32.partialorder %v590_v61, 8.507059e+37  ;;  %v8496_v61 = vld [vmem:[#allocation11_spill] sm:$0xff] }
  0xcb   :  { %v564_v8 = vsel %vm563_vm0, %v6180_v26, %v560_v47  ;;  %v599_v36 = vmul.f32 %v6230_v58, %v598_v16  ;;  %v592_v26 = vand.u32 2147483648, %v6138_v63 }
  0xcc   :  { %1383 = vmatpush.bf16.msra.mxu1 %v5514_v0  ;;  %v549_v0 = vsel %vm548_vm14, %v6162_v21, %v545_v59  ;;  %v613_v21 = vmul.f32 %v4746_v50, %v516_v25  ;;  %v569_v49 = vsel %vm566_vm1, %v568_v45, %v564_v8  ;;  %v614_v59 = vmul.f32 %v4748_v22, %v531_v42 }
  0xcd   :  { %v554_v40 = vsel %vm551_vm15, %v553_v62, %v549_v0  ;;  %v612_v43 = vmul.f32 0.0, %v569_v49  ;;  %v585_v0 = vadd.f32 %v6215_v31, %v584_v32  ;;  %v600_v37 = vadd.f32 %v6230_v58, %v599_v36 }
  0xce   :  { %1409 = vmatpush.bf16.msrb.mxu3 %v5506_v57  ;;  %v611_v41 = vmul.f32 0.0, %v554_v40  ;;  %v605_v62 = vand.u32 2147483647, %v6140_v28  ;;  %v593_v23 = vor.u32 1.1754944e-38, %v592_v26  ;;  %v608_v22 = vor.u32 1.1754944e-38, %v607_v2  ;;  %v8495_v26 = vld [vmem:[#allocation55_spill] sm:$0xff] }
  0xcf   :  { %v6275_v17 = vadd.f32 %v614_v59, %v612_v43  ;;  %v589_v50 = vsel %vm588_vm5, %v6215_v31, %v585_v0  ;;  %v604_v63 = vsel %vm603_vm7, %v6230_v58, %v600_v37  ;;  %v8493_v59 = vld [vmem:[#allocation16_spill] sm:$0xff]  ;;  %v8494_v0 = vld [vmem:[#allocation54_spill] sm:$0xff] }
  0xd0   :  { %1384 = vmatpush.bf16.msra.mxu1 %v5530_v5  ;;  %v6269_v15 = vadd.f32 %v613_v21, %v611_v41  ;;  %v594_v16 = vsel %vm591_vm8, %v593_v23, %v589_v50  ;;  %vm606_vm9 = vcmp.eq.f32.partialorder %v605_v62, 8.507059e+37  ;;  %v8497_v37 = vld [vmem:[#allocation20_spill] sm:$0xff]  ;;  %v8498_v2 = vld [vmem:[#allocation58_spill] sm:$0xff]  ;;  %v8499_v50 = vld [vmem:[#allocation59_spill] sm:$0xff] }
  0xd1   :  { %v609_v32 = vsel %vm606_vm9, %v608_v22, %v604_v63  ;;  %v8500_v62 = vld [vmem:[#allocation14_spill] sm:$0xff]  ;;  %v8501_v23 = vld [vmem:[#allocation24_spill] sm:$0xff] }
  0xd2   :  { %1410 = vmatpush.bf16.msrb.mxu3 %v5541_v13  ;;  %4749 = vtanh.f32 %v6269_v15  ;;  %v8502_v63 = vld [vmem:[#allocation62_spill] sm:$0xff] }
  0xd3   :  { %4751 = vtanh.f32 %v6275_v17  ;;  %v8504_v22 = vld [vmem:[#allocation18_spill] sm:$0xff] }
  0xd4   :  { %1385 = vmatpush.bf16.msra.mxu1 %v5550_v19 }
  0xd6   :  { %1411 = vmatpush.bf16.msrb.mxu3 %v5553_v20 }
  0xd8   :  { %1386 = vmatpush.bf16.msra.mxu1 %v5566_v30  ;;  %v4750_v25 = vpop.eup %4749 }
  0xd9   :  { %v619_v47 = vmul.f32 %v4750_v25, %v594_v16  ;;  %v4752_v45 = vpop.eup %4751  ;;  %v8503_v25 = vld [vmem:[#allocation63_spill] sm:$0xff] }
  0xda   :  { %1412 = vmatpush.bf16.msrb.mxu3 %v5577_v39  ;;  %v620_v31 = vmul.f32 %v4752_v45, %v609_v32  ;;  %v8505_v16 = vld [vmem:[#allocation27_spill] sm:$0xff]  ;;  %v8508_v32 = vld [vmem:[#allocation22_spill] sm:$0xff] }
  0xdb   :  { %v1125_v42 = vpack.c.bf16 %v619_v47, %v619_v47  ;;  %v8507_v45 = vld [vmem:[#allocation67_spill] sm:$0xff] }
  0xdc   :  { %1387 = vmatpush.bf16.msra.mxu1 %v5586_v44  ;;  %v623_v28 = vrot.slane %v620_v31, 7  ;;  %v1126_v40 = vpack.c.bf16 %v620_v31, %v620_v31  ;;  %v8509_v31 = vld [vmem:[#allocation28_spill] sm:$0xff] }
  0xdd   :  { %v1129_v21 = vunpack.c.l.b16 %v1125_v42  ;;  %v8511_v42 = vld [vmem:[#allocation44_spill] sm:$0xff] }
  0xde   :  { %1413 = vmatpush.bf16.msrb.mxu3 %v5589_v48  ;;  %v625_v58 = vsel %vm624_vm10, %v623_v28, %v619_v47  ;;  %v1130_v8 = vunpack.c.l.b16 %v1126_v40  ;;  %v8506_v47 = vld [vmem:[#allocation66_spill] sm:$0xff]  ;;  %v8512_v40 = vld [vmem:[#allocation71_spill] sm:$0xff] }
  0xdf   :  { %v627_v41 = vpack.c.bf16 %v625_v58, %v625_v58  ;;  %v8510_v28 = vld [vmem:[#allocation42_spill] sm:$0xff]  ;;  %v8513_v58 = vld [vmem:[#allocation72_spill] sm:$0xff] }
  0xe0   :  { %1388 = vmatpush.bf16.msra.mxu1 %v5602_v54  ;;  %v1131_v36 = vrot.slane %v1130_v8, 7  ;;  %v8514_v8 = vld [vmem:[#allocation48_spill] sm:$0xff] }
  0xe1   :  { %966 = vmatmul.bf16.vlgmr.msrb.gmra.mxu0 %v627_v41  ;;  %992 = vmatmul.bf16.vlgmr.msra.gmra.mxu2 %v627_v41 }
  0xe2   :  { %1414 = vmatpush.bf16.msrb.mxu3 %v5610_v1  ;;  %1135 = vmatpush.bf16.msrb.mxu0 %v5188_v3  ;;  %v1132_v49 = vsel %vm624_vm10, %v1131_v36, %v1129_v21  ;;  %v8516_v21 = vld [vmem:[#allocation77_spill] sm:$0xff]  ;;  %v8517_v36 = vld [vmem:[#allocation79_spill] sm:$0xff] }
  0xe3   :  { %1161 = vmatpush.bf16.msra.mxu2 %v5254_v29  ;;  %v1133_v43 = vpack.c.b16 %v1132_v49, %v1132_v49  ;;  %v8518_v49 = vld [vmem:[#allocation52_spill] sm:$0xff] }
  0xe4   :  { %1389 = vmatpush.bf16.msra.mxu1 %v5622_v9 }
  0xe5   :  { %1156 = vmatmul.bf16.vlgmr.msrb.gmra.mxu1 %v1133_v43  ;;  %1182 = vmatmul.bf16.vlgmr.msra.gmra.mxu3 %v1133_v43 }
  0xe6   :  { %1415 = vmatpush.bf16.msrb.mxu3 %v5625_v12  ;;  %1136 = vmatpush.bf16.msrb.mxu0 %v5200_v7 }
  0xe7   :  { %1162 = vmatpush.bf16.msra.mxu2 %v5286_v38 }
  0xe8   :  { %1390 = vmatpush.bf16.msra.mxu1 %v5649_v35 }
  0xea   :  { %1416 = vmatpush.bf16.msrb.mxu3 %v5663_v53  ;;  %1137 = vmatpush.bf16.msrb.mxu0 %v5246_v24 }
  0xeb   :  { %1163 = vmatpush.bf16.msra.mxu2 %v5331_v51 }
  0xec   :  { %1435 = vmatpush.bf16.msrb.mxu1 %v5676_v4 }
  0xee   :  { %1461 = vmatpush.bf16.msra.mxu3 %v5678_v6  ;;  %1138 = vmatpush.bf16.msrb.mxu0 %v5274_v34 }
  0xef   :  { %1164 = vmatpush.bf16.msra.mxu2 %v8493_v59 }
  0xf0   :  { %1436 = vmatpush.bf16.msrb.mxu1 %v5705_v52  ;;  %v8533_v52 = vld [vmem:[#allocation84_spill] sm:$0xff] }
  0xf1   :  { %1018 = vmatmul.bf16.vlgmr.msra.gmra.mxu0 %v627_v41  ;;  %1044 = vmatmul.bf16.vlgmr.msrb.gmra.mxu2 %v627_v41  ;;  %v8515_v41 = vld [vmem:[#allocation49_spill] sm:$0xff] }
  0xf2   :  { %1462 = vmatpush.bf16.msra.mxu3 %v5716_v14  ;;  %1139 = vmatpush.bf16.msrb.mxu0 %v8496_v61  ;;  %v8532_v14 = vld [vmem:[#allocation80_spill] sm:$0xff] }
  0xf3   :  { %1165 = vmatpush.bf16.msra.mxu2 %v8497_v37 }
  0xf4   :  { %1437 = vmatpush.bf16.msrb.mxu1 %v8494_v0  ;;  %v8531_v0 = vld [vmem:[#allocation78_spill] sm:$0xff] }
  0xf6   :  { %1463 = vmatpush.bf16.msra.mxu3 %v8495_v26  ;;  %1140 = vmatpush.bf16.msrb.mxu0 %v8500_v62  ;;  %v8530_v26 = vld [vmem:[#allocation76_spill] sm:$0xff] }
  0xf7   :  { %1166 = vmatpush.bf16.msra.mxu2 %v8501_v23 }
  0xf8   :  { %1438 = vmatpush.bf16.msrb.mxu1 %v8498_v2  ;;  %v8529_v2 = vld [vmem:[#allocation75_spill] sm:$0xff] }
  0xfa   :  { %1464 = vmatpush.bf16.msra.mxu3 %v8499_v50  ;;  %1141 = vmatpush.bf16.msrb.mxu0 %v8504_v22  ;;  %v8526_v50 = vld [vmem:[#allocation68_spill] sm:$0xff] }
  0xfb   :  { %1167 = vmatpush.bf16.msra.mxu2 %v8505_v16 }
  0xfc   :  { %1439 = vmatpush.bf16.msrb.mxu1 %v8502_v63  ;;  %v8525_v63 = vld [vmem:[#allocation65_spill] sm:$0xff] }
  0xfe   :  { %1465 = vmatpush.bf16.msra.mxu3 %v8503_v25  ;;  %1142 = vmatpush.bf16.msrb.mxu0 %v8508_v32  ;;  %v8521_v25 = vld [vmem:[#allocation57_spill] sm:$0xff] }
  0xff   :  { %1168 = vmatpush.bf16.msra.mxu2 %v8509_v31 }
 0x100   :  { %1440 = vmatpush.bf16.msrb.mxu1 %v8506_v47  ;;  %v8520_v47 = vld [vmem:[#allocation56_spill] sm:$0xff] }
 0x101   :  { %1143 = vmatmul.bf16.vlgmr.msrb.gmra.mxu0 %v1133_v43 }
 0x102   :  { %1466 = vmatpush.bf16.msra.mxu3 %v8507_v45  ;;  %1370 = vmatpush.bf16.msra.mxu0 %v8510_v28  ;;  %v8519_v45 = vld [vmem:[#allocation53_spill] sm:$0xff] }
 0x103   :  { %1396 = vmatpush.bf16.msrb.mxu2 %v8511_v42 }
 0x104   :  { %1441 = vmatpush.bf16.msrb.mxu1 %v8512_v40  ;;  %1169 = vmatmul.bf16.vlgmr.msra.gmra.mxu2 %v1133_v43  ;;  %v8522_v40 = vld [vmem:[#allocation60_spill] sm:$0xff] }
 0x105   :  { %v8524_v43 = vld [vmem:[#allocation64_spill] sm:$0xff] }
 0x106   :  { %1467 = vmatpush.bf16.msra.mxu3 %v8513_v58  ;;  %1371 = vmatpush.bf16.msra.mxu0 %v8514_v8  ;;  %v8523_v58 = vld [vmem:[#allocation61_spill] sm:$0xff] }
 0x107   :  { %1397 = vmatpush.bf16.msrb.mxu2 %v8515_v41  ;;  %v8553_v41 = vld [vmem:[#allocation92_spill] sm:$0xff] }
 0x108   :  { %1442 = vmatpush.bf16.msrb.mxu1 %v8516_v21  ;;  %v8527_v21 = vld [vmem:[#allocation70_spill] sm:$0xff] }
 0x10a   :  { %1468 = vmatpush.bf16.msra.mxu3 %v8517_v36  ;;  %1372 = vmatpush.bf16.msra.mxu0 %v8518_v49  ;;  %v8528_v36 = vld [vmem:[#allocation74_spill] sm:$0xff]  ;;  %v8550_v49 = vld [vmem:[#allocation93_spill] sm:$0xff] }
 0x10b   :  { %1398 = vmatpush.bf16.msrb.mxu2 %v8519_v45 }
 0x10e   :  { %1373 = vmatpush.bf16.msra.mxu0 %v8520_v47 }
 0x10f   :  { %1399 = vmatpush.bf16.msrb.mxu2 %v8521_v25 }
 0x112   :  { %1374 = vmatpush.bf16.msra.mxu0 %v8522_v40  ;;  %v8542_v40 = vld [vmem:[#allocation81_spill] sm:$0xff] }
 0x113   :  { %1400 = vmatpush.bf16.msrb.mxu2 %v8523_v58 }
 0x116   :  { %1375 = vmatpush.bf16.msra.mxu0 %v8524_v43  ;;  %v8534_v43 = vld [vmem:[#allocation85_spill] sm:$0xff] }
 0x117   :  { %1401 = vmatpush.bf16.msrb.mxu2 %v8525_v63 }
 0x11a   :  { %1376 = vmatpush.bf16.msra.mxu0 %v8526_v50  ;;  %v8535_v50 = vld [vmem:[#allocation88_spill] sm:$0xff] }
 0x11b   :  { %1402 = vmatpush.bf16.msrb.mxu2 %v8527_v21  ;;  %v8536_v21 = vld [vmem:[#allocation89_spill] sm:$0xff] }
 0x11e   :  { %1377 = vmatpush.bf16.msra.mxu0 %v8528_v36  ;;  %v8537_v36 = vld [vmem:[#allocation90_spill] sm:$0xff] }
 0x11f   :  { %1403 = vmatpush.bf16.msrb.mxu2 %v8529_v2  ;;  %v8538_v2 = vld [vmem:[#allocation91_spill] sm:$0xff] }
 0x122   :  { %1422 = vmatpush.bf16.msrb.mxu0 %v8530_v26 }
 0x123   :  { %1448 = vmatpush.bf16.msra.mxu2 %v8531_v0 }
 0x124   :  { %v980_v63 = vpop.f32.mrf.mxu1 }
 0x126   :  { %1423 = vmatpush.bf16.msrb.mxu0 %v8532_v14  ;;  %v8541_v14 = vld [vmem:[#allocation83_spill] sm:$0xff] }
 0x127   :  { %1449 = vmatpush.bf16.msra.mxu2 %v5999_v10 }
 0x12a   :  { %1424 = vmatpush.bf16.msrb.mxu0 %v8533_v52  ;;  %v1006_v26 = vpop.f32.mrf.mxu3 }
 0x12b   :  { %1450 = vmatpush.bf16.msra.mxu2 %v8534_v43 }
 0x12c   :  { %v982_v58 = vpop.f32.mrf.mxu1 }
 0x12d   :  { %v258_v58 = vld [vmem:[%s8162_s5] sm:$0xf] }
 0x12e   :  { %1425 = vmatpush.bf16.msrb.mxu0 %v8535_v50 }
 0x12f   :  { %1451 = vmatpush.bf16.msra.mxu2 %v8536_v21 }
 0x132   :  { %1426 = vmatpush.bf16.msrb.mxu0 %v8537_v36  ;;  %v1008_v43 = vpop.f32.mrf.mxu3 }
 0x133   :  { %1452 = vmatpush.bf16.msra.mxu2 %v8538_v2  ;;  %v6374_v43 = vperm.slane %v258_v58, 1 }
 0x134   :  { %v1032_v52 = vpop.f32.mrf.mxu1 }
 0x135   :  { %8540 = vst [vmem:[#allocation101_spill] sm:$0xff] %v6374_v43 }
 0x136   :  { %1427 = vmatpush.bf16.msrb.mxu0 %v6123_v33  ;;  %v6371_v33 = vperm.slane %v258_v58, 0 }
 0x137   :  { %1453 = vmatpush.bf16.msra.mxu2 %v6130_v18 }
 0x138   :  { %8539 = vst [vmem:[#allocation100_spill] sm:$0xff] %v6371_v33 }
 0x13a   :  { %1428 = vmatpush.bf16.msrb.mxu0 %v6160_v56 }
 0x13b   :  { %1454 = vmatpush.bf16.msra.mxu2 %v6169_v27  ;;  %v6366_v21 = vpop.f32.mrf.mxu3 }
 0x13c   :  { %v1034_v36 = vpop.f32.mrf.mxu1 }
 0x13e   :  { %1429 = vmatpush.bf16.msrb.mxu0 %v6226_v46 }
 0x13f   :  { %1455 = vmatpush.bf16.msra.mxu2 %v6228_v11 }
 0x143   :  { %v1060_v2 = vpop.f32.mrf.mxu3 }
 0x15e   :  { %v967_v18 = vpop.f32.mrf.mxu0 }
 0x15f   :  { %v968_v56 = vadd.f32 %v967_v18, %v6371_v33 }
 0x161   :  { %v981_v27 = vadd.f32 %v980_v63, %v968_v56 }
 0x162   :  { %v1157_v50 = vpop.f32.mrf.mxu1 }
 0x163   :  { %v4515_v46 = vmul.f32 -1.442695, %v981_v27  ;;  %v1192_v10 = vrot.slane %v1157_v50, 7  ;;  %v1208_v36 = vadd.f32 %v1157_v50, %v8541_v14  ;;  %v8543_v27 = vld [vmem:[#allocation87_spill] sm:$0xff] }
 0x164   :  { %v993_v11 = vpop.f32.mrf.mxu2 }
 0x165   :  { %4753 = vpow2.f32 %v4515_v46  ;;  %v994_v2 = vadd.f32 %v993_v11, %v6374_v43  ;;  %v1204_v6 = vadd.f32 %v1192_v10, %v8542_v40  ;;  %v4521_v35 = vmul.f32 -1.442695, %v1208_v36  ;;  %v8545_v36 = vld [vmem:[#allocation86_spill] sm:$0xff] }
 0x166   :  { %v969_v0 = vpop.f32.mrf.mxu0  ;;  %v6380_v46 = vperm.slane %v258_v58, 2 }
 0x167   :  { %v1007_v4 = vadd.f32 %v1006_v26, %v994_v2  ;;  %v4520_v63 = vmul.f32 -1.442695, %v1204_v6 }
 0x168   :  { %v1183_v53 = vpop.f32.mrf.mxu3  ;;  %8544 = vst [vmem:[#allocation102_spill] sm:$0xff] %v6380_v46 }
 0x169   :  { %v4516_v25 = vmul.f32 -1.442695, %v1007_v4  ;;  %v1210_v47 = vadd.f32 %v1183_v53, %v8543_v27  ;;  %v1194_v11 = vrot.slane %v1183_v53, 7 }
 0x16a   :  { %v1159_v18 = vpop.f32.mrf.mxu1 }
 0x16b   :  { %v4754_v56 = vpop.eup %4753  ;;  %4755 = vpow2.f32 %v4516_v25  ;;  %v4523_v10 = vmul.f32 -1.442695, %v1210_v47  ;;  %v1206_v2 = vadd.f32 %v1194_v11, %v8545_v36  ;;  %v6386_v47 = vperm.slane %v258_v58, 3 }
 0x16c   :  { %v1065_v33 = vadd.f32 1.0, %v4754_v56  ;;  %v995_v12 = vpop.f32.mrf.mxu2  ;;  %4757 = vpow2.f32 %v4521_v35 }
 0x16d   :  { %v4522_v14 = vmul.f32 -1.442695, %v1206_v2  ;;  %8546 = vst [vmem:[#allocation103_spill] sm:$0xff] %v6386_v47 }
 0x16e   :  { %4759 = vrcp.f32 %v1065_v33  ;;  %v1019_v0 = vpop.f32.mrf.mxu0  ;;  %v1077_v11 = vand.u32 2147483648, %v1065_v33  ;;  %vm1071_vm12 = vweird.f32 %v1065_v33 }
 0x16f   :  { %4761 = vpow2.f32 %v4520_v63  ;;  %v1020_v4 = vadd.f32 %v1019_v0, %v6380_v46  ;;  %v1075_v0 = vand.u32 2147483647, %v1065_v33 }
 0x170   :  { %v1185_v26 = vpop.f32.mrf.mxu3  ;;  %4763 = vpow2.f32 %v4523_v10 }
 0x171   :  { %v4756_v50 = vpop.eup %4755  ;;  %v1033_v27 = vadd.f32 %v1032_v52, %v1020_v4  ;;  %vm1076_vm14 = vcmp.eq.f32.partialorder %v1075_v0, 8.507059e+37  ;;  %v8547_v0 = vld [vmem:[#allocation73_spill] sm:$0xff] }
 0x172   :  { %v4758_v6 = vpop.eup %4757  ;;  %v1084_v25 = vadd.f32 1.0, %v4756_v50 }
 0x173   :  { %v6384_v63 = vadd.f32 1.0, %v4758_v6  ;;  %v1078_v6 = vor.u32 1.1754944e-38, %v1077_v11 }
 0x174   :  { %v4760_v18 = vpop.eup %4759  ;;  %v1045_v56 = vpop.f32.mrf.mxu2  ;;  %4765 = vrcp.f32 %v1084_v25  ;;  %v1096_v36 = vand.u32 2147483648, %v1084_v25  ;;  %vm1090_vm0 = vweird.f32 %v1084_v25 }
 0x175   :  { %v4762_v12 = vpop.eup %4761  ;;  %v1067_v35 = vmul.f32 %v4760_v18, %v1065_v33  ;;  %4767 = vtanh.f32 %v1033_v27  ;;  %vm1072_vm11 = vweird.f32 %v4760_v18  ;;  %v1046_v52 = vadd.f32 %v1045_v56, %v6386_v47 }
 0x176   :  { %v1021_v53 = vpop.f32.mrf.mxu0  ;;  %v6388_v26 = vadd.f32 1.0, %v4762_v12  ;;  %v4764_v50 = vpop.eup %4763  ;;  %4769 = vpow2.f32 %v4522_v14  ;;  %vm1073_vm13 = vmor %vm1071_vm12, %vm1072_vm11  ;;  %v1094_v56 = vand.u32 2147483647, %v1084_v25  ;;  %vm1277_vm5 = vweird.f32 %v6384_v63 }
 0x177   :  { %v1068_v40 = vsub.f32 1.0, %v1067_v35  ;;  %4771 = vrcp.f32 %v6384_v63  ;;  %v6393_v27 = vadd.f32 1.0, %v4764_v50 }
 0x178   :  { %4773 = vrcp.f32 %v6388_v26  ;;  %vm1095_vm2 = vcmp.eq.f32.partialorder %v1094_v56, 8.507059e+37  ;;  %vm1262_vm6 = vweird.f32 %v6388_v26 }
 0x179   :  { %v1069_v10 = vmul.f32 %v4760_v18, %v1068_v40  ;;  %v1059_v40 = vadd.f32 %v6366_v21, %v1046_v52  ;;  %v8548_v21 = vld [vmem:[#allocation69_spill] sm:$0xff] }
 0x17a   :  { %v4766_v46 = vpop.eup %4765 }
 0x17b   :  { %v1086_v4 = vmul.f32 %v4766_v46, %v1084_v25  ;;  %v1070_v2 = vadd.f32 %v4760_v18, %v1069_v10  ;;  %v4768_v53 = vpop.eup %4767  ;;  %vm1091_vm15 = vweird.f32 %v4766_v46  ;;  %v4517_v33 = vmul.f32 -1.442695, %v1059_v40 }
 0x17c   :  { %v1047_v58 = vpop.f32.mrf.mxu2  ;;  %v4770_v47 = vpop.eup %4769  ;;  %vm1092_vm1 = vmor %vm1090_vm0, %vm1091_vm15 }
 0x17d   :  { %v1087_v12 = vsub.f32 1.0, %v1086_v4  ;;  %v1074_v14 = vsel %vm1073_vm13, %v4760_v18, %v1070_v2  ;;  %v6396_v45 = vpop.eup %4771  ;;  %4775 = vpow2.f32 %v4517_v33  ;;  %v1097_v4 = vor.u32 1.1754944e-38, %v1096_v36 }
 0x17e   :  { %v1144_v35 = vpop.f32.mrf.mxu0  ;;  %v1079_v43 = vsel %vm1076_vm14, %v1078_v6, %v1074_v14  ;;  %v6399_v50 = vpop.eup %4773  ;;  %v6402_v2 = vadd.f32 1.0, %v4770_v47  ;;  %4777 = vrcp.f32 %v6393_v27  ;;  %vm1278_vm3 = vweird.f32 %v6396_v45 }
 0x17f   :  { %v1088_v9 = vmul.f32 %v4766_v46, %v1087_v12  ;;  %v1121_v10 = vmul.f32 %v4768_v53, %v1079_v43  ;;  %v1191_v58 = vrot.slane %v1144_v35, 7  ;;  %v1207_v11 = vadd.f32 %v1144_v35, %v8547_v0  ;;  %vm6448_vm7 = vmor %vm1277_vm5, %vm1278_vm3 }
 0x180   :  { %v1258_v40 = vmul.f32 %v6399_v50, %v6388_v26  ;;  %vm1263_vm4 = vweird.f32 %v6399_v50 }
 0x181   :  { %v1089_v18 = vadd.f32 %v4766_v46, %v1088_v9  ;;  %v1203_v52 = vadd.f32 %v1191_v58, %v8548_v21  ;;  %v4519_v43 = vmul.f32 -1.442695, %v1207_v11  ;;  %v1273_v9 = vmul.f32 %v6396_v45, %v6384_v63  ;;  %vm6458_vm9 = vmor %vm1262_vm6, %vm1263_vm4 }
 0x182   :  { %v1259_v56 = vsub.f32 1.0, %v1258_v40 }
 0x183   :  { %v1093_v6 = vsel %vm1092_vm1, %v4766_v46, %v1089_v18  ;;  %v4518_v12 = vmul.f32 -1.442695, %v1203_v52  ;;  %4779 = vpow2.f32 %v4519_v43  ;;  %v4776_v35 = vpop.eup %4775  ;;  %v1274_v33 = vsub.f32 1.0, %v1273_v9 }
 0x184   :  { %v1098_v25 = vsel %vm1095_vm2, %v1097_v4, %v1093_v6  ;;  %v6413_v46 = vpop.eup %4777  ;;  %v6415_v58 = vadd.f32 1.0, %v4776_v35 }
 0x185   :  { %v1120_v36 = vmul.f32 0.0, %v1098_v25  ;;  %4781 = vpow2.f32 %v4518_v12  ;;  %v1313_v52 = vmul.f32 %v6413_v46, %v6393_v27  ;;  %v1275_v12 = vmul.f32 %v6396_v45, %v1274_v33 }
 0x186   :  { %v1146_v47 = vpop.f32.mrf.mxu0  ;;  %4783 = vrcp.f32 %v6402_v2  ;;  %v1283_v25 = vand.u32 2147483648, %v6384_v63  ;;  %vm1110_vm13 = vweird.f32 %v6415_v58 }
 0x187   :  { %v1170_v14 = vpop.f32.mrf.mxu2  ;;  %v6411_v53 = vadd.f32 %v1121_v10, %v1120_v36  ;;  %4785 = vrcp.f32 %v6415_v58  ;;  %v1260_v10 = vmul.f32 %v6399_v50, %v1259_v56  ;;  %v1268_v47 = vand.u32 2147483648, %v6388_v26 }
 0x188   :  { %v1193_v35 = vrot.slane %v1170_v14, 7  ;;  %v1314_v33 = vsub.f32 1.0, %v1313_v52  ;;  %v1276_v36 = vadd.f32 %v6396_v45, %v1275_v12  ;;  %v1284_v0 = vor.u32 1.1754944e-38, %v1283_v25 }
 0x189   :  { %8549 = vst [vmem:[#allocation104_spill] sm:$0xff] %v6411_v53  ;;  %v4780_v11 = vpop.eup %4779  ;;  %v1261_v9 = vadd.f32 %v6399_v50, %v1260_v10  ;;  %v1209_v1 = vadd.f32 %v1170_v14, %v8550_v49  ;;  %v1269_v54 = vor.u32 1.1754944e-38, %v1268_v47  ;;  %v1114_v10 = vand.u32 2147483647, %v6415_v58 }
 0x18a   :  { %v6420_v4 = vadd.f32 1.0, %v4780_v11  ;;  %v1281_v11 = vand.u32 2147483647, %v6384_v63  ;;  %v1205_v8 = vadd.f32 %v1193_v35, %v8553_v41  ;;  %v1315_v25 = vmul.f32 %v6413_v46, %v1314_v33 }
 0x18b   :  { %v4782_v18 = vpop.eup %4781  ;;  %v1116_v49 = vand.u32 2147483648, %v6415_v58  ;;  %v1265_v48 = vsel %vm6458_vm9, %v6399_v50, %v1261_v9  ;;  %vm6479_vm14 = vcmp.eq.f32.partialorder %v1114_v10, 8.507059e+37  ;;  %vm1318_vm9 = vweird.f32 %v6413_v46 }
 0x18c   :  { %v6422_v6 = vpop.eup %4783  ;;  %v6426_v40 = vadd.f32 1.0, %v4782_v18  ;;  %4787 = vrcp.f32 %v6420_v4  ;;  %v1266_v18 = vand.u32 2147483647, %v6388_v26  ;;  %vm6453_vm8 = vcmp.eq.f32.partialorder %v1281_v11, 8.507059e+37 }
 0x18d   :  { %v6438_v56 = vmul.f32 %v6422_v6, %v6402_v2  ;;  %v1245_v50 = vand.u32 2147483648, %v6420_v4  ;;  %v1117_v26 = vor.u32 1.1754944e-38, %v1116_v49  ;;  %vm1239_vm2 = vweird.f32 %v6420_v4 }
 0x18e   :  { %4789 = vrcp.f32 %v6426_v40  ;;  %vm6465_vm11 = vcmp.eq.f32.partialorder %v1266_v18, 8.507059e+37  ;;  %vm1224_vm3 = vweird.f32 %v6426_v40  ;;  %v1316_v35 = vadd.f32 %v6413_v46, %v1315_v25 }
 0x18f   :  { %v1172_v43 = vpop.f32.mrf.mxu2  ;;  %v1299_v14 = vsub.f32 1.0, %v6438_v56  ;;  %4791 = vtanh.f32 %v6411_v53  ;;  %v1280_v56 = vsel %vm6448_vm7, %v6396_v45, %v1276_v36  ;;  %v1230_v45 = vand.u32 2147483648, %v6426_v40 }
 0x190   :  { %v4786_v43 = vpop.eup %4785  ;;  %4793 = vtanh.f32 %v1209_v1  ;;  %v1243_v1 = vand.u32 2147483647, %v6420_v4  ;;  %v1306_v25 = vand.u32 2147483647, %v6402_v2 }
 0x191   :  { %v1106_v21 = vmul.f32 %v4786_v43, %v6415_v58  ;;  %vm1111_vm12 = vweird.f32 %v4786_v43  ;;  %4795 = vtanh.f32 %v1205_v8  ;;  %v1228_v8 = vand.u32 2147483647, %v6426_v40 }
 0x192   :  { %v4788_v12 = vpop.eup %4787  ;;  %vm1112_vm0 = vmor %vm1110_vm13, %vm1111_vm12  ;;  %vm1244_vm6 = vcmp.eq.f32.partialorder %v1243_v1, 8.507059e+37  ;;  %vm1302_vm12 = vweird.f32 %v6402_v2 }
 0x193   :  { %v1107_v47 = vsub.f32 1.0, %v1106_v21  ;;  %v1235_v41 = vmul.f32 %v4788_v12, %v6420_v4  ;;  %vm1240_vm15 = vweird.f32 %v4788_v12  ;;  %vm1229_vm7 = vcmp.eq.f32.partialorder %v1228_v8, 8.507059e+37 }
 0x194   :  { %v4790_v11 = vpop.eup %4789  ;;  %vm1241_vm4 = vmor %vm1239_vm2, %vm1240_vm15 }
 0x195   :  { %v1108_v21 = vmul.f32 %v4786_v43, %v1107_v47  ;;  %v1220_v33 = vmul.f32 %v4790_v11, %v6426_v40  ;;  %v1236_v18 = vsub.f32 1.0, %v1235_v41  ;;  %vm1225_vm1 = vweird.f32 %v4790_v11  ;;  %v4792_v58 = vpop.eup %4791 }
 0x196   :  { %v1285_v47 = vsel %vm6453_vm8, %v1284_v0, %v1280_v56  ;;  %vm1226_vm5 = vmor %vm1224_vm3, %vm1225_vm1  ;;  %v1270_v0 = vsel %vm6465_vm11, %v1269_v54, %v1265_v48  ;;  %v1300_v56 = vmul.f32 %v6422_v6, %v1299_v14  ;;  %vm1317_vm8 = vweird.f32 %v6393_v27 }
 0x197   :  { %v1221_v44 = vsub.f32 1.0, %v1220_v33  ;;  %v1109_v9 = vadd.f32 %v4786_v43, %v1108_v21  ;;  %v1237_v36 = vmul.f32 %v4788_v12, %v1236_v18  ;;  %v4794_v21 = vpop.eup %4793  ;;  %v1321_v48 = vand.u32 2147483647, %v6393_v27  ;;  %vm1319_vm13 = vmor %vm1317_vm8, %vm1318_vm9 }
 0x198   :  { %v4796_v42 = vpop.eup %4795  ;;  %vm1303_vm11 = vweird.f32 %v6422_v6  ;;  %vm1346_vm1 = vcmask 1042434  }
 0x199   :  { %v1222_v52 = vmul.f32 %v4790_v11, %v1221_v44  ;;  %v1113_v41 = vsel %vm1112_vm0, %v4786_v43, %v1109_v9  ;;  %v1238_v10 = vadd.f32 %v4788_v12, %v1237_v36  ;;  %v1246_v44 = vor.u32 1.1754944e-38, %v1245_v50 }
 0x19a   :  { %v1118_v49 = vsel %vm6479_vm14, %v1117_v26, %v1113_v41  ;;  %v1231_v43 = vor.u32 1.1754944e-38, %v1230_v45  ;;  %v8562_v26 = vrot.slane %v6275_v17, 7  ;;  %vm6520_vm14 = vmor %vm1302_vm12, %vm1303_vm11  ;;  %vm1322_vm15 = vcmp.eq.f32.partialorder %v1321_v48, 8.507059e+37 }
 0x19b   :  { %v1223_v33 = vadd.f32 %v4790_v11, %v1222_v52  ;;  %v1124_v18 = vmul.f32 %v4792_v58, %v1118_v49  ;;  %v1242_v9 = vsel %vm1241_vm4, %v4788_v12, %v1238_v10  ;;  %v8563_v52 = vrot.slane %v6269_v15, 7  ;;  %v8577_v58 = vld [vmem:[#allocation21_spill] sm:$0xff] }
 0x19c   :  { %v1247_v53 = vsel %vm1244_vm6, %v1246_v44, %v1242_v9  ;;  %v1334_v50 = vmul.f32 %v8562_v26, %v1285_v47  ;;  %v1323_v15 = vand.u32 2147483648, %v6393_v27  ;;  %v1320_v10 = vsel %vm1319_vm13, %v6413_v46, %v1316_v35  ;;  %v8566_v44 = vld [vmem:[#allocation6_spill] sm:$0xff]  ;;  %v8567_v27 = vld [vmem:[#allocation5_spill] sm:$0xff] }
 0x19d   :  { %v1227_v4 = vsel %vm1226_vm5, %v4790_v11, %v1223_v33  ;;  %v1350_v63 = vrot.slane %v1124_v18, 7  ;;  %v1336_v36 = vmul.f32 %v4794_v21, %v1247_v53  ;;  %v1333_v41 = vmul.f32 %v8563_v52, %v1270_v0  ;;  %v8568_v53 = vld [vmem:[#allocation9_spill] sm:$0xff]  ;;  %v8571_v52 = vld [vmem:[#allocation10_spill] sm:$0xff] }
 0x19e   :  { %v1232_v40 = vsel %vm1229_vm7, %v1231_v43, %v1227_v4  ;;  %v1301_v11 = vadd.f32 %v6422_v6, %v1300_v56  ;;  %v1324_v49 = vor.u32 1.1754944e-38, %v1323_v15  ;;  %vm1307_vm0 = vcmp.eq.f32.partialorder %v1306_v25, 8.507059e+37  ;;  %v8573_v15 = vld [vmem:[#allocation13_spill] sm:$0xff]  ;;  %v8576_v25 = vld [vmem:[#allocation23_spill] sm:$0xff] }
 0x19f   :  { %v1335_v45 = vmul.f32 %v4796_v42, %v1232_v40  ;;  %v1353_v12 = vpack.c.bf16 %v1350_v63, %v1350_v63  ;;  %v6504_v54 = vadd.f32 %v1336_v36, %v1334_v50  ;;  %v1308_v42 = vand.u32 2147483648, %v6402_v2  ;;  %v8570_v36 = vld [vmem:[#allocation12_spill] sm:$0xff] }
 0x1a0   :  { %v1305_v21 = vsel %vm6520_vm14, %v6422_v6, %v1301_v11  ;;  %v1325_v18 = vsel %vm1322_vm15, %v1324_v49, %v1320_v10  ;;  %v8569_v6 = vld [vmem:[#allocation7_spill] sm:$0xff]  ;;  %v8578_v10 = vld [vmem:[#allocation26_spill] sm:$0xff]  ;;  %v8579_v49 = vld [vmem:[#allocation25_spill] sm:$0xff] }
 0x1a1   :  { %v6508_v14 = vadd.f32 %v1335_v45, %v1333_v41  ;;  %v1364_v17 = vshll.u32 %v1353_v12, 16  ;;  %4797 = vtanh.f32 %v6504_v54  ;;  %v1362_v1 = vshrl.u32 %v1353_v12, 16  ;;  %v8572_v11 = vld [vmem:[#allocation15_spill] sm:$0xff] }
 0x1a2   :  { %v1309_v33 = vor.u32 1.1754944e-38, %v1308_v42 }
 0x1a3   :  { %4799 = vtanh.f32 %v6508_v14  ;;  %v1366_v8 = vrot.slane %v1364_v17, 1 }
 0x1a4   :  { %v1310_v9 = vsel %vm1307_vm0, %v1309_v33, %v1305_v21  ;;  %v8580_v21 = vld [vmem:[#allocation29_spill] sm:$0xff]  ;;  %v8581_v33 = vld [vmem:[#allocation44_spill] sm:$0xff] }
 0x1a5   :  { %v1367_v47 = vor.u32 %v1366_v8, %v1362_v1  ;;  %v8574_v1 = vld [vmem:[#allocation19_spill] sm:$0xff]  ;;  %v8575_v8 = vld [vmem:[#allocation17_spill] sm:$0xff] }
 0x1a7   :  { %1391 = vmatmul.bf16.vlgmr.msra.gmra.mxu1 %v1367_v47  ;;  %1417 = vmatmul.bf16.vlgmr.msrb.gmra.mxu3 %v1367_v47  ;;  %v4798_v2 = vpop.eup %4797 }
 0x1a8   :  { %1560 = vmatpush.bf16.msra.mxu1 %v8566_v44  ;;  %1586 = vmatpush.bf16.msrb.mxu3 %v8567_v27  ;;  %v1342_v46 = vmul.f32 %v4798_v2, %v1325_v18  ;;  %v8582_v2 = vld [vmem:[#allocation36_spill] sm:$0xff]  ;;  %v8583_v18 = vld [vmem:[#allocation37_spill] sm:$0xff] }
 0x1a9   :  { %v4800_v43 = vpop.eup %4799 }
 0x1aa   :  { %v1341_v0 = vmul.f32 %v4800_v43, %v1310_v9  ;;  %v1345_v4 = vrot.slane %v1342_v46, 7  ;;  %v1538_v56 = vpack.c.bf16 %v1342_v46, %v1342_v46  ;;  %v8584_v43 = vld [vmem:[#allocation48_spill] sm:$0xff]  ;;  %v8585_v9 = vld [vmem:[#allocation49_spill] sm:$0xff]  ;;  %v8586_v46 = vld [vmem:[#allocation38_spill] sm:$0xff] }
 0x1ac   :  { %1561 = vmatpush.bf16.msra.mxu1 %v8568_v53  ;;  %1587 = vmatpush.bf16.msrb.mxu3 %v8569_v6  ;;  %v1537_v63 = vpack.c.bf16 %v1341_v0, %v1341_v0  ;;  %v1347_v40 = vsel %vm1346_vm1, %v1345_v4, %v1341_v0  ;;  %v1542_v45 = vunpack.c.l.b16 %v1538_v56  ;;  %v8587_v0 = vld [vmem:[#allocation39_spill] sm:$0xff]  ;;  %v8588_v4 = vld [vmem:[#allocation52_spill] sm:$0xff] }
 0x1ad   :  { %v1352_v26 = vpack.c.bf16 %v1347_v40, %v1347_v40  ;;  %v8590_v56 = vld [vmem:[#allocation40_spill] sm:$0xff]  ;;  %v8591_v40 = vld [vmem:[#allocation41_spill] sm:$0xff] }
 0x1ae   :  { %v1541_v50 = vunpack.c.l.b16 %v1537_v63  ;;  %v8589_v63 = vld [vmem:[#allocation53_spill] sm:$0xff] }
 0x1af   :  { %v1357_v41 = vshll.u32 %v1352_v26, 16  ;;  %v1355_v48 = vshrl.u32 %v1352_v26, 16  ;;  %v8592_v26 = vld [vmem:[#allocation56_spill] sm:$0xff] }
 0x1b0   :  { %1562 = vmatpush.bf16.msra.mxu1 %v8570_v36  ;;  %1588 = vmatpush.bf16.msrb.mxu3 %v8571_v52  ;;  %v1543_v12 = vrot.slane %v1541_v50, 1  ;;  %v8593_v50 = vld [vmem:[#allocation57_spill] sm:$0xff] }
 0x1b1   :  { %v1359_v35 = vrot.slane %v1357_v41, 1  ;;  %v8594_v41 = vld [vmem:[#allocation43_spill] sm:$0xff] }
 0x1b2   :  { %v1544_v17 = vsel %vm624_vm10, %v1542_v45, %v1543_v12  ;;  %v8595_v45 = vld [vmem:[#allocation45_spill] sm:$0xff]  ;;  %v8596_v12 = vld [vmem:[#allocation46_spill] sm:$0xff] }
 0x1b3   :  { %v1360_v42 = vor.u32 %v1359_v35, %v1355_v48  ;;  %v8597_v48 = vld [vmem:[#allocation47_spill] sm:$0xff]  ;;  %v8598_v35 = vld [vmem:[#allocation60_spill] sm:$0xff] }
 0x1b4   :  { %1563 = vmatpush.bf16.msra.mxu1 %v8572_v11  ;;  %1589 = vmatpush.bf16.msrb.mxu3 %v8573_v15 }
 0x1b5   :  { %1378 = vmatmul.bf16.vlgmr.msra.gmra.mxu0 %v1360_v42  ;;  %1404 = vmatmul.bf16.vlgmr.msrb.gmra.mxu2 %v1360_v42 }
 0x1b6   :  { %1547 = vmatpush.bf16.msra.mxu0 %v5188_v3  ;;  %1573 = vmatpush.bf16.msrb.mxu2 %v5254_v29 }
 0x1b7   :  { %1443 = vmatmul.bf16.vlgmr.msrb.gmra.mxu1 %v1367_v47  ;;  %1469 = vmatmul.bf16.vlgmr.msra.gmra.mxu3 %v1367_v47  ;;  %v1545_v47 = vpack.c.b16 %v1544_v17, %v1544_v17  ;;  %v8599_v17 = vld [vmem:[#allocation61_spill] sm:$0xff] }
 0x1b8   :  { %1564 = vmatpush.bf16.msra.mxu1 %v8574_v1  ;;  %1590 = vmatpush.bf16.msrb.mxu3 %v8575_v8 }
 0x1ba   :  { %1548 = vmatpush.bf16.msra.mxu0 %v5200_v7  ;;  %1574 = vmatpush.bf16.msrb.mxu2 %v5286_v38 }
 0x1bc   :  { %1565 = vmatpush.bf16.msra.mxu1 %v8576_v25  ;;  %1591 = vmatpush.bf16.msrb.mxu3 %v8577_v58 }
 0x1be   :  { %1549 = vmatpush.bf16.msra.mxu0 %v5246_v24  ;;  %1575 = vmatpush.bf16.msrb.mxu2 %v5331_v51 }
 0x1c0   :  { %1566 = vmatpush.bf16.msra.mxu1 %v8578_v10  ;;  %1592 = vmatpush.bf16.msrb.mxu3 %v8579_v49 }
 0x1c2   :  { %1550 = vmatpush.bf16.msra.mxu0 %v5274_v34  ;;  %1576 = vmatpush.bf16.msrb.mxu2 %v8493_v59 }
 0x1c4   :  { %1567 = vmatpush.bf16.msra.mxu1 %v5510_v60  ;;  %1593 = vmatpush.bf16.msrb.mxu3 %v5498_v55 }
 0x1c5   :  { %1430 = vmatmul.bf16.vlgmr.msrb.gmra.mxu0 %v1360_v42  ;;  %1456 = vmatmul.bf16.vlgmr.msra.gmra.mxu2 %v1360_v42  ;;  %v8600_v42 = vld [vmem:[#allocation50_spill] sm:$0xff] }
 0x1c6   :  { %1551 = vmatpush.bf16.msra.mxu0 %v8496_v61  ;;  %1577 = vmatpush.bf16.msrb.mxu2 %v8497_v37 }
 0x1c7   :  { %1568 = vmatmul.bf16.vlgmr.msra.gmra.mxu1 %v1545_v47  ;;  %1594 = vmatmul.bf16.vlgmr.msrb.gmra.mxu3 %v1545_v47 }
 0x1c8   :  { %1789 = vmatpush.bf16.msrb.mxu1 %v8580_v21  ;;  %1815 = vmatpush.bf16.msra.mxu3 %v5506_v57 }
 0x1ca   :  { %1552 = vmatpush.bf16.msra.mxu0 %v8500_v62  ;;  %1578 = vmatpush.bf16.msrb.mxu2 %v8501_v23 }
 0x1cc   :  { %1790 = vmatpush.bf16.msrb.mxu1 %v5530_v5  ;;  %1816 = vmatpush.bf16.msra.mxu3 %v5541_v13 }
 0x1ce   :  { %1553 = vmatpush.bf16.msra.mxu0 %v8504_v22  ;;  %1579 = vmatpush.bf16.msrb.mxu2 %v8505_v16  ;;  %v8643_v22 = vld [vmem:[#allocation102_spill] sm:$0xff] }
 0x1d0   :  { %1791 = vmatpush.bf16.msrb.mxu1 %v5550_v19  ;;  %1817 = vmatpush.bf16.msra.mxu3 %v5553_v20  ;;  %v8653_v20 = vld [vmem:[#allocation93_spill] sm:$0xff] }
 0x1d2   :  { %1554 = vmatpush.bf16.msra.mxu0 %v8508_v32  ;;  %1580 = vmatpush.bf16.msrb.mxu2 %v8509_v31 }
 0x1d4   :  { %1792 = vmatpush.bf16.msrb.mxu1 %v5566_v30  ;;  %1818 = vmatpush.bf16.msra.mxu3 %v5577_v39 }
 0x1d5   :  { %1555 = vmatmul.bf16.vlgmr.msra.gmra.mxu0 %v1545_v47  ;;  %1581 = vmatmul.bf16.vlgmr.msrb.gmra.mxu2 %v1545_v47  ;;  %v8601_v47 = vld [vmem:[#allocation51_spill] sm:$0xff] }
 0x1d6   :  { %1776 = vmatpush.bf16.msrb.mxu0 %v8510_v28  ;;  %1802 = vmatpush.bf16.msra.mxu2 %v8581_v33 }
 0x1d8   :  { %1793 = vmatpush.bf16.msrb.mxu1 %v8582_v2  ;;  %1819 = vmatpush.bf16.msra.mxu3 %v8583_v18 }
 0x1da   :  { %1777 = vmatpush.bf16.msrb.mxu0 %v8584_v43  ;;  %1803 = vmatpush.bf16.msra.mxu2 %v8585_v9  ;;  %v8636_v43 = vld [vmem:[#allocation100_spill] sm:$0xff] }
 0x1dc   :  { %1794 = vmatpush.bf16.msrb.mxu1 %v8586_v46  ;;  %1820 = vmatpush.bf16.msra.mxu3 %v8587_v0 }
 0x1de   :  { %1778 = vmatpush.bf16.msrb.mxu0 %v8588_v4  ;;  %1804 = vmatpush.bf16.msra.mxu2 %v8589_v63  ;;  %v8602_v63 = vld [vmem:[#allocation64_spill] sm:$0xff]  ;;  %v8605_v4 = vld [vmem:[#allocation55_spill] sm:$0xff] }
 0x1e0   :  { %1795 = vmatpush.bf16.msrb.mxu1 %v8590_v56  ;;  %1821 = vmatpush.bf16.msra.mxu3 %v8591_v40 }
 0x1e2   :  { %1779 = vmatpush.bf16.msrb.mxu0 %v8592_v26  ;;  %1805 = vmatpush.bf16.msra.mxu2 %v8593_v50  ;;  %v8603_v26 = vld [vmem:[#allocation65_spill] sm:$0xff]  ;;  %v8604_v50 = vld [vmem:[#allocation54_spill] sm:$0xff] }
 0x1e4   :  { %1796 = vmatpush.bf16.msrb.mxu1 %v8594_v41  ;;  %1822 = vmatpush.bf16.msra.mxu3 %v8595_v45  ;;  %v8606_v45 = vld [vmem:[#allocation68_spill] sm:$0xff] }
 0x1e6   :  { %1780 = vmatpush.bf16.msrb.mxu0 %v8598_v35  ;;  %1806 = vmatpush.bf16.msra.mxu2 %v8599_v17  ;;  %v8609_v35 = vld [vmem:[#allocation59_spill] sm:$0xff]  ;;  %v8610_v17 = vld [vmem:[#allocation74_spill] sm:$0xff] }
 0x1e8   :  { %1841 = vmatpush.bf16.msra.mxu1 %v8596_v12  ;;  %1867 = vmatpush.bf16.msrb.mxu3 %v8597_v48  ;;  %v8607_v12 = vld [vmem:[#allocation70_spill] sm:$0xff] }
 0x1e9   :  { %v8608_v48 = vld [vmem:[#allocation58_spill] sm:$0xff] }
 0x1ea   :  { %1781 = vmatpush.bf16.msrb.mxu0 %v8602_v63  ;;  %1807 = vmatpush.bf16.msra.mxu2 %v8603_v26  ;;  %v8613_v63 = vld [vmem:[#allocation78_spill] sm:$0xff] }
 0x1eb   :  { %v8614_v26 = vld [vmem:[#allocation62_spill] sm:$0xff] }
 0x1ec   :  { %1842 = vmatpush.bf16.msra.mxu1 %v8600_v42  ;;  %1868 = vmatpush.bf16.msrb.mxu3 %v8601_v47  ;;  %v8611_v42 = vld [vmem:[#allocation75_spill] sm:$0xff]  ;;  %v8612_v47 = vld [vmem:[#allocation76_spill] sm:$0xff] }
 0x1ee   :  { %1782 = vmatpush.bf16.msrb.mxu0 %v8606_v45  ;;  %1808 = vmatpush.bf16.msra.mxu2 %v8607_v12  ;;  %v8617_v45 = vld [vmem:[#allocation82_spill] sm:$0xff] }
 0x1ef   :  { %v8618_v12 = vld [vmem:[#allocation66_spill] sm:$0xff] }
 0x1f0   :  { %1843 = vmatpush.bf16.msra.mxu1 %v8604_v50  ;;  %1869 = vmatpush.bf16.msrb.mxu3 %v8605_v4  ;;  %v8615_v50 = vld [vmem:[#allocation63_spill] sm:$0xff]  ;;  %v8616_v4 = vld [vmem:[#allocation80_spill] sm:$0xff] }
 0x1f2   :  { %1783 = vmatpush.bf16.msrb.mxu0 %v8610_v17  ;;  %1809 = vmatpush.bf16.msra.mxu2 %v8611_v42  ;;  %v8621_v17 = vld [vmem:[#allocation85_spill] sm:$0xff]  ;;  %v8622_v42 = vld [vmem:[#allocation71_spill] sm:$0xff] }
 0x1f4   :  { %1844 = vmatpush.bf16.msra.mxu1 %v8608_v48  ;;  %1870 = vmatpush.bf16.msrb.mxu3 %v8609_v35  ;;  %v8619_v48 = vld [vmem:[#allocation67_spill] sm:$0xff]  ;;  %v8620_v35 = vld [vmem:[#allocation84_spill] sm:$0xff] }
 0x1f6   :  { %1828 = vmatpush.bf16.msra.mxu0 %v8612_v47  ;;  %1854 = vmatpush.bf16.msrb.mxu2 %v8613_v63  ;;  %v8623_v47 = vld [vmem:[#allocation72_spill] sm:$0xff] }
 0x1f7   :  { %v8624_v63 = vld [vmem:[#allocation88_spill] sm:$0xff] }
 0x1f8   :  { %1845 = vmatpush.bf16.msra.mxu1 %v8614_v26  ;;  %1871 = vmatpush.bf16.msrb.mxu3 %v8615_v50  ;;  %v8625_v26 = vld [vmem:[#allocation89_spill] sm:$0xff] }
 0x1f9   :  { %v8626_v50 = vld [vmem:[#allocation77_spill] sm:$0xff] }
 0x1fa   :  { %1829 = vmatpush.bf16.msra.mxu0 %v8616_v4  ;;  %1855 = vmatpush.bf16.msrb.mxu2 %v8617_v45  ;;  %v8627_v4 = vld [vmem:[#allocation79_spill] sm:$0xff]  ;;  %v8628_v45 = vld [vmem:[#allocation90_spill] sm:$0xff] }
 0x1fc   :  { %1846 = vmatpush.bf16.msra.mxu1 %v8618_v12  ;;  %1872 = vmatpush.bf16.msrb.mxu3 %v8619_v48  ;;  %v8629_v12 = vld [vmem:[#allocation91_spill] sm:$0xff]  ;;  %v8630_v48 = vld [vmem:[#allocation94_spill] sm:$0xff] }
 0x1fe   :  { %1830 = vmatpush.bf16.msra.mxu0 %v8620_v35  ;;  %1856 = vmatpush.bf16.msrb.mxu2 %v8621_v17  ;;  %v8631_v35 = vld [vmem:[#allocation95_spill] sm:$0xff]  ;;  %v8632_v17 = vld [vmem:[#allocation96_spill] sm:$0xff] }
 0x200   :  { %1847 = vmatpush.bf16.msra.mxu1 %v8622_v42  ;;  %1873 = vmatpush.bf16.msrb.mxu3 %v8623_v47  ;;  %v8633_v42 = vld [vmem:[#allocation97_spill] sm:$0xff]  ;;  %v8634_v47 = vld [vmem:[#allocation98_spill] sm:$0xff] }
 0x202   :  { %1831 = vmatpush.bf16.msra.mxu0 %v8624_v63  ;;  %1857 = vmatpush.bf16.msrb.mxu2 %v8625_v26  ;;  %v8635_v63 = vld [vmem:[#allocation99_spill] sm:$0xff] }
 0x204   :  { %1848 = vmatpush.bf16.msra.mxu1 %v8626_v50  ;;  %1874 = vmatpush.bf16.msrb.mxu3 %v8627_v4 }
 0x206   :  { %1832 = vmatpush.bf16.msra.mxu0 %v8628_v45  ;;  %1858 = vmatpush.bf16.msrb.mxu2 %v8629_v12 }
 0x20a   :  { %1833 = vmatpush.bf16.msra.mxu0 %v8630_v48  ;;  %1859 = vmatpush.bf16.msrb.mxu2 %v8631_v35 }
 0x20e   :  { %1834 = vmatpush.bf16.msra.mxu0 %v8632_v17  ;;  %1860 = vmatpush.bf16.msrb.mxu2 %v8633_v42  ;;  %v8637_v17 = vld [vmem:[#allocation101_spill] sm:$0xff] }
 0x212   :  { %1835 = vmatpush.bf16.msra.mxu0 %v8634_v47  ;;  %1861 = vmatpush.bf16.msrb.mxu2 %v8635_v63 }
 0x224   :  { %v1392_v26 = vpop.f32.mrf.mxu1 }
 0x22a   :  { %v1418_v50 = vpop.f32.mrf.mxu3 }
 0x22c   :  { %v1394_v41 = vpop.f32.mrf.mxu1 }
 0x232   :  { %v1420_v4 = vpop.f32.mrf.mxu3  ;;  %v1379_v9 = vpop.f32.mrf.mxu0 }
 0x233   :  { %v1380_v12 = vadd.f32 %v1379_v9, %v8636_v43 }
 0x234   :  { %v1444_v45 = vpop.f32.mrf.mxu1 }
 0x235   :  { %v1393_v40 = vadd.f32 %v1392_v26, %v1380_v12 }
 0x237   :  { %v4524_v48 = vmul.f32 -1.442695, %v1393_v40 }
 0x238   :  { %v1405_v56 = vpop.f32.mrf.mxu2 }
 0x239   :  { %4801 = vpow2.f32 %v4524_v48  ;;  %v1406_v33 = vadd.f32 %v1405_v56, %v8637_v17  ;;  %v8638_v56 = vld [vmem:[#allocation81_spill] sm:$0xff] }
 0x23a   :  { %v1470_v35 = vpop.f32.mrf.mxu3  ;;  %v1381_v42 = vpop.f32.mrf.mxu0 }
 0x23b   :  { %v1419_v47 = vadd.f32 %v1418_v50, %v1406_v33 }
 0x23c   :  { %v1446_v28 = vpop.f32.mrf.mxu1 }
 0x23d   :  { %v4525_v0 = vmul.f32 -1.442695, %v1419_v47  ;;  %v8639_v28 = vld [vmem:[#allocation83_spill] sm:$0xff] }
 0x23f   :  { %v4802_v63 = vpop.eup %4801  ;;  %4803 = vpow2.f32 %v4525_v0 }
 0x240   :  { %v6627_v46 = vadd.f32 1.0, %v4802_v63  ;;  %v1407_v4 = vpop.f32.mrf.mxu2 }
 0x242   :  { %v1472_v41 = vpop.f32.mrf.mxu3  ;;  %4805 = vrcp.f32 %v6627_v46  ;;  %v1431_v9 = vpop.f32.mrf.mxu0  ;;  %vm1483_vm6 = vweird.f32 %v6627_v46 }
 0x243   :  { %v1432_v39 = vadd.f32 %v1431_v9, %v8643_v22 }
 0x244   :  { %v1569_v26 = vpop.f32.mrf.mxu1 }
 0x245   :  { %v1604_v40 = vrot.slane %v1569_v26, 6  ;;  %v1608_v12 = vrot.slane %v1569_v26, 7  ;;  %v4804_v48 = vpop.eup %4803 }
 0x246   :  { %v6630_v43 = vadd.f32 1.0, %v4804_v48 }
 0x247   :  { %v1620_v42 = vadd.f32 %v1604_v40, %v8638_v56  ;;  %v1624_v33 = vadd.f32 %v1608_v12, %v8639_v28  ;;  %v8640_v40 = vld [vmem:[#allocation103_spill] sm:$0xff]  ;;  %v8641_v12 = vld [vmem:[#allocation86_spill] sm:$0xff] }
 0x248   :  { %v6634_v50 = vpop.eup %4805  ;;  %4807 = vrcp.f32 %v6630_v43  ;;  %v1457_v63 = vpop.f32.mrf.mxu2  ;;  %vm1502_vm2 = vweird.f32 %v6630_v43 }
 0x249   :  { %v4529_v0 = vmul.f32 -1.442695, %v1620_v42  ;;  %v4530_v47 = vmul.f32 -1.442695, %v1624_v33  ;;  %v1479_v41 = vmul.f32 %v6634_v50, %v6627_v46  ;;  %v1458_v56 = vadd.f32 %v1457_v63, %v8640_v40  ;;  %v8642_v42 = vld [vmem:[#allocation87_spill] sm:$0xff] }
 0x24a   :  { %v1595_v4 = vpop.f32.mrf.mxu3  ;;  %v1433_v48 = vpop.f32.mrf.mxu0  ;;  %vm1484_vm4 = vweird.f32 %v6634_v50 }
 0x24b   :  { %4809 = vpow2.f32 %v4529_v0  ;;  %v1606_v26 = vrot.slane %v1595_v4, 6  ;;  %v1610_v17 = vrot.slane %v1595_v4, 7  ;;  %v1471_v32 = vadd.f32 %v1470_v35, %v1458_v56  ;;  %vm6667_vm7 = vmor %vm1483_vm6, %vm1484_vm4 }
 0x24c   :  { %4811 = vpow2.f32 %v4530_v47  ;;  %v1571_v31 = vpop.f32.mrf.mxu1  ;;  %v1480_v2 = vsub.f32 1.0, %v1479_v41  ;;  %v1445_v41 = vadd.f32 %v1444_v45, %v1432_v39  ;;  %v1489_v45 = vand.u32 2147483648, %v6627_v46 }
 0x24d   :  { %v1622_v28 = vadd.f32 %v1606_v26, %v8641_v12  ;;  %v1626_v16 = vadd.f32 %v1610_v17, %v8642_v42  ;;  %v4526_v30 = vmul.f32 -1.442695, %v1471_v32  ;;  %v1508_v17 = vand.u32 2147483648, %v6630_v43  ;;  %v8652_v12 = vld [vmem:[#allocation92_spill] sm:$0xff] }
 0x24e   :  { %v4808_v18 = vpop.eup %4807  ;;  %v1481_v63 = vmul.f32 %v6634_v50, %v1480_v2 }
 0x24f   :  { %v1498_v33 = vmul.f32 %v4808_v18, %v6630_v43  ;;  %v4531_v47 = vmul.f32 -1.442695, %v1622_v28  ;;  %v4532_v40 = vmul.f32 -1.442695, %v1626_v16  ;;  %4813 = vpow2.f32 %v4526_v30 }
 0x250   :  { %v1459_v23 = vpop.f32.mrf.mxu2  ;;  %vm1503_vm3 = vweird.f32 %v4808_v18  ;;  %v1482_v2 = vadd.f32 %v6634_v50, %v1481_v63  ;;  %v1506_v30 = vand.u32 2147483647, %v6630_v43  ;;  %v1487_v16 = vand.u32 2147483647, %v6627_v46  ;;  %v8646_v43 = vld [vmem:[#allocation69_spill] sm:$0xff] }
 0x251   :  { %v4810_v0 = vpop.eup %4809  ;;  %v1499_v48 = vsub.f32 1.0, %v1498_v33  ;;  %4815 = vpow2.f32 %v4531_v47  ;;  %vm6654_vm5 = vmor %vm1502_vm2, %vm1503_vm3  ;;  %v1509_v47 = vor.u32 1.1754944e-38, %v1508_v17 }
 0x252   :  { %v4812_v4 = vpop.eup %4811  ;;  %v1597_v31 = vpop.f32.mrf.mxu3  ;;  %v6645_v56 = vadd.f32 1.0, %v4810_v0  ;;  %4817 = vpow2.f32 %v4532_v40  ;;  %v1486_v46 = vsel %vm6667_vm7, %v6634_v50, %v1482_v2  ;;  %vm1507_vm8 = vcmp.eq.f32.partialorder %v1506_v30, 8.507059e+37 }
 0x253   :  { %v1500_v35 = vmul.f32 %v4808_v18, %v1499_v48  ;;  %v6649_v32 = vadd.f32 1.0, %v4812_v4  ;;  %v1556_v23 = vpop.f32.mrf.mxu0  ;;  %v8647_v4 = vld [vmem:[#allocation73_spill] sm:$0xff]  ;;  %vm1488_vm9 = vcmp.eq.f32.partialorder %v1487_v16, 8.507059e+37  ;;  %v8650_v31 = vld [vmem:[#allocation104_spill] sm:$0xff] }
 0x254   :  { %v1603_v28 = vrot.slane %v1556_v23, 6  ;;  %v1607_v26 = vrot.slane %v1556_v23, 7  ;;  %4819 = vrcp.f32 %v6645_v56  ;;  %v1490_v23 = vor.u32 1.1754944e-38, %v1489_v45 }
 0x255   :  { %v1501_v9 = vadd.f32 %v4808_v18, %v1500_v35  ;;  %v4814_v33 = vpop.eup %4813  ;;  %4821 = vrcp.f32 %v6649_v32  ;;  %vm1678_vm11 = vweird.f32 %v6645_v56  ;;  %vm1693_vm12 = vweird.f32 %v6649_v32 }
 0x256   :  { %v1619_v40 = vadd.f32 %v1603_v28, %v8646_v43  ;;  %v1623_v48 = vadd.f32 %v1607_v26, %v8647_v4  ;;  %4823 = vtanh.f32 %v1445_v41  ;;  %v6671_v63 = vadd.f32 1.0, %v4814_v33 }
 0x257   :  { %v1505_v0 = vsel %vm6654_vm5, %v4808_v18, %v1501_v9  ;;  %v4816_v18 = vpop.eup %4815  ;;  %v1491_v33 = vsel %vm1488_vm9, %v1490_v23, %v1486_v46  ;;  %v1682_v42 = vand.u32 2147483647, %v6645_v56 }
 0x258   :  { %v6676_v35 = vpop.f32.mrf.mxu2  ;;  %v1510_v9 = vsel %vm1507_vm8, %v1509_v47, %v1505_v0  ;;  %v4818_v28 = vpop.eup %4817  ;;  %4825 = vrcp.f32 %v6671_v63  ;;  %v4527_v17 = vmul.f32 -1.442695, %v1619_v40  ;;  %v4528_v26 = vmul.f32 -1.442695, %v1623_v48 }
 0x259   :  { %v1532_v50 = vmul.f32 %v1510_v9, %v8650_v31  ;;  %v6684_v2 = vadd.f32 1.0, %v4816_v18  ;;  %v6686_v45 = vadd.f32 1.0, %v4818_v28  ;;  %v1684_v18 = vand.u32 2147483648, %v6645_v56 }
 0x25a   :  { %v6679_v41 = vpop.eup %4819  ;;  %4827 = vpow2.f32 %v4527_v17  ;;  %v1528_v28 = vand.u32 2147483648, %v6671_v63  ;;  %vm1522_vm15 = vweird.f32 %v6671_v63  ;;  %vm6736_vm3 = vcmp.eq.f32.partialorder %v1682_v42, 8.507059e+37 }
 0x25b   :  { %v1558_v39 = vpop.f32.mrf.mxu0  ;;  %v6681_v4 = vpop.eup %4821  ;;  %4829 = vpow2.f32 %v4528_v26  ;;  %v1674_v16 = vmul.f32 %v6679_v41, %v6645_v56  ;;  %vm1679_vm14 = vweird.f32 %v6679_v41 }
 0x25c   :  { %v4824_v30 = vpop.eup %4823  ;;  %v1689_v40 = vmul.f32 %v6681_v4, %v6649_v32  ;;  %4831 = vrcp.f32 %v6684_v2  ;;  %v1529_v37 = vor.u32 1.1754944e-38, %v1528_v28  ;;  %vm1694_vm1 = vweird.f32 %v6681_v4  ;;  %vm6748_vm5 = vmor %vm1678_vm11, %vm1679_vm14 }
 0x25d   :  { %v1533_v0 = vmul.f32 %v4824_v30, %v1491_v33  ;;  %4833 = vrcp.f32 %v6686_v45  ;;  %v1675_v17 = vsub.f32 1.0, %v1674_v16  ;;  %v1699_v30 = vand.u32 2147483648, %v6649_v32  ;;  %vm6755_vm6 = vmor %vm1693_vm12, %vm1694_vm1 }
 0x25e   :  { %v4826_v48 = vpop.eup %4825  ;;  %v1690_v33 = vsub.f32 1.0, %v1689_v40  ;;  %v1605_v16 = vrot.slane %v6676_v35, 6 }
 0x25f   :  { %v6692_v47 = vadd.f32 %v1533_v0, %v1532_v50  ;;  %v1518_v23 = vmul.f32 %v4826_v48, %v6671_v63  ;;  %vm1523_vm13 = vweird.f32 %v4826_v48  ;;  %v1700_v43 = vor.u32 1.1754944e-38, %v1699_v30 }
 0x260   :  { %v1584_v46 = vpop.f32.mrf.mxu2  ;;  %v4828_v9 = vpop.eup %4827  ;;  %v1621_v22 = vadd.f32 %v1605_v16, %v8652_v12  ;;  %vm1524_vm0 = vmor %vm1522_vm15, %vm1523_vm13 }
 0x261   :  { %8651 = vst [vmem:[#allocation6_spill] sm:$0xff] %v6692_v47  ;;  %v4830_v26 = vpop.eup %4829  ;;  %v1519_v31 = vsub.f32 1.0, %v1518_v23  ;;  %v6700_v50 = vadd.f32 1.0, %v4828_v9  ;;  %4835 = vtanh.f32 %v6692_v47  ;;  %v6707_v46 = vor.u32 1.1754944e-38, %v1684_v18 }
 0x262   :  { %v6705_v0 = vadd.f32 1.0, %v4830_v26  ;;  %v6712_v40 = vpop.eup %4831  ;;  %v1676_v23 = vmul.f32 %v6679_v41, %v1675_v17  ;;  %v1609_v9 = vrot.slane %v6676_v35, 7  ;;  %v1691_v18 = vmul.f32 %v6681_v4, %v1690_v33 }
 0x263   :  { %4837 = vrcp.f32 %v6700_v50  ;;  %v6718_v26 = vpop.eup %4833  ;;  %v1520_v39 = vmul.f32 %v4826_v48, %v1519_v31  ;;  %v1526_v47 = vand.u32 2147483647, %v6671_v63  ;;  %v1697_v17 = vand.u32 2147483647, %v6649_v32 }
 0x264   :  { %4839 = vrcp.f32 %v6705_v0  ;;  %v1714_v35 = vmul.f32 %v6712_v40, %v6684_v2  ;;  %v1729_v31 = vmul.f32 %v6718_v26, %v6686_v45  ;;  %v1625_v19 = vadd.f32 %v1609_v9, %v8653_v20 }
 0x265   :  { %v1521_v62 = vadd.f32 %v4826_v48, %v1520_v39  ;;  %v1677_v30 = vadd.f32 %v6679_v41, %v1676_v23  ;;  %v1692_v59 = vadd.f32 %v6681_v4, %v1691_v18  ;;  %vm1527_vm2 = vcmp.eq.f32.partialorder %v1526_v47, 8.507059e+37 }
 0x266   :  { %vm6740_vm4 = vcmp.eq.f32.partialorder %v1697_v17, 8.507059e+37  ;;  %4841 = vtanh.f32 %v1621_v22  ;;  %v1646_v17 = vand.u32 2147483648, %v6700_v50  ;;  %vm1640_vm9 = vweird.f32 %v6700_v50 }
 0x267   :  { %v4836_v33 = vpop.eup %4835  ;;  %v1525_v34 = vsel %vm1524_vm0, %v4826_v48, %v1521_v62  ;;  %v1715_v62 = vsub.f32 1.0, %v1714_v35  ;;  %v1681_v56 = vsel %vm6748_vm5, %v6679_v41, %v1677_v30  ;;  %4843 = vtanh.f32 %v1625_v19 }
 0x268   :  { %v1530_v23 = vsel %vm1527_vm2, %v1529_v37, %v1525_v34  ;;  %v1730_v34 = vsub.f32 1.0, %v1729_v31  ;;  %v1696_v22 = vsel %vm6755_vm6, %v6681_v4, %v1692_v59  ;;  %v1661_v31 = vand.u32 2147483648, %v6705_v0 }
 0x269   :  { %v4838_v61 = vpop.eup %4837  ;;  %v1536_v42 = vmul.f32 %v4836_v33, %v1530_v23  ;;  %v1644_v33 = vand.u32 2147483647, %v6700_v50  ;;  %v1659_v23 = vand.u32 2147483647, %v6705_v0  ;;  %v1716_v19 = vmul.f32 %v6712_v40, %v1715_v62 }
 0x26a   :  { %v4840_v39 = vpop.eup %4839  ;;  %v1636_v63 = vmul.f32 %v4838_v61, %v6700_v50  ;;  %vm1641_vm7 = vweird.f32 %v4838_v61  ;;  %v1686_v59 = vsel %vm6736_vm3, %v6707_v46, %v1681_v56  ;;  %v1647_v28 = vor.u32 1.1754944e-38, %v1646_v17 }
 0x26b   :  { %v1651_v48 = vmul.f32 %v4840_v39, %v6705_v0  ;;  %v1766_v35 = vrot.slane %v1536_v42, 6  ;;  %vm1656_vm8 = vweird.f32 %v4840_v39  ;;  %vm1642_vm11 = vmor %vm1640_vm9, %vm1641_vm7  ;;  %vm1655_vm12 = vweird.f32 %v6705_v0 }
 0x26c   :  { %v1637_v37 = vsub.f32 1.0, %v1636_v63  ;;  %v4842_v4 = vpop.eup %4841  ;;  %vm1645_vm13 = vcmp.eq.f32.partialorder %v1644_v33, 8.507059e+37  ;;  %vm1657_vm14 = vmor %vm1655_vm12, %vm1656_vm8  ;;  %v1662_v62 = vor.u32 1.1754944e-38, %v1661_v31  ;;  %v1701_v50 = vsel %vm6740_vm4, %v1700_v43, %v1696_v22 }
 0x26d   :  { %v1652_v18 = vsub.f32 1.0, %v1651_v48  ;;  %v1769_v41 = vpack.c.bf16 %v1766_v35, %v1766_v35  ;;  %v4844_v47 = vpop.eup %4843  ;;  %vm1660_vm15 = vcmp.eq.f32.partialorder %v1659_v23, 8.507059e+37  ;;  %v8662_v46 = vrot.slane %v6508_v14, 7 }
 0x26e   :  { %v1638_v32 = vmul.f32 %v4838_v61, %v1637_v37  ;;  %v1731_v0 = vmul.f32 %v6718_v26, %v1730_v34  ;;  %v1717_v14 = vadd.f32 %v6712_v40, %v1716_v19  ;;  %vm1719_vm0 = vweird.f32 %v6712_v40 }
 0x26f   :  { %v1653_v63 = vmul.f32 %v4840_v39, %v1652_v18  ;;  %v1773_v42 = vrot.slane %v1769_v41, 1  ;;  %v1749_v16 = vmul.f32 %v8662_v46, %v1686_v59  ;;  %vm1734_vm1 = vweird.f32 %v6718_v26 }
 0x270   :  { %v1639_v30 = vadd.f32 %v4838_v61, %v1638_v32  ;;  %v1732_v34 = vadd.f32 %v6718_v26, %v1731_v0  ;;  %vm1718_vm2 = vweird.f32 %v6684_v2  ;;  %v1739_v32 = vand.u32 2147483648, %v6686_v45  ;;  %v8664_v0 = vld [vmem:[#allocation8_spill] sm:$0xff] }
 0x271   :  { %v1654_v48 = vadd.f32 %v4840_v39, %v1653_v63  ;;  %1797 = vmatmul.bf16.vlgmr.msrb.gmra.mxu1 %v1773_v42  ;;  %1823 = vmatmul.bf16.vlgmr.msra.gmra.mxu3 %v1773_v42  ;;  %v1722_v33 = vand.u32 2147483647, %v6684_v2  ;;  %vm1733_vm3 = vweird.f32 %v6686_v45  ;;  %vm1720_vm4 = vmor %vm1718_vm2, %vm1719_vm0  ;;  %v1737_v31 = vand.u32 2147483647, %v6686_v45 }
 0x272   :  { %v1643_v37 = vsel %vm1642_vm11, %v4838_v61, %v1639_v30  ;;  %1967 = vmatpush.bf16.msrb.mxu1 %v8566_v44  ;;  %1993 = vmatpush.bf16.msra.mxu3 %v8567_v27  ;;  %v8663_v61 = vrot.slane %v6504_v54, 7  ;;  %v1724_v54 = vand.u32 2147483648, %v6684_v2  ;;  %vm1735_vm5 = vmor %vm1733_vm3, %vm1734_vm1  ;;  %v1721_v63 = vsel %vm1720_vm4, %v6712_v40, %v1717_v14  ;;  %v8670_v14 = vld [vmem:[#allocation14_spill] sm:$0xff] }
 0x273   :  { %v1648_v18 = vsel %vm1645_vm13, %v1647_v28, %v1643_v37  ;;  %v1658_v35 = vsel %vm1657_vm14, %v4840_v39, %v1654_v48  ;;  %v1736_v41 = vsel %vm1735_vm5, %v6718_v26, %v1732_v34  ;;  %v1740_v19 = vor.u32 1.1754944e-38, %v1739_v32  ;;  %v8672_v34 = vld [vmem:[#allocation34_spill] sm:$0xff]  ;;  %v8673_v32 = vld [vmem:[#allocation35_spill] sm:$0xff] }
 0x274   :  { %v1663_v56 = vsel %vm1660_vm15, %v1662_v62, %v1658_v35  ;;  %v1751_v17 = vmul.f32 %v4842_v4, %v1648_v18  ;;  %v1750_v9 = vmul.f32 %v8663_v61, %v1701_v50  ;;  %v1725_v23 = vor.u32 1.1754944e-38, %v1724_v54  ;;  %v8667_v61 = vld [vmem:[#allocation20_spill] sm:$0xff] }
 0x275   :  { %v1752_v43 = vmul.f32 %v4844_v47, %v1663_v56  ;;  %vm1723_vm6 = vcmp.eq.f32.partialorder %v1722_v33, 8.507059e+37  ;;  %vm1738_vm7 = vcmp.eq.f32.partialorder %v1737_v31, 8.507059e+37  ;;  %vm1762_vm8 = vcmask 1043459   ;;  %v8665_v56 = vld [vmem:[#allocation16_spill] sm:$0xff]  ;;  %v8674_v33 = vld [vmem:[#allocation18_spill] sm:$0xff]  ;;  %v8675_v31 = vld [vmem:[#allocation27_spill] sm:$0xff] }
 0x276   :  { %v6785_v22 = vadd.f32 %v1751_v17, %v1749_v16  ;;  %1968 = vmatpush.bf16.msrb.mxu1 %v8568_v53  ;;  %1994 = vmatpush.bf16.msra.mxu3 %v8569_v6  ;;  %v1726_v59 = vsel %vm1723_vm6, %v1725_v23, %v1721_v63  ;;  %v1741_v4 = vsel %vm1738_vm7, %v1740_v19, %v1736_v41  ;;  %v8666_v17 = vld [vmem:[#allocation11_spill] sm:$0xff]  ;;  %v8671_v54 = vld [vmem:[#allocation24_spill] sm:$0xff]  ;;  %v8677_v23 = vld [vmem:[#allocation37_spill] sm:$0xff] }
 0x277   :  { %v6787_v39 = vadd.f32 %v1752_v43, %v1750_v9  ;;  %v8668_v9 = vld [vmem:[#allocation32_spill] sm:$0xff]  ;;  %v8669_v43 = vld [vmem:[#allocation33_spill] sm:$0xff]  ;;  %v8678_v41 = vld [vmem:[#allocation22_spill] sm:$0xff] }
 0x278   :  { %4845 = vtanh.f32 %v6785_v22  ;;  %v8676_v63 = vld [vmem:[#allocation36_spill] sm:$0xff] }
 0x279   :  { %4847 = vtanh.f32 %v6787_v39  ;;  %v8679_v19 = vld [vmem:[#allocation28_spill] sm:$0xff] }
 0x27a   :  { %1969 = vmatpush.bf16.msrb.mxu1 %v8570_v36  ;;  %1995 = vmatpush.bf16.msra.mxu3 %v8571_v52 }
 0x27e   :  { %v4846_v30 = vpop.eup %4845  ;;  %1970 = vmatpush.bf16.msrb.mxu1 %v8572_v11  ;;  %1996 = vmatpush.bf16.msra.mxu3 %v8573_v15 }
 0x27f   :  { %v4848_v2 = vpop.eup %4847  ;;  %v1757_v28 = vmul.f32 %v4846_v30, %v1726_v59  ;;  %v8680_v30 = vld [vmem:[#allocation38_spill] sm:$0xff]  ;;  %v8681_v59 = vld [vmem:[#allocation39_spill] sm:$0xff] }
 0x280   :  { %v1758_v45 = vmul.f32 %v4848_v2, %v1741_v4  ;;  %v8682_v2 = vld [vmem:[#allocation42_spill] sm:$0xff]  ;;  %v8683_v4 = vld [vmem:[#allocation44_spill] sm:$0xff] }
 0x281   :  { %v1943_v40 = vpack.c.bf16 %v1757_v28, %v1757_v28  ;;  %1849 = vmatmul.bf16.vlgmr.msra.gmra.mxu1 %v1773_v42  ;;  %1875 = vmatmul.bf16.vlgmr.msrb.gmra.mxu3 %v1773_v42 }
 0x282   :  { %v1761_v48 = vrot.slane %v1758_v45, 7  ;;  %v1944_v47 = vpack.c.bf16 %v1758_v45, %v1758_v45  ;;  %1971 = vmatpush.bf16.msrb.mxu1 %v8574_v1  ;;  %1997 = vmatpush.bf16.msra.mxu3 %v8575_v8  ;;  %v8685_v45 = vld [vmem:[#allocation41_spill] sm:$0xff] }
 0x283   :  { %v1947_v26 = vunpack.c.l.b16 %v1943_v40  ;;  %v8686_v40 = vld [vmem:[#allocation48_spill] sm:$0xff] }
 0x284   :  { %v1763_v37 = vsel %vm1762_vm8, %v1761_v48, %v1757_v28  ;;  %v1948_v62 = vunpack.c.l.b16 %v1944_v47  ;;  %v8684_v28 = vld [vmem:[#allocation40_spill] sm:$0xff]  ;;  %v8687_v48 = vld [vmem:[#allocation49_spill] sm:$0xff]  ;;  %v8688_v47 = vld [vmem:[#allocation43_spill] sm:$0xff] }
 0x285   :  { %v1768_v50 = vpack.c.bf16 %v1763_v37, %v1763_v37  ;;  %v1949_v18 = vrot.slane %v1947_v26, 2  ;;  %v8689_v26 = vld [vmem:[#allocation45_spill] sm:$0xff]  ;;  %v8690_v37 = vld [vmem:[#allocation46_spill] sm:$0xff] }
 0x286   :  { %v1950_v35 = vrot.slane %v1948_v62, 1  ;;  %1972 = vmatpush.bf16.msrb.mxu1 %v8576_v25  ;;  %1998 = vmatpush.bf16.msra.mxu3 %v8577_v58  ;;  %v8691_v62 = vld [vmem:[#allocation47_spill] sm:$0xff] }
 0x287   :  { %v1772_v46 = vrot.slane %v1768_v50, 1  ;;  %v8692_v50 = vld [vmem:[#allocation52_spill] sm:$0xff] }
 0x288   :  { %v1951_v16 = vsel %vm624_vm10, %v1950_v35, %v1949_v18  ;;  %v8693_v18 = vld [vmem:[#allocation53_spill] sm:$0xff]  ;;  %v8694_v35 = vld [vmem:[#allocation50_spill] sm:$0xff] }
 0x289   :  { %1784 = vmatmul.bf16.vlgmr.msrb.gmra.mxu0 %v1772_v46  ;;  %1810 = vmatmul.bf16.vlgmr.msra.gmra.mxu2 %v1772_v46  ;;  %v1952_v42 = vpack.c.b16 %v1951_v16, %v1951_v16  ;;  %v8696_v16 = vld [vmem:[#allocation56_spill] sm:$0xff] }
 0x28a   :  { %1954 = vmatpush.bf16.msrb.mxu0 %v5188_v3  ;;  %1980 = vmatpush.bf16.msra.mxu2 %v5254_v29 }
 0x28b   :  { %1973 = vmatpush.bf16.msrb.mxu1 %v8578_v10  ;;  %1999 = vmatpush.bf16.msra.mxu3 %v8579_v49 }
 0x28e   :  { %1955 = vmatpush.bf16.msrb.mxu0 %v5200_v7  ;;  %1981 = vmatpush.bf16.msra.mxu2 %v5286_v38 }
 0x28f   :  { %1974 = vmatpush.bf16.msrb.mxu1 %v5510_v60  ;;  %2000 = vmatpush.bf16.msra.mxu3 %v5498_v55 }
 0x292   :  { %1956 = vmatpush.bf16.msrb.mxu0 %v5246_v24  ;;  %1982 = vmatpush.bf16.msra.mxu2 %v5331_v51 }
 0x293   :  { %2208 = vmatpush.bf16.msra.mxu1 %v8580_v21  ;;  %2234 = vmatpush.bf16.msrb.mxu3 %v5506_v57 }
 0x294   :  { %1975 = vmatmul.bf16.vlgmr.msrb.gmra.mxu1 %v1952_v42  ;;  %2001 = vmatmul.bf16.vlgmr.msra.gmra.mxu3 %v1952_v42 }
 0x296   :  { %1957 = vmatpush.bf16.msrb.mxu0 %v8664_v0  ;;  %1983 = vmatpush.bf16.msra.mxu2 %v8665_v56 }
 0x297   :  { %2209 = vmatpush.bf16.msra.mxu1 %v5530_v5  ;;  %2235 = vmatpush.bf16.msrb.mxu3 %v5541_v13 }
 0x299   :  { %1836 = vmatmul.bf16.vlgmr.msra.gmra.mxu0 %v1772_v46  ;;  %1862 = vmatmul.bf16.vlgmr.msrb.gmra.mxu2 %v1772_v46  ;;  %v8695_v46 = vld [vmem:[#allocation51_spill] sm:$0xff] }
 0x29a   :  { %1958 = vmatpush.bf16.msrb.mxu0 %v8666_v17  ;;  %1984 = vmatpush.bf16.msra.mxu2 %v8667_v61 }
 0x29b   :  { %2210 = vmatpush.bf16.msra.mxu1 %v8668_v9  ;;  %2236 = vmatpush.bf16.msrb.mxu3 %v8669_v43 }
 0x29e   :  { %1959 = vmatpush.bf16.msrb.mxu0 %v8670_v14  ;;  %1985 = vmatpush.bf16.msra.mxu2 %v8671_v54 }
 0x29f   :  { %2211 = vmatpush.bf16.msra.mxu1 %v8672_v34  ;;  %2237 = vmatpush.bf16.msrb.mxu3 %v8673_v32 }
 0x2a2   :  { %1960 = vmatpush.bf16.msrb.mxu0 %v8674_v33  ;;  %1986 = vmatpush.bf16.msra.mxu2 %v8675_v31 }
 0x2a3   :  { %2212 = vmatpush.bf16.msra.mxu1 %v8676_v63  ;;  %2238 = vmatpush.bf16.msrb.mxu3 %v8677_v23 }
 0x2a6   :  { %1961 = vmatpush.bf16.msrb.mxu0 %v8678_v41  ;;  %1987 = vmatpush.bf16.msra.mxu2 %v8679_v19 }
 0x2a7   :  { %2213 = vmatpush.bf16.msra.mxu1 %v8680_v30  ;;  %2239 = vmatpush.bf16.msrb.mxu3 %v8681_v59 }
 0x2a9   :  { %1962 = vmatmul.bf16.vlgmr.msrb.gmra.mxu0 %v1952_v42  ;;  %1988 = vmatmul.bf16.vlgmr.msra.gmra.mxu2 %v1952_v42  ;;  %v8697_v42 = vld [vmem:[#allocation57_spill] sm:$0xff] }
 0x2aa   :  { %2195 = vmatpush.bf16.msra.mxu0 %v8682_v2  ;;  %2221 = vmatpush.bf16.msrb.mxu2 %v8683_v4 }
 0x2ab   :  { %2214 = vmatpush.bf16.msra.mxu1 %v8684_v28  ;;  %2240 = vmatpush.bf16.msrb.mxu3 %v8685_v45 }
 0x2ae   :  { %2196 = vmatpush.bf16.msra.mxu0 %v8686_v40  ;;  %2222 = vmatpush.bf16.msrb.mxu2 %v8687_v48  ;;  %v8698_v48 = vld [vmem:[#allocation54_spill] sm:$0xff]  ;;  %v8699_v40 = vld [vmem:[#allocation55_spill] sm:$0xff] }
 0x2af   :  { %2215 = vmatpush.bf16.msra.mxu1 %v8688_v47  ;;  %2241 = vmatpush.bf16.msrb.mxu3 %v8689_v26  ;;  %v8700_v26 = vld [vmem:[#allocation60_spill] sm:$0xff] }
 0x2b2   :  { %2197 = vmatpush.bf16.msra.mxu0 %v8692_v50  ;;  %2223 = vmatpush.bf16.msrb.mxu2 %v8693_v18  ;;  %v8703_v50 = vld [vmem:[#allocation59_spill] sm:$0xff]  ;;  %v8704_v18 = vld [vmem:[#allocation64_spill] sm:$0xff] }
 0x2b3   :  { %2260 = vmatpush.bf16.msrb.mxu1 %v8690_v37  ;;  %2286 = vmatpush.bf16.msra.mxu3 %v8691_v62  ;;  %v8701_v37 = vld [vmem:[#allocation61_spill] sm:$0xff]  ;;  %v8702_v62 = vld [vmem:[#allocation58_spill] sm:$0xff] }
 0x2b6   :  { %2198 = vmatpush.bf16.msra.mxu0 %v8696_v16  ;;  %2224 = vmatpush.bf16.msrb.mxu2 %v8697_v42  ;;  %v8707_v16 = vld [vmem:[#allocation63_spill] sm:$0xff]  ;;  %v8708_v42 = vld [vmem:[#allocation68_spill] sm:$0xff] }
 0x2b7   :  { %2261 = vmatpush.bf16.msrb.mxu1 %v8694_v35  ;;  %2287 = vmatpush.bf16.msra.mxu3 %v8695_v46  ;;  %v8705_v35 = vld [vmem:[#allocation65_spill] sm:$0xff]  ;;  %v8706_v46 = vld [vmem:[#allocation62_spill] sm:$0xff] }
 0x2ba   :  { %2199 = vmatpush.bf16.msra.mxu0 %v8700_v26  ;;  %2225 = vmatpush.bf16.msrb.mxu2 %v8701_v37  ;;  %v8711_v26 = vld [vmem:[#allocation67_spill] sm:$0xff]  ;;  %v8712_v37 = vld [vmem:[#allocation74_spill] sm:$0xff] }
 0x2bb   :  { %2262 = vmatpush.bf16.msrb.mxu1 %v8698_v48  ;;  %2288 = vmatpush.bf16.msra.mxu3 %v8699_v40  ;;  %v8709_v48 = vld [vmem:[#allocation70_spill] sm:$0xff] }
 0x2bc   :  { %v8710_v40 = vld [vmem:[#allocation66_spill] sm:$0xff] }
 0x2be   :  { %2200 = vmatpush.bf16.msra.mxu0 %v8704_v18  ;;  %2226 = vmatpush.bf16.msrb.mxu2 %v8705_v35  ;;  %v8715_v18 = vld [vmem:[#allocation78_spill] sm:$0xff]  ;;  %v8716_v35 = vld [vmem:[#allocation71_spill] sm:$0xff] }
 0x2bf   :  { %2263 = vmatpush.bf16.msrb.mxu1 %v8702_v62  ;;  %2289 = vmatpush.bf16.msra.mxu3 %v8703_v50  ;;  %v8713_v62 = vld [vmem:[#allocation75_spill] sm:$0xff]  ;;  %v8714_v50 = vld [vmem:[#allocation76_spill] sm:$0xff] }
 0x2c2   :  { %2201 = vmatpush.bf16.msra.mxu0 %v8708_v42  ;;  %2227 = vmatpush.bf16.msrb.mxu2 %v8709_v48  ;;  %v8719_v42 = vld [vmem:[#allocation82_spill] sm:$0xff]  ;;  %v8720_v48 = vld [vmem:[#allocation77_spill] sm:$0xff] }
 0x2c3   :  { %2264 = vmatpush.bf16.msrb.mxu1 %v8706_v46  ;;  %2290 = vmatpush.bf16.msra.mxu3 %v8707_v16  ;;  %v8717_v46 = vld [vmem:[#allocation72_spill] sm:$0xff] }
 0x2c4   :  { %v8718_v16 = vld [vmem:[#allocation80_spill] sm:$0xff] }
 0x2c6   :  { %2202 = vmatpush.bf16.msra.mxu0 %v8712_v37  ;;  %2228 = vmatpush.bf16.msrb.mxu2 %v8713_v62  ;;  %v8723_v37 = vld [vmem:[#allocation85_spill] sm:$0xff]  ;;  %v8724_v62 = vld [vmem:[#allocation88_spill] sm:$0xff] }
 0x2c7   :  { %2265 = vmatpush.bf16.msrb.mxu1 %v8710_v40  ;;  %2291 = vmatpush.bf16.msra.mxu3 %v8711_v26  ;;  %v8721_v40 = vld [vmem:[#allocation79_spill] sm:$0xff]  ;;  %v8722_v26 = vld [vmem:[#allocation84_spill] sm:$0xff] }
 0x2ca   :  { %2247 = vmatpush.bf16.msrb.mxu0 %v8714_v50  ;;  %2273 = vmatpush.bf16.msra.mxu2 %v8715_v18  ;;  %v8725_v50 = vld [vmem:[#allocation89_spill] sm:$0xff]  ;;  %v8726_v18 = vld [vmem:[#allocation90_spill] sm:$0xff] }
 0x2cb   :  { %2266 = vmatpush.bf16.msrb.mxu1 %v8716_v35  ;;  %2292 = vmatpush.bf16.msra.mxu3 %v8717_v46  ;;  %v8727_v35 = vld [vmem:[#allocation91_spill] sm:$0xff]  ;;  %v8728_v46 = vld [vmem:[#allocation94_spill] sm:$0xff] }
 0x2ce   :  { %2248 = vmatpush.bf16.msrb.mxu0 %v8718_v16  ;;  %2274 = vmatpush.bf16.msra.mxu2 %v8719_v42  ;;  %v8729_v16 = vld [vmem:[#allocation95_spill] sm:$0xff]  ;;  %v8730_v42 = vld [vmem:[#allocation96_spill] sm:$0xff] }
 0x2cf   :  { %2267 = vmatpush.bf16.msrb.mxu1 %v8720_v48  ;;  %2293 = vmatpush.bf16.msra.mxu3 %v8721_v40  ;;  %v8731_v48 = vld [vmem:[#allocation97_spill] sm:$0xff]  ;;  %v8732_v40 = vld [vmem:[#allocation98_spill] sm:$0xff] }
 0x2d2   :  { %2249 = vmatpush.bf16.msrb.mxu0 %v8722_v26  ;;  %2275 = vmatpush.bf16.msra.mxu2 %v8723_v37  ;;  %v8733_v26 = vld [vmem:[#allocation99_spill] sm:$0xff] }
 0x2d6   :  { %2250 = vmatpush.bf16.msrb.mxu0 %v8724_v62  ;;  %2276 = vmatpush.bf16.msra.mxu2 %v8725_v50 }
 0x2da   :  { %2251 = vmatpush.bf16.msrb.mxu0 %v8726_v18  ;;  %2277 = vmatpush.bf16.msra.mxu2 %v8727_v35  ;;  %v8734_v35 = vld [vmem:[#allocation100_spill] sm:$0xff] }
 0x2de   :  { %2252 = vmatpush.bf16.msrb.mxu0 %v8728_v46  ;;  %2278 = vmatpush.bf16.msra.mxu2 %v8729_v16 }
 0x2e2   :  { %2253 = vmatpush.bf16.msrb.mxu0 %v8730_v42  ;;  %2279 = vmatpush.bf16.msra.mxu2 %v8731_v48  ;;  %v8735_v42 = vld [vmem:[#allocation101_spill] sm:$0xff] }
 0x2e6   :  { %2254 = vmatpush.bf16.msrb.mxu0 %v8732_v40  ;;  %2280 = vmatpush.bf16.msra.mxu2 %v8733_v26 }
 0x2ee   :  { %v1798_v37 = vpop.f32.mrf.mxu1 }
 0x2f4   :  { %v1824_v62 = vpop.f32.mrf.mxu3 }
 0x2f6   :  { %v1800_v47 = vpop.f32.mrf.mxu1 }
 0x2fc   :  { %v1826_v50 = vpop.f32.mrf.mxu3 }
 0x2fe   :  { %v1850_v4 = vpop.f32.mrf.mxu1 }
 0x304   :  { %v1876_v2 = vpop.f32.mrf.mxu3 }
 0x306   :  { %v1785_v18 = vpop.f32.mrf.mxu0  ;;  %v1852_v46 = vpop.f32.mrf.mxu1 }
 0x307   :  { %v1786_v19 = vadd.f32 %v1785_v18, %v8734_v35  ;;  %v8737_v46 = vld [vmem:[#allocation83_spill] sm:$0xff]  ;;  %v8740_v35 = vld [vmem:[#allocation86_spill] sm:$0xff] }
 0x309   :  { %v1799_v41 = vadd.f32 %v1798_v37, %v1786_v19  ;;  %v8736_v19 = vld [vmem:[#allocation81_spill] sm:$0xff] }
 0x30b   :  { %v4533_v16 = vmul.f32 -1.442695, %v1799_v41 }
 0x30c   :  { %v1811_v45 = vpop.f32.mrf.mxu2  ;;  %v1878_v40 = vpop.f32.mrf.mxu3 }
 0x30d   :  { %4849 = vpow2.f32 %v4533_v16  ;;  %v1812_v48 = vadd.f32 %v1811_v45, %v8735_v42 }
 0x30e   :  { %v1787_v28 = vpop.f32.mrf.mxu0 }
 0x30f   :  { %v1825_v31 = vadd.f32 %v1824_v62, %v1812_v48 }
 0x311   :  { %v1976_v26 = vpop.f32.mrf.mxu1  ;;  %v4534_v33 = vmul.f32 -1.442695, %v1825_v31 }
 0x312   :  { %v2011_v59 = vrot.slane %v1976_v26, 5  ;;  %v2015_v50 = vrot.slane %v1976_v26, 6  ;;  %v8738_v26 = vld [vmem:[#allocation103_spill] sm:$0xff] }
 0x313   :  { %v4850_v47 = vpop.eup %4849  ;;  %4851 = vpow2.f32 %v4534_v33 }
 0x314   :  { %v6900_v30 = vadd.f32 1.0, %v4850_v47  ;;  %v1813_v54 = vpop.f32.mrf.mxu2  ;;  %v2027_v41 = vadd.f32 %v2011_v59, %v8736_v19  ;;  %v2031_v45 = vadd.f32 %v2015_v50, %v8737_v46 }
 0x316   :  { %4853 = vrcp.f32 %v6900_v30  ;;  %v1837_v37 = vpop.f32.mrf.mxu0  ;;  %v4538_v62 = vmul.f32 -1.442695, %v2027_v41  ;;  %v4539_v31 = vmul.f32 -1.442695, %v2031_v45  ;;  %vm1889_vm11 = vweird.f32 %v6900_v30 }
 0x317   :  { %v2002_v18 = vpop.f32.mrf.mxu3 }
 0x318   :  { %v2013_v59 = vrot.slane %v2002_v18, 5  ;;  %v2017_v45 = vrot.slane %v2002_v18, 6 }
 0x319   :  { %v1978_v28 = vpop.f32.mrf.mxu1  ;;  %v4852_v40 = vpop.eup %4851 }
 0x31a   :  { %v1902_v48 = vadd.f32 1.0, %v4852_v40  ;;  %v8739_v28 = vld [vmem:[#allocation102_spill] sm:$0xff]  ;;  %v2029_v14 = vadd.f32 %v2013_v59, %v8740_v35 }
 0x31b   :  { %v1838_v46 = vadd.f32 %v1837_v37, %v8739_v28  ;;  %v8745_v28 = vld [vmem:[#allocation6_spill] sm:$0xff] }
 0x31c   :  { %v6905_v16 = vpop.eup %4853  ;;  %4855 = vrcp.f32 %v1902_v48  ;;  %v1863_v33 = vpop.f32.mrf.mxu2  ;;  %vm1908_vm12 = vweird.f32 %v1902_v48  ;;  %v1914_v18 = vand.u32 2147483648, %v1902_v48 }
 0x31d   :  { %v1885_v54 = vmul.f32 %v6905_v16, %v6900_v30  ;;  %v1864_v47 = vadd.f32 %v1863_v33, %v8738_v26  ;;  %4857 = vpow2.f32 %v4538_v62  ;;  %v1851_v17 = vadd.f32 %v1850_v4, %v1838_v46 }
 0x31e   :  { %v1839_v19 = vpop.f32.mrf.mxu0  ;;  %4859 = vpow2.f32 %v4539_v31  ;;  %vm1890_vm13 = vweird.f32 %v6905_v16  ;;  %v1895_v46 = vand.u32 2147483648, %v6900_v30 }
 0x31f   :  { %v2004_v42 = vpop.f32.mrf.mxu3  ;;  %v1877_v50 = vadd.f32 %v1876_v2, %v1864_v47  ;;  %v1886_v40 = vsub.f32 1.0, %v1885_v54  ;;  %v4540_v2 = vmul.f32 -1.442695, %v2029_v14  ;;  %vm1891_vm15 = vmor %vm1889_vm11, %vm1890_vm13 }
 0x320   :  { %v8741_v42 = vld [vmem:[#allocation87_spill] sm:$0xff] }
 0x321   :  { %v4535_v23 = vmul.f32 -1.442695, %v1877_v50  ;;  %v1887_v19 = vmul.f32 %v6905_v16, %v1886_v40  ;;  %v2033_v31 = vadd.f32 %v2017_v45, %v8741_v42  ;;  %v8746_v42 = vld [vmem:[#allocation73_spill] sm:$0xff] }
 0x322   :  { %v4856_v41 = vpop.eup %4855 }
 0x323   :  { %v1904_v63 = vmul.f32 %v4856_v41, %v1902_v48  ;;  %v4858_v61 = vpop.eup %4857  ;;  %4861 = vpow2.f32 %v4535_v23  ;;  %vm1909_vm9 = vweird.f32 %v4856_v41  ;;  %v1912_v23 = vand.u32 2147483647, %v1902_v48 }
 0x324   :  { %v1865_v32 = vpop.f32.mrf.mxu2  ;;  %v4860_v33 = vpop.eup %4859  ;;  %v6914_v54 = vadd.f32 1.0, %v4858_v61  ;;  %4863 = vtanh.f32 %v1851_v17  ;;  %vm6921_vm14 = vmor %vm1908_vm12, %vm1909_vm9  ;;  %v1893_v61 = vand.u32 2147483647, %v6900_v30  ;;  %v4541_v50 = vmul.f32 -1.442695, %v2033_v31 }
 0x325   :  { %v1905_v62 = vsub.f32 1.0, %v1904_v63  ;;  %v6917_v59 = vadd.f32 1.0, %v4860_v33  ;;  %v1888_v32 = vadd.f32 %v6905_v16, %v1887_v19  ;;  %4865 = vpow2.f32 %v4540_v2 }
 0x326   :  { %v1963_v47 = vpop.f32.mrf.mxu0  ;;  %4867 = vrcp.f32 %v6914_v54  ;;  %v1915_v48 = vor.u32 1.1754944e-38, %v1914_v18  ;;  %vm1913_vm0 = vcmp.eq.f32.partialorder %v1912_v23, 8.507059e+37  ;;  %vm1894_vm1 = vcmp.eq.f32.partialorder %v1893_v61, 8.507059e+37  ;;  %v8744_v18 = vld [vmem:[#allocation69_spill] sm:$0xff] }
 0x327   :  { %v1906_v37 = vmul.f32 %v4856_v41, %v1905_v62  ;;  %v2010_v45 = vrot.slane %v1963_v47, 5  ;;  %4869 = vrcp.f32 %v6917_v59  ;;  %v1892_v62 = vsel %vm1891_vm15, %v6905_v16, %v1888_v32 }
 0x328   :  { %v2014_v2 = vrot.slane %v1963_v47, 6  ;;  %vm2085_vm7 = vweird.f32 %v6914_v54  ;;  %vm2100_vm9 = vweird.f32 %v6917_v59 }
 0x329   :  { %v1907_v63 = vadd.f32 %v4856_v41, %v1906_v37  ;;  %v4862_v4 = vpop.eup %4861 }
 0x32a   :  { %v6930_v40 = vadd.f32 1.0, %v4862_v4  ;;  %v4864_v19 = vpop.eup %4863  ;;  %v2030_v16 = vadd.f32 %v2014_v2, %v8746_v42 }
 0x32b   :  { %v1911_v17 = vsel %vm6921_vm14, %v4856_v41, %v1907_v63  ;;  %v1896_v41 = vor.u32 1.1754944e-38, %v1895_v46  ;;  %v2026_v63 = vadd.f32 %v2010_v45, %v8744_v18  ;;  %v4866_v4 = vpop.eup %4865 }
 0x32c   :  { %v6937_v33 = vpop.f32.mrf.mxu2  ;;  %4871 = vrcp.f32 %v6930_v40  ;;  %v1916_v31 = vsel %vm1913_vm0, %v1915_v48, %v1911_v17  ;;  %v6942_v30 = vpop.eup %4867  ;;  %v6948_v17 = vadd.f32 1.0, %v4866_v4  ;;  %v4537_v47 = vmul.f32 -1.442695, %v2030_v16 }
 0x32d   :  { %4873 = vpow2.f32 %v4541_v50  ;;  %v1897_v14 = vsel %vm1894_vm1, %v1896_v41, %v1892_v62  ;;  %v1938_v26 = vmul.f32 %v1916_v31, %v8745_v28  ;;  %v4536_v32 = vmul.f32 -1.442695, %v2026_v63  ;;  %v6946_v23 = vpop.eup %4869 }
 0x32e   :  { %v1965_v37 = vpop.f32.mrf.mxu0  ;;  %v1939_v46 = vmul.f32 %v4864_v19, %v1897_v14  ;;  %v2081_v50 = vmul.f32 %v6942_v30, %v6914_v54  ;;  %v2096_v28 = vmul.f32 %v6946_v23, %v6917_v59  ;;  %v1934_v4 = vand.u32 2147483648, %v6930_v40 }
 0x32f   :  { %4875 = vpow2.f32 %v4536_v32  ;;  %v1932_v16 = vand.u32 2147483647, %v6930_v40  ;;  %vm1928_vm3 = vweird.f32 %v6930_v40  ;;  %vm2086_vm6 = vweird.f32 %v6942_v30 }
 0x330   :  { %v6955_v62 = vadd.f32 %v1939_v46, %v1938_v26  ;;  %4877 = vpow2.f32 %v4537_v47  ;;  %v2082_v19 = vsub.f32 1.0, %v2081_v50  ;;  %v2097_v63 = vsub.f32 1.0, %v2096_v28  ;;  %vm7001_vm11 = vmor %vm2085_vm7, %vm2086_vm6 }
 0x331   :  { %4879 = vrcp.f32 %v6948_v17  ;;  %vm1933_vm5 = vcmp.eq.f32.partialorder %v1932_v16, 8.507059e+37  ;;  %v2106_v47 = vand.u32 2147483648, %v6917_v59  ;;  %v2089_v46 = vand.u32 2147483647, %v6914_v54 }
 0x332   :  { %v4872_v35 = vpop.eup %4871  ;;  %8747 = vst [vmem:[#allocation5_spill] sm:$0xff] %v6955_v62  ;;  %4881 = vtanh.f32 %v6955_v62  ;;  %v2098_v28 = vmul.f32 %v6946_v23, %v2097_v63  ;;  %v2104_v63 = vand.u32 2147483647, %v6917_v59  ;;  %vm2101_vm8 = vweird.f32 %v6946_v23 }
 0x333   :  { %v4874_v61 = vpop.eup %4873  ;;  %v1924_v45 = vmul.f32 %v4872_v35, %v6930_v40  ;;  %vm1929_vm2 = vweird.f32 %v4872_v35  ;;  %vm7006_vm12 = vcmp.eq.f32.partialorder %v2089_v46, 8.507059e+37  ;;  %vm7014_vm14 = vmor %vm2100_vm9, %vm2101_vm8  ;;  %vm2125_vm8 = vweird.f32 %v6948_v17 }
 0x334   :  { %v1991_v48 = vpop.f32.mrf.mxu2  ;;  %v6957_v31 = vadd.f32 1.0, %v4874_v61  ;;  %v2083_v61 = vmul.f32 %v6942_v30, %v2082_v19  ;;  %vm6970_vm4 = vmor %vm1928_vm3, %vm1929_vm2  ;;  %v2091_v19 = vand.u32 2147483648, %v6914_v54  ;;  %v2099_v62 = vadd.f32 %v6946_v23, %v2098_v28 }
 0x335   :  { %v1925_v41 = vsub.f32 1.0, %v1924_v45  ;;  %v4876_v37 = vpop.eup %4875  ;;  %vm7010_vm13 = vcmp.eq.f32.partialorder %v2104_v63, 8.507059e+37 }
 0x336   :  { %v6963_v26 = vadd.f32 1.0, %v4876_v37  ;;  %v4878_v32 = vpop.eup %4877  ;;  %4883 = vrcp.f32 %v6957_v31  ;;  %v2016_v37 = vrot.slane %v6937_v33, 6 }
 0x337   :  { %v1926_v2 = vmul.f32 %v4872_v35, %v1925_v41  ;;  %v6974_v45 = vadd.f32 1.0, %v4878_v32  ;;  %v6977_v48 = vpop.eup %4879  ;;  %v1935_v41 = vor.u32 1.1754944e-38, %v1934_v4 }
 0x338   :  { %4885 = vrcp.f32 %v6963_v26  ;;  %v4882_v32 = vpop.eup %4881  ;;  %vm2047_vm0 = vweird.f32 %v6963_v26  ;;  %vm2126_vm7 = vweird.f32 %v6977_v48 }
 0x339   :  { %v1927_v14 = vadd.f32 %v4872_v35, %v1926_v2  ;;  %v2012_v2 = vrot.slane %v6937_v33, 5  ;;  %4887 = vrcp.f32 %v6974_v45 }
 0x33b   :  { %v1931_v40 = vsel %vm6970_vm4, %v4872_v35, %v1927_v14  ;;  %v2121_v35 = vmul.f32 %v6977_v48, %v6948_v17  ;;  %v2084_v14 = vadd.f32 %v6942_v30, %v2083_v61  ;;  %v2028_v33 = vadd.f32 %v2012_v2, %v8652_v12 }
 0x33c   :  { %v1936_v4 = vsel %vm1933_vm5, %v1935_v41, %v1931_v40  ;;  %v6993_v50 = vpop.eup %4883  ;;  %v2092_v41 = vor.u32 1.1754944e-38, %v2091_v19  ;;  %v2032_v40 = vadd.f32 %v2016_v37, %v8653_v20  ;;  %v2103_v20 = vsel %vm7014_vm14, %v6946_v23, %v2099_v62 }
 0x33d   :  { %v1942_v16 = vmul.f32 %v4882_v32, %v1936_v4  ;;  %v2107_v32 = vor.u32 1.1754944e-38, %v2106_v47  ;;  %v2122_v19 = vsub.f32 1.0, %v2121_v35  ;;  %v2136_v37 = vmul.f32 %v6993_v50, %v6957_v31 }
 0x33e   :  { %v4886_v42 = vpop.eup %4885  ;;  %v2088_v46 = vsel %vm7001_vm11, %v6942_v30, %v2084_v14  ;;  %4889 = vtanh.f32 %v2028_v33  ;;  %v2053_v12 = vand.u32 2147483648, %v6963_v26  ;;  %v2051_v61 = vand.u32 2147483647, %v6963_v26  ;;  %vm2127_vm11 = vmor %vm2125_vm8, %vm2126_vm7 }
 0x33f   :  { %v2173_v18 = vrot.slane %v1942_v16, 5  ;;  %v2043_v54 = vmul.f32 %v4886_v42, %v6963_v26  ;;  %v4888_v2 = vpop.eup %4887  ;;  %4891 = vtanh.f32 %v2032_v40  ;;  %vm2048_vm15 = vweird.f32 %v4886_v42 }
 0x340   :  { %v2058_v63 = vmul.f32 %v4888_v2, %v6974_v45  ;;  %vm2063_vm1 = vweird.f32 %v4888_v2  ;;  %v2066_v23 = vand.u32 2147483647, %v6974_v45  ;;  %v2137_v62 = vsub.f32 1.0, %v2136_v37  ;;  %vm2049_vm2 = vmor %vm2047_vm0, %vm2048_vm15 }
 0x341   :  { %v2176_v47 = vpack.c.bf16 %v2173_v18, %v2173_v18  ;;  %v2044_v16 = vsub.f32 1.0, %v2043_v54  ;;  %v2068_v18 = vand.u32 2147483648, %v6974_v45  ;;  %v2054_v33 = vor.u32 1.1754944e-38, %v2053_v12 }
 0x342   :  { %v2059_v56 = vsub.f32 1.0, %v2058_v63  ;;  %v2093_v40 = vsel %vm7006_vm12, %v2092_v41, %v2088_v46  ;;  %vm2052_vm3 = vcmp.eq.f32.partialorder %v2051_v61, 8.507059e+37  ;;  %vm2062_vm4 = vweird.f32 %v6974_v45 }
 0x343   :  { %v2186_v35 = vshrl.u32 %v2176_v47, 16  ;;  %v2189_v34 = vshll.u32 %v2176_v47, 16  ;;  %v2045_v0 = vmul.f32 %v4886_v42, %v2044_v16  ;;  %vm2064_vm5 = vmor %vm2062_vm4, %vm2063_vm1  ;;  %v2108_v12 = vsel %vm7010_vm13, %v2107_v32, %v2103_v20 }
 0x344   :  { %v2060_v59 = vmul.f32 %v4888_v2, %v2059_v56  ;;  %v4890_v16 = vpop.eup %4889  ;;  %vm2067_vm6 = vcmp.eq.f32.partialorder %v2066_v23, 8.507059e+37  ;;  %v2138_v45 = vmul.f32 %v6993_v50, %v2137_v62  ;;  %v8759_v46 = vrot.slane %v6787_v39, 7 }
 0x345   :  { %v2188_v30 = vrot.slane %v2186_v35, 1  ;;  %v2191_v14 = vrot.slane %v2189_v34, 2  ;;  %v2046_v54 = vadd.f32 %v4886_v42, %v2045_v0  ;;  %v4892_v35 = vpop.eup %4891  ;;  %v2123_v0 = vmul.f32 %v6977_v48, %v2122_v19 }
 0x346   :  { %v2061_v26 = vadd.f32 %v4888_v2, %v2060_v59  ;;  %v2069_v34 = vor.u32 1.1754944e-38, %v2068_v18  ;;  %v2157_v61 = vmul.f32 %v8759_v46, %v2108_v12  ;;  %v2129_v39 = vand.u32 2147483647, %v6948_v17 }
 0x347   :  { %v2192_v47 = vor.u32 %v2191_v14, %v2188_v30  ;;  %v2050_v63 = vsel %vm2049_vm2, %v4886_v42, %v2046_v54  ;;  %v8758_v42 = vrot.slane %v6785_v22, 7  ;;  %v2124_v32 = vadd.f32 %v6977_v48, %v2123_v0 }
 0x348   :  { %v2055_v56 = vsel %vm2052_vm3, %v2054_v33, %v2050_v63  ;;  %v2065_v41 = vsel %vm2064_vm5, %v4888_v2, %v2061_v26  ;;  %v2131_v22 = vand.u32 2147483648, %v6948_v17  ;;  %v2139_v18 = vadd.f32 %v6993_v50, %v2138_v45 }
 0x349   :  { %2216 = vmatmul.bf16.vlgmr.msra.gmra.mxu1 %v2192_v47  ;;  %2242 = vmatmul.bf16.vlgmr.msrb.gmra.mxu3 %v2192_v47  ;;  %v2156_v4 = vmul.f32 %v8758_v42, %v2093_v40  ;;  %v2158_v37 = vmul.f32 %v4890_v16, %v2055_v56  ;;  %v2070_v19 = vsel %vm2067_vm6, %v2069_v34, %v2065_v41  ;;  %vm2141_vm9 = vweird.f32 %v6993_v50 }
 0x34a   :  { %2386 = vmatpush.bf16.msra.mxu1 %v8566_v44  ;;  %2412 = vmatpush.bf16.msrb.mxu3 %v8567_v27  ;;  %v2159_v28 = vmul.f32 %v4892_v35, %v2070_v19  ;;  %v2146_v30 = vand.u32 2147483648, %v6957_v31  ;;  %vm2140_vm12 = vweird.f32 %v6957_v31  ;;  %v2144_v14 = vand.u32 2147483647, %v6957_v31 }
 0x34b   :  { %v7046_v20 = vadd.f32 %v2158_v37, %v2156_v4  ;;  %v2128_v54 = vsel %vm2127_vm11, %v6977_v48, %v2124_v32  ;;  %v2132_v59 = vor.u32 1.1754944e-38, %v2131_v22  ;;  %vm2142_vm13 = vmor %vm2140_vm12, %vm2141_vm9  ;;  %vm2130_vm14 = vcmp.eq.f32.partialorder %v2129_v39, 8.507059e+37  ;;  %v8762_v32 = vld [vmem:[#allocation34_spill] sm:$0xff]  ;;  %v8763_v22 = vld [vmem:[#allocation35_spill] sm:$0xff] }
 0x34c   :  { %v7051_v2 = vadd.f32 %v2159_v28, %v2157_v61  ;;  %v2143_v17 = vsel %vm2142_vm13, %v6993_v50, %v2139_v18  ;;  %v2147_v62 = vor.u32 1.1754944e-38, %v2146_v30  ;;  %vm2145_vm15 = vcmp.eq.f32.partialorder %v2144_v14, 8.507059e+37  ;;  %v8760_v61 = vld [vmem:[#allocation8_spill] sm:$0xff]  ;;  %v8764_v39 = vld [vmem:[#allocation11_spill] sm:$0xff]  ;;  %v8767_v14 = vld [vmem:[#allocation37_spill] sm:$0xff] }
 0x34d   :  { %4893 = vtanh.f32 %v7046_v20  ;;  %v2133_v33 = vsel %vm2130_vm14, %v2132_v59, %v2128_v54  ;;  %vm2169_vm0 = vcmask 1044484   ;;  %v8761_v28 = vld [vmem:[#allocation16_spill] sm:$0xff]  ;;  %v8768_v54 = vld [vmem:[#allocation14_spill] sm:$0xff] }
 0x34e   :  { %2387 = vmatpush.bf16.msra.mxu1 %v8568_v53  ;;  %2413 = vmatpush.bf16.msrb.mxu3 %v8569_v6  ;;  %4895 = vtanh.f32 %v7051_v2  ;;  %v2148_v31 = vsel %vm2145_vm15, %v2147_v62, %v2143_v17  ;;  %v8765_v18 = vld [vmem:[#allocation20_spill] sm:$0xff]  ;;  %v8770_v17 = vld [vmem:[#allocation38_spill] sm:$0xff] }
 0x34f   :  { %v8766_v30 = vld [vmem:[#allocation36_spill] sm:$0xff]  ;;  %v8772_v62 = vld [vmem:[#allocation18_spill] sm:$0xff] }
 0x350   :  { %v8769_v59 = vld [vmem:[#allocation24_spill] sm:$0xff] }
 0x352   :  { %2388 = vmatpush.bf16.msra.mxu1 %v8570_v36  ;;  %2414 = vmatpush.bf16.msrb.mxu3 %v8571_v52 }
 0x353   :  { %v4894_v23 = vpop.eup %4893 }
 0x354   :  { %v2164_v40 = vmul.f32 %v4894_v23, %v2133_v33  ;;  %v4896_v16 = vpop.eup %4895  ;;  %v8771_v23 = vld [vmem:[#allocation39_spill] sm:$0xff] }
 0x355   :  { %v2165_v48 = vmul.f32 %v4896_v16, %v2148_v31  ;;  %v8773_v33 = vld [vmem:[#allocation27_spill] sm:$0xff]  ;;  %v8775_v16 = vld [vmem:[#allocation41_spill] sm:$0xff]  ;;  %v8776_v31 = vld [vmem:[#allocation22_spill] sm:$0xff] }
 0x356   :  { %2389 = vmatpush.bf16.msra.mxu1 %v8572_v11  ;;  %2415 = vmatpush.bf16.msrb.mxu3 %v8573_v15  ;;  %v2362_v63 = vpack.c.bf16 %v2164_v40, %v2164_v40 }
 0x357   :  { %v2168_v26 = vrot.slane %v2165_v48, 7  ;;  %v2363_v35 = vpack.c.bf16 %v2165_v48, %v2165_v48  ;;  %v8777_v48 = vld [vmem:[#allocation28_spill] sm:$0xff] }
 0x358   :  { %v2366_v0 = vunpack.c.l.b16 %v2362_v63  ;;  %v8778_v63 = vld [vmem:[#allocation42_spill] sm:$0xff] }
 0x359   :  { %2268 = vmatmul.bf16.vlgmr.msrb.gmra.mxu1 %v2192_v47  ;;  %2294 = vmatmul.bf16.vlgmr.msra.gmra.mxu3 %v2192_v47  ;;  %v2170_v50 = vsel %vm2169_vm0, %v2168_v26, %v2164_v40  ;;  %v2367_v56 = vunpack.c.l.b16 %v2363_v35  ;;  %v8774_v40 = vld [vmem:[#allocation40_spill] sm:$0xff]  ;;  %v8780_v35 = vld [vmem:[#allocation43_spill] sm:$0xff] }
 0x35a   :  { %2390 = vmatpush.bf16.msra.mxu1 %v8574_v1  ;;  %2416 = vmatpush.bf16.msrb.mxu3 %v8575_v8  ;;  %v2368_v34 = vrot.slane %v2366_v0, 3  ;;  %v2175_v12 = vpack.c.bf16 %v2170_v50, %v2170_v50  ;;  %v8779_v26 = vld [vmem:[#allocation44_spill] sm:$0xff]  ;;  %v8781_v0 = vld [vmem:[#allocation45_spill] sm:$0xff]  ;;  %v8782_v50 = vld [vmem:[#allocation46_spill] sm:$0xff] }
 0x35b   :  { %v2369_v41 = vrot.slane %v2367_v56, 2  ;;  %v8783_v56 = vld [vmem:[#allocation47_spill] sm:$0xff] }
 0x35c   :  { %v2178_v42 = vshrl.u32 %v2175_v12, 16  ;;  %v2181_v4 = vshll.u32 %v2175_v12, 16  ;;  %v8785_v12 = vld [vmem:[#allocation49_spill] sm:$0xff] }
 0x35d   :  { %v2370_v47 = vsel %vm624_vm10, %v2369_v41, %v2368_v34  ;;  %v8784_v34 = vld [vmem:[#allocation48_spill] sm:$0xff]  ;;  %v8786_v41 = vld [vmem:[#allocation50_spill] sm:$0xff] }
 0x35e   :  { %2391 = vmatpush.bf16.msra.mxu1 %v8576_v25  ;;  %2417 = vmatpush.bf16.msrb.mxu3 %v8577_v58  ;;  %v2180_v37 = vrot.slane %v2178_v42, 1  ;;  %v2183_v45 = vrot.slane %v2181_v4, 2  ;;  %v2371_v46 = vpack.c.b16 %v2370_v47, %v2370_v47  ;;  %v8787_v42 = vld [vmem:[#allocation51_spill] sm:$0xff]  ;;  %v8788_v4 = vld [vmem:[#allocation52_spill] sm:$0xff]  ;;  %v8789_v47 = vld [vmem:[#allocation53_spill] sm:$0xff] }
 0x360   :  { %v2184_v19 = vor.u32 %v2183_v45, %v2180_v37  ;;  %v8790_v37 = vld [vmem:[#allocation54_spill] sm:$0xff]  ;;  %v8791_v45 = vld [vmem:[#allocation55_spill] sm:$0xff] }
 0x362   :  { %2392 = vmatpush.bf16.msra.mxu1 %v8578_v10  ;;  %2418 = vmatpush.bf16.msrb.mxu3 %v8579_v49 }
 0x363   :  { %2203 = vmatmul.bf16.vlgmr.msra.gmra.mxu0 %v2184_v19  ;;  %2229 = vmatmul.bf16.vlgmr.msrb.gmra.mxu2 %v2184_v19 }
 0x364   :  { %2373 = vmatpush.bf16.msra.mxu0 %v5188_v3  ;;  %2399 = vmatpush.bf16.msrb.mxu2 %v5254_v29 }
 0x366   :  { %2393 = vmatpush.bf16.msra.mxu1 %v5510_v60  ;;  %2419 = vmatpush.bf16.msrb.mxu3 %v5498_v55 }
 0x368   :  { %2374 = vmatpush.bf16.msra.mxu0 %v5200_v7  ;;  %2400 = vmatpush.bf16.msrb.mxu2 %v5286_v38 }
 0x369   :  { %2394 = vmatmul.bf16.vlgmr.msra.gmra.mxu1 %v2371_v46  ;;  %2420 = vmatmul.bf16.vlgmr.msrb.gmra.mxu3 %v2371_v46 }
 0x36a   :  { %2615 = vmatpush.bf16.msrb.mxu1 %v8580_v21  ;;  %2641 = vmatpush.bf16.msra.mxu3 %v5506_v57 }
 0x36c   :  { %2375 = vmatpush.bf16.msra.mxu0 %v5246_v24  ;;  %2401 = vmatpush.bf16.msrb.mxu2 %v5331_v51 }
 0x36e   :  { %2616 = vmatpush.bf16.msrb.mxu1 %v5530_v5  ;;  %2642 = vmatpush.bf16.msra.mxu3 %v5541_v13 }
 0x370   :  { %2376 = vmatpush.bf16.msra.mxu0 %v8760_v61  ;;  %2402 = vmatpush.bf16.msrb.mxu2 %v8761_v28 }
 0x372   :  { %2617 = vmatpush.bf16.msrb.mxu1 %v8668_v9  ;;  %2643 = vmatpush.bf16.msra.mxu3 %v8669_v43 }
 0x373   :  { %2255 = vmatmul.bf16.vlgmr.msrb.gmra.mxu0 %v2184_v19  ;;  %2281 = vmatmul.bf16.vlgmr.msra.gmra.mxu2 %v2184_v19  ;;  %v8792_v19 = vld [vmem:[#allocation56_spill] sm:$0xff] }
 0x374   :  { %2377 = vmatpush.bf16.msra.mxu0 %v8764_v39  ;;  %2403 = vmatpush.bf16.msrb.mxu2 %v8765_v18 }
 0x376   :  { %2618 = vmatpush.bf16.msrb.mxu1 %v8762_v32  ;;  %2644 = vmatpush.bf16.msra.mxu3 %v8763_v22 }
 0x378   :  { %2378 = vmatpush.bf16.msra.mxu0 %v8768_v54  ;;  %2404 = vmatpush.bf16.msrb.mxu2 %v8769_v59 }
 0x37a   :  { %2619 = vmatpush.bf16.msrb.mxu1 %v8766_v30  ;;  %2645 = vmatpush.bf16.msra.mxu3 %v8767_v14 }
 0x37c   :  { %2379 = vmatpush.bf16.msra.mxu0 %v8772_v62  ;;  %2405 = vmatpush.bf16.msrb.mxu2 %v8773_v33 }
 0x37e   :  { %2620 = vmatpush.bf16.msrb.mxu1 %v8770_v17  ;;  %2646 = vmatpush.bf16.msra.mxu3 %v8771_v23 }
 0x380   :  { %2380 = vmatpush.bf16.msra.mxu0 %v8776_v31  ;;  %2406 = vmatpush.bf16.msrb.mxu2 %v8777_v48  ;;  %v8831_v31 = vld [vmem:[#allocation83_spill] sm:$0xff] }
 0x382   :  { %2621 = vmatpush.bf16.msrb.mxu1 %v8774_v40  ;;  %2647 = vmatpush.bf16.msra.mxu3 %v8775_v16 }
 0x383   :  { %2381 = vmatmul.bf16.vlgmr.msra.gmra.mxu0 %v2371_v46  ;;  %2407 = vmatmul.bf16.vlgmr.msrb.gmra.mxu2 %v2371_v46  ;;  %v8793_v46 = vld [vmem:[#allocation57_spill] sm:$0xff] }
 0x384   :  { %2602 = vmatpush.bf16.msrb.mxu0 %v8778_v63  ;;  %2628 = vmatpush.bf16.msra.mxu2 %v8779_v26 }
 0x386   :  { %2622 = vmatpush.bf16.msrb.mxu1 %v8780_v35  ;;  %2648 = vmatpush.bf16.msra.mxu3 %v8781_v0  ;;  %v8796_v0 = vld [vmem:[#allocation60_spill] sm:$0xff]  ;;  %v8799_v35 = vld [vmem:[#allocation63_spill] sm:$0xff] }
 0x388   :  { %2603 = vmatpush.bf16.msrb.mxu0 %v8784_v34  ;;  %2629 = vmatpush.bf16.msra.mxu2 %v8785_v12 }
 0x38a   :  { %2667 = vmatpush.bf16.msra.mxu1 %v8782_v50  ;;  %2693 = vmatpush.bf16.msrb.mxu3 %v8783_v56  ;;  %v8794_v56 = vld [vmem:[#allocation58_spill] sm:$0xff]  ;;  %v8795_v50 = vld [vmem:[#allocation59_spill] sm:$0xff] }
 0x38c   :  { %2604 = vmatpush.bf16.msrb.mxu0 %v8788_v4  ;;  %2630 = vmatpush.bf16.msra.mxu2 %v8789_v47  ;;  %v8800_v47 = vld [vmem:[#allocation64_spill] sm:$0xff] }
 0x38e   :  { %2668 = vmatpush.bf16.msra.mxu1 %v8786_v41  ;;  %2694 = vmatpush.bf16.msrb.mxu3 %v8787_v42  ;;  %v8797_v41 = vld [vmem:[#allocation61_spill] sm:$0xff]  ;;  %v8798_v42 = vld [vmem:[#allocation62_spill] sm:$0xff] }
 0x390   :  { %2605 = vmatpush.bf16.msrb.mxu0 %v8792_v19  ;;  %2631 = vmatpush.bf16.msra.mxu2 %v8793_v46  ;;  %v8803_v19 = vld [vmem:[#allocation67_spill] sm:$0xff]  ;;  %v8804_v46 = vld [vmem:[#allocation68_spill] sm:$0xff] }
 0x392   :  { %2669 = vmatpush.bf16.msra.mxu1 %v8790_v37  ;;  %2695 = vmatpush.bf16.msrb.mxu3 %v8791_v45  ;;  %v8801_v37 = vld [vmem:[#allocation65_spill] sm:$0xff]  ;;  %v8802_v45 = vld [vmem:[#allocation66_spill] sm:$0xff] }
 0x394   :  { %2606 = vmatpush.bf16.msrb.mxu0 %v8796_v0  ;;  %2632 = vmatpush.bf16.msra.mxu2 %v8797_v41  ;;  %v8807_v0 = vld [vmem:[#allocation72_spill] sm:$0xff]  ;;  %v8808_v41 = vld [vmem:[#allocation74_spill] sm:$0xff] }
 0x396   :  { %2670 = vmatpush.bf16.msra.mxu1 %v8794_v56  ;;  %2696 = vmatpush.bf16.msrb.mxu3 %v8795_v50  ;;  %v8805_v56 = vld [vmem:[#allocation70_spill] sm:$0xff]  ;;  %v8806_v50 = vld [vmem:[#allocation71_spill] sm:$0xff] }
 0x398   :  { %2607 = vmatpush.bf16.msrb.mxu0 %v8800_v47  ;;  %2633 = vmatpush.bf16.msra.mxu2 %v8801_v37  ;;  %v8811_v47 = vld [vmem:[#allocation78_spill] sm:$0xff]  ;;  %v8812_v37 = vld [vmem:[#allocation77_spill] sm:$0xff] }
 0x39a   :  { %2671 = vmatpush.bf16.msra.mxu1 %v8798_v42  ;;  %2697 = vmatpush.bf16.msrb.mxu3 %v8799_v35  ;;  %v8809_v42 = vld [vmem:[#allocation75_spill] sm:$0xff]  ;;  %v8810_v35 = vld [vmem:[#allocation76_spill] sm:$0xff] }
 0x39c   :  { %2608 = vmatpush.bf16.msrb.mxu0 %v8804_v46  ;;  %2634 = vmatpush.bf16.msra.mxu2 %v8805_v56  ;;  %v8815_v46 = vld [vmem:[#allocation82_spill] sm:$0xff]  ;;  %v8816_v56 = vld [vmem:[#allocation84_spill] sm:$0xff] }
 0x39e   :  { %2672 = vmatpush.bf16.msra.mxu1 %v8802_v45  ;;  %2698 = vmatpush.bf16.msrb.mxu3 %v8803_v19  ;;  %v8813_v45 = vld [vmem:[#allocation79_spill] sm:$0xff]  ;;  %v8814_v19 = vld [vmem:[#allocation80_spill] sm:$0xff] }
 0x3a0   :  { %2609 = vmatpush.bf16.msrb.mxu0 %v8808_v41  ;;  %2635 = vmatpush.bf16.msra.mxu2 %v8809_v42  ;;  %v8819_v41 = vld [vmem:[#allocation89_spill] sm:$0xff]  ;;  %v8820_v42 = vld [vmem:[#allocation90_spill] sm:$0xff] }
 0x3a2   :  { %2673 = vmatpush.bf16.msra.mxu1 %v8806_v50  ;;  %2699 = vmatpush.bf16.msrb.mxu3 %v8807_v0  ;;  %v8817_v50 = vld [vmem:[#allocation85_spill] sm:$0xff]  ;;  %v8818_v0 = vld [vmem:[#allocation88_spill] sm:$0xff] }
 0x3a4   :  { %2654 = vmatpush.bf16.msra.mxu0 %v8810_v35  ;;  %2680 = vmatpush.bf16.msrb.mxu2 %v8811_v47  ;;  %v8821_v35 = vld [vmem:[#allocation91_spill] sm:$0xff]  ;;  %v8822_v47 = vld [vmem:[#allocation94_spill] sm:$0xff] }
 0x3a6   :  { %2674 = vmatpush.bf16.msra.mxu1 %v8812_v37  ;;  %2700 = vmatpush.bf16.msrb.mxu3 %v8813_v45  ;;  %v8823_v37 = vld [vmem:[#allocation95_spill] sm:$0xff]  ;;  %v8824_v45 = vld [vmem:[#allocation96_spill] sm:$0xff] }
 0x3a8   :  { %2655 = vmatpush.bf16.msra.mxu0 %v8814_v19  ;;  %2681 = vmatpush.bf16.msrb.mxu2 %v8815_v46  ;;  %v8825_v19 = vld [vmem:[#allocation97_spill] sm:$0xff]  ;;  %v8826_v46 = vld [vmem:[#allocation98_spill] sm:$0xff] }
 0x3ac   :  { %2656 = vmatpush.bf16.msra.mxu0 %v8816_v56  ;;  %2682 = vmatpush.bf16.msrb.mxu2 %v8817_v50  ;;  %v8827_v56 = vld [vmem:[#allocation99_spill] sm:$0xff] }
 0x3b0   :  { %2657 = vmatpush.bf16.msra.mxu0 %v8818_v0  ;;  %2683 = vmatpush.bf16.msrb.mxu2 %v8819_v41 }
 0x3b4   :  { %2658 = vmatpush.bf16.msra.mxu0 %v8820_v42  ;;  %2684 = vmatpush.bf16.msrb.mxu2 %v8821_v35 }
 0x3b8   :  { %2659 = vmatpush.bf16.msra.mxu0 %v8822_v47  ;;  %2685 = vmatpush.bf16.msrb.mxu2 %v8823_v37  ;;  %v8828_v47 = vld [vmem:[#allocation100_spill] sm:$0xff] }
 0x3bc   :  { %2660 = vmatpush.bf16.msra.mxu0 %v8824_v45  ;;  %2686 = vmatpush.bf16.msrb.mxu2 %v8825_v19 }
 0x3c0   :  { %2661 = vmatpush.bf16.msra.mxu0 %v8826_v46  ;;  %2687 = vmatpush.bf16.msrb.mxu2 %v8827_v56  ;;  %v8829_v46 = vld [vmem:[#allocation101_spill] sm:$0xff] }
 0x3c6   :  { %v2217_v50 = vpop.f32.mrf.mxu1 }
 0x3cc   :  { %v2243_v0 = vpop.f32.mrf.mxu3 }
 0x3ce   :  { %v2219_v4 = vpop.f32.mrf.mxu1 }
 0x3d4   :  { %v2245_v41 = vpop.f32.mrf.mxu3 }
 0x3d5   :  { %v8830_v41 = vld [vmem:[#allocation81_spill] sm:$0xff] }
 0x3d6   :  { %v7159_v16 = vpop.f32.mrf.mxu1 }
 0x3dc   :  { %v2295_v42 = vpop.f32.mrf.mxu3 }
 0x3de   :  { %v2271_v35 = vpop.f32.mrf.mxu1 }
 0x3e0   :  { %v2204_v40 = vpop.f32.mrf.mxu0 }
 0x3e1   :  { %v2205_v12 = vadd.f32 %v2204_v40, %v8828_v47 }
 0x3e3   :  { %v2218_v37 = vadd.f32 %v2217_v50, %v2205_v12 }
 0x3e4   :  { %v2297_v34 = vpop.f32.mrf.mxu3 }
 0x3e5   :  { %v4542_v45 = vmul.f32 -1.442695, %v2218_v37 }
 0x3e6   :  { %v2230_v23 = vpop.f32.mrf.mxu2  ;;  %v2395_v19 = vpop.f32.mrf.mxu1 }
 0x3e7   :  { %4897 = vpow2.f32 %v4542_v45  ;;  %v2231_v17 = vadd.f32 %v2230_v23, %v8829_v46  ;;  %v2430_v56 = vrot.slane %v2395_v19, 4  ;;  %v2434_v4 = vrot.slane %v2395_v19, 5  ;;  %v8833_v19 = vld [vmem:[#allocation87_spill] sm:$0xff] }
 0x3e8   :  { %v2206_v26 = vpop.f32.mrf.mxu0 }
 0x3e9   :  { %v2244_v63 = vadd.f32 %v2243_v0, %v2231_v17  ;;  %v2446_v14 = vadd.f32 %v2430_v56, %v8830_v41  ;;  %v2450_v40 = vadd.f32 %v2434_v4, %v8831_v31 }
 0x3eb   :  { %v4543_v30 = vmul.f32 -1.442695, %v2244_v63  ;;  %v4547_v50 = vmul.f32 -1.442695, %v2446_v14  ;;  %v4548_v23 = vmul.f32 -1.442695, %v2450_v40 }
 0x3ec   :  { %v2421_v48 = vpop.f32.mrf.mxu3  ;;  %v8832_v63 = vld [vmem:[#allocation86_spill] sm:$0xff] }
 0x3ed   :  { %v4898_v35 = vpop.eup %4897  ;;  %4899 = vpow2.f32 %v4543_v30  ;;  %v2432_v47 = vrot.slane %v2421_v48, 4  ;;  %v2436_v26 = vrot.slane %v2421_v48, 5 }
 0x3ee   :  { %v2232_v34 = vpop.f32.mrf.mxu2  ;;  %v2397_v12 = vpop.f32.mrf.mxu1  ;;  %v7165_v37 = vadd.f32 1.0, %v4898_v35  ;;  %4901 = vpow2.f32 %v4547_v50 }
 0x3ef   :  { %v2448_v56 = vadd.f32 %v2432_v47, %v8832_v63  ;;  %v2452_v14 = vadd.f32 %v2436_v26, %v8833_v19  ;;  %v8835_v19 = vld [vmem:[#allocation102_spill] sm:$0xff] }
 0x3f0   :  { %v2256_v45 = vpop.f32.mrf.mxu0  ;;  %4903 = vrcp.f32 %v7165_v37  ;;  %vm2308_vm5 = vweird.f32 %v7165_v37 }
 0x3f1   :  { %4905 = vpow2.f32 %v4548_v23  ;;  %v4549_v34 = vmul.f32 -1.442695, %v2448_v56  ;;  %v4550_v48 = vmul.f32 -1.442695, %v2452_v14  ;;  %v8834_v56 = vld [vmem:[#allocation103_spill] sm:$0xff]  ;;  %v2257_v63 = vadd.f32 %v2256_v45, %v8835_v19  ;;  %v8836_v45 = vld [vmem:[#allocation69_spill] sm:$0xff] }
 0x3f3   :  { %v4900_v17 = vpop.eup %4899  ;;  %v2270_v33 = vadd.f32 %v7159_v16, %v2257_v63 }
 0x3f4   :  { %v7168_v0 = vadd.f32 1.0, %v4900_v17  ;;  %v2423_v30 = vpop.f32.mrf.mxu3  ;;  %v4902_v35 = vpop.eup %4901 }
 0x3f5   :  { %v7175_v40 = vadd.f32 1.0, %v4902_v35 }
 0x3f6   :  { %4907 = vrcp.f32 %v7168_v0  ;;  %v2282_v4 = vpop.f32.mrf.mxu2  ;;  %v7173_v50 = vpop.eup %4903  ;;  %vm2327_vm3 = vweird.f32 %v7168_v0 }
 0x3f7   :  { %v4906_v31 = vpop.eup %4905  ;;  %v2304_v47 = vmul.f32 %v7173_v50, %v7165_v37  ;;  %4909 = vpow2.f32 %v4549_v34  ;;  %v2283_v30 = vadd.f32 %v2282_v4, %v8834_v56  ;;  %vm2309_vm2 = vweird.f32 %v7173_v50 }
 0x3f8   :  { %v2258_v12 = vpop.f32.mrf.mxu0  ;;  %4911 = vpow2.f32 %v4550_v48  ;;  %v7183_v26 = vadd.f32 1.0, %v4906_v31  ;;  %vm7225_vm6 = vmor %vm2308_vm5, %vm2309_vm2  ;;  %vm2504_vm11 = vweird.f32 %v7175_v40 }
 0x3f9   :  { %4913 = vrcp.f32 %v7175_v40  ;;  %v2305_v12 = vsub.f32 1.0, %v2304_v47  ;;  %v2296_v34 = vadd.f32 %v2295_v42, %v2283_v30  ;;  %v2314_v47 = vand.u32 2147483648, %v7165_v37 }
 0x3fa   :  { %4915 = vrcp.f32 %v7183_v26  ;;  %vm2519_vm12 = vweird.f32 %v7183_v26 }
 0x3fb   :  { %v2306_v4 = vmul.f32 %v7173_v50, %v2305_v12 }
 0x3fc   :  { %v7177_v17 = vpop.eup %4907 }
 0x3fd   :  { %v2323_v23 = vmul.f32 %v7177_v17, %v7168_v0  ;;  %v4910_v46 = vpop.eup %4909  ;;  %vm2328_vm1 = vweird.f32 %v7177_v17 }
 0x3fe   :  { %v2284_v14 = vpop.f32.mrf.mxu2  ;;  %v4912_v32 = vpop.eup %4911  ;;  %v7197_v56 = vadd.f32 1.0, %v4910_v46  ;;  %v2307_v46 = vadd.f32 %v7173_v50, %v2306_v4  ;;  %vm7216_vm4 = vmor %vm2327_vm3, %vm2328_vm1 }
 0x3ff   :  { %v2324_v35 = vsub.f32 1.0, %v2323_v23  ;;  %v7190_v31 = vpop.eup %4913  ;;  %v4544_v14 = vmul.f32 -1.442695, %v2296_v34  ;;  %v7199_v42 = vadd.f32 1.0, %v4912_v32 }
 0x400   :  { %v2382_v41 = vpop.f32.mrf.mxu0  ;;  %v2500_v16 = vmul.f32 %v7190_v31, %v7175_v40  ;;  %vm2505_vm9 = vweird.f32 %v7190_v31 }
 0x401   :  { %v2429_v22 = vrot.slane %v2382_v41, 4  ;;  %v2325_v48 = vmul.f32 %v7177_v17, %v2324_v35  ;;  %v2433_v23 = vrot.slane %v2382_v41, 5  ;;  %4917 = vpow2.f32 %v4544_v14  ;;  %v8837_v35 = vld [vmem:[#allocation73_spill] sm:$0xff]  ;;  %v7207_v41 = vpop.eup %4915  ;;  %vm7272_vm13 = vmor %vm2504_vm11, %vm2505_vm9 }
 0x402   :  { %4919 = vtanh.f32 %v2270_v33  ;;  %v2331_v14 = vand.u32 2147483647, %v7168_v0  ;;  %v2501_v33 = vsub.f32 1.0, %v2500_v16  ;;  %v2515_v4 = vmul.f32 %v7207_v41, %v7183_v26 }
 0x403   :  { %v2445_v19 = vadd.f32 %v2429_v22, %v8836_v45  ;;  %v2326_v63 = vadd.f32 %v7177_v17, %v2325_v48  ;;  %v2449_v12 = vadd.f32 %v2433_v23, %v8837_v35  ;;  %v2333_v22 = vand.u32 2147483648, %v7168_v0 }
 0x404   :  { %v2312_v48 = vand.u32 2147483647, %v7165_v37  ;;  %v2311_v37 = vsel %vm7225_vm6, %v7173_v50, %v2307_v46  ;;  %v2315_v16 = vor.u32 1.1754944e-38, %v2314_v47  ;;  %vm2332_vm7 = vcmp.eq.f32.partialorder %v2331_v14, 8.507059e+37  ;;  %v8842_v46 = vld [vmem:[#allocation5_spill] sm:$0xff] }
 0x405   :  { %v4545_v34 = vmul.f32 -1.442695, %v2445_v19  ;;  %v4546_v45 = vmul.f32 -1.442695, %v2449_v12  ;;  %v2330_v23 = vsel %vm7216_vm4, %v7177_v17, %v2326_v63  ;;  %v2502_v17 = vmul.f32 %v7190_v31, %v2501_v33 }
 0x406   :  { %v7201_v30 = vpop.f32.mrf.mxu2  ;;  %vm2313_vm8 = vcmp.eq.f32.partialorder %v2312_v48, 8.507059e+37  ;;  %v2516_v63 = vsub.f32 1.0, %v2515_v4  ;;  %v2525_v48 = vand.u32 2147483648, %v7183_v26  ;;  %vm2520_vm14 = vweird.f32 %v7207_v41 }
 0x407   :  { %4921 = vpow2.f32 %v4545_v34  ;;  %v4918_v12 = vpop.eup %4917  ;;  %v2334_v34 = vor.u32 1.1754944e-38, %v2333_v22  ;;  %v2316_v19 = vsel %vm2313_vm8, %v2315_v16, %v2311_v37  ;;  %vm7291_vm0 = vmor %vm2519_vm12, %vm2520_vm14 }
 0x408   :  { %v2384_v32 = vpop.f32.mrf.mxu0  ;;  %4923 = vrcp.f32 %v7197_v56  ;;  %v4920_v35 = vpop.eup %4919  ;;  %v2517_v4 = vmul.f32 %v7207_v41, %v2516_v63 }
 0x409   :  { %4925 = vrcp.f32 %v7199_v42  ;;  %v7236_v32 = vadd.f32 1.0, %v4918_v12  ;;  %v2335_v62 = vsel %vm2332_vm7, %v2334_v34, %v2330_v23  ;;  %v2358_v33 = vmul.f32 %v4920_v35, %v2316_v19 }
 0x40a   :  { %4927 = vpow2.f32 %v4546_v45  ;;  %v2510_v45 = vand.u32 2147483648, %v7175_v40  ;;  %v2357_v14 = vmul.f32 %v2335_v62, %v8842_v46  ;;  %v2431_v23 = vrot.slane %v7201_v30, 4 }
 0x40b   :  { %4929 = vrcp.f32 %v7236_v32  ;;  %v2503_v12 = vadd.f32 %v7190_v31, %v2502_v17  ;;  %v2435_v35 = vrot.slane %v7201_v30, 5  ;;  %v2508_v17 = vand.u32 2147483647, %v7175_v40 }
 0x40c   :  { %v7266_v16 = vadd.f32 %v2358_v33, %v2357_v14  ;;  %v2511_v19 = vor.u32 1.1754944e-38, %v2510_v45  ;;  %v2526_v46 = vor.u32 1.1754944e-38, %v2525_v48  ;;  %v2523_v30 = vand.u32 2147483647, %v7183_v26  ;;  %v8845_v14 = vld [vmem:[#allocation92_spill] sm:$0xff]  ;;  %v8846_v48 = vld [vmem:[#allocation93_spill] sm:$0xff] }
 0x40d   :  { %v4922_v9 = vpop.eup %4921  ;;  %v2447_v33 = vadd.f32 %v2431_v23, %v8845_v14  ;;  %v2507_v40 = vsel %vm7272_vm13, %v7190_v31, %v2503_v12  ;;  %v2518_v47 = vadd.f32 %v7207_v41, %v2517_v4  ;;  %v2451_v5 = vadd.f32 %v2435_v35, %v8846_v48 }
 0x40e   :  { %v2410_v43 = vpop.f32.mrf.mxu2  ;;  %v7240_v22 = vpop.eup %4923  ;;  %v7242_v0 = vadd.f32 1.0, %v4922_v9  ;;  %v2353_v18 = vand.u32 2147483648, %v7236_v32  ;;  %vm2509_vm15 = vcmp.eq.f32.partialorder %v2508_v17, 8.507059e+37  ;;  %v2351_v12 = vand.u32 2147483647, %v7236_v32 }
 0x40f   :  { %v7244_v50 = vpop.eup %4925  ;;  %v2540_v62 = vmul.f32 %v7240_v22, %v7197_v56  ;;  %v2512_v23 = vsel %vm2509_vm15, %v2511_v19, %v2507_v40  ;;  %v2522_v63 = vsel %vm7291_vm0, %v7207_v41, %v2518_v47  ;;  %vm2347_vm2 = vweird.f32 %v7236_v32 }
 0x410   :  { %v4928_v43 = vpop.eup %4927  ;;  %4931 = vrcp.f32 %v7242_v0  ;;  %v7262_v34 = vmul.f32 %v7244_v50, %v7199_v42  ;;  %v2472_v35 = vand.u32 2147483648, %v7242_v0  ;;  %v2470_v40 = vand.u32 2147483647, %v7242_v0 }
 0x411   :  { %v7253_v9 = vadd.f32 1.0, %v4928_v43  ;;  %v4930_v37 = vpop.eup %4929  ;;  %v2541_v54 = vsub.f32 1.0, %v2540_v62  ;;  %vm2466_vm5 = vweird.f32 %v7242_v0  ;;  %vm2352_vm6 = vcmp.eq.f32.partialorder %v2351_v12, 8.507059e+37 }
 0x412   :  { %v2343_v43 = vmul.f32 %v4930_v37, %v7236_v32  ;;  %v2556_v13 = vsub.f32 1.0, %v7262_v34  ;;  %vm2348_vm1 = vweird.f32 %v4930_v37  ;;  %v2473_v47 = vor.u32 1.1754944e-38, %v2472_v35 }
 0x413   :  { %4933 = vrcp.f32 %v7253_v9  ;;  %vm2349_vm3 = vmor %vm2347_vm2, %vm2348_vm1  ;;  %v2487_v32 = vand.u32 2147483648, %v7253_v9  ;;  %v2542_v48 = vmul.f32 %v7240_v22, %v2541_v54  ;;  %vm2471_vm9 = vcmp.eq.f32.partialorder %v2470_v40, 8.507059e+37 }
 0x414   :  { %v2344_v45 = vsub.f32 1.0, %v2343_v43  ;;  %4935 = vtanh.f32 %v7266_v16  ;;  %v2354_v43 = vor.u32 1.1754944e-38, %v2353_v18  ;;  %v2485_v18 = vand.u32 2147483647, %v7253_v9 }
 0x415   :  { %4937 = vtanh.f32 %v2447_v33  ;;  %vm2524_vm11 = vcmp.eq.f32.partialorder %v2523_v30, 8.507059e+37  ;;  %vm2481_vm12 = vweird.f32 %v7253_v9  ;;  %vm2545_vm15 = vweird.f32 %v7240_v22 }
 0x416   :  { %v4932_v59 = vpop.eup %4931  ;;  %v2345_v4 = vmul.f32 %v4930_v37, %v2344_v45  ;;  %4939 = vtanh.f32 %v2451_v5  ;;  %vm2486_vm14 = vcmp.eq.f32.partialorder %v2485_v18, 8.507059e+37  ;;  %vm2544_vm0 = vweird.f32 %v7197_v56 }
 0x417   :  { %v2462_v39 = vmul.f32 %v4932_v59, %v7242_v0  ;;  %vm2467_vm4 = vweird.f32 %v4932_v59  ;;  %vm7324_vm1 = vmor %vm2544_vm0, %vm2545_vm15  ;;  %vm2560_vm2 = vweird.f32 %v7244_v50 }
 0x418   :  { %v2346_v17 = vadd.f32 %v4930_v37, %v2345_v4  ;;  %vm2468_vm7 = vmor %vm2466_vm5, %vm2467_vm4 }
 0x419   :  { %v4934_v62 = vpop.eup %4933  ;;  %v2463_v34 = vsub.f32 1.0, %v2462_v39 }
 0x41a   :  { %v2477_v26 = vmul.f32 %v4934_v62, %v7253_v9  ;;  %v2350_v45 = vsel %vm2349_vm3, %v4930_v37, %v2346_v17  ;;  %v4936_v31 = vpop.eup %4935  ;;  %vm2482_vm8 = vweird.f32 %v4934_v62  ;;  %v2488_v17 = vor.u32 1.1754944e-38, %v2487_v32 }
 0x41b   :  { %v2464_v19 = vmul.f32 %v4932_v59, %v2463_v34  ;;  %v2355_v33 = vsel %vm2352_vm6, %v2354_v43, %v2350_v45  ;;  %v4938_v34 = vpop.eup %4937  ;;  %vm2483_vm13 = vmor %vm2481_vm12, %vm2482_vm8  ;;  %v2527_v43 = vsel %vm2524_vm11, %v2526_v46, %v2522_v63  ;;  %v2543_v9 = vadd.f32 %v7240_v22, %v2542_v48 }
 0x41c   :  { %v2478_v39 = vsub.f32 1.0, %v2477_v26  ;;  %v2361_v4 = vmul.f32 %v4936_v31, %v2355_v33  ;;  %v4940_v0 = vpop.eup %4939  ;;  %v2572_v31 = vrot.slane %v7051_v2, 7  ;;  %v2548_v2 = vand.u32 2147483647, %v7197_v56 }
 0x41d   :  { %v2465_v41 = vadd.f32 %v4932_v59, %v2464_v19  ;;  %v8849_v19 = vrot.slane %v7046_v20, 7  ;;  %v2550_v20 = vand.u32 2147483648, %v7197_v56  ;;  %v2565_v56 = vand.u32 2147483648, %v7199_v42 }
 0x41e   :  { %v2479_v5 = vmul.f32 %v4934_v62, %v2478_v39  ;;  %v2592_v35 = vrot.slane %v2361_v4, 4  ;;  %vm2559_vm3 = vweird.f32 %v7199_v42  ;;  %v2563_v32 = vand.u32 2147483647, %v7199_v42 }
 0x41f   :  { %v2469_v26 = vsel %vm2468_vm7, %v4932_v59, %v2465_v41  ;;  %v2575_v39 = vmul.f32 %v8849_v19, %v2512_v23  ;;  %v2557_v59 = vmul.f32 %v7244_v50, %v2556_v13  ;;  %v2576_v41 = vmul.f32 %v2572_v31, %v2527_v43  ;;  %vm2561_vm5 = vmor %vm2559_vm3, %vm2560_vm2  ;;  %v8860_v13 = vld [vmem:[#allocation18_spill] sm:$0xff] }
 0x420   :  { %v2474_v37 = vsel %vm2471_vm9, %v2473_v47, %v2469_v26  ;;  %v2480_v12 = vadd.f32 %v4934_v62, %v2479_v5  ;;  %v2595_v54 = vpack.c.bf16 %v2592_v35, %v2592_v35  ;;  %v2551_v47 = vor.u32 1.1754944e-38, %v2550_v20  ;;  %v8858_v20 = vld [vmem:[#allocation32_spill] sm:$0xff] }
 0x421   :  { %v2577_v45 = vmul.f32 %v4938_v34, %v2474_v37  ;;  %v2558_v48 = vadd.f32 %v7244_v50, %v2557_v59  ;;  %vm2549_vm4 = vcmp.eq.f32.partialorder %v2548_v2, 8.507059e+37  ;;  %v2566_v34 = vor.u32 1.1754944e-38, %v2565_v56  ;;  %v8852_v59 = vld [vmem:[#allocation11_spill] sm:$0xff]  ;;  %v8859_v2 = vld [vmem:[#allocation33_spill] sm:$0xff]  ;;  %v8862_v56 = vld [vmem:[#allocation34_spill] sm:$0xff] }
 0x422   :  { %v2484_v33 = vsel %vm2483_vm13, %v4934_v62, %v2480_v12  ;;  %v2599_v63 = vrot.slane %v2595_v54, 2  ;;  %v2547_v62 = vsel %vm7324_vm1, %v7240_v22, %v2543_v9  ;;  %vm2564_vm6 = vcmp.eq.f32.partialorder %v2563_v32, 8.507059e+37  ;;  %v8854_v9 = vld [vmem:[#allocation30_spill] sm:$0xff]  ;;  %v8865_v32 = vld [vmem:[#allocation28_spill] sm:$0xff] }
 0x423   :  { %v2489_v30 = vsel %vm2486_vm14, %v2488_v17, %v2484_v33  ;;  %v7313_v40 = vadd.f32 %v2577_v45, %v2575_v39  ;;  %v2562_v18 = vsel %vm2561_vm5, %v7244_v50, %v2558_v48  ;;  %v2552_v4 = vsel %vm2549_vm4, %v2551_v47, %v2547_v62  ;;  %v8861_v48 = vld [vmem:[#allocation27_spill] sm:$0xff]  ;;  %v8864_v47 = vld [vmem:[#allocation22_spill] sm:$0xff] }
 0x424   :  { %v2578_v46 = vmul.f32 %v4940_v0, %v2489_v30  ;;  %2623 = vmatmul.bf16.vlgmr.msrb.gmra.mxu1 %v2599_v63  ;;  %2649 = vmatmul.bf16.vlgmr.msra.gmra.mxu3 %v2599_v63  ;;  %v2567_v22 = vsel %vm2564_vm6, %v2566_v34, %v2562_v18  ;;  %vm2588_vm7 = vcmask 1045509   ;;  %v8853_v30 = vld [vmem:[#allocation20_spill] sm:$0xff]  ;;  %v8863_v62 = vld [vmem:[#allocation35_spill] sm:$0xff]  ;;  %v8867_v18 = vld [vmem:[#allocation37_spill] sm:$0xff] }
 0x425   :  { %4941 = vtanh.f32 %v7313_v40  ;;  %2793 = vmatpush.bf16.msrb.mxu1 %v8566_v44  ;;  %2819 = vmatpush.bf16.msra.mxu3 %v8567_v27  ;;  %v8869_v34 = vld [vmem:[#allocation44_spill] sm:$0xff] }
 0x426   :  { %v7320_v23 = vadd.f32 %v2578_v46, %v2576_v41  ;;  %v8855_v41 = vld [vmem:[#allocation31_spill] sm:$0xff]  ;;  %v8856_v46 = vld [vmem:[#allocation14_spill] sm:$0xff] }
 0x428   :  { %4943 = vtanh.f32 %v7320_v23 }
 0x429   :  { %2794 = vmatpush.bf16.msrb.mxu1 %v8568_v53  ;;  %2820 = vmatpush.bf16.msra.mxu3 %v8569_v6 }
 0x42b   :  { %v4942_v5 = vpop.eup %4941 }
 0x42c   :  { %v2583_v26 = vmul.f32 %v4942_v5, %v2552_v4  ;;  %v8866_v5 = vld [vmem:[#allocation36_spill] sm:$0xff]  ;;  %v8868_v4 = vld [vmem:[#allocation42_spill] sm:$0xff] }
 0x42d   :  { %2795 = vmatpush.bf16.msrb.mxu1 %v8570_v36  ;;  %2821 = vmatpush.bf16.msra.mxu3 %v8571_v52 }
 0x42e   :  { %v4944_v0 = vpop.eup %4943  ;;  %v2769_v37 = vpack.c.bf16 %v2583_v26, %v2583_v26 }
 0x42f   :  { %v2584_v42 = vmul.f32 %v4944_v0, %v2567_v22  ;;  %v8871_v0 = vld [vmem:[#allocation39_spill] sm:$0xff]  ;;  %v8872_v22 = vld [vmem:[#allocation48_spill] sm:$0xff] }
 0x430   :  { %v2773_v12 = vunpack.c.l.b16 %v2769_v37  ;;  %v8873_v37 = vld [vmem:[#allocation49_spill] sm:$0xff] }
 0x431   :  { %v2587_v35 = vrot.slane %v2584_v42, 7  ;;  %v2770_v50 = vpack.c.bf16 %v2584_v42, %v2584_v42  ;;  %2796 = vmatpush.bf16.msrb.mxu1 %v8572_v11  ;;  %2822 = vmatpush.bf16.msra.mxu3 %v8573_v15  ;;  %v8874_v42 = vld [vmem:[#allocation40_spill] sm:$0xff] }
 0x432   :  { %v2775_v19 = vrot.slane %v2773_v12, 4  ;;  %v8875_v12 = vld [vmem:[#allocation41_spill] sm:$0xff] }
 0x433   :  { %v2589_v17 = vsel %vm2588_vm7, %v2587_v35, %v2583_v26  ;;  %v2774_v43 = vunpack.c.l.b16 %v2770_v50  ;;  %v8870_v26 = vld [vmem:[#allocation38_spill] sm:$0xff]  ;;  %v8876_v35 = vld [vmem:[#allocation52_spill] sm:$0xff]  ;;  %v8877_v50 = vld [vmem:[#allocation53_spill] sm:$0xff] }
 0x434   :  { %v2594_v39 = vpack.c.bf16 %v2589_v17, %v2589_v17  ;;  %2675 = vmatmul.bf16.vlgmr.msra.gmra.mxu1 %v2599_v63  ;;  %2701 = vmatmul.bf16.vlgmr.msrb.gmra.mxu3 %v2599_v63  ;;  %v8857_v63 = vld [vmem:[#allocation24_spill] sm:$0xff]  ;;  %v8878_v17 = vld [vmem:[#allocation43_spill] sm:$0xff] }
 0x435   :  { %v2776_v45 = vrot.slane %v2774_v43, 3  ;;  %2797 = vmatpush.bf16.msrb.mxu1 %v8574_v1  ;;  %2823 = vmatpush.bf16.msra.mxu3 %v8575_v8  ;;  %v8879_v43 = vld [vmem:[#allocation45_spill] sm:$0xff] }
 0x436   :  { %v2598_v31 = vrot.slane %v2594_v39, 2  ;;  %v8881_v39 = vld [vmem:[#allocation47_spill] sm:$0xff] }
 0x437   :  { %v2777_v33 = vsel %vm624_vm10, %v2776_v45, %v2775_v19  ;;  %v8880_v19 = vld [vmem:[#allocation46_spill] sm:$0xff]  ;;  %v8882_v45 = vld [vmem:[#allocation56_spill] sm:$0xff] }
 0x438   :  { %2610 = vmatmul.bf16.vlgmr.msrb.gmra.mxu0 %v2598_v31  ;;  %2636 = vmatmul.bf16.vlgmr.msra.gmra.mxu2 %v2598_v31  ;;  %v2778_v54 = vpack.c.b16 %v2777_v33, %v2777_v33  ;;  %v8884_v33 = vld [vmem:[#allocation50_spill] sm:$0xff] }
 0x439   :  { %2780 = vmatpush.bf16.msrb.mxu0 %v5188_v3  ;;  %2806 = vmatpush.bf16.msra.mxu2 %v5254_v29 }
 0x43a   :  { %2798 = vmatpush.bf16.msrb.mxu1 %v8576_v25  ;;  %2824 = vmatpush.bf16.msra.mxu3 %v8577_v58 }
 0x43d   :  { %2781 = vmatpush.bf16.msrb.mxu0 %v5200_v7  ;;  %2807 = vmatpush.bf16.msra.mxu2 %v5286_v38 }
 0x43e   :  { %2799 = vmatpush.bf16.msrb.mxu1 %v8578_v10  ;;  %2825 = vmatpush.bf16.msra.mxu3 %v8579_v49 }
 0x441   :  { %2782 = vmatpush.bf16.msrb.mxu0 %v5246_v24  ;;  %2808 = vmatpush.bf16.msra.mxu2 %v5331_v51 }
 0x442   :  { %2800 = vmatpush.bf16.msrb.mxu1 %v5510_v60  ;;  %2826 = vmatpush.bf16.msra.mxu3 %v5498_v55 }
 0x445   :  { %2783 = vmatpush.bf16.msrb.mxu0 %v8760_v61  ;;  %2809 = vmatpush.bf16.msra.mxu2 %v8761_v28 }
 0x446   :  { %3034 = vmatpush.bf16.msra.mxu1 %v8580_v21  ;;  %3060 = vmatpush.bf16.msrb.mxu3 %v5506_v57 }
 0x447   :  { %2801 = vmatmul.bf16.vlgmr.msrb.gmra.mxu1 %v2778_v54  ;;  %2827 = vmatmul.bf16.vlgmr.msra.gmra.mxu3 %v2778_v54 }
 0x448   :  { %2662 = vmatmul.bf16.vlgmr.msra.gmra.mxu0 %v2598_v31  ;;  %2688 = vmatmul.bf16.vlgmr.msrb.gmra.mxu2 %v2598_v31  ;;  %v8883_v31 = vld [vmem:[#allocation57_spill] sm:$0xff] }
 0x449   :  { %2784 = vmatpush.bf16.msrb.mxu0 %v8852_v59  ;;  %2810 = vmatpush.bf16.msra.mxu2 %v8853_v30 }
 0x44a   :  { %3035 = vmatpush.bf16.msra.mxu1 %v8854_v9  ;;  %3061 = vmatpush.bf16.msrb.mxu3 %v8855_v41 }
 0x44d   :  { %2785 = vmatpush.bf16.msrb.mxu0 %v8856_v46  ;;  %2811 = vmatpush.bf16.msra.mxu2 %v8857_v63 }
 0x44e   :  { %3036 = vmatpush.bf16.msra.mxu1 %v8858_v20  ;;  %3062 = vmatpush.bf16.msrb.mxu3 %v8859_v2 }
 0x451   :  { %2786 = vmatpush.bf16.msrb.mxu0 %v8860_v13  ;;  %2812 = vmatpush.bf16.msra.mxu2 %v8861_v48 }
 0x452   :  { %3037 = vmatpush.bf16.msra.mxu1 %v8862_v56  ;;  %3063 = vmatpush.bf16.msrb.mxu3 %v8863_v62 }
 0x455   :  { %2787 = vmatpush.bf16.msrb.mxu0 %v8864_v47  ;;  %2813 = vmatpush.bf16.msra.mxu2 %v8865_v32 }
 0x456   :  { %3038 = vmatpush.bf16.msra.mxu1 %v8866_v5  ;;  %3064 = vmatpush.bf16.msrb.mxu3 %v8867_v18 }
 0x458   :  { %2788 = vmatmul.bf16.vlgmr.msrb.gmra.mxu0 %v2778_v54  ;;  %2814 = vmatmul.bf16.vlgmr.msra.gmra.mxu2 %v2778_v54  ;;  %v8885_v54 = vld [vmem:[#allocation51_spill] sm:$0xff] }
 0x459   :  { %3021 = vmatpush.bf16.msra.mxu0 %v8868_v4  ;;  %3047 = vmatpush.bf16.msrb.mxu2 %v8869_v34 }
 0x45a   :  { %3039 = vmatpush.bf16.msra.mxu1 %v8870_v26  ;;  %3065 = vmatpush.bf16.msrb.mxu3 %v8871_v0 }
 0x45d   :  { %3022 = vmatpush.bf16.msra.mxu0 %v8872_v22  ;;  %3048 = vmatpush.bf16.msrb.mxu2 %v8873_v37  ;;  %v8886_v37 = vld [vmem:[#allocation60_spill] sm:$0xff] }
 0x45e   :  { %3040 = vmatpush.bf16.msra.mxu1 %v8874_v42  ;;  %3066 = vmatpush.bf16.msrb.mxu3 %v8875_v12 }
 0x461   :  { %3023 = vmatpush.bf16.msra.mxu0 %v8876_v35  ;;  %3049 = vmatpush.bf16.msrb.mxu2 %v8877_v50  ;;  %v8887_v35 = vld [vmem:[#allocation61_spill] sm:$0xff]  ;;  %v8888_v50 = vld [vmem:[#allocation54_spill] sm:$0xff] }
 0x462   :  { %3041 = vmatpush.bf16.msra.mxu1 %v8878_v17  ;;  %3067 = vmatpush.bf16.msrb.mxu3 %v8879_v43  ;;  %v8889_v17 = vld [vmem:[#allocation55_spill] sm:$0xff]  ;;  %v8890_v43 = vld [vmem:[#allocation64_spill] sm:$0xff] }
 0x465   :  { %3024 = vmatpush.bf16.msra.mxu0 %v8882_v45  ;;  %3050 = vmatpush.bf16.msrb.mxu2 %v8883_v31  ;;  %v8893_v45 = vld [vmem:[#allocation59_spill] sm:$0xff]  ;;  %v8894_v31 = vld [vmem:[#allocation68_spill] sm:$0xff] }
 0x466   :  { %3086 = vmatpush.bf16.msrb.mxu1 %v8880_v19  ;;  %3112 = vmatpush.bf16.msra.mxu3 %v8881_v39  ;;  %v8891_v19 = vld [vmem:[#allocation65_spill] sm:$0xff]  ;;  %v8892_v39 = vld [vmem:[#allocation58_spill] sm:$0xff] }
 0x469   :  { %3025 = vmatpush.bf16.msra.mxu0 %v8886_v37  ;;  %3051 = vmatpush.bf16.msrb.mxu2 %v8887_v35  ;;  %v8897_v37 = vld [vmem:[#allocation63_spill] sm:$0xff]  ;;  %v8898_v35 = vld [vmem:[#allocation74_spill] sm:$0xff] }
 0x46a   :  { %3087 = vmatpush.bf16.msrb.mxu1 %v8884_v33  ;;  %3113 = vmatpush.bf16.msra.mxu3 %v8885_v54  ;;  %v8895_v33 = vld [vmem:[#allocation70_spill] sm:$0xff] }
 0x46b   :  { %v8896_v54 = vld [vmem:[#allocation62_spill] sm:$0xff] }
 0x46d   :  { %3026 = vmatpush.bf16.msra.mxu0 %v8890_v43  ;;  %3052 = vmatpush.bf16.msrb.mxu2 %v8891_v19  ;;  %v8901_v43 = vld [vmem:[#allocation78_spill] sm:$0xff] }
 0x46e   :  { %3088 = vmatpush.bf16.msrb.mxu1 %v8888_v50  ;;  %3114 = vmatpush.bf16.msra.mxu3 %v8889_v17  ;;  %v8899_v50 = vld [vmem:[#allocation75_spill] sm:$0xff]  ;;  %v8900_v17 = vld [vmem:[#allocation76_spill] sm:$0xff]  ;;  %v8902_v19 = vld [vmem:[#allocation66_spill] sm:$0xff] }
 0x471   :  { %3027 = vmatpush.bf16.msra.mxu0 %v8894_v31  ;;  %3053 = vmatpush.bf16.msrb.mxu2 %v8895_v33  ;;  %v8905_v31 = vld [vmem:[#allocation82_spill] sm:$0xff]  ;;  %v8906_v33 = vld [vmem:[#allocation71_spill] sm:$0xff] }
 0x472   :  { %3089 = vmatpush.bf16.msrb.mxu1 %v8892_v39  ;;  %3115 = vmatpush.bf16.msra.mxu3 %v8893_v45  ;;  %v8903_v39 = vld [vmem:[#allocation67_spill] sm:$0xff]  ;;  %v8904_v45 = vld [vmem:[#allocation80_spill] sm:$0xff] }
 0x475   :  { %3028 = vmatpush.bf16.msra.mxu0 %v8898_v35  ;;  %3054 = vmatpush.bf16.msrb.mxu2 %v8899_v50  ;;  %v8909_v35 = vld [vmem:[#allocation85_spill] sm:$0xff] }
 0x476   :  { %3090 = vmatpush.bf16.msrb.mxu1 %v8896_v54  ;;  %3116 = vmatpush.bf16.msra.mxu3 %v8897_v37  ;;  %v8907_v54 = vld [vmem:[#allocation72_spill] sm:$0xff]  ;;  %v8910_v50 = vld [vmem:[#allocation77_spill] sm:$0xff] }
 0x477   :  { %v8908_v37 = vld [vmem:[#allocation84_spill] sm:$0xff] }
 0x479   :  { %3073 = vmatpush.bf16.msrb.mxu0 %v8900_v17  ;;  %3099 = vmatpush.bf16.msra.mxu2 %v8901_v43  ;;  %v8911_v17 = vld [vmem:[#allocation79_spill] sm:$0xff]  ;;  %v8912_v43 = vld [vmem:[#allocation88_spill] sm:$0xff] }
 0x47a   :  { %3091 = vmatpush.bf16.msrb.mxu1 %v8902_v19  ;;  %3117 = vmatpush.bf16.msra.mxu3 %v8903_v39  ;;  %v8913_v19 = vld [vmem:[#allocation89_spill] sm:$0xff]  ;;  %v8914_v39 = vld [vmem:[#allocation90_spill] sm:$0xff] }
 0x47d   :  { %3074 = vmatpush.bf16.msrb.mxu0 %v8904_v45  ;;  %3100 = vmatpush.bf16.msra.mxu2 %v8905_v31  ;;  %v8915_v45 = vld [vmem:[#allocation91_spill] sm:$0xff]  ;;  %v8916_v31 = vld [vmem:[#allocation94_spill] sm:$0xff] }
 0x47e   :  { %3092 = vmatpush.bf16.msrb.mxu1 %v8906_v33  ;;  %3118 = vmatpush.bf16.msra.mxu3 %v8907_v54  ;;  %v8917_v33 = vld [vmem:[#allocation95_spill] sm:$0xff]  ;;  %v8918_v54 = vld [vmem:[#allocation96_spill] sm:$0xff] }
 0x481   :  { %3075 = vmatpush.bf16.msrb.mxu0 %v8908_v37  ;;  %3101 = vmatpush.bf16.msra.mxu2 %v8909_v35  ;;  %v8919_v37 = vld [vmem:[#allocation97_spill] sm:$0xff]  ;;  %v8920_v35 = vld [vmem:[#allocation98_spill] sm:$0xff] }
 0x482   :  { %3093 = vmatpush.bf16.msrb.mxu1 %v8910_v50  ;;  %3119 = vmatpush.bf16.msra.mxu3 %v8911_v17  ;;  %v8921_v50 = vld [vmem:[#allocation99_spill] sm:$0xff] }
 0x485   :  { %3076 = vmatpush.bf16.msrb.mxu0 %v8912_v43  ;;  %3102 = vmatpush.bf16.msra.mxu2 %v8913_v19 }
 0x489   :  { %3077 = vmatpush.bf16.msrb.mxu0 %v8914_v39  ;;  %3103 = vmatpush.bf16.msra.mxu2 %v8915_v45  ;;  %v8922_v45 = vld [vmem:[#allocation100_spill] sm:$0xff] }
 0x48d   :  { %3078 = vmatpush.bf16.msrb.mxu0 %v8916_v31  ;;  %3104 = vmatpush.bf16.msra.mxu2 %v8917_v33 }
 0x491   :  { %3079 = vmatpush.bf16.msrb.mxu0 %v8918_v54  ;;  %3105 = vmatpush.bf16.msra.mxu2 %v8919_v37  ;;  %v8923_v37 = vld [vmem:[#allocation101_spill] sm:$0xff] }
 0x495   :  { %3080 = vmatpush.bf16.msrb.mxu0 %v8920_v35  ;;  %3106 = vmatpush.bf16.msra.mxu2 %v8921_v50 }
 0x4a1   :  { %v2624_v17 = vpop.f32.mrf.mxu1 }
 0x4a7   :  { %v2650_v43 = vpop.f32.mrf.mxu3 }
 0x4a9   :  { %v2626_v22 = vpop.f32.mrf.mxu1 }
 0x4af   :  { %v2652_v19 = vpop.f32.mrf.mxu3 }
 0x4b1   :  { %v7435_v12 = vpop.f32.mrf.mxu1 }
 0x4b5   :  { %v2611_v39 = vpop.f32.mrf.mxu0 }
 0x4b6   :  { %v2612_v42 = vadd.f32 %v2611_v39, %v8922_v45 }
 0x4b7   :  { %v2702_v34 = vpop.f32.mrf.mxu3 }
 0x4b8   :  { %v2625_v31 = vadd.f32 %v2624_v17, %v2612_v42 }
 0x4b9   :  { %v2678_v4 = vpop.f32.mrf.mxu1 }
 0x4ba   :  { %v4551_v33 = vmul.f32 -1.442695, %v2625_v31  ;;  %v8924_v4 = vld [vmem:[#allocation81_spill] sm:$0xff]  ;;  %v8925_v31 = vld [vmem:[#allocation83_spill] sm:$0xff] }
 0x4bb   :  { %v2637_v54 = vpop.f32.mrf.mxu2 }
 0x4bc   :  { %4945 = vpow2.f32 %v4551_v33  ;;  %v2638_v32 = vadd.f32 %v2637_v54, %v8923_v37  ;;  %v8926_v37 = vld [vmem:[#allocation86_spill] sm:$0xff] }
 0x4bd   :  { %v2613_v35 = vpop.f32.mrf.mxu0 }
 0x4be   :  { %v2651_v47 = vadd.f32 %v2650_v43, %v2638_v32 }
 0x4bf   :  { %v2704_v0 = vpop.f32.mrf.mxu3 }
 0x4c0   :  { %v4552_v50 = vmul.f32 -1.442695, %v2651_v47 }
 0x4c2   :  { %v4946_v26 = vpop.eup %4945  ;;  %4947 = vpow2.f32 %v4552_v50 }
 0x4c3   :  { %v7439_v22 = vadd.f32 1.0, %v4946_v26  ;;  %v2639_v48 = vpop.f32.mrf.mxu2 }
 0x4c4   :  { %v2802_v19 = vpop.f32.mrf.mxu1 }
 0x4c5   :  { %v2837_v13 = vrot.slane %v2802_v19, 3  ;;  %v2841_v39 = vrot.slane %v2802_v19, 4  ;;  %4949 = vrcp.f32 %v7439_v22  ;;  %v2663_v42 = vpop.f32.mrf.mxu0  ;;  %vm2715_vm13 = vweird.f32 %v7439_v22 }
 0x4c7   :  { %v2853_v17 = vadd.f32 %v2837_v13, %v8924_v4  ;;  %v2857_v33 = vadd.f32 %v2841_v39, %v8925_v31 }
 0x4c8   :  { %v4948_v54 = vpop.eup %4947 }
 0x4c9   :  { %v4556_v35 = vmul.f32 -1.442695, %v2853_v17  ;;  %v7444_v32 = vadd.f32 1.0, %v4948_v54  ;;  %v4557_v47 = vmul.f32 -1.442695, %v2857_v33  ;;  %v8927_v17 = vld [vmem:[#allocation103_spill] sm:$0xff] }
 0x4ca   :  { %v2828_v0 = vpop.f32.mrf.mxu3 }
 0x4cb   :  { %4951 = vpow2.f32 %v4556_v35  ;;  %v2839_v26 = vrot.slane %v2828_v0, 3  ;;  %v7446_v50 = vpop.eup %4949  ;;  %v2689_v43 = vpop.f32.mrf.mxu2  ;;  %v2843_v19 = vrot.slane %v2828_v0, 4  ;;  %v8928_v35 = vld [vmem:[#allocation87_spill] sm:$0xff]  ;;  %vm2734_vm9 = vweird.f32 %v7444_v32 }
 0x4cc   :  { %4953 = vrcp.f32 %v7444_v32  ;;  %v2804_v48 = vpop.f32.mrf.mxu1  ;;  %v2711_v13 = vmul.f32 %v7446_v50, %v7439_v22  ;;  %v2690_v54 = vadd.f32 %v2689_v43, %v8927_v17  ;;  %vm2716_vm11 = vweird.f32 %v7446_v50 }
 0x4cd   :  { %v2855_v45 = vadd.f32 %v2839_v26, %v8926_v37  ;;  %4955 = vpow2.f32 %v4557_v47  ;;  %v2665_v39 = vpop.f32.mrf.mxu0  ;;  %v2859_v4 = vadd.f32 %v2843_v19, %v8928_v35  ;;  %vm7482_vm14 = vmor %vm2715_vm13, %vm2716_vm11 }
 0x4ce   :  { %v2703_v18 = vadd.f32 %v2702_v34, %v2690_v54  ;;  %v2712_v63 = vsub.f32 1.0, %v2711_v13  ;;  %v8929_v39 = vld [vmem:[#allocation102_spill] sm:$0xff] }
 0x4cf   :  { %v4558_v33 = vmul.f32 -1.442695, %v2855_v45  ;;  %v2664_v56 = vadd.f32 %v2663_v42, %v8929_v39  ;;  %v4559_v43 = vmul.f32 -1.442695, %v2859_v4 }
 0x4d0   :  { %v4553_v0 = vmul.f32 -1.442695, %v2703_v18  ;;  %v2713_v45 = vmul.f32 %v7446_v50, %v2712_v63 }
 0x4d1   :  { %v4952_v31 = vpop.eup %4951  ;;  %4957 = vpow2.f32 %v4558_v33 }
 0x4d2   :  { %v4954_v5 = vpop.eup %4953  ;;  %v2830_v46 = vpop.f32.mrf.mxu3  ;;  %v7455_v26 = vadd.f32 1.0, %v4952_v31  ;;  %4959 = vpow2.f32 %v4553_v0  ;;  %v2740_v31 = vand.u32 2147483648, %v7444_v32  ;;  %v2714_v63 = vadd.f32 %v7446_v50, %v2713_v45 }
 0x4d3   :  { %v2730_v48 = vmul.f32 %v4954_v5, %v7444_v32  ;;  %v4956_v62 = vpop.eup %4955  ;;  %v2691_v37 = vpop.f32.mrf.mxu2  ;;  %vm2735_vm8 = vweird.f32 %v4954_v5  ;;  %v2719_v0 = vand.u32 2147483647, %v7439_v22 }
 0x4d4   :  { %v7459_v54 = vadd.f32 1.0, %v4956_v62  ;;  %4961 = vrcp.f32 %v7455_v26  ;;  %v2677_v37 = vadd.f32 %v7435_v12, %v2664_v56  ;;  %v2738_v62 = vand.u32 2147483647, %v7444_v32  ;;  %vm7468_vm12 = vmor %vm2734_vm9, %vm2735_vm8  ;;  %v8932_v12 = vld [vmem:[#allocation69_spill] sm:$0xff] }
 0x4d5   :  { %v2731_v47 = vsub.f32 1.0, %v2730_v48  ;;  %v2789_v19 = vpop.f32.mrf.mxu0  ;;  %4963 = vpow2.f32 %v4559_v43  ;;  %v2721_v56 = vand.u32 2147483648, %v7439_v22  ;;  %v8933_v43 = vld [vmem:[#allocation73_spill] sm:$0xff]  ;;  %v2718_v22 = vsel %vm7482_vm14, %v7446_v50, %v2714_v63 }
 0x4d6   :  { %v2836_v46 = vrot.slane %v2789_v19, 3  ;;  %v2840_v18 = vrot.slane %v2789_v19, 4  ;;  %4965 = vrcp.f32 %v7459_v54  ;;  %v2741_v19 = vor.u32 1.1754944e-38, %v2740_v31 }
 0x4d7   :  { %v2732_v34 = vmul.f32 %v4954_v5, %v2731_v47  ;;  %v4958_v42 = vpop.eup %4957  ;;  %4967 = vtanh.f32 %v2677_v37  ;;  %vm2739_vm15 = vcmp.eq.f32.partialorder %v2738_v62, 8.507059e+37  ;;  %v2722_v33 = vor.u32 1.1754944e-38, %v2721_v56 }
 0x4d8   :  { %v4960_v4 = vpop.eup %4959  ;;  %v2852_v48 = vadd.f32 %v2836_v46, %v8932_v12  ;;  %v2856_v32 = vadd.f32 %v2840_v18, %v8933_v43  ;;  %v7486_v35 = vadd.f32 1.0, %v4958_v42  ;;  %vm2720_vm0 = vcmp.eq.f32.partialorder %v2719_v0, 8.507059e+37 }
 0x4d9   :  { %v2733_v13 = vadd.f32 %v4954_v5, %v2732_v34  ;;  %v2723_v42 = vsel %vm2720_vm0, %v2722_v33, %v2718_v22  ;;  %vm2911_vm1 = vweird.f32 %v7455_v26  ;;  %vm2926_vm9 = vweird.f32 %v7459_v54 }
 0x4da   :  { %v7488_v46 = vpop.eup %4961  ;;  %v4554_v31 = vmul.f32 -1.442695, %v2852_v48  ;;  %v4555_v12 = vmul.f32 -1.442695, %v2856_v32 }
 0x4db   :  { %v2737_v47 = vsel %vm7468_vm12, %v4954_v5, %v2733_v13  ;;  %v7480_v45 = vpop.f32.mrf.mxu2  ;;  %v2748_v5 = vadd.f32 1.0, %v4960_v4  ;;  %v4964_v18 = vpop.eup %4963  ;;  %v2907_v37 = vmul.f32 %v7488_v46, %v7455_v26  ;;  %vm2912_vm2 = vweird.f32 %v7488_v46 }
 0x4dc   :  { %v2742_v43 = vsel %vm2739_vm15, %v2741_v19, %v2737_v47  ;;  %v7493_v39 = vpop.eup %4965  ;;  %v7499_v63 = vadd.f32 1.0, %v4964_v18  ;;  %vm7537_vm7 = vmor %vm2911_vm1, %vm2912_vm2 }
 0x4dd   :  { %v2791_v13 = vpop.f32.mrf.mxu0  ;;  %4969 = vrcp.f32 %v2748_v5  ;;  %v2764_v50 = vmul.f32 %v2742_v43, %v7266_v16  ;;  %v4968_v62 = vpop.eup %4967  ;;  %v2922_v4 = vmul.f32 %v7493_v39, %v7459_v54  ;;  %v2908_v0 = vsub.f32 1.0, %v2907_v37 }
 0x4de   :  { %4971 = vrcp.f32 %v7486_v35  ;;  %v2765_v56 = vmul.f32 %v4968_v62, %v2723_v42  ;;  %vm2754_vm4 = vweird.f32 %v2748_v5  ;;  %vm2927_vm8 = vweird.f32 %v7493_v39 }
 0x4df   :  { %4973 = vpow2.f32 %v4554_v31  ;;  %v2923_v43 = vsub.f32 1.0, %v2922_v4  ;;  %v2909_v13 = vmul.f32 %v7488_v46, %v2908_v0  ;;  %v2760_v31 = vand.u32 2147483648, %v2748_v5  ;;  %vm7553_vm12 = vmor %vm2926_vm9, %vm2927_vm8 }
 0x4e0   :  { %4975 = vpow2.f32 %v4555_v12  ;;  %v7503_v32 = vadd.f32 %v2765_v56, %v2764_v50  ;;  %v2758_v50 = vand.u32 2147483647, %v2748_v5  ;;  %vm2951_vm8 = vweird.f32 %v7486_v35 }
 0x4e1   :  { %4977 = vrcp.f32 %v7499_v63  ;;  %v2924_v56 = vmul.f32 %v7493_v39, %v2923_v43  ;;  %v2761_v16 = vor.u32 1.1754944e-38, %v2760_v31  ;;  %v2915_v43 = vand.u32 2147483647, %v7455_v26  ;;  %v8939_v31 = vld [vmem:[#allocation93_spill] sm:$0xff] }
 0x4e2   :  { %8936 = vst [vmem:[#allocation9_spill] sm:$0xff] %v7503_v32  ;;  %4979 = vtanh.f32 %v7503_v32  ;;  %vm2759_vm6 = vcmp.eq.f32.partialorder %v2758_v50, 8.507059e+37 }
 0x4e3   :  { %v2817_v48 = vpop.f32.mrf.mxu2  ;;  %v4970_v47 = vpop.eup %4969  ;;  %v2925_v50 = vadd.f32 %v7493_v39, %v2924_v56  ;;  %vm2916_vm11 = vcmp.eq.f32.partialorder %v2915_v43, 8.507059e+37 }
 0x4e4   :  { %v7506_v19 = vpop.eup %4971  ;;  %v2750_v34 = vmul.f32 %v4970_v47, %v2748_v5  ;;  %vm2755_vm3 = vweird.f32 %v4970_v47  ;;  %v2838_v48 = vrot.slane %v7480_v45, 3 }
 0x4e5   :  { %v4974_v22 = vpop.eup %4973  ;;  %v2947_v33 = vmul.f32 %v7506_v19, %v7486_v35  ;;  %vm2756_vm5 = vmor %vm2754_vm4, %vm2755_vm3 }
 0x4e6   :  { %v2751_v12 = vsub.f32 1.0, %v2750_v34  ;;  %v4976_v18 = vpop.eup %4975  ;;  %v7515_v37 = vadd.f32 1.0, %v4974_v22  ;;  %v2842_v34 = vrot.slane %v7480_v45, 4  ;;  %v2910_v22 = vadd.f32 %v7488_v46, %v2909_v13 }
 0x4e7   :  { %v7517_v62 = vadd.f32 1.0, %v4976_v18  ;;  %v7519_v4 = vpop.eup %4977  ;;  %v2932_v18 = vand.u32 2147483648, %v7459_v54  ;;  %v2948_v5 = vsub.f32 1.0, %v2947_v33  ;;  %v2854_v13 = vadd.f32 %v2838_v48, %v8845_v14 }
 0x4e8   :  { %v2752_v42 = vmul.f32 %v4970_v47, %v2751_v12  ;;  %4981 = vrcp.f32 %v7515_v37  ;;  %v2917_v12 = vand.u32 2147483648, %v7455_v26  ;;  %v2962_v32 = vmul.f32 %v7519_v4, %v7499_v63  ;;  %v4980_v17 = vpop.eup %4979 }
 0x4e9   :  { %4983 = vrcp.f32 %v7517_v62  ;;  %v2858_v59 = vadd.f32 %v2842_v34, %v8939_v31  ;;  %v2933_v2 = vor.u32 1.1754944e-38, %v2932_v18  ;;  %v2949_v28 = vmul.f32 %v7506_v19, %v2948_v5 }
 0x4ea   :  { %v2753_v0 = vadd.f32 %v4970_v47, %v2752_v42  ;;  %v2918_v26 = vor.u32 1.1754944e-38, %v2917_v12  ;;  %v2963_v48 = vsub.f32 1.0, %v2962_v32  ;;  %4985 = vtanh.f32 %v2854_v13 }
 0x4eb   :  { %v2929_v32 = vsel %vm7553_vm12, %v7493_v39, %v2925_v50  ;;  %4987 = vtanh.f32 %v2858_v59  ;;  %v2877_v5 = vand.u32 2147483647, %v7515_v37  ;;  %v2894_v45 = vand.u32 2147483648, %v7517_v62 }
 0x4ec   :  { %v2757_v42 = vsel %vm2756_vm5, %v4970_v47, %v2753_v0  ;;  %v2914_v47 = vsel %vm7537_vm7, %v7488_v46, %v2910_v22  ;;  %v2930_v22 = vand.u32 2147483647, %v7459_v54  ;;  %v2892_v13 = vand.u32 2147483647, %v7517_v62 }
 0x4ed   :  { %v2762_v33 = vsel %vm2759_vm6, %v2761_v16, %v2757_v42  ;;  %v2919_v56 = vsel %vm2916_vm11, %v2918_v26, %v2914_v47  ;;  %v2879_v42 = vand.u32 2147483648, %v7515_v37  ;;  %vm2873_vm0 = vweird.f32 %v7515_v37 }
 0x4ee   :  { %v2768_v0 = vmul.f32 %v4980_v17, %v2762_v33  ;;  %v4982_v30 = vpop.eup %4981  ;;  %vm2931_vm15 = vcmp.eq.f32.partialorder %v2930_v22, 8.507059e+37  ;;  %vm2888_vm2 = vweird.f32 %v7517_v62  ;;  %vm2878_vm3 = vcmp.eq.f32.partialorder %v2877_v5, 8.507059e+37 }
 0x4ef   :  { %v4984_v20 = vpop.eup %4983  ;;  %v2869_v16 = vmul.f32 %v4982_v30, %v7515_v37  ;;  %vm2874_vm13 = vweird.f32 %v4982_v30  ;;  %v2934_v46 = vsel %vm2931_vm15, %v2933_v2, %v2929_v32  ;;  %v2964_v22 = vmul.f32 %v7519_v4, %v2963_v48 }
 0x4f0   :  { %v2999_v34 = vrot.slane %v2768_v0, 3  ;;  %v2884_v17 = vmul.f32 %v4984_v20, %v7517_v62  ;;  %vm2889_vm14 = vweird.f32 %v4984_v20  ;;  %v4986_v50 = vpop.eup %4985  ;;  %vm2875_vm1 = vmor %vm2873_vm0, %vm2874_vm13  ;;  %vm2893_vm5 = vcmp.eq.f32.partialorder %v2892_v13, 8.507059e+37 }
 0x4f1   :  { %v2870_v12 = vsub.f32 1.0, %v2869_v16  ;;  %v2880_v16 = vor.u32 1.1754944e-38, %v2879_v42  ;;  %vm2890_vm4 = vmor %vm2888_vm2, %vm2889_vm14  ;;  %v8943_v2 = vrot.slane %v7320_v23, 7  ;;  %vm2952_vm6 = vweird.f32 %v7506_v19 }
 0x4f2   :  { %v3002_v18 = vpack.c.bf16 %v2999_v34, %v2999_v34  ;;  %v2885_v43 = vsub.f32 1.0, %v2884_v17  ;;  %v4988_v17 = vpop.eup %4987  ;;  %vm2967_vm7 = vweird.f32 %v7519_v4  ;;  %v2955_v23 = vand.u32 2147483647, %v7486_v35  ;;  %vm2953_vm9 = vmor %vm2951_vm8, %vm2952_vm6 }
 0x4f3   :  { %v2871_v33 = vmul.f32 %v4982_v30, %v2870_v12  ;;  %v2972_v5 = vand.u32 2147483648, %v7499_v63  ;;  %vm2966_vm11 = vweird.f32 %v7499_v63  ;;  %vm2995_vm15 = vcmask 1046534  }
 0x4f4   :  { %v3012_v47 = vshrl.u32 %v3002_v18, 16  ;;  %v3015_v0 = vshll.u32 %v3002_v18, 16  ;;  %v2886_v54 = vmul.f32 %v4984_v20, %v2885_v43  ;;  %v2895_v18 = vor.u32 1.1754944e-38, %v2894_v45  ;;  %vm2968_vm12 = vmor %vm2966_vm11, %vm2967_vm7 }
 0x4f5   :  { %v2872_v26 = vadd.f32 %v4982_v30, %v2871_v33  ;;  %vm2956_vm13 = vcmp.eq.f32.partialorder %v2955_v23, 8.507059e+37  ;;  %v8948_v23 = vld [vmem:[#allocation20_spill] sm:$0xff] }
 0x4f6   :  { %v3014_v59 = vrot.slane %v3012_v47, 2  ;;  %v3017_v39 = vrot.slane %v3015_v0, 3  ;;  %v2887_v34 = vadd.f32 %v4984_v20, %v2886_v54  ;;  %v8942_v0 = vrot.slane %v7313_v40, 7 }
 0x4f7   :  { %v2876_v12 = vsel %vm2875_vm1, %v4982_v30, %v2872_v26  ;;  %v2983_v30 = vmul.f32 %v8943_v2, %v2934_v46  ;;  %v2957_v40 = vand.u32 2147483648, %v7486_v35  ;;  %v2973_v35 = vor.u32 1.1754944e-38, %v2972_v5  ;;  %v8949_v5 = vld [vmem:[#allocation34_spill] sm:$0xff] }
 0x4f8   :  { %v3018_v43 = vor.u32 %v3017_v39, %v3014_v59  ;;  %v2881_v33 = vsel %vm2878_vm3, %v2880_v16, %v2876_v12  ;;  %v2891_v37 = vsel %vm2890_vm4, %v4984_v20, %v2887_v34  ;;  %v2982_v42 = vmul.f32 %v8942_v0, %v2919_v56 }
 0x4f9   :  { %v2896_v47 = vsel %vm2893_vm5, %v2895_v18, %v2891_v37  ;;  %v2984_v54 = vmul.f32 %v4986_v50, %v2881_v33  ;;  %v2950_v20 = vadd.f32 %v7506_v19, %v2949_v28  ;;  %v2965_v56 = vadd.f32 %v7519_v4, %v2964_v22 }
 0x4fa   :  { %3042 = vmatmul.bf16.vlgmr.msra.gmra.mxu1 %v3018_v43  ;;  %3068 = vmatmul.bf16.vlgmr.msrb.gmra.mxu3 %v3018_v43  ;;  %v2985_v62 = vmul.f32 %v4988_v17, %v2896_v47  ;;  %v2970_v28 = vand.u32 2147483647, %v7499_v63  ;;  %v2958_v13 = vor.u32 1.1754944e-38, %v2957_v40  ;;  %v8946_v40 = vld [vmem:[#allocation33_spill] sm:$0xff] }
 0x4fb   :  { %3212 = vmatpush.bf16.msra.mxu1 %v8566_v44  ;;  %3238 = vmatpush.bf16.msrb.mxu3 %v8567_v27  ;;  %v7576_v32 = vadd.f32 %v2984_v54, %v2982_v42  ;;  %v2954_v45 = vsel %vm2953_vm9, %v7506_v19, %v2950_v20  ;;  %v2969_v26 = vsel %vm2968_vm12, %v7519_v4, %v2965_v56  ;;  %v8945_v20 = vld [vmem:[#allocation32_spill] sm:$0xff]  ;;  %v8947_v56 = vld [vmem:[#allocation11_spill] sm:$0xff] }
 0x4fc   :  { %v7580_v48 = vadd.f32 %v2985_v62, %v2983_v30  ;;  %v2959_v39 = vsel %vm2956_vm13, %v2958_v13, %v2954_v45  ;;  %vm2971_vm14 = vcmp.eq.f32.partialorder %v2970_v28, 8.507059e+37  ;;  %v8944_v62 = vld [vmem:[#allocation16_spill] sm:$0xff]  ;;  %v8950_v28 = vld [vmem:[#allocation35_spill] sm:$0xff]  ;;  %v8951_v45 = vld [vmem:[#allocation14_spill] sm:$0xff] }
 0x4fd   :  { %4989 = vtanh.f32 %v7576_v32  ;;  %v2974_v16 = vsel %vm2971_vm14, %v2973_v35, %v2969_v26  ;;  %v8952_v13 = vld [vmem:[#allocation24_spill] sm:$0xff]  ;;  %v8954_v35 = vld [vmem:[#allocation37_spill] sm:$0xff] }
 0x4fe   :  { %4991 = vtanh.f32 %v7580_v48  ;;  %v8953_v26 = vld [vmem:[#allocation36_spill] sm:$0xff] }
 0x4ff   :  { %3213 = vmatpush.bf16.msra.mxu1 %v8568_v53  ;;  %3239 = vmatpush.bf16.msrb.mxu3 %v8569_v6 }
 0x503   :  { %3214 = vmatpush.bf16.msra.mxu1 %v8570_v36  ;;  %3240 = vmatpush.bf16.msrb.mxu3 %v8571_v52  ;;  %v4990_v59 = vpop.eup %4989 }
 0x504   :  { %v4992_v50 = vpop.eup %4991  ;;  %v2990_v34 = vmul.f32 %v4990_v59, %v2959_v39  ;;  %v8955_v59 = vld [vmem:[#allocation18_spill] sm:$0xff]  ;;  %v8956_v39 = vld [vmem:[#allocation27_spill] sm:$0xff] }
 0x505   :  { %v2991_v46 = vmul.f32 %v4992_v50, %v2974_v16  ;;  %v8957_v50 = vld [vmem:[#allocation38_spill] sm:$0xff]  ;;  %v8958_v16 = vld [vmem:[#allocation39_spill] sm:$0xff] }
 0x506   :  { %v3188_v63 = vpack.c.bf16 %v2990_v34, %v2990_v34 }
 0x507   :  { %3215 = vmatpush.bf16.msra.mxu1 %v8572_v11  ;;  %3241 = vmatpush.bf16.msrb.mxu3 %v8573_v15  ;;  %v2994_v19 = vrot.slane %v2991_v46, 7  ;;  %v3189_v4 = vpack.c.bf16 %v2991_v46, %v2991_v46  ;;  %v8960_v46 = vld [vmem:[#allocation28_spill] sm:$0xff] }
 0x508   :  { %v3192_v17 = vunpack.c.l.b16 %v3188_v63  ;;  %v8961_v63 = vld [vmem:[#allocation42_spill] sm:$0xff] }
 0x509   :  { %v2996_v12 = vsel %vm2995_vm15, %v2994_v19, %v2990_v34  ;;  %v3193_v18 = vunpack.c.l.b16 %v3189_v4  ;;  %v8959_v34 = vld [vmem:[#allocation22_spill] sm:$0xff]  ;;  %v8962_v19 = vld [vmem:[#allocation44_spill] sm:$0xff] }
 0x50a   :  { %3094 = vmatmul.bf16.vlgmr.msrb.gmra.mxu1 %v3018_v43  ;;  %3120 = vmatmul.bf16.vlgmr.msra.gmra.mxu3 %v3018_v43  ;;  %v3001_v22 = vpack.c.bf16 %v2996_v12, %v2996_v12  ;;  %v3194_v33 = vrot.slane %v3192_v17, 5  ;;  %v8963_v4 = vld [vmem:[#allocation40_spill] sm:$0xff]  ;;  %v8964_v17 = vld [vmem:[#allocation41_spill] sm:$0xff] }
 0x50b   :  { %3216 = vmatpush.bf16.msra.mxu1 %v8574_v1  ;;  %3242 = vmatpush.bf16.msrb.mxu3 %v8575_v8  ;;  %v3195_v37 = vrot.slane %v3193_v18, 4  ;;  %v8965_v12 = vld [vmem:[#allocation48_spill] sm:$0xff]  ;;  %v8966_v18 = vld [vmem:[#allocation49_spill] sm:$0xff] }
 0x50c   :  { %v3004_v47 = vshrl.u32 %v3001_v22, 16  ;;  %v3007_v0 = vshll.u32 %v3001_v22, 16  ;;  %v8967_v22 = vld [vmem:[#allocation43_spill] sm:$0xff] }
 0x50d   :  { %v3196_v42 = vsel %vm624_vm10, %v3195_v37, %v3194_v33  ;;  %v8968_v33 = vld [vmem:[#allocation45_spill] sm:$0xff]  ;;  %v8969_v37 = vld [vmem:[#allocation46_spill] sm:$0xff] }
 0x50e   :  { %v3006_v54 = vrot.slane %v3004_v47, 2  ;;  %v3009_v2 = vrot.slane %v3007_v0, 3  ;;  %v3197_v30 = vpack.c.b16 %v3196_v42, %v3196_v42  ;;  %v8970_v47 = vld [vmem:[#allocation47_spill] sm:$0xff]  ;;  %v8971_v0 = vld [vmem:[#allocation52_spill] sm:$0xff]  ;;  %v8972_v42 = vld [vmem:[#allocation53_spill] sm:$0xff] }
 0x50f   :  { %3217 = vmatpush.bf16.msra.mxu1 %v8576_v25  ;;  %3243 = vmatpush.bf16.msrb.mxu3 %v8577_v58 }
 0x510   :  { %v3010_v43 = vor.u32 %v3009_v2, %v3006_v54  ;;  %v8973_v54 = vld [vmem:[#allocation50_spill] sm:$0xff]  ;;  %v8974_v2 = vld [vmem:[#allocation51_spill] sm:$0xff] }
 0x512   :  { %3029 = vmatmul.bf16.vlgmr.msra.gmra.mxu0 %v3010_v43  ;;  %3055 = vmatmul.bf16.vlgmr.msrb.gmra.mxu2 %v3010_v43 }
 0x513   :  { %3199 = vmatpush.bf16.msra.mxu0 %v5188_v3  ;;  %3225 = vmatpush.bf16.msrb.mxu2 %v5254_v29 }
 0x514   :  { %3218 = vmatpush.bf16.msra.mxu1 %v8578_v10  ;;  %3244 = vmatpush.bf16.msrb.mxu3 %v8579_v49 }
 0x517   :  { %3200 = vmatpush.bf16.msra.mxu0 %v5200_v7  ;;  %3226 = vmatpush.bf16.msrb.mxu2 %v5286_v38 }
 0x518   :  { %3219 = vmatpush.bf16.msra.mxu1 %v5510_v60  ;;  %3245 = vmatpush.bf16.msrb.mxu3 %v5498_v55 }
 0x51b   :  { %3201 = vmatpush.bf16.msra.mxu0 %v5246_v24  ;;  %3227 = vmatpush.bf16.msrb.mxu2 %v5331_v51 }
 0x51c   :  { %3441 = vmatpush.bf16.msrb.mxu1 %v8580_v21  ;;  %3467 = vmatpush.bf16.msra.mxu3 %v5506_v57 }
 0x51d   :  { %3220 = vmatmul.bf16.vlgmr.msra.gmra.mxu1 %v3197_v30  ;;  %3246 = vmatmul.bf16.vlgmr.msrb.gmra.mxu3 %v3197_v30 }
 0x51f   :  { %3202 = vmatpush.bf16.msra.mxu0 %v8760_v61  ;;  %3228 = vmatpush.bf16.msrb.mxu2 %v8944_v62 }
 0x520   :  { %3442 = vmatpush.bf16.msrb.mxu1 %v8854_v9  ;;  %3468 = vmatpush.bf16.msra.mxu3 %v8855_v41 }
 0x522   :  { %3081 = vmatmul.bf16.vlgmr.msrb.gmra.mxu0 %v3010_v43  ;;  %3107 = vmatmul.bf16.vlgmr.msra.gmra.mxu2 %v3010_v43  ;;  %v8975_v43 = vld [vmem:[#allocation56_spill] sm:$0xff] }
 0x523   :  { %3203 = vmatpush.bf16.msra.mxu0 %v8947_v56  ;;  %3229 = vmatpush.bf16.msrb.mxu2 %v8948_v23 }
 0x524   :  { %3443 = vmatpush.bf16.msrb.mxu1 %v8945_v20  ;;  %3469 = vmatpush.bf16.msra.mxu3 %v8946_v40 }
 0x527   :  { %3204 = vmatpush.bf16.msra.mxu0 %v8951_v45  ;;  %3230 = vmatpush.bf16.msrb.mxu2 %v8952_v13  ;;  %v9020_v45 = vld [vmem:[#allocation87_spill] sm:$0xff] }
 0x528   :  { %3444 = vmatpush.bf16.msrb.mxu1 %v8949_v5  ;;  %3470 = vmatpush.bf16.msra.mxu3 %v8950_v28 }
 0x52b   :  { %3205 = vmatpush.bf16.msra.mxu0 %v8955_v59  ;;  %3231 = vmatpush.bf16.msrb.mxu2 %v8956_v39 }
 0x52c   :  { %3445 = vmatpush.bf16.msrb.mxu1 %v8953_v26  ;;  %3471 = vmatpush.bf16.msra.mxu3 %v8954_v35 }
 0x52f   :  { %3206 = vmatpush.bf16.msra.mxu0 %v8959_v34  ;;  %3232 = vmatpush.bf16.msrb.mxu2 %v8960_v46 }
 0x530   :  { %3446 = vmatpush.bf16.msrb.mxu1 %v8957_v50  ;;  %3472 = vmatpush.bf16.msra.mxu3 %v8958_v16 }
 0x532   :  { %3207 = vmatmul.bf16.vlgmr.msra.gmra.mxu0 %v3197_v30  ;;  %3233 = vmatmul.bf16.vlgmr.msrb.gmra.mxu2 %v3197_v30  ;;  %v8976_v30 = vld [vmem:[#allocation57_spill] sm:$0xff] }
 0x533   :  { %3428 = vmatpush.bf16.msrb.mxu0 %v8961_v63  ;;  %3454 = vmatpush.bf16.msra.mxu2 %v8962_v19  ;;  %v9013_v19 = vld [vmem:[#allocation100_spill] sm:$0xff] }
 0x534   :  { %3447 = vmatpush.bf16.msrb.mxu1 %v8963_v4  ;;  %3473 = vmatpush.bf16.msra.mxu3 %v8964_v17 }
 0x537   :  { %3429 = vmatpush.bf16.msrb.mxu0 %v8965_v12  ;;  %3455 = vmatpush.bf16.msra.mxu2 %v8966_v18  ;;  %v8977_v18 = vld [vmem:[#allocation54_spill] sm:$0xff] }
 0x538   :  { %3448 = vmatpush.bf16.msrb.mxu1 %v8967_v22  ;;  %3474 = vmatpush.bf16.msra.mxu3 %v8968_v33  ;;  %v8978_v22 = vld [vmem:[#allocation55_spill] sm:$0xff]  ;;  %v8979_v33 = vld [vmem:[#allocation60_spill] sm:$0xff] }
 0x53b   :  { %3430 = vmatpush.bf16.msrb.mxu0 %v8971_v0  ;;  %3456 = vmatpush.bf16.msra.mxu2 %v8972_v42  ;;  %v8982_v0 = vld [vmem:[#allocation59_spill] sm:$0xff]  ;;  %v8983_v42 = vld [vmem:[#allocation64_spill] sm:$0xff] }
 0x53c   :  { %3493 = vmatpush.bf16.msra.mxu1 %v8969_v37  ;;  %3519 = vmatpush.bf16.msrb.mxu3 %v8970_v47  ;;  %v8980_v37 = vld [vmem:[#allocation61_spill] sm:$0xff]  ;;  %v8981_v47 = vld [vmem:[#allocation58_spill] sm:$0xff] }
 0x53f   :  { %3431 = vmatpush.bf16.msrb.mxu0 %v8975_v43  ;;  %3457 = vmatpush.bf16.msra.mxu2 %v8976_v30  ;;  %v8986_v43 = vld [vmem:[#allocation63_spill] sm:$0xff]  ;;  %v8987_v30 = vld [vmem:[#allocation68_spill] sm:$0xff] }
 0x540   :  { %3494 = vmatpush.bf16.msra.mxu1 %v8973_v54  ;;  %3520 = vmatpush.bf16.msrb.mxu3 %v8974_v2  ;;  %v8984_v54 = vld [vmem:[#allocation65_spill] sm:$0xff]  ;;  %v8985_v2 = vld [vmem:[#allocation62_spill] sm:$0xff] }
 0x543   :  { %3432 = vmatpush.bf16.msrb.mxu0 %v8979_v33  ;;  %3458 = vmatpush.bf16.msra.mxu2 %v8980_v37  ;;  %v8990_v33 = vld [vmem:[#allocation67_spill] sm:$0xff]  ;;  %v8991_v37 = vld [vmem:[#allocation74_spill] sm:$0xff] }
 0x544   :  { %3495 = vmatpush.bf16.msra.mxu1 %v8977_v18  ;;  %3521 = vmatpush.bf16.msrb.mxu3 %v8978_v22  ;;  %v8988_v18 = vld [vmem:[#allocation70_spill] sm:$0xff] }
 0x545   :  { %v8989_v22 = vld [vmem:[#allocation66_spill] sm:$0xff] }
 0x547   :  { %3433 = vmatpush.bf16.msrb.mxu0 %v8983_v42  ;;  %3459 = vmatpush.bf16.msra.mxu2 %v8984_v54  ;;  %v8994_v42 = vld [vmem:[#allocation78_spill] sm:$0xff]  ;;  %v8995_v54 = vld [vmem:[#allocation71_spill] sm:$0xff] }
 0x548   :  { %3496 = vmatpush.bf16.msra.mxu1 %v8981_v47  ;;  %3522 = vmatpush.bf16.msrb.mxu3 %v8982_v0  ;;  %v8992_v47 = vld [vmem:[#allocation75_spill] sm:$0xff]  ;;  %v8993_v0 = vld [vmem:[#allocation76_spill] sm:$0xff] }
 0x54b   :  { %3434 = vmatpush.bf16.msrb.mxu0 %v8987_v30  ;;  %3460 = vmatpush.bf16.msra.mxu2 %v8988_v18  ;;  %v8998_v30 = vld [vmem:[#allocation82_spill] sm:$0xff]  ;;  %v8999_v18 = vld [vmem:[#allocation77_spill] sm:$0xff] }
 0x54c   :  { %3497 = vmatpush.bf16.msra.mxu1 %v8985_v2  ;;  %3523 = vmatpush.bf16.msrb.mxu3 %v8986_v43  ;;  %v8996_v2 = vld [vmem:[#allocation72_spill] sm:$0xff] }
 0x54d   :  { %v8997_v43 = vld [vmem:[#allocation80_spill] sm:$0xff] }
 0x54f   :  { %3435 = vmatpush.bf16.msrb.mxu0 %v8991_v37  ;;  %3461 = vmatpush.bf16.msra.mxu2 %v8992_v47  ;;  %v9002_v37 = vld [vmem:[#allocation85_spill] sm:$0xff]  ;;  %v9003_v47 = vld [vmem:[#allocation88_spill] sm:$0xff] }
 0x550   :  { %3498 = vmatpush.bf16.msra.mxu1 %v8989_v22  ;;  %3524 = vmatpush.bf16.msrb.mxu3 %v8990_v33  ;;  %v9000_v22 = vld [vmem:[#allocation79_spill] sm:$0xff]  ;;  %v9001_v33 = vld [vmem:[#allocation84_spill] sm:$0xff] }
 0x553   :  { %3480 = vmatpush.bf16.msra.mxu0 %v8993_v0  ;;  %3506 = vmatpush.bf16.msrb.mxu2 %v8994_v42  ;;  %v9004_v0 = vld [vmem:[#allocation89_spill] sm:$0xff]  ;;  %v9005_v42 = vld [vmem:[#allocation90_spill] sm:$0xff] }
 0x554   :  { %3499 = vmatpush.bf16.msra.mxu1 %v8995_v54  ;;  %3525 = vmatpush.bf16.msrb.mxu3 %v8996_v2  ;;  %v9006_v54 = vld [vmem:[#allocation91_spill] sm:$0xff]  ;;  %v9007_v2 = vld [vmem:[#allocation94_spill] sm:$0xff] }
 0x557   :  { %3481 = vmatpush.bf16.msra.mxu0 %v8997_v43  ;;  %3507 = vmatpush.bf16.msrb.mxu2 %v8998_v30  ;;  %v9008_v43 = vld [vmem:[#allocation95_spill] sm:$0xff]  ;;  %v9009_v30 = vld [vmem:[#allocation96_spill] sm:$0xff] }
 0x558   :  { %3500 = vmatpush.bf16.msra.mxu1 %v8999_v18  ;;  %3526 = vmatpush.bf16.msrb.mxu3 %v9000_v22  ;;  %v9010_v18 = vld [vmem:[#allocation97_spill] sm:$0xff]  ;;  %v9011_v22 = vld [vmem:[#allocation98_spill] sm:$0xff] }
 0x55b   :  { %3482 = vmatpush.bf16.msra.mxu0 %v9001_v33  ;;  %3508 = vmatpush.bf16.msrb.mxu2 %v9002_v37  ;;  %v9012_v33 = vld [vmem:[#allocation99_spill] sm:$0xff] }
 0x55f   :  { %3483 = vmatpush.bf16.msra.mxu0 %v9003_v47  ;;  %3509 = vmatpush.bf16.msrb.mxu2 %v9004_v0 }
 0x563   :  { %3484 = vmatpush.bf16.msra.mxu0 %v9005_v42  ;;  %3510 = vmatpush.bf16.msrb.mxu2 %v9006_v54 }
 0x567   :  { %3485 = vmatpush.bf16.msra.mxu0 %v9007_v2  ;;  %3511 = vmatpush.bf16.msrb.mxu2 %v9008_v43 }
 0x56b   :  { %3486 = vmatpush.bf16.msra.mxu0 %v9009_v30  ;;  %3512 = vmatpush.bf16.msrb.mxu2 %v9010_v18  ;;  %v9014_v18 = vld [vmem:[#allocation101_spill] sm:$0xff] }
 0x56f   :  { %3487 = vmatpush.bf16.msra.mxu0 %v9011_v22  ;;  %3513 = vmatpush.bf16.msrb.mxu2 %v9012_v33 }
 0x577   :  { %v3043_v37 = vpop.f32.mrf.mxu1 }
 0x57d   :  { %v3069_v47 = vpop.f32.mrf.mxu3 }
 0x57f   :  { %v3045_v12 = vpop.f32.mrf.mxu1 }
 0x585   :  { %v3071_v0 = vpop.f32.mrf.mxu3 }
 0x587   :  { %v3095_v17 = vpop.f32.mrf.mxu1 }
 0x58d   :  { %v3121_v42 = vpop.f32.mrf.mxu3 }
 0x58f   :  { %v3097_v4 = vpop.f32.mrf.mxu1  ;;  %v3030_v54 = vpop.f32.mrf.mxu0 }
 0x590   :  { %v3031_v2 = vadd.f32 %v3030_v54, %v9013_v19 }
 0x592   :  { %v3044_v63 = vadd.f32 %v3043_v37, %v3031_v2 }
 0x594   :  { %v4560_v43 = vmul.f32 -1.442695, %v3044_v63 }
 0x595   :  { %v3123_v46 = vpop.f32.mrf.mxu3  ;;  %v3056_v30 = vpop.f32.mrf.mxu2 }
 0x596   :  { %4993 = vpow2.f32 %v4560_v43  ;;  %v3057_v34 = vadd.f32 %v3056_v30, %v9014_v18  ;;  %v9015_v46 = vld [vmem:[#allocation81_spill] sm:$0xff]  ;;  %v9017_v18 = vld [vmem:[#allocation103_spill] sm:$0xff] }
 0x597   :  { %v3032_v22 = vpop.f32.mrf.mxu0 }
 0x598   :  { %v3070_v16 = vadd.f32 %v3069_v47, %v3057_v34  ;;  %v9016_v22 = vld [vmem:[#allocation83_spill] sm:$0xff] }
 0x59a   :  { %v3221_v33 = vpop.f32.mrf.mxu1  ;;  %v4561_v50 = vmul.f32 -1.442695, %v3070_v16 }
 0x59b   :  { %v3256_v12 = vrot.slane %v3221_v33, 2  ;;  %v3260_v54 = vrot.slane %v3221_v33, 3 }
 0x59c   :  { %v4994_v39 = vpop.eup %4993  ;;  %4995 = vpow2.f32 %v4561_v50 }
 0x59d   :  { %v7691_v0 = vadd.f32 1.0, %v4994_v39  ;;  %v3058_v4 = vpop.f32.mrf.mxu2  ;;  %v3272_v2 = vadd.f32 %v3256_v12, %v9015_v46  ;;  %v3276_v34 = vadd.f32 %v3260_v54, %v9016_v22 }
 0x59f   :  { %4997 = vrcp.f32 %v7691_v0  ;;  %v3082_v37 = vpop.f32.mrf.mxu0  ;;  %v4565_v47 = vmul.f32 -1.442695, %v3272_v2  ;;  %v4566_v59 = vmul.f32 -1.442695, %v3276_v34  ;;  %v9019_v2 = vld [vmem:[#allocation86_spill] sm:$0xff]  ;;  %vm3134_vm4 = vweird.f32 %v7691_v0 }
 0x5a0   :  { %v3247_v63 = vpop.f32.mrf.mxu3 }
 0x5a1   :  { %v3258_v4 = vrot.slane %v3247_v63, 2  ;;  %v3262_v35 = vrot.slane %v3247_v63, 3 }
 0x5a2   :  { %v3223_v43 = vpop.f32.mrf.mxu1  ;;  %v4996_v19 = vpop.eup %4995 }
 0x5a3   :  { %v3147_v30 = vadd.f32 1.0, %v4996_v19  ;;  %v9018_v43 = vld [vmem:[#allocation102_spill] sm:$0xff]  ;;  %v3274_v22 = vadd.f32 %v3258_v4, %v9019_v2  ;;  %v3278_v28 = vadd.f32 %v3262_v35, %v9020_v45 }
 0x5a4   :  { %v3083_v19 = vadd.f32 %v3082_v37, %v9018_v43 }
 0x5a5   :  { %v7696_v16 = vpop.eup %4997  ;;  %4999 = vrcp.f32 %v3147_v30  ;;  %v3108_v50 = vpop.f32.mrf.mxu2  ;;  %vm3153_vm1 = vweird.f32 %v3147_v30  ;;  %v3157_v35 = vand.u32 2147483647, %v3147_v30 }
 0x5a6   :  { %v3130_v39 = vmul.f32 %v7696_v16, %v7691_v0  ;;  %v3109_v33 = vadd.f32 %v3108_v50, %v9017_v18  ;;  %5001 = vpow2.f32 %v4565_v47  ;;  %v3096_v56 = vadd.f32 %v3095_v17, %v3083_v19  ;;  %v9027_v18 = vld [vmem:[#allocation9_spill] sm:$0xff] }
 0x5a7   :  { %v3084_v26 = vpop.f32.mrf.mxu0  ;;  %5003 = vpow2.f32 %v4566_v59  ;;  %v4567_v47 = vmul.f32 -1.442695, %v3274_v22  ;;  %v3159_v59 = vand.u32 2147483648, %v3147_v30  ;;  %vm3135_vm2 = vweird.f32 %v7696_v16 }
 0x5a8   :  { %v3249_v12 = vpop.f32.mrf.mxu3  ;;  %v3122_v46 = vadd.f32 %v3121_v42, %v3109_v33  ;;  %v3131_v54 = vsub.f32 1.0, %v3130_v39  ;;  %vm7725_vm5 = vmor %vm3134_vm4, %vm3135_vm2  ;;  %vm3158_vm6 = vcmp.eq.f32.partialorder %v3157_v35, 8.507059e+37 }
 0x5a9   :  { %v4568_v12 = vmul.f32 -1.442695, %v3278_v28  ;;  %v3140_v28 = vand.u32 2147483648, %v7691_v0 }
 0x5aa   :  { %v4562_v5 = vmul.f32 -1.442695, %v3122_v46  ;;  %v3132_v26 = vmul.f32 %v7696_v16, %v3131_v54  ;;  %v3160_v54 = vor.u32 1.1754944e-38, %v3159_v59  ;;  %v9026_v46 = vld [vmem:[#allocation73_spill] sm:$0xff] }
 0x5ab   :  { %v5000_v13 = vpop.eup %4999 }
 0x5ac   :  { %v3149_v23 = vmul.f32 %v5000_v13, %v3147_v30  ;;  %5005 = vpow2.f32 %v4562_v5  ;;  %v5002_v34 = vpop.eup %5001  ;;  %vm3154_vm0 = vweird.f32 %v5000_v13  ;;  %v3133_v17 = vadd.f32 %v7696_v16, %v3132_v26 }
 0x5ad   :  { %v3110_v50 = vpop.f32.mrf.mxu2  ;;  %5007 = vtanh.f32 %v3096_v56  ;;  %v5004_v39 = vpop.eup %5003  ;;  %v7705_v4 = vadd.f32 1.0, %v5002_v34  ;;  %vm7709_vm3 = vmor %vm3153_vm1, %vm3154_vm0  ;;  %v3138_v56 = vand.u32 2147483647, %v7691_v0 }
 0x5ae   :  { %v3150_v63 = vsub.f32 1.0, %v3149_v23  ;;  %5009 = vpow2.f32 %v4567_v47  ;;  %v7716_v22 = vadd.f32 1.0, %v5004_v39 }
 0x5af   :  { %v3208_v37 = vpop.f32.mrf.mxu0  ;;  %5011 = vpow2.f32 %v4568_v12  ;;  %v9025_v12 = vld [vmem:[#allocation69_spill] sm:$0xff]  ;;  %vm3139_vm7 = vcmp.eq.f32.partialorder %v3138_v56, 8.507059e+37  ;;  %vm3330_vm13 = vweird.f32 %v7705_v4 }
 0x5b0   :  { %v3151_v42 = vmul.f32 %v5000_v13, %v3150_v63  ;;  %v3255_v19 = vrot.slane %v3208_v37, 2  ;;  %5013 = vrcp.f32 %v7705_v4  ;;  %v3137_v63 = vsel %vm7725_vm5, %v7696_v16, %v3133_v17 }
 0x5b1   :  { %v3259_v47 = vrot.slane %v3208_v37, 3  ;;  %vm3345_vm14 = vweird.f32 %v7716_v22  ;;  %v3349_v62 = vand.u32 2147483647, %v7716_v22 }
 0x5b2   :  { %v3152_v5 = vadd.f32 %v5000_v13, %v3151_v42  ;;  %v5006_v23 = vpop.eup %5005  ;;  %v3271_v42 = vadd.f32 %v3255_v19, %v9025_v12 }
 0x5b3   :  { %v7720_v33 = vadd.f32 1.0, %v5006_v23  ;;  %v5008_v0 = vpop.eup %5007  ;;  %v3275_v43 = vadd.f32 %v3259_v47, %v9026_v46 }
 0x5b4   :  { %v3156_v30 = vsel %vm7709_vm3, %v5000_v13, %v3152_v5  ;;  %v3141_v13 = vor.u32 1.1754944e-38, %v3140_v28  ;;  %v5010_v59 = vpop.eup %5009  ;;  %v4563_v16 = vmul.f32 -1.442695, %v3271_v42 }
 0x5b5   :  { %v7729_v34 = vpop.f32.mrf.mxu2  ;;  %5015 = vrcp.f32 %v7720_v33  ;;  %v3161_v26 = vsel %vm3158_vm6, %v3160_v54, %v3156_v30  ;;  %v5012_v5 = vpop.eup %5011  ;;  %v4564_v17 = vmul.f32 -1.442695, %v3275_v43  ;;  %v7741_v37 = vadd.f32 1.0, %v5010_v59 }
 0x5b6   :  { %5017 = vrcp.f32 %v7716_v22  ;;  %v3142_v23 = vsel %vm3139_vm7, %v3141_v13, %v3137_v63  ;;  %v3183_v50 = vmul.f32 %v3161_v26, %v9027_v18  ;;  %v7739_v35 = vpop.eup %5013  ;;  %v7743_v19 = vadd.f32 1.0, %v5012_v5 }
 0x5b7   :  { %v3210_v39 = vpop.f32.mrf.mxu0  ;;  %v3184_v30 = vmul.f32 %v5008_v0, %v3142_v23  ;;  %5019 = vpow2.f32 %v4563_v16  ;;  %v3326_v18 = vmul.f32 %v7739_v35, %v7705_v4  ;;  %vm3173_vm9 = vweird.f32 %v7720_v33 }
 0x5b8   :  { %5021 = vpow2.f32 %v4564_v17  ;;  %v3179_v39 = vand.u32 2147483648, %v7720_v33  ;;  %vm3331_vm15 = vweird.f32 %v7739_v35  ;;  %vm3350_vm7 = vcmp.eq.f32.partialorder %v3349_v62, 8.507059e+37 }
 0x5b9   :  { %v7750_v13 = vadd.f32 %v3184_v30, %v3183_v50  ;;  %5023 = vrcp.f32 %v7741_v37  ;;  %v3327_v42 = vsub.f32 1.0, %v3326_v18  ;;  %v3177_v50 = vand.u32 2147483647, %v7720_v33  ;;  %vm7798_vm2 = vmor %vm3330_vm13, %vm3331_vm15 }
 0x5ba   :  { %5025 = vrcp.f32 %v7743_v19  ;;  %v3336_v30 = vand.u32 2147483648, %v7705_v4 }
 0x5bb   :  { %v5016_v28 = vpop.eup %5015  ;;  %9028 = vst [vmem:[#allocation7_spill] sm:$0xff] %v7750_v13  ;;  %5027 = vtanh.f32 %v7750_v13  ;;  %v3328_v18 = vmul.f32 %v7739_v35, %v3327_v42  ;;  %vm3178_vm12 = vcmp.eq.f32.partialorder %v3177_v50, 8.507059e+37  ;;  %v3351_v42 = vand.u32 2147483648, %v7716_v22 }
 0x5bc   :  { %v3169_v54 = vmul.f32 %v5016_v28, %v7720_v33  ;;  %v7746_v63 = vpop.eup %5017  ;;  %vm3174_vm8 = vweird.f32 %v5016_v28  ;;  %v3337_v45 = vor.u32 1.1754944e-38, %v3336_v30 }
 0x5bd   :  { %v3236_v56 = vpop.f32.mrf.mxu2  ;;  %v3341_v43 = vmul.f32 %v7746_v63, %v7716_v22  ;;  %v5020_v47 = vpop.eup %5019  ;;  %vm3175_vm11 = vmor %vm3173_vm9, %vm3174_vm8  ;;  %v3329_v50 = vadd.f32 %v7739_v35, %v3328_v18  ;;  %vm3346_vm1 = vweird.f32 %v7746_v63 }
 0x5be   :  { %v3170_v26 = vsub.f32 1.0, %v3169_v54  ;;  %v5022_v59 = vpop.eup %5021  ;;  %v7758_v5 = vadd.f32 1.0, %v5020_v47  ;;  %vm7814_vm3 = vmor %vm3345_vm14, %vm3346_vm1 }
 0x5bf   :  { %v7762_v17 = vadd.f32 1.0, %v5022_v59  ;;  %v3342_v54 = vsub.f32 1.0, %v3341_v43  ;;  %v7767_v56 = vpop.eup %5023  ;;  %v3261_v59 = vrot.slane %v7729_v34, 3  ;;  %v3334_v43 = vand.u32 2147483647, %v7705_v4 }
 0x5c0   :  { %v3171_v0 = vmul.f32 %v5016_v28, %v3170_v26  ;;  %5029 = vrcp.f32 %v7758_v5  ;;  %v3180_v26 = vor.u32 1.1754944e-38, %v3179_v39  ;;  %v7772_v47 = vpop.eup %5025  ;;  %v3366_v12 = vmul.f32 %v7767_v56, %v7741_v37 }
 0x5c1   :  { %5031 = vrcp.f32 %v7762_v17  ;;  %v5028_v33 = vpop.eup %5027  ;;  %v3343_v46 = vmul.f32 %v7746_v63, %v3342_v54  ;;  %vm7789_vm0 = vcmp.eq.f32.partialorder %v3334_v43, 8.507059e+37  ;;  %v3298_v4 = vand.u32 2147483648, %v7758_v5 }
 0x5c2   :  { %v3172_v23 = vadd.f32 %v5016_v28, %v3171_v0  ;;  %v3257_v0 = vrot.slane %v7729_v34, 2  ;;  %v3367_v30 = vsub.f32 1.0, %v3366_v12  ;;  %vm3292_vm6 = vweird.f32 %v7758_v5 }
 0x5c3   :  { %vm3307_vm9 = vweird.f32 %v7762_v17  ;;  %vm3371_vm14 = vweird.f32 %v7767_v56  ;;  %vm3386_vm15 = vweird.f32 %v7772_v47 }
 0x5c4   :  { %v3176_v16 = vsel %vm3175_vm11, %v5016_v28, %v3172_v23  ;;  %v3381_v28 = vmul.f32 %v7772_v47, %v7743_v19  ;;  %v3273_v23 = vadd.f32 %v3257_v0, %v8845_v14  ;;  %v3368_v22 = vmul.f32 %v7767_v56, %v3367_v30 }
 0x5c5   :  { %v3181_v39 = vsel %vm3178_vm12, %v3180_v26, %v3176_v16  ;;  %v3277_v16 = vadd.f32 %v3261_v59, %v8939_v31  ;;  %v3344_v59 = vadd.f32 %v7746_v63, %v3343_v46 }
 0x5c6   :  { %v3187_v34 = vmul.f32 %v5028_v33, %v3181_v39  ;;  %v5030_v13 = vpop.eup %5029  ;;  %v3352_v33 = vor.u32 1.1754944e-38, %v3351_v42  ;;  %v3333_v42 = vsel %vm7798_vm2, %v7739_v35, %v3329_v50  ;;  %5033 = vtanh.f32 %v3273_v23 }
 0x5c7   :  { %v5032_v2 = vpop.eup %5031  ;;  %v3288_v39 = vmul.f32 %v5030_v13, %v7758_v5  ;;  %5035 = vtanh.f32 %v3277_v16  ;;  %vm3293_vm4 = vweird.f32 %v5030_v13  ;;  %v3313_v35 = vand.u32 2147483648, %v7762_v17 }
 0x5c8   :  { %v3418_v26 = vrot.slane %v3187_v34, 2  ;;  %v3303_v0 = vmul.f32 %v5032_v2, %v7762_v17  ;;  %v3382_v34 = vsub.f32 1.0, %v3381_v28  ;;  %v3296_v28 = vand.u32 2147483647, %v7758_v5  ;;  %vm3294_vm8 = vmor %vm3292_vm6, %vm3293_vm4 }
 0x5c9   :  { %v3289_v31 = vsub.f32 1.0, %v3288_v39  ;;  %vm3308_vm5 = vweird.f32 %v5032_v2  ;;  %v3311_v50 = vand.u32 2147483647, %v7762_v17  ;;  %v3348_v16 = vsel %vm7814_vm3, %v7746_v63, %v3344_v59 }
 0x5ca   :  { %v3421_v43 = vpack.c.bf16 %v3418_v26, %v3418_v26  ;;  %v3304_v14 = vsub.f32 1.0, %v3303_v0  ;;  %v3338_v63 = vsel %vm7789_vm0, %v3337_v45, %v3333_v42  ;;  %vm3297_vm11 = vcmp.eq.f32.partialorder %v3296_v28, 8.507059e+37  ;;  %vm3309_vm12 = vmor %vm3307_vm9, %vm3308_vm5 }
 0x5cb   :  { %v3290_v46 = vmul.f32 %v5030_v13, %v3289_v31  ;;  %v3314_v5 = vor.u32 1.1754944e-38, %v3313_v35  ;;  %v3353_v62 = vsel %vm3350_vm7, %v3352_v33, %v3348_v16  ;;  %vm3312_vm13 = vcmp.eq.f32.partialorder %v3311_v50, 8.507059e+37 }
 0x5cc   :  { %v7808_v61 = vrot.slane %v3421_v43, 3  ;;  %v3305_v23 = vmul.f32 %v5032_v2, %v3304_v14  ;;  %v3299_v14 = vor.u32 1.1754944e-38, %v3298_v4  ;;  %v5034_v39 = vpop.eup %5033  ;;  %v9035_v43 = vrot.slane %v7576_v32, 7 }
 0x5cd   :  { %v3291_v31 = vadd.f32 %v5030_v13, %v3290_v46  ;;  %v5036_v30 = vpop.eup %5035  ;;  %v9036_v45 = vrot.slane %v7580_v48, 7  ;;  %v3376_v32 = vand.u32 2147483648, %v7741_v37  ;;  %vm3370_vm0 = vweird.f32 %v7741_v37 }
 0x5ce   :  { %3449 = vmatmul.bf16.vlgmr.msrb.gmra.mxu1 %v7808_v61  ;;  %3475 = vmatmul.bf16.vlgmr.msra.gmra.mxu3 %v7808_v61  ;;  %v3306_v26 = vadd.f32 %v5032_v2, %v3305_v23  ;;  %v3401_v17 = vmul.f32 %v9035_v43, %v3338_v63  ;;  %vm3372_vm1 = vmor %vm3370_vm0, %vm3371_vm14  ;;  %vm3385_vm2 = vweird.f32 %v7743_v19  ;;  %v3389_v48 = vand.u32 2147483647, %v7743_v19  ;;  %v9055_v63 = vld [vmem:[#allocation40_spill] sm:$0xff]  ;;  %v9065_v43 = vld [vmem:[#allocation50_spill] sm:$0xff] }
 0x5cf   :  { %3619 = vmatpush.bf16.msrb.mxu1 %v8566_v44  ;;  %3645 = vmatpush.bf16.msra.mxu3 %v8567_v27  ;;  %v3295_v18 = vsel %vm3294_vm8, %v5030_v13, %v3291_v31  ;;  %v3383_v44 = vmul.f32 %v7772_v47, %v3382_v34  ;;  %v3402_v13 = vmul.f32 %v9036_v45, %v3353_v62  ;;  %vm3387_vm3 = vmor %vm3385_vm2, %vm3386_vm15  ;;  %v3377_v46 = vor.u32 1.1754944e-38, %v3376_v32  ;;  %v9059_v62 = vld [vmem:[#allocation43_spill] sm:$0xff]  ;;  %v9068_v45 = vld [vmem:[#allocation57_spill] sm:$0xff] }
 0x5d0   :  { %v3300_v27 = vsel %vm3297_vm11, %v3299_v14, %v3295_v18  ;;  %v3310_v0 = vsel %vm3309_vm12, %v5032_v2, %v3306_v26  ;;  %v3369_v34 = vadd.f32 %v7767_v56, %v3368_v22  ;;  %vm3390_vm5 = vcmp.eq.f32.partialorder %v3389_v48, 8.507059e+37  ;;  %v9057_v18 = vld [vmem:[#allocation48_spill] sm:$0xff]  ;;  %v9072_v32 = vld [vmem:[#allocation61_spill] sm:$0xff] }
 0x5d1   :  { %v3315_v59 = vsel %vm3312_vm13, %v3314_v5, %v3310_v0  ;;  %v3403_v4 = vmul.f32 %v5034_v39, %v3300_v27  ;;  %v3384_v42 = vadd.f32 %v7772_v47, %v3383_v44  ;;  %vm3414_vm6 = vcmask 1047559   ;;  %v9056_v39 = vld [vmem:[#allocation41_spill] sm:$0xff]  ;;  %v9061_v44 = vld [vmem:[#allocation46_spill] sm:$0xff]  ;;  %v9062_v27 = vld [vmem:[#allocation47_spill] sm:$0xff] }
 0x5d2   :  { %v3404_v54 = vmul.f32 %v5036_v30, %v3315_v59  ;;  %v3373_v12 = vsel %vm3372_vm1, %v7767_v56, %v3369_v34  ;;  %v9058_v5 = vld [vmem:[#allocation49_spill] sm:$0xff]  ;;  %v9063_v0 = vld [vmem:[#allocation52_spill] sm:$0xff] }
 0x5d3   :  { %3620 = vmatpush.bf16.msrb.mxu1 %v8568_v53  ;;  %3646 = vmatpush.bf16.msra.mxu3 %v8569_v6  ;;  %v7842_v33 = vadd.f32 %v3403_v4, %v3401_v17  ;;  %v3374_v53 = vand.u32 2147483647, %v7741_v37  ;;  %v3391_v6 = vand.u32 2147483648, %v7743_v19  ;;  %v9060_v30 = vld [vmem:[#allocation45_spill] sm:$0xff]  ;;  %v9066_v17 = vld [vmem:[#allocation51_spill] sm:$0xff]  ;;  %v9067_v4 = vld [vmem:[#allocation56_spill] sm:$0xff] }
 0x5d4   :  { %v7846_v2 = vadd.f32 %v3404_v54, %v3402_v13  ;;  %v9064_v59 = vld [vmem:[#allocation53_spill] sm:$0xff]  ;;  %v9069_v13 = vld [vmem:[#allocation54_spill] sm:$0xff]  ;;  %v9070_v54 = vld [vmem:[#allocation55_spill] sm:$0xff] }
 0x5d5   :  { %5037 = vtanh.f32 %v7842_v33  ;;  %vm3375_vm4 = vcmp.eq.f32.partialorder %v3374_v53, 8.507059e+37  ;;  %v9071_v34 = vld [vmem:[#allocation60_spill] sm:$0xff]  ;;  %v9074_v53 = vld [vmem:[#allocation59_spill] sm:$0xff]  ;;  %v9076_v48 = vld [vmem:[#allocation65_spill] sm:$0xff] }
 0x5d6   :  { %5039 = vtanh.f32 %v7846_v2  ;;  %v3378_v28 = vsel %vm3375_vm4, %v3377_v46, %v3373_v12  ;;  %v9077_v12 = vld [vmem:[#allocation62_spill] sm:$0xff]  ;;  %v9078_v46 = vld [vmem:[#allocation63_spill] sm:$0xff] }
 0x5d7   :  { %3621 = vmatpush.bf16.msrb.mxu1 %v8570_v36  ;;  %3647 = vmatpush.bf16.msra.mxu3 %v8571_v52  ;;  %v3388_v36 = vsel %vm3387_vm3, %v7772_v47, %v3384_v42  ;;  %v3392_v52 = vor.u32 1.1754944e-38, %v3391_v6  ;;  %v9073_v42 = vld [vmem:[#allocation58_spill] sm:$0xff]  ;;  %v9075_v6 = vld [vmem:[#allocation64_spill] sm:$0xff] }
 0x5d9   :  { %v3393_v19 = vsel %vm3390_vm5, %v3392_v52, %v3388_v36  ;;  %v9079_v36 = vld [vmem:[#allocation68_spill] sm:$0xff]  ;;  %v9080_v52 = vld [vmem:[#allocation70_spill] sm:$0xff] }
 0x5db   :  { %3622 = vmatpush.bf16.msrb.mxu1 %v8572_v11  ;;  %3648 = vmatpush.bf16.msra.mxu3 %v8573_v15  ;;  %v5038_v37 = vpop.eup %5037 }
 0x5dc   :  { %v5040_v35 = vpop.eup %5039  ;;  %v3409_v23 = vmul.f32 %v5038_v37, %v3378_v28  ;;  %v9081_v37 = vld [vmem:[#allocation66_spill] sm:$0xff]  ;;  %v9082_v28 = vld [vmem:[#allocation67_spill] sm:$0xff] }
 0x5dd   :  { %v3410_v56 = vmul.f32 %v5040_v35, %v3393_v19  ;;  %v9083_v35 = vld [vmem:[#allocation74_spill] sm:$0xff]  ;;  %v9084_v19 = vld [vmem:[#allocation75_spill] sm:$0xff] }
 0x5de   :  { %3501 = vmatmul.bf16.vlgmr.msra.gmra.mxu1 %v7808_v61  ;;  %3527 = vmatmul.bf16.vlgmr.msrb.gmra.mxu3 %v7808_v61  ;;  %v3595_v11 = vpack.c.bf16 %v3409_v23, %v3409_v23 }
 0x5df   :  { %3623 = vmatpush.bf16.msrb.mxu1 %v8574_v1  ;;  %3649 = vmatpush.bf16.msra.mxu3 %v8575_v8  ;;  %v3413_v15 = vrot.slane %v3410_v56, 7  ;;  %v3596_v47 = vpack.c.bf16 %v3410_v56, %v3410_v56  ;;  %v9086_v56 = vld [vmem:[#allocation78_spill] sm:$0xff] }
 0x5e0   :  { %v3599_v50 = vunpack.c.l.b16 %v3595_v11  ;;  %v9087_v11 = vld [vmem:[#allocation71_spill] sm:$0xff] }
 0x5e1   :  { %v3415_v16 = vsel %vm3414_vm6, %v3413_v15, %v3409_v23  ;;  %v3600_v22 = vunpack.c.l.b16 %v3596_v47  ;;  %v9085_v23 = vld [vmem:[#allocation76_spill] sm:$0xff] }
 0x5e2   :  { %v3420_v31 = vpack.c.bf16 %v3415_v16, %v3415_v16  ;;  %v3601_v61 = vrot.slane %v3599_v50, 6  ;;  %v9088_v15 = vld [vmem:[#allocation72_spill] sm:$0xff]  ;;  %v9090_v50 = vld [vmem:[#allocation82_spill] sm:$0xff]  ;;  %v9091_v16 = vld [vmem:[#allocation77_spill] sm:$0xff] }
 0x5e3   :  { %3624 = vmatpush.bf16.msrb.mxu1 %v8576_v25  ;;  %3650 = vmatpush.bf16.msra.mxu3 %v8577_v58  ;;  %v3602_v14 = vrot.slane %v3600_v22, 5  ;;  %v9046_v25 = vld [vmem:[#allocation37_spill] sm:$0xff]  ;;  %v9047_v58 = vld [vmem:[#allocation18_spill] sm:$0xff]  ;;  %v9089_v47 = vld [vmem:[#allocation80_spill] sm:$0xff] }
 0x5e4   :  { %v3424_v26 = vrot.slane %v3420_v31, 3  ;;  %v9092_v22 = vld [vmem:[#allocation79_spill] sm:$0xff]  ;;  %v9093_v31 = vld [vmem:[#allocation84_spill] sm:$0xff] }
 0x5e5   :  { %v3603_v1 = vsel %vm624_vm10, %v3602_v14, %v3601_v61  ;;  %v9094_v61 = vld [vmem:[#allocation85_spill] sm:$0xff]  ;;  %v9095_v14 = vld [vmem:[#allocation88_spill] sm:$0xff] }
 0x5e6   :  { %3436 = vmatmul.bf16.vlgmr.msrb.gmra.mxu0 %v3424_v26  ;;  %3462 = vmatmul.bf16.vlgmr.msra.gmra.mxu2 %v3424_v26  ;;  %v3604_v8 = vpack.c.b16 %v3603_v1, %v3603_v1  ;;  %v9097_v1 = vld [vmem:[#allocation90_spill] sm:$0xff] }
 0x5e7   :  { %3625 = vmatpush.bf16.msrb.mxu1 %v8578_v10  ;;  %3651 = vmatpush.bf16.msra.mxu3 %v8579_v49  ;;  %v9048_v10 = vld [vmem:[#allocation27_spill] sm:$0xff]  ;;  %v9049_v49 = vld [vmem:[#allocation38_spill] sm:$0xff] }
 0x5e8   :  { %3606 = vmatpush.bf16.msrb.mxu0 %v5188_v3  ;;  %3632 = vmatpush.bf16.msra.mxu2 %v5254_v29  ;;  %v9037_v3 = vld [vmem:[#allocation8_spill] sm:$0xff] }
 0x5e9   :  { %v9038_v29 = vld [vmem:[#allocation16_spill] sm:$0xff] }
 0x5eb   :  { %3626 = vmatpush.bf16.msrb.mxu1 %v5510_v60  ;;  %3652 = vmatpush.bf16.msra.mxu3 %v5498_v55  ;;  %v9041_v55 = vld [vmem:[#allocation34_spill] sm:$0xff]  ;;  %v9045_v60 = vld [vmem:[#allocation36_spill] sm:$0xff] }
 0x5ec   :  { %3607 = vmatpush.bf16.msrb.mxu0 %v5200_v7  ;;  %3633 = vmatpush.bf16.msra.mxu2 %v5286_v38  ;;  %v9039_v7 = vld [vmem:[#allocation11_spill] sm:$0xff]  ;;  %v9040_v38 = vld [vmem:[#allocation20_spill] sm:$0xff] }
 0x5ee   :  { %3627 = vmatmul.bf16.vlgmr.msrb.gmra.mxu1 %v3604_v8  ;;  %3653 = vmatmul.bf16.vlgmr.msra.gmra.mxu3 %v3604_v8 }
 0x5ef   :  { %3859 = vmatpush.bf16.msra.mxu1 %v8580_v21  ;;  %3885 = vmatpush.bf16.msrb.mxu3 %v5506_v57  ;;  %v9042_v57 = vld [vmem:[#allocation35_spill] sm:$0xff] }
 0x5f0   :  { %3608 = vmatpush.bf16.msrb.mxu0 %v5246_v24  ;;  %3634 = vmatpush.bf16.msra.mxu2 %v5331_v51  ;;  %v9043_v24 = vld [vmem:[#allocation14_spill] sm:$0xff]  ;;  %v9044_v51 = vld [vmem:[#allocation24_spill] sm:$0xff]  ;;  %v9050_v21 = vld [vmem:[#allocation39_spill] sm:$0xff] }
 0x5f3   :  { %3860 = vmatpush.bf16.msra.mxu1 %v8854_v9  ;;  %3886 = vmatpush.bf16.msrb.mxu3 %v8855_v41  ;;  %v9051_v9 = vld [vmem:[#allocation22_spill] sm:$0xff]  ;;  %v9052_v41 = vld [vmem:[#allocation28_spill] sm:$0xff] }
 0x5f4   :  { %3609 = vmatpush.bf16.msrb.mxu0 %v9037_v3  ;;  %3635 = vmatpush.bf16.msra.mxu2 %v9038_v29  ;;  %v9099_v3 = vld [vmem:[#allocation94_spill] sm:$0xff]  ;;  %v9100_v29 = vld [vmem:[#allocation95_spill] sm:$0xff] }
 0x5f6   :  { %3488 = vmatmul.bf16.vlgmr.msra.gmra.mxu0 %v3424_v26  ;;  %3514 = vmatmul.bf16.vlgmr.msrb.gmra.mxu2 %v3424_v26  ;;  %v9096_v26 = vld [vmem:[#allocation89_spill] sm:$0xff] }
 0x5f7   :  { %3861 = vmatpush.bf16.msra.mxu1 %v8945_v20  ;;  %3887 = vmatpush.bf16.msrb.mxu3 %v8946_v40  ;;  %v9053_v20 = vld [vmem:[#allocation42_spill] sm:$0xff]  ;;  %v9054_v40 = vld [vmem:[#allocation44_spill] sm:$0xff] }
 0x5f8   :  { %3610 = vmatpush.bf16.msrb.mxu0 %v9039_v7  ;;  %3636 = vmatpush.bf16.msra.mxu2 %v9040_v38  ;;  %v9101_v7 = vld [vmem:[#allocation96_spill] sm:$0xff]  ;;  %v9102_v38 = vld [vmem:[#allocation97_spill] sm:$0xff] }
 0x5fb   :  { %3862 = vmatpush.bf16.msra.mxu1 %v9041_v55  ;;  %3888 = vmatpush.bf16.msrb.mxu3 %v9042_v57  ;;  %v9103_v55 = vld [vmem:[#allocation98_spill] sm:$0xff]  ;;  %v9104_v57 = vld [vmem:[#allocation99_spill] sm:$0xff] }
 0x5fc   :  { %3611 = vmatpush.bf16.msrb.mxu0 %v9043_v24  ;;  %3637 = vmatpush.bf16.msra.mxu2 %v9044_v51 }
 0x5ff   :  { %3863 = vmatpush.bf16.msra.mxu1 %v9045_v60  ;;  %3889 = vmatpush.bf16.msrb.mxu3 %v9046_v25 }
 0x600   :  { %3612 = vmatpush.bf16.msrb.mxu0 %v9047_v58  ;;  %3638 = vmatpush.bf16.msra.mxu2 %v9048_v10 }
 0x603   :  { %3864 = vmatpush.bf16.msra.mxu1 %v9049_v49  ;;  %3890 = vmatpush.bf16.msrb.mxu3 %v9050_v21 }
 0x604   :  { %3613 = vmatpush.bf16.msrb.mxu0 %v9051_v9  ;;  %3639 = vmatpush.bf16.msra.mxu2 %v9052_v41  ;;  %v9105_v9 = vld [vmem:[#allocation100_spill] sm:$0xff] }
 0x607   :  { %3865 = vmatpush.bf16.msra.mxu1 %v9055_v63  ;;  %3891 = vmatpush.bf16.msrb.mxu3 %v9056_v39 }
 0x608   :  { %3846 = vmatpush.bf16.msra.mxu0 %v9053_v20  ;;  %3872 = vmatpush.bf16.msrb.mxu2 %v9054_v40 }
 0x609   :  { %3614 = vmatmul.bf16.vlgmr.msrb.gmra.mxu0 %v3604_v8  ;;  %3640 = vmatmul.bf16.vlgmr.msra.gmra.mxu2 %v3604_v8  ;;  %v9098_v8 = vld [vmem:[#allocation91_spill] sm:$0xff] }
 0x60b   :  { %3866 = vmatpush.bf16.msra.mxu1 %v9059_v62  ;;  %3892 = vmatpush.bf16.msrb.mxu3 %v9060_v30 }
 0x60c   :  { %3847 = vmatpush.bf16.msra.mxu0 %v9057_v18  ;;  %3873 = vmatpush.bf16.msrb.mxu2 %v9058_v5  ;;  %v9106_v5 = vld [vmem:[#allocation101_spill] sm:$0xff] }
 0x60f   :  { %3911 = vmatpush.bf16.msrb.mxu1 %v9061_v44  ;;  %3937 = vmatpush.bf16.msra.mxu3 %v9062_v27 }
 0x610   :  { %3848 = vmatpush.bf16.msra.mxu0 %v9063_v0  ;;  %3874 = vmatpush.bf16.msrb.mxu2 %v9064_v59  ;;  %v9107_v59 = vld [vmem:[#allocation81_spill] sm:$0xff] }
 0x613   :  { %3912 = vmatpush.bf16.msrb.mxu1 %v9065_v43  ;;  %3938 = vmatpush.bf16.msra.mxu3 %v9066_v17 }
 0x614   :  { %3849 = vmatpush.bf16.msra.mxu0 %v9067_v4  ;;  %3875 = vmatpush.bf16.msrb.mxu2 %v9068_v45 }
 0x617   :  { %3913 = vmatpush.bf16.msrb.mxu1 %v9069_v13  ;;  %3939 = vmatpush.bf16.msra.mxu3 %v9070_v54  ;;  %v9108_v13 = vld [vmem:[#allocation83_spill] sm:$0xff] }
 0x618   :  { %3850 = vmatpush.bf16.msra.mxu0 %v9071_v34  ;;  %3876 = vmatpush.bf16.msrb.mxu2 %v9072_v32 }
 0x61b   :  { %3914 = vmatpush.bf16.msrb.mxu1 %v9073_v42  ;;  %3940 = vmatpush.bf16.msra.mxu3 %v9074_v53 }
 0x61c   :  { %3851 = vmatpush.bf16.msra.mxu0 %v9075_v6  ;;  %3877 = vmatpush.bf16.msrb.mxu2 %v9076_v48 }
 0x61f   :  { %3915 = vmatpush.bf16.msrb.mxu1 %v9077_v12  ;;  %3941 = vmatpush.bf16.msra.mxu3 %v9078_v46 }
 0x620   :  { %3852 = vmatpush.bf16.msra.mxu0 %v9079_v36  ;;  %3878 = vmatpush.bf16.msrb.mxu2 %v9080_v52 }
 0x623   :  { %3916 = vmatpush.bf16.msrb.mxu1 %v9081_v37  ;;  %3942 = vmatpush.bf16.msra.mxu3 %v9082_v28  ;;  %v9109_v28 = vld [vmem:[#allocation86_spill] sm:$0xff] }
 0x624   :  { %3853 = vmatpush.bf16.msra.mxu0 %v9083_v35  ;;  %3879 = vmatpush.bf16.msrb.mxu2 %v9084_v19 }
 0x627   :  { %3917 = vmatpush.bf16.msrb.mxu1 %v9087_v11  ;;  %3943 = vmatpush.bf16.msra.mxu3 %v9088_v15  ;;  %v9110_v15 = vld [vmem:[#allocation87_spill] sm:$0xff] }
 0x628   :  { %3898 = vmatpush.bf16.msrb.mxu0 %v9085_v23  ;;  %3924 = vmatpush.bf16.msra.mxu2 %v9086_v56 }
 0x62b   :  { %3918 = vmatpush.bf16.msrb.mxu1 %v9091_v16  ;;  %3944 = vmatpush.bf16.msra.mxu3 %v9092_v22 }
 0x62c   :  { %3899 = vmatpush.bf16.msrb.mxu0 %v9089_v47  ;;  %3925 = vmatpush.bf16.msra.mxu2 %v9090_v50 }
 0x630   :  { %3900 = vmatpush.bf16.msrb.mxu0 %v9093_v31  ;;  %3926 = vmatpush.bf16.msra.mxu2 %v9094_v61 }
 0x634   :  { %3901 = vmatpush.bf16.msrb.mxu0 %v9095_v14  ;;  %3927 = vmatpush.bf16.msra.mxu2 %v9096_v26 }
 0x638   :  { %3902 = vmatpush.bf16.msrb.mxu0 %v9097_v1  ;;  %3928 = vmatpush.bf16.msra.mxu2 %v9098_v8  ;;  %v9111_v8 = vld [vmem:[#allocation103_spill] sm:$0xff] }
 0x63c   :  { %3903 = vmatpush.bf16.msrb.mxu0 %v9099_v3  ;;  %3929 = vmatpush.bf16.msra.mxu2 %v9100_v29 }
 0x640   :  { %3904 = vmatpush.bf16.msrb.mxu0 %v9101_v7  ;;  %3930 = vmatpush.bf16.msra.mxu2 %v9102_v38 }
 0x644   :  { %3905 = vmatpush.bf16.msrb.mxu0 %v9103_v55  ;;  %3931 = vmatpush.bf16.msra.mxu2 %v9104_v57  ;;  %v9112_v57 = vld [vmem:[#allocation102_spill] sm:$0xff] }
 0x64b   :  { %v3450_v24 = vpop.f32.mrf.mxu1 }
 0x651   :  { %v3476_v51 = vpop.f32.mrf.mxu3 }
 0x653   :  { %v3452_v60 = vpop.f32.mrf.mxu1 }
 0x659   :  { %v3478_v25 = vpop.f32.mrf.mxu3 }
 0x65b   :  { %v7955_v58 = vpop.f32.mrf.mxu1 }
 0x661   :  { %v3528_v10 = vpop.f32.mrf.mxu3 }
 0x663   :  { %v3504_v49 = vpop.f32.mrf.mxu1  ;;  %v3437_v21 = vpop.f32.mrf.mxu0 }
 0x664   :  { %v3438_v41 = vadd.f32 %v3437_v21, %v9105_v9 }
 0x666   :  { %v3451_v20 = vadd.f32 %v3450_v24, %v3438_v41 }
 0x668   :  { %v4569_v63 = vmul.f32 -1.442695, %v3451_v20 }
 0x669   :  { %v3530_v40 = vpop.f32.mrf.mxu3  ;;  %v3463_v39 = vpop.f32.mrf.mxu2 }
 0x66a   :  { %5041 = vpow2.f32 %v4569_v63  ;;  %v3464_v62 = vadd.f32 %v3463_v39, %v9106_v5  ;;  %v9113_v63 = vld [vmem:[#allocation69_spill] sm:$0xff] }
 0x66b   :  { %v3628_v18 = vpop.f32.mrf.mxu1  ;;  %v3439_v44 = vpop.f32.mrf.mxu0 }
 0x66c   :  { %v3663_v30 = vrot.slane %v3628_v18, 1  ;;  %v3477_v27 = vadd.f32 %v3476_v51, %v3464_v62  ;;  %v3667_v0 = vrot.slane %v3628_v18, 2 }
 0x66e   :  { %v3679_v43 = vadd.f32 %v3663_v30, %v9107_v59  ;;  %v4570_v17 = vmul.f32 -1.442695, %v3477_v27  ;;  %v3683_v54 = vadd.f32 %v3667_v0, %v9108_v13  ;;  %v9114_v0 = vld [vmem:[#allocation73_spill] sm:$0xff] }
 0x670   :  { %v5042_v45 = vpop.eup %5041  ;;  %5043 = vpow2.f32 %v4570_v17  ;;  %v4574_v34 = vmul.f32 -1.442695, %v3679_v43  ;;  %v4575_v48 = vmul.f32 -1.442695, %v3683_v54 }
 0x671   :  { %v3654_v4 = vpop.f32.mrf.mxu3  ;;  %v3465_v32 = vpop.f32.mrf.mxu2  ;;  %v7961_v53 = vadd.f32 1.0, %v5042_v45 }
 0x672   :  { %5045 = vpow2.f32 %v4574_v34  ;;  %v3665_v12 = vrot.slane %v3654_v4, 1  ;;  %v3669_v37 = vrot.slane %v3654_v4, 2 }
 0x673   :  { %v3630_v42 = vpop.f32.mrf.mxu1  ;;  %v3489_v6 = vpop.f32.mrf.mxu0  ;;  %5047 = vrcp.f32 %v7961_v53  ;;  %v3547_v45 = vand.u32 2147483648, %v7961_v53  ;;  %vm3541_vm11 = vweird.f32 %v7961_v53 }
 0x674   :  { %5049 = vpow2.f32 %v4575_v48  ;;  %v3681_v35 = vadd.f32 %v3665_v12, %v9109_v28  ;;  %v3685_v47 = vadd.f32 %v3669_v37, %v9110_v15  ;;  %v3490_v24 = vadd.f32 %v3489_v6, %v9112_v57 }
 0x675   :  { %v3545_v42 = vand.u32 2147483647, %v7961_v53  ;;  %v3548_v28 = vor.u32 1.1754944e-38, %v3547_v45 }
 0x676   :  { %v5044_v46 = vpop.eup %5043  ;;  %v4576_v50 = vmul.f32 -1.442695, %v3681_v35  ;;  %v4577_v26 = vmul.f32 -1.442695, %v3685_v47  ;;  %v3503_v18 = vadd.f32 %v7955_v58, %v3490_v24 }
 0x677   :  { %v7964_v36 = vadd.f32 1.0, %v5044_v46  ;;  %vm3546_vm14 = vcmp.eq.f32.partialorder %v3545_v42, 8.507059e+37 }
 0x678   :  { %v5046_v23 = vpop.eup %5045 }
 0x679   :  { %v3656_v52 = vpop.f32.mrf.mxu3  ;;  %5051 = vrcp.f32 %v7964_v36  ;;  %v3515_v19 = vpop.f32.mrf.mxu2  ;;  %v7971_v16 = vadd.f32 1.0, %v5046_v23  ;;  %v3566_v4 = vand.u32 2147483648, %v7964_v36  ;;  %vm3560_vm8 = vweird.f32 %v7964_v36 }
 0x67a   :  { %v7968_v11 = vpop.eup %5047  ;;  %5053 = vpow2.f32 %v4576_v50  ;;  %v3516_v3 = vadd.f32 %v3515_v19, %v9111_v8  ;;  %v3564_v54 = vand.u32 2147483647, %v7964_v36 }
 0x67b   :  { %v3491_v56 = vpop.f32.mrf.mxu0  ;;  %v5050_v22 = vpop.eup %5049  ;;  %v3537_v61 = vmul.f32 %v7968_v11, %v7961_v53  ;;  %5055 = vrcp.f32 %v7971_v16  ;;  %vm3542_vm7 = vweird.f32 %v7968_v11  ;;  %v3567_v37 = vor.u32 1.1754944e-38, %v3566_v4 }
 0x67c   :  { %v7979_v1 = vadd.f32 1.0, %v5050_v22  ;;  %5057 = vpow2.f32 %v4577_v26  ;;  %v3529_v51 = vadd.f32 %v3528_v10, %v3516_v3  ;;  %vm8020_vm12 = vmor %vm3541_vm11, %vm3542_vm7  ;;  %vm3565_vm13 = vcmp.eq.f32.partialorder %v3564_v54, 8.507059e+37 }
 0x67d   :  { %v3538_v38 = vsub.f32 1.0, %v3537_v61  ;;  %v3743_v61 = vand.u32 2147483648, %v7971_v16  ;;  %vm3737_vm0 = vweird.f32 %v7971_v16 }
 0x67e   :  { %5059 = vrcp.f32 %v7979_v1  ;;  %v4571_v20 = vmul.f32 -1.442695, %v3529_v51  ;;  %vm3752_vm1 = vweird.f32 %v7979_v1 }
 0x67f   :  { %v7973_v31 = vpop.eup %5051  ;;  %v3539_v41 = vmul.f32 %v7968_v11, %v3538_v38 }
 0x680   :  { %v3556_v14 = vmul.f32 %v7973_v31, %v7964_v36  ;;  %v5054_v25 = vpop.eup %5053  ;;  %vm3561_vm10 = vweird.f32 %v7973_v31  ;;  %5061 = vpow2.f32 %v4571_v20 }
 0x681   :  { %v3517_v29 = vpop.f32.mrf.mxu2  ;;  %v7986_v21 = vpop.eup %5055  ;;  %v7992_v62 = vadd.f32 1.0, %v5054_v25  ;;  %v3540_v58 = vadd.f32 %v7968_v11, %v3539_v41  ;;  %vm8010_vm9 = vmor %vm3560_vm8, %vm3561_vm10  ;;  %v3804_v25 = vrot.slane %v7842_v33, 7 }
 0x682   :  { %v3557_v7 = vsub.f32 1.0, %v3556_v14  ;;  %v5058_v30 = vpop.eup %5057  ;;  %v3733_v44 = vmul.f32 %v7986_v21, %v7971_v16  ;;  %v9119_v14 = vld [vmem:[#allocation7_spill] sm:$0xff]  ;;  %vm3738_vm15 = vweird.f32 %v7986_v21  ;;  %v3758_v29 = vand.u32 2147483648, %v7979_v1 }
 0x683   :  { %v8016_v6 = vadd.f32 1.0, %v5058_v30  ;;  %v3544_v53 = vsel %vm8020_vm12, %v7968_v11, %v3540_v58  ;;  %vm8066_vm2 = vmor %vm3737_vm0, %vm3738_vm15 }
 0x684   :  { %v3558_v49 = vmul.f32 %v7973_v31, %v3557_v7  ;;  %v8000_v17 = vpop.eup %5059  ;;  %v3734_v48 = vsub.f32 1.0, %v3733_v44  ;;  %v3549_v50 = vsel %vm3546_vm14, %v3548_v28, %v3544_v53  ;;  %v3759_v30 = vor.u32 1.1754944e-38, %v3758_v29 }
 0x685   :  { %v3748_v12 = vmul.f32 %v8000_v17, %v7979_v1  ;;  %vm3753_vm3 = vweird.f32 %v8000_v17 }
 0x686   :  { %v3615_v55 = vpop.f32.mrf.mxu0  ;;  %v3559_v27 = vadd.f32 %v7973_v31, %v3558_v49  ;;  %v5062_v52 = vpop.eup %5061  ;;  %v3735_v15 = vmul.f32 %v7986_v21, %v3734_v48  ;;  %vm8087_vm5 = vmor %vm3752_vm1, %vm3753_vm3 }
 0x687   :  { %v3662_v60 = vrot.slane %v3615_v55, 1  ;;  %v3666_v40 = vrot.slane %v3615_v55, 2  ;;  %v8031_v35 = vadd.f32 1.0, %v5062_v52  ;;  %v3749_v47 = vsub.f32 1.0, %v3748_v12 }
 0x688   :  { %v3563_v36 = vsel %vm8010_vm9, %v7973_v31, %v3559_v27  ;;  %v3736_v51 = vadd.f32 %v7986_v21, %v3735_v15  ;;  %v9122_v27 = vld [vmem:[#allocation92_spill] sm:$0xff] }
 0x689   :  { %v3678_v39 = vadd.f32 %v3662_v60, %v9113_v63  ;;  %v3682_v59 = vadd.f32 %v3666_v40, %v9114_v0  ;;  %v3568_v19 = vsel %vm3565_vm13, %v3567_v37, %v3563_v36  ;;  %v3750_v38 = vmul.f32 %v8000_v17, %v3749_v47 }
 0x68a   :  { %v3590_v26 = vmul.f32 %v3568_v19, %v9119_v14  ;;  %v3741_v63 = vand.u32 2147483647, %v7971_v16  ;;  %v3740_v16 = vsel %vm8066_vm2, %v7986_v21, %v3736_v51  ;;  %v3584_v48 = vand.u32 2147483647, %v8031_v35 }
 0x68b   :  { %v4572_v43 = vmul.f32 -1.442695, %v3678_v39  ;;  %v4573_v34 = vmul.f32 -1.442695, %v3682_v59  ;;  %v3751_v59 = vadd.f32 %v8000_v17, %v3750_v38  ;;  %vm3580_vm10 = vweird.f32 %v8031_v35 }
 0x68c   :  { %v7994_v10 = vpop.f32.mrf.mxu2  ;;  %vm3742_vm4 = vcmp.eq.f32.partialorder %v3741_v63, 8.507059e+37  ;;  %vm3585_vm9 = vcmp.eq.f32.partialorder %v3584_v48, 8.507059e+37 }
 0x68d   :  { %5063 = vpow2.f32 %v4572_v43  ;;  %v3664_v24 = vrot.slane %v7994_v10, 1  ;;  %v3668_v41 = vrot.slane %v7994_v10, 2  ;;  %v3756_v10 = vand.u32 2147483647, %v7979_v1 }
 0x68e   :  { %v3617_v13 = vpop.f32.mrf.mxu0  ;;  %5065 = vtanh.f32 %v3503_v18  ;;  %v3744_v18 = vor.u32 1.1754944e-38, %v3743_v61  ;;  %v3755_v37 = vsel %vm8087_vm5, %v8000_v17, %v3751_v59  ;;  %vm3792_vm5 = vweird.f32 %v8016_v6 }
 0x68f   :  { %5067 = vrcp.f32 %v7992_v62  ;;  %v3680_v0 = vadd.f32 %v3664_v24, %v9122_v27  ;;  %v9123_v13 = vld [vmem:[#allocation93_spill] sm:$0xff]  ;;  %vm3757_vm15 = vcmp.eq.f32.partialorder %v3756_v10, 8.507059e+37 }
 0x690   :  { %5069 = vpow2.f32 %v4573_v34  ;;  %v3684_v54 = vadd.f32 %v3668_v41, %v9123_v13  ;;  %v3586_v34 = vand.u32 2147483648, %v8031_v35  ;;  %v3745_v12 = vsel %vm3742_vm4, %v3744_v18, %v3740_v16 }
 0x691   :  { %5071 = vrcp.f32 %v8016_v6  ;;  %v3808_v63 = vmul.f32 %v3804_v25, %v3745_v12  ;;  %v3805_v18 = vrot.slane %v7846_v2, 7  ;;  %v3798_v13 = vand.u32 2147483648, %v8016_v6 }
 0x692   :  { %5073 = vrcp.f32 %v8031_v35  ;;  %v3587_v28 = vor.u32 1.1754944e-38, %v3586_v34 }
 0x693   :  { %v5064_v56 = vpop.eup %5063 }
 0x694   :  { %v3643_v23 = vpop.f32.mrf.mxu2  ;;  %v5066_v22 = vpop.eup %5065  ;;  %v8036_v31 = vadd.f32 1.0, %v5064_v56 }
 0x695   :  { %v8038_v11 = vpop.eup %5067  ;;  %v3591_v7 = vmul.f32 %v5066_v22, %v3549_v50 }
 0x696   :  { %v5070_v3 = vpop.eup %5069  ;;  %5075 = vrcp.f32 %v8036_v31  ;;  %v8056_v49 = vmul.f32 %v8038_v11, %v7992_v62  ;;  %v3705_v52 = vand.u32 2147483648, %v8036_v31  ;;  %v3703_v23 = vand.u32 2147483647, %v8036_v31 }
 0x697   :  { %v8046_v55 = vadd.f32 1.0, %v5070_v3  ;;  %v8050_v60 = vpop.eup %5071  ;;  %v8060_v40 = vadd.f32 %v3591_v7, %v3590_v26  ;;  %vm3699_vm11 = vweird.f32 %v8036_v31  ;;  %vm3778_vm4 = vweird.f32 %v8038_v11 }
 0x698   :  { %v5074_v20 = vpop.eup %5073  ;;  %v3774_v4 = vsub.f32 1.0, %v8056_v49  ;;  %v3788_v58 = vmul.f32 %v8050_v60, %v8016_v6  ;;  %v3706_v50 = vor.u32 1.1754944e-38, %v3705_v52  ;;  %vm3704_vm14 = vcmp.eq.f32.partialorder %v3703_v23, 8.507059e+37 }
 0x699   :  { %5077 = vrcp.f32 %v8046_v55  ;;  %v3576_v44 = vmul.f32 %v5074_v20, %v8031_v35  ;;  %vm3581_vm6 = vweird.f32 %v5074_v20  ;;  %v3720_v22 = vand.u32 2147483648, %v8046_v55 }
 0x69a   :  { %5079 = vtanh.f32 %v8060_v40  ;;  %vm3582_vm7 = vmor %vm3580_vm10, %vm3581_vm6  ;;  %v3718_v14 = vand.u32 2147483647, %v8046_v55  ;;  %v3789_v29 = vsub.f32 1.0, %v3788_v58  ;;  %vm3714_vm0 = vweird.f32 %v8046_v55 }
 0x69b   :  { %v3577_v45 = vsub.f32 1.0, %v3576_v44  ;;  %5081 = vtanh.f32 %v3680_v0  ;;  %v3721_v41 = vor.u32 1.1754944e-38, %v3720_v22  ;;  %vm3793_vm3 = vweird.f32 %v8050_v60 }
 0x69c   :  { %v5076_v43 = vpop.eup %5075  ;;  %5083 = vtanh.f32 %v3684_v54  ;;  %vm3719_vm2 = vcmp.eq.f32.partialorder %v3718_v14, 8.507059e+37  ;;  %v3790_v10 = vmul.f32 %v8050_v60, %v3789_v29  ;;  %v3796_v49 = vand.u32 2147483647, %v8016_v6  ;;  %vm3794_vm6 = vmor %vm3792_vm5, %vm3793_vm3  ;;  %v4716_v14 = vld [vmem:[%s8163_s6 + $0x38] sm:$0xff] }
 0x69d   :  { %v3695_v32 = vmul.f32 %v5076_v43, %v8036_v31  ;;  %v3578_v42 = vmul.f32 %v5074_v20, %v3577_v45  ;;  %vm3700_vm8 = vweird.f32 %v5076_v43  ;;  %vm3777_vm10 = vweird.f32 %v7992_v62 }
 0x69e   :  { %vm3701_vm12 = vmor %vm3699_vm11, %vm3700_vm8  ;;  %v3791_v2 = vadd.f32 %v8050_v60, %v3790_v10  ;;  %vm3797_vm8 = vcmp.eq.f32.partialorder %v3796_v49, 8.507059e+37 }
 0x69f   :  { %v5078_v46 = vpop.eup %5077  ;;  %v3696_v36 = vsub.f32 1.0, %v3695_v32  ;;  %v3579_v53 = vadd.f32 %v5074_v20, %v3578_v42  ;;  %v3781_v32 = vand.u32 2147483647, %v7992_v62  ;;  %v3799_v42 = vor.u32 1.1754944e-38, %v3798_v13 }
 0x6a0   :  { %v3710_v1 = vmul.f32 %v5078_v46, %v8046_v55  ;;  %v5080_v47 = vpop.eup %5079  ;;  %vm3715_vm13 = vweird.f32 %v5078_v46  ;;  %v3795_v21 = vsel %vm3794_vm6, %v8050_v60, %v3791_v2 }
 0x6a1   :  { %v3697_v19 = vmul.f32 %v5076_v43, %v3696_v36  ;;  %v3583_v15 = vsel %vm3582_vm7, %v5074_v20, %v3579_v53  ;;  %v5082_v3 = vpop.eup %5081  ;;  %vm3716_vm1 = vmor %vm3714_vm0, %vm3715_vm13  ;;  %v3760_v20 = vsel %vm3757_vm15, %v3759_v30, %v3755_v37  ;;  %v3775_v30 = vmul.f32 %v8038_v11, %v3774_v4 }
 0x6a2   :  { %v3711_v56 = vsub.f32 1.0, %v3710_v1  ;;  %v3588_v35 = vsel %vm3585_vm9, %v3587_v28, %v3583_v15  ;;  %v5084_v38 = vpop.eup %5083  ;;  %v3809_v59 = vmul.f32 %v3805_v18, %v3760_v20  ;;  %v3783_v4 = vand.u32 2147483648, %v7992_v62  ;;  %vm3779_vm7 = vmor %vm3777_vm10, %vm3778_vm4 }
 0x6a3   :  { %v3698_v17 = vadd.f32 %v5076_v43, %v3697_v19  ;;  %v3594_v26 = vmul.f32 %v5080_v47, %v3588_v35  ;;  %v3776_v34 = vadd.f32 %v8038_v11, %v3775_v30  ;;  %v3800_v6 = vsel %vm3797_vm8, %v3799_v42, %v3795_v21 }
 0x6a4   :  { %v3712_v61 = vmul.f32 %v5078_v46, %v3711_v56  ;;  %v3784_v36 = vor.u32 1.1754944e-38, %v3783_v4  ;;  %vm3782_vm9 = vcmp.eq.f32.partialorder %v3781_v32, 8.507059e+37  ;;  %vm4095_vm10 = vcmask 58368  }
 0x6a5   :  { %v3702_v7 = vsel %vm3701_vm12, %v5076_v43, %v3698_v17  ;;  %v3824_v51 = vrot.slane %v3594_v26, 1  ;;  %v3780_v12 = vsel %vm3779_vm7, %v8038_v11, %v3776_v34 }
 0x6a6   :  { %v3707_v31 = vsel %vm3704_vm14, %v3706_v50, %v3702_v7  ;;  %v3713_v24 = vadd.f32 %v5078_v46, %v3712_v61  ;;  %v3785_v37 = vsel %vm3782_vm9, %v3784_v36, %v3780_v12 }
 0x6a7   :  { %v3810_v39 = vmul.f32 %v5082_v3, %v3707_v31  ;;  %v3827_v27 = vpack.c.bf16 %v3824_v51, %v3824_v51 }
 0x6a8   :  { %v3717_v44 = vsel %vm3716_vm1, %v5078_v46, %v3713_v24  ;;  %v4715_v24 = vld [vmem:[%s8163_s6 + $0x30] sm:$0xff] }
 0x6a9   :  { %v3722_v0 = vsel %vm3719_vm2, %v3721_v41, %v3717_v44  ;;  %v3812_v16 = vadd.f32 %v3810_v39, %v3808_v63  ;;  %v3837_v55 = vshrl.u32 %v3827_v27, 16  ;;  %v3840_v58 = vshll.u32 %v3827_v27, 16  ;;  %v4714_v41 = vld [vmem:[%s8163_s6 + $0x28] sm:$0xff]  ;;  %v4713_v44 = vld [vmem:[%s8163_s6 + $0x20] sm:$0xff]  ;;  %v4712_v27 = vld [vmem:[%s8163_s6 + $0x18] sm:$0xff] }
 0x6aa   :  { %v3811_v43 = vmul.f32 %v5084_v38, %v3722_v0 }
 0x6ab   :  { %v3839_v25 = vrot.slane %v3837_v55, 3  ;;  %v3842_v45 = vrot.slane %v3840_v58, 4  ;;  %5085 = vtanh.f32 %v3812_v16 }
 0x6ac   :  { %v3813_v33 = vadd.f32 %v3811_v43, %v3809_v59  ;;  %v4711_v43 = vld [vmem:[%s8163_s6 + $0x10] sm:$0xff] }
 0x6ad   :  { %v3843_v54 = vor.u32 %v3842_v45, %v3839_v25  ;;  %v4710_v45 = vld [vmem:[%s8163_s6 + $0x8] sm:$0xff] }
 0x6ae   :  { %5087 = vtanh.f32 %v3813_v33 }
 0x6af   :  { %3867 = vmatmul.bf16.vlgmr.msra.gmra.mxu1 %v3843_v54  ;;  %3893 = vmatmul.bf16.vlgmr.msrb.gmra.mxu3 %v3843_v54 }
 0x6b1   :  { %v5086_v48 = vpop.eup %5085 }
 0x6b2   :  { %v3816_v53 = vmul.f32 %v5086_v48, %v3785_v37 }
 0x6b4   :  { %v5088_v46 = vpop.eup %5087 }
 0x6b5   :  { %v3817_v52 = vmul.f32 %v5088_v46, %v3800_v6 }
 0x6b7   :  { %v3820_v1 = vrot.slane %v3817_v52, 7 }
 0x6b9   :  { %v3826_v28 = vpack.c.bf16 %v3820_v1, %v3816_v53 }
 0x6bb   :  { %v3829_v19 = vshrl.u32 %v3826_v28, 16  ;;  %v3832_v23 = vshll.u32 %v3826_v28, 16 }
 0x6bd   :  { %v3831_v62 = vrot.slane %v3829_v19, 3  ;;  %v3834_v56 = vrot.slane %v3832_v23, 4 }
 0x6bf   :  { %v3835_v60 = vor.u32 %v3834_v56, %v3831_v62  ;;  %3919 = vmatmul.bf16.vlgmr.msrb.gmra.mxu1 %v3843_v54  ;;  %3945 = vmatmul.bf16.vlgmr.msra.gmra.mxu3 %v3843_v54 }
 0x6c1   :  { %3854 = vmatmul.bf16.vlgmr.msra.gmra.mxu0 %v3835_v60  ;;  %3880 = vmatmul.bf16.vlgmr.msrb.gmra.mxu2 %v3835_v60 }
 0x6c2   :  { %4082 = vmatpush.bf16.msra.mxu0 %v4716_v14 }
 0x6c6   :  { %4083 = vmatpush.bf16.msra.mxu0 %v4715_v24 }
 0x6ca   :  { %4084 = vmatpush.bf16.msra.mxu0 %v4714_v41 }
 0x6ce   :  { %4085 = vmatpush.bf16.msra.mxu0 %v4713_v44 }
 0x6d1   :  { %3906 = vmatmul.bf16.vlgmr.msrb.gmra.mxu0 %v3835_v60  ;;  %3932 = vmatmul.bf16.vlgmr.msra.gmra.mxu2 %v3835_v60 }
 0x6d2   :  { %4086 = vmatpush.bf16.msra.mxu0 %v4712_v27 }
 0x6d6   :  { %4087 = vmatpush.bf16.msra.mxu0 %v4711_v43 }
 0x6da   :  { %4088 = vmatpush.bf16.msra.mxu0 %v4710_v45 }
 0x72c   :  { %v3868_v11 = vpop.f32.mrf.mxu1 }
 0x732   :  { %v3894_v15 = vpop.f32.mrf.mxu3 }
 0x734   :  { %v3870_v47 = vpop.f32.mrf.mxu1 }
 0x73a   :  { %v3896_v17 = vpop.f32.mrf.mxu3 }
 0x73c   :  { %v3920_v50 = vpop.f32.mrf.mxu1 }
 0x73e   :  { %v3855_v22 = vpop.f32.mrf.mxu0 }
 0x73f   :  { %v3856_v35 = vadd.f32 %v3855_v22, %v9105_v9 }
 0x741   :  { %v3869_v61 = vadd.f32 %v3868_v11, %v3856_v35 }
 0x742   :  { %v3946_v3 = vpop.f32.mrf.mxu3 }
 0x743   :  { %v4578_v26 = vmul.f32 -1.442695, %v3869_v61 }
 0x744   :  { %v3881_v29 = vpop.f32.mrf.mxu2  ;;  %v3922_v7 = vpop.f32.mrf.mxu1 }
 0x745   :  { %5089 = vpow2.f32 %v4578_v26  ;;  %v3882_v38 = vadd.f32 %v3881_v29, %v9106_v5 }
 0x746   :  { %v3857_v31 = vpop.f32.mrf.mxu0 }
 0x747   :  { %v3895_v51 = vadd.f32 %v3894_v15, %v3882_v38  ;;  %v4720_v31 = vld [vmem:[%s8164_s7] ss:$0 sm:$0xff] }
 0x749   :  { %v4579_v9 = vmul.f32 -1.442695, %v3895_v51 }
 0x74a   :  { %v3948_v63 = vpop.f32.mrf.mxu3 }
 0x74b   :  { %v5090_v20 = vpop.eup %5089  ;;  %5091 = vpow2.f32 %v4579_v9 }
 0x74c   :  { %v3953_v39 = vadd.f32 1.0, %v5090_v20  ;;  %v3883_v18 = vpop.f32.mrf.mxu2 }
 0x74e   :  { %5093 = vrcp.f32 %v3953_v39  ;;  %v3907_v5 = vpop.f32.mrf.mxu0  ;;  %v3965_v46 = vand.u32 2147483648, %v3953_v39  ;;  %vm3959_vm13 = vweird.f32 %v3953_v39  ;;  %v3963_v36 = vand.u32 2147483647, %v3953_v39 }
 0x74f   :  { %v3908_v2 = vadd.f32 %v3907_v5, %v9112_v57 }
 0x750   :  { %v3966_v28 = vor.u32 1.1754944e-38, %v3965_v46  ;;  %vm3964_vm2 = vcmp.eq.f32.partialorder %v3963_v36, 8.507059e+37 }
 0x751   :  { %v5092_v10 = vpop.eup %5091  ;;  %v3921_v21 = vadd.f32 %v3920_v50, %v3908_v2 }
 0x752   :  { %v3972_v0 = vadd.f32 1.0, %v5092_v10 }
 0x754   :  { %v5094_v16 = vpop.eup %5093  ;;  %5095 = vrcp.f32 %v3972_v0  ;;  %v3933_v59 = vpop.f32.mrf.mxu2  ;;  %v3984_v42 = vand.u32 2147483648, %v3972_v0  ;;  %v3982_v57 = vand.u32 2147483647, %v3972_v0  ;;  %vm3978_vm14 = vweird.f32 %v3972_v0 }
 0x755   :  { %v3955_v55 = vmul.f32 %v5094_v16, %v3953_v39  ;;  %v3934_v58 = vadd.f32 %v3933_v59, %v9111_v8  ;;  %v4709_v8 = vld [vmem:[%s8163_s6] sm:$0xff]  ;;  %vm3960_vm11 = vweird.f32 %v5094_v16 }
 0x756   :  { %v3909_v30 = vpop.f32.mrf.mxu0  ;;  %4089 = vmatpush.bf16.msra.mxu0 %v4709_v8  ;;  %vm3961_vm15 = vmor %vm3959_vm13, %vm3960_vm11  ;;  %v3985_v37 = vor.u32 1.1754944e-38, %v3984_v42  ;;  %vm3983_vm1 = vcmp.eq.f32.partialorder %v3982_v57, 8.507059e+37 }
 0x757   :  { %v3956_v33 = vsub.f32 1.0, %v3955_v55  ;;  %v3947_v25 = vadd.f32 %v3946_v3, %v3934_v58 }
 0x759   :  { %v4580_v13 = vmul.f32 -1.442695, %v3947_v25  ;;  %v3957_v34 = vmul.f32 %v5094_v16, %v3956_v33 }
 0x75a   :  { %v5096_v54 = vpop.eup %5095 }
 0x75b   :  { %v3974_v49 = vmul.f32 %v5096_v54, %v3972_v0  ;;  %5097 = vpow2.f32 %v4580_v13  ;;  %v3958_v48 = vadd.f32 %v5094_v16, %v3957_v34  ;;  %vm3979_vm12 = vweird.f32 %v5096_v54 }
 0x75c   :  { %v3935_v4 = vpop.f32.mrf.mxu2  ;;  %5099 = vtanh.f32 %v3921_v21  ;;  %vm3980_vm0 = vmor %vm3978_vm14, %vm3979_vm12 }
 0x75d   :  { %v3975_v32 = vsub.f32 1.0, %v3974_v49  ;;  %v3962_v53 = vsel %vm3961_vm15, %v5094_v16, %v3958_v48 }
 0x75e   :  { %v3967_v62 = vsel %vm3964_vm2, %v3966_v28, %v3962_v53 }
 0x75f   :  { %v3976_v12 = vmul.f32 %v5096_v54, %v3975_v32 }
 0x761   :  { %v5098_v6 = vpop.eup %5097  ;;  %v3977_v52 = vadd.f32 %v5096_v54, %v3976_v12 }
 0x762   :  { %v3992_v1 = vadd.f32 1.0, %v5098_v6  ;;  %v5100_v60 = vpop.eup %5099 }
 0x763   :  { %v3981_v19 = vsel %vm3980_vm0, %v5096_v54, %v3977_v52  ;;  %v4009_v11 = vmul.f32 %v5100_v60, %v3967_v62 }
 0x764   :  { %v3986_v23 = vsel %vm3983_vm1, %v3985_v37, %v3981_v19  ;;  %5101 = vrcp.f32 %v3992_v1  ;;  %v4004_v22 = vand.u32 2147483648, %v3992_v1  ;;  %v4002_v61 = vand.u32 2147483647, %v3992_v1 }
 0x765   :  { %v4008_v56 = vmul.f32 %v3986_v23, %v8060_v40  ;;  %vm3998_vm4 = vweird.f32 %v3992_v1 }
 0x766   :  { %v4005_v26 = vor.u32 1.1754944e-38, %v4004_v22  ;;  %vm4003_vm6 = vcmp.eq.f32.partialorder %v4002_v61, 8.507059e+37 }
 0x767   :  { %v4010_v47 = vadd.f32 %v4009_v11, %v4008_v56 }
 0x769   :  { %5103 = vtanh.f32 %v4010_v47 }
 0x76a   :  { %v5102_v15 = vpop.eup %5101 }
 0x76b   :  { %v3994_v17 = vmul.f32 %v5102_v15, %v3992_v1  ;;  %vm3999_vm3 = vweird.f32 %v5102_v15 }
 0x76c   :  { %vm4000_vm5 = vmor %vm3998_vm4, %vm3999_vm3 }
 0x76d   :  { %v3995_v50 = vsub.f32 1.0, %v3994_v17 }
 0x76f   :  { %v3996_v35 = vmul.f32 %v5102_v15, %v3995_v50  ;;  %v5104_v29 = vpop.eup %5103 }
 0x771   :  { %v3997_v14 = vadd.f32 %v5102_v15, %v3996_v35 }
 0x773   :  { %v4001_v3 = vsel %vm4000_vm5, %v5102_v15, %v3997_v14 }
 0x774   :  { %v4006_v7 = vsel %vm4003_vm6, %v4005_v26, %v4001_v3 }
 0x775   :  { %v4012_v40 = vmul.f32 %v5104_v29, %v4006_v7 }
 0x777   :  { %v4013_v38 = vpack.c.bf16 %v4012_v40, %v4012_v40 }
 0x779   :  { %4090 = vmatmul.bf16.vlgmr.msra.gmra.mxu0 %v4013_v38 }
 0x7f6   :  { %v4091_v24 = vpop.f32.mrf.mxu0 }
 0x7f7   :  { %v4092_v51 = vadd.f32 %v4720_v31, %v4091_v24 }
 0x7f9   :  { %4096 = vst.msk [vmem:[#allocation2] sm:$0x3] %vm4095_vm10, %v4092_v51 }
 0x7fa   :  { %4107 = dma.vmem_to_hbm [thread:$0]  %s4103_s19, 32, %s4105_s22, [#allocation3]  }
 0x7fe   :  { %v4093_v9 = vpop.f32.mrf.mxu0 }
 0x7ff   :  { %5129 = dma.done.wait [#allocation3], 32  }
 0x800   :  { %5130 = vsyncadd [#allocation3], 4294967264 }
 0x801   :  { %4112 = vsyncpa [#allocation3], 1 }

</bundles_post_ra>
